<compile_context>
chip_gen: v7x
topology: tpu7x:2x2x1
jax: 0.10.0
libtpu: 0.0.40
codegen_flags: <defaults>
</compile_context>

<pallas_src>
import numpy as np
import jax
import jax.numpy as jnp
from jax import lax
from jax.experimental import pallas as pl
from jax.experimental.pallas import tpu as pltpu

F32 = jnp.float32
BF16 = jnp.bfloat16


# ----------------------------- Pallas kernel -----------------------------

def fused_cnn_kernel(x_ref, g1_ref, b1e_ref, rse1_ref, rso1_ref, cse1_ref, cso1_ref,
                     sdn_ref, sup_ref, g2_ref, b2e_ref, rse2_ref, rso2_ref,
                     cse2_ref, cso2_ref, w3_ref, b3_ref, w4_ref, b4_ref, o_ref):
    # ---- conv1 + folded BN1: 3 MXU matmuls (kw/cout folded into G1), accumulate in regs ----
    acc1 = jnp.broadcast_to(b1e_ref[...], (28, 896))                    # f32, hoisted once
    for kh in range(3):
        xs = x_ref[0, kh:kh + 28, :].astype(BF16)                       # (28, 30)
        acc1 = acc1 + jnp.dot(xs, g1_ref[kh], preferred_element_type=F32)
    a1 = jnp.maximum(acc1, 0.0).astype(BF16)                            # ReLU, (28, 896), 1 cast

    # ---- 2x2 max-pool #1: even/odd 0/1 selection matmuls (bf16 exact), all rows at once.
    #      Column selectors also place the result into conv2's width-padded layout
    #      (lane groups 0 and 15 of the 512-wide output stay exactly zero).
    r1 = jnp.maximum(jnp.dot(rse1_ref[...], a1, preferred_element_type=F32),
                     jnp.dot(rso1_ref[...], a1, preferred_element_type=F32)).astype(BF16)   # (14, 896)
    pooled = jnp.maximum(jnp.dot(r1, cse1_ref[...], preferred_element_type=F32),
                         jnp.dot(r1, cso1_ref[...], preferred_element_type=F32))            # (14, 512)
    pooledb = pooled.astype(BF16)

    # ---- conv2 + folded BN2: kw and cin folded into per-kh G2 matrices; the height
    #      padding is produced by 0/1 row-shift selectors instead of a padded scratch. ----
    acc2 = jnp.broadcast_to(b2e_ref[...], (14, 896))
    acc2 = acc2 + jnp.dot(pooledb, g2_ref[1], preferred_element_type=F32)        # kh = 1 (no shift)
    lhs0 = jnp.dot(sdn_ref[...], pooledb, preferred_element_type=F32).astype(BF16)   # rows [0; p[0:13]]
    acc2 = acc2 + jnp.dot(lhs0, g2_ref[0], preferred_element_type=F32)
    lhs2 = jnp.dot(sup_ref[...], pooledb, preferred_element_type=F32).astype(BF16)   # rows [p[1:14]; 0]
    acc2 = acc2 + jnp.dot(lhs2, g2_ref[2], preferred_element_type=F32)
    a2 = jnp.maximum(acc2, 0.0).astype(BF16)                            # ReLU, (14, 896)

    # ---- 2x2 max-pool #2 -> (7, 448) features, already in HWC flatten order ----
    r2 = jnp.maximum(jnp.dot(rse2_ref[...], a2, preferred_element_type=F32),
                     jnp.dot(rso2_ref[...], a2, preferred_element_type=F32)).astype(BF16)   # (7, 896)
    feat = jnp.maximum(jnp.dot(r2, cse2_ref[...], preferred_element_type=F32),
                       jnp.dot(r2, cso2_ref[...], preferred_element_type=F32))              # (7, 448)

    # ---- fc1 + ReLU + fc2 (fused head; weights resident, no HBM roundtrip) ----
    h = b3_ref[...]                                                     # (1, 128) f32
    for i in range(7):
        h = h + jnp.dot(feat[i:i + 1, :].astype(BF16), w3_ref[i],
                        preferred_element_type=F32)
    h = jnp.maximum(h, 0.0).astype(BF16)
    o_ref[0] = jnp.dot(h, w4_ref[...], preferred_element_type=F32) + b4_ref[...]


# ----------------------------- Pallas wrapper -----------------------------

def conv_net_forward(prep, x_nchw):
    B = x_nchw.shape[0]
    x = x_nchw.reshape(B, 28, 28)                         # squeeze Cin = 1
    xp = jnp.pad(x, ((0, 0), (1, 1), (1, 1)))             # (B, 30, 30), zero padding for conv1

    w_names = ["g1", "b1e", "rse1", "rso1", "cse1", "cso1", "sdn", "sup",
               "g2", "b2e", "rse2", "rso2", "cse2", "cso2", "w3", "b3", "w4", "b4"]
    weights = [prep[n] for n in w_names]

    in_specs = [pl.BlockSpec((1, 30, 30), lambda i: (i, 0, 0))]          # one image per grid step
    for a in weights:                                                    # constants: fetched once
        in_specs.append(pl.BlockSpec(tuple(a.shape), lambda i, _nd=a.ndim: (0,) * _nd))

    out = pl.pallas_call(
        fused_cnn_kernel,
        out_shape=jax.ShapeDtypeStruct((B, 1, 10), jnp.float32),
        grid=(B,),
        in_specs=in_specs,
        out_specs=pl.BlockSpec((1, 1, 10), lambda i: (i, 0, 0)),
        compiler_params=pltpu.CompilerParams(
            dimension_semantics=("parallel",),             # megacore-split the batch on v7x
            vmem_limit_bytes=48 * 1024 * 1024),            # explicit budget (fits 64 MiB v7x)
    )(xp, *weights)
    return out.reshape(B, 10)


# ----------------------------- parameters & prep -----------------------------

def make_params(key):
    ks = jax.random.split(key, 16)
    p = {}
    p["conv1_w"] = 0.1 * jax.random.normal(ks[0], (3, 3, 1, 32), jnp.float32)    # HWIO
    p["conv1_b"] = 0.1 * jax.random.normal(ks[1], (32,), jnp.float32)
    p["bn1_gamma"] = 1.0 + 0.1 * jax.random.normal(ks[2], (32,), jnp.float32)
    p["bn1_beta"] = 0.1 * jax.random.normal(ks[3], (32,), jnp.float32)
    p["bn1_mean"] = 0.1 * jax.random.normal(ks[4], (32,), jnp.float32)
    p["bn1_var"] = jax.random.uniform(ks[5], (32,), jnp.float32, 0.5, 1.5)
    p["conv2_w"] = 0.05 * jax.random.normal(ks[6], (3, 3, 32, 64), jnp.float32)   # HWIO
    p["conv2_b"] = 0.1 * jax.random.normal(ks[7], (64,), jnp.float32)
    p["bn2_gamma"] = 1.0 + 0.1 * jax.random.normal(ks[8], (64,), jnp.float32)
    p["bn2_beta"] = 0.1 * jax.random.normal(ks[9], (64,), jnp.float32)
    p["bn2_mean"] = 0.1 * jax.random.normal(ks[10], (64,), jnp.float32)
    p["bn2_var"] = jax.random.uniform(ks[11], (64,), jnp.float32, 0.5, 1.5)
    p["fc1_w"] = 0.02 * jax.random.normal(ks[12], (64 * 7 * 7, 128), jnp.float32)  # CHW rows
    p["fc1_b"] = 0.1 * jax.random.normal(ks[13], (128,), jnp.float32)
    p["fc2_w"] = 0.1 * jax.random.normal(ks[14], (128, 10), jnp.float32)
    p["fc2_b"] = 0.1 * jax.random.normal(ks[15], (10,), jnp.float32)
    return p


def prepare_params(p, eps=1e-5):
    """One-time host-side prep: fold BN, build conv 'G' matrices, pooling/shift selectors,
    and permute fc1 rows to the kernel's HWC flatten order."""
    P = {k: np.asarray(v) for k, v in p.items()}

    # fold BatchNorm (eval mode) into conv weights / biases
    s1 = P["bn1_gamma"] / np.sqrt(P["bn1_var"] + eps)
    w1f = P["conv1_w"][:, :, 0, :] * s1                                # (3,3,32)
    b1f = (P["conv1_b"] - P["bn1_mean"]) * s1 + P["bn1_beta"]
    s2 = P["bn2_gamma"] / np.sqrt(P["bn2_var"] + eps)
    w2f = P["conv2_w"] * s2                                            # (3,3,32,64)
    b2f = (P["conv2_b"] - P["bn2_mean"]) * s2 + P["bn2_beta"]

    # conv1: G1[kh, j, w*32+c] = w1f[kh, j-w, c]  (kw shift folded into the weight matrix)
    G1 = np.zeros((3, 30, 28 * 32), np.float32)
    for kh in range(3):
        for kw in range(3):
            for w in range(28):
                G1[kh, w + kw, w * 32:(w + 1) * 32] += w1f[kh, kw, :]
    b1e = np.tile(b1f.astype(np.float32), 28)[None, :]                 # (1, 896)

    # conv2: G2[kh, jp*32+c, j*64+c2] = w2f[kh, jp-j, c, c2]; rows address the width-padded
    # pool1 output (jp in 0..15, groups 0/15 are the zero padding)
    G2 = np.zeros((3, 16 * 32, 14 * 64), np.float32)
    for kh in range(3):
        for kw in range(3):
            for j in range(14):
                jp = j + kw
                G2[kh, jp * 32:(jp + 1) * 32, j * 64:(j + 1) * 64] = w2f[kh, kw]
    b2e = np.tile(b2f.astype(np.float32), 14)[None, :]                 # (1, 896)

    # 2x2 max-pool 0/1 selectors (each output column/row selects exactly one input element)
    rse1 = np.zeros((14, 28), np.float32); rse1[np.arange(14), 2 * np.arange(14)] = 1.0
    rso1 = np.zeros((14, 28), np.float32); rso1[np.arange(14), 2 * np.arange(14) + 1] = 1.0
    cse1 = np.zeros((896, 512), np.float32)
    cso1 = np.zeros((896, 512), np.float32)
    for j in range(14):
        for c in range(32):
            cse1[(2 * j) * 32 + c, (j + 1) * 32 + c] = 1.0             # target is width-padded
            cso1[(2 * j + 1) * 32 + c, (j + 1) * 32 + c] = 1.0
    rse2 = np.zeros((7, 14), np.float32); rse2[np.arange(7), 2 * np.arange(7)] = 1.0
    rso2 = np.zeros((7, 14), np.float32); rso2[np.arange(7), 2 * np.arange(7) + 1] = 1.0
    cse2 = np.zeros((896, 448), np.float32)
    cso2 = np.zeros((896, 448), np.float32)
    for q in range(7):
        for c2 in range(64):
            cse2[(2 * q) * 64 + c2, q * 64 + c2] = 1.0
            cso2[(2 * q + 1) * 64 + c2, q * 64 + c2] = 1.0

    # conv2 height-padding row shifts (kh = 0 / kh = 2), replacing an explicit padded scratch
    sdn = np.zeros((14, 14), np.float32); sdn[np.arange(1, 14), np.arange(0, 13)] = 1.0
    sup = np.zeros((14, 14), np.float32); sup[np.arange(0, 13), np.arange(1, 14)] = 1.0

    # fc1 rows: PyTorch CHW flatten order -> kernel HWC flatten order, grouped by output row
    w3 = P["fc1_w"].reshape(64, 7, 7, 128).transpose(1, 2, 0, 3).reshape(7, 7 * 64, 128)

    cvt = lambda a: jnp.asarray(a, dtype=jnp.bfloat16)
    return {
        "g1": cvt(G1), "b1e": jnp.asarray(b1e, dtype=jnp.float32),
        "rse1": cvt(rse1), "rso1": cvt(rso1), "cse1": cvt(cse1), "cso1": cvt(cso1),
        "sdn": cvt(sdn), "sup": cvt(sup),
        "g2": cvt(G2), "b2e": jnp.asarray(b2e, dtype=jnp.float32),
        "rse2": cvt(rse2), "rso2": cvt(rso2), "cse2": cvt(cse2), "cso2": cvt(cso2),
        "w3": cvt(w3), "b3": jnp.asarray(P["fc1_b"][None, :], dtype=jnp.float32),
        "w4": cvt(P["fc2_w"]), "b4": jnp.asarray(P["fc2_b"][None, :], dtype=jnp.float32),
    }


# ----------------------------- pure-JAX f32 reference -----------------------------

def reference_forward(p, x, eps=1e-5):
    def bn(y, g, b, m, v):
        return (y - m) / jnp.sqrt(v + eps) * g + b
    xh = jnp.transpose(x, (0, 2, 3, 1))                                # NHWC
    y = lax.conv_general_dilated(xh, p["conv1_w"], (1, 1), "SAME",
                                 dimension_numbers=("NHWC", "HWIO", "NHWC")) + p["conv1_b"]
    y = jax.nn.relu(bn(y, p["bn1_gamma"], p["bn1_beta"], p["bn1_mean"], p["bn1_var"]))
    y = lax.reduce_window(y, -jnp.inf, lax.max, (1, 2, 2, 1), (1, 2, 2, 1), "VALID")
    y = lax.conv_general_dilated(y, p["conv2_w"], (1, 1), "SAME",
                                 dimension_numbers=("NHWC", "HWIO", "NHWC")) + p["conv2_b"]
    y = jax.nn.relu(bn(y, p["bn2_gamma"], p["bn2_beta"], p["bn2_mean"], p["bn2_var"]))
    y = lax.reduce_window(y, -jnp.inf, lax.max, (1, 2, 2, 1), (1, 2, 2, 1), "VALID")
    flat = jnp.transpose(y, (0, 3, 1, 2)).reshape(x.shape[0], -1)      # PyTorch CHW flatten
    h = jax.nn.relu(flat @ p["fc1_w"] + p["fc1_b"])
    return h @ p["fc2_w"] + p["fc2_b"]


# ----------------------------- main -----------------------------

if __name__ == "__main__":
    key = jax.random.PRNGKey(0)
    kx, kp = jax.random.split(key)
    # MNIST-like input implied by the 64*7*7 flatten: (B, 1, 28, 28), batch = 2
    x = jax.random.normal(kx, (2, 1, 28, 28), jnp.float32)
    params = make_params(kp)
    prep = prepare_params(params)

    fwd = jax.jit(conv_net_forward)
    logits = fwd(prep, x)
    jax.block_until_ready(logits)
    assert logits.shape == (2, 10) and logits.dtype == jnp.float32

    # bf16 conv/fc operands (f32 accumulation) -> small drift vs the f32 reference.
    ref = reference_forward(params, x)
    err = float(jnp.max(jnp.abs(logits - ref)))
    assert err < 0.2, f"kernel deviates from f32 reference: max|diff|={err:.4f}"
    print("KERNEL_OK")
</pallas_src>

<mosaic_0001>
module attributes {stable_mosaic.version = 11 : i64} {
  func.func @fused_cnn_kernel(%arg0: i32, %arg1: memref<1x30x30xf32, #tpu.memory_space<vmem>>, %arg2: memref<3x30x896xbf16, #tpu.memory_space<vmem>>, %arg3: memref<1x896xf32, #tpu.memory_space<vmem>>, %arg4: memref<14x28xbf16, #tpu.memory_space<vmem>>, %arg5: memref<14x28xbf16, #tpu.memory_space<vmem>>, %arg6: memref<896x512xbf16, #tpu.memory_space<vmem>>, %arg7: memref<896x512xbf16, #tpu.memory_space<vmem>>, %arg8: memref<14x14xbf16, #tpu.memory_space<vmem>>, %arg9: memref<14x14xbf16, #tpu.memory_space<vmem>>, %arg10: memref<3x512x896xbf16, #tpu.memory_space<vmem>>, %arg11: memref<1x896xf32, #tpu.memory_space<vmem>>, %arg12: memref<7x14xbf16, #tpu.memory_space<vmem>>, %arg13: memref<7x14xbf16, #tpu.memory_space<vmem>>, %arg14: memref<896x448xbf16, #tpu.memory_space<vmem>>, %arg15: memref<896x448xbf16, #tpu.memory_space<vmem>>, %arg16: memref<7x448x128xbf16, #tpu.memory_space<vmem>>, %arg17: memref<1x128xf32, #tpu.memory_space<vmem>>, %arg18: memref<128x10xbf16, #tpu.memory_space<vmem>>, %arg19: memref<1x10xf32, #tpu.memory_space<vmem>>, %arg20: memref<1x1x10xf32, #tpu.memory_space<vmem>>) attributes {dimension_semantics = [#tpu.dimension_semantics<parallel>], iteration_bounds = array<i64: 2>, scalar_prefetch = 0 : i64, scratch_operands = 0 : i64, tpu.core_type = #tpu.core_type<tc>, window_params = [{transform_indices = @transform_0, window_bounds = array<i64: 1, 30, 30>}, {pipeline_mode = #tpu.pipeline_mode<synchronous>, transform_indices = @transform_1, window_bounds = array<i64: 3, 30, 896>}, {pipeline_mode = #tpu.pipeline_mode<synchronous>, transform_indices = @transform_2, window_bounds = array<i64: 1, 896>}, {pipeline_mode = #tpu.pipeline_mode<synchronous>, transform_indices = @transform_3, window_bounds = array<i64: 14, 28>}, {pipeline_mode = #tpu.pipeline_mode<synchronous>, transform_indices = @transform_4, window_bounds = array<i64: 14, 28>}, {pipeline_mode = #tpu.pipeline_mode<synchronous>, transform_indices = @transform_5, window_bounds = array<i64: 896, 512>}, {pipeline_mode = #tpu.pipeline_mode<synchronous>, transform_indices = @transform_6, window_bounds = array<i64: 896, 512>}, {pipeline_mode = #tpu.pipeline_mode<synchronous>, transform_indices = @transform_7, window_bounds = array<i64: 14, 14>}, {pipeline_mode = #tpu.pipeline_mode<synchronous>, transform_indices = @transform_8, window_bounds = array<i64: 14, 14>}, {pipeline_mode = #tpu.pipeline_mode<synchronous>, transform_indices = @transform_9, window_bounds = array<i64: 3, 512, 896>}, {pipeline_mode = #tpu.pipeline_mode<synchronous>, transform_indices = @transform_10, window_bounds = array<i64: 1, 896>}, {pipeline_mode = #tpu.pipeline_mode<synchronous>, transform_indices = @transform_11, window_bounds = array<i64: 7, 14>}, {pipeline_mode = #tpu.pipeline_mode<synchronous>, transform_indices = @transform_12, window_bounds = array<i64: 7, 14>}, {pipeline_mode = #tpu.pipeline_mode<synchronous>, transform_indices = @transform_13, window_bounds = array<i64: 896, 448>}, {pipeline_mode = #tpu.pipeline_mode<synchronous>, transform_indices = @transform_14, window_bounds = array<i64: 896, 448>}, {pipeline_mode = #tpu.pipeline_mode<synchronous>, transform_indices = @transform_15, window_bounds = array<i64: 7, 448, 128>}, {pipeline_mode = #tpu.pipeline_mode<synchronous>, transform_indices = @transform_16, window_bounds = array<i64: 1, 128>}, {pipeline_mode = #tpu.pipeline_mode<synchronous>, transform_indices = @transform_17, window_bounds = array<i64: 128, 10>}, {pipeline_mode = #tpu.pipeline_mode<synchronous>, transform_indices = @transform_18, window_bounds = array<i64: 1, 10>}, {transform_indices = @transform_19, window_bounds = array<i64: 1, 1, 10>}]} {
    %c0 = arith.constant 0 : index
    %c0_0 = arith.constant 0 : index
    %0 = vector.load %arg3[%c0, %c0_0] : memref<1x896xf32, #tpu.memory_space<vmem>>, vector<1x896xf32>
    %1 = vector.shape_cast %0 : vector<1x896xf32> to vector<1x896xf32>
    %2 = vector.broadcast %1 : vector<1x896xf32> to vector<28x896xf32>
    %c0_1 = arith.constant 0 : index
    %c0_2 = arith.constant 0 : index
    %c0_3 = arith.constant 0 : index
    %3 = vector.load %arg1[%c0_1, %c0_2, %c0_3] : memref<1x30x30xf32, #tpu.memory_space<vmem>>, vector<1x28x30xf32>
    %4 = vector.shape_cast %3 : vector<1x28x30xf32> to vector<28x30xf32>
    %5 = arith.truncf %4 : vector<28x30xf32> to vector<28x30xbf16>
    %c0_4 = arith.constant 0 : index
    %c0_5 = arith.constant 0 : index
    %c0_6 = arith.constant 0 : index
    %6 = vector.load %arg2[%c0_4, %c0_5, %c0_6] : memref<3x30x896xbf16, #tpu.memory_space<vmem>>, vector<1x30x896xbf16>
    %7 = vector.shape_cast %6 : vector<1x30x896xbf16> to vector<30x896xbf16>
    %cst = arith.constant dense<0.000000e+00> : vector<28x896xf32>
    %8 = tpu.matmul %5, %7, %cst {dimension_numbers = #tpu.dot_dimension_numbers<[1], [0], [0], [1], [0, 0, 1, 1], [], []>} : vector<28x30xbf16>, vector<30x896xbf16>, vector<28x896xf32> -> vector<28x896xf32>
    %9 = arith.addf %2, %8 : vector<28x896xf32>
    %c0_7 = arith.constant 0 : index
    %c1 = arith.constant 1 : index
    %c0_8 = arith.constant 0 : index
    %10 = vector.load %arg1[%c0_7, %c1, %c0_8] : memref<1x30x30xf32, #tpu.memory_space<vmem>>, vector<1x28x30xf32>
    %11 = vector.shape_cast %10 : vector<1x28x30xf32> to vector<28x30xf32>
    %12 = arith.truncf %11 : vector<28x30xf32> to vector<28x30xbf16>
    %c1_9 = arith.constant 1 : index
    %c0_10 = arith.constant 0 : index
    %c0_11 = arith.constant 0 : index
    %13 = vector.load %arg2[%c1_9, %c0_10, %c0_11] : memref<3x30x896xbf16, #tpu.memory_space<vmem>>, vector<1x30x896xbf16>
    %14 = vector.shape_cast %13 : vector<1x30x896xbf16> to vector<30x896xbf16>
    %cst_12 = arith.constant dense<0.000000e+00> : vector<28x896xf32>
    %15 = tpu.matmul %12, %14, %cst_12 {dimension_numbers = #tpu.dot_dimension_numbers<[1], [0], [0], [1], [0, 0, 1, 1], [], []>} : vector<28x30xbf16>, vector<30x896xbf16>, vector<28x896xf32> -> vector<28x896xf32>
    %16 = arith.addf %9, %15 : vector<28x896xf32>
    %c0_13 = arith.constant 0 : index
    %c2 = arith.constant 2 : index
    %c0_14 = arith.constant 0 : index
    %17 = vector.load %arg1[%c0_13, %c2, %c0_14] : memref<1x30x30xf32, #tpu.memory_space<vmem>>, vector<1x28x30xf32>
    %18 = vector.shape_cast %17 : vector<1x28x30xf32> to vector<28x30xf32>
    %19 = arith.truncf %18 : vector<28x30xf32> to vector<28x30xbf16>
    %c2_15 = arith.constant 2 : index
    %c0_16 = arith.constant 0 : index
    %c0_17 = arith.constant 0 : index
    %20 = vector.load %arg2[%c2_15, %c0_16, %c0_17] : memref<3x30x896xbf16, #tpu.memory_space<vmem>>, vector<1x30x896xbf16>
    %21 = vector.shape_cast %20 : vector<1x30x896xbf16> to vector<30x896xbf16>
    %cst_18 = arith.constant dense<0.000000e+00> : vector<28x896xf32>
    %22 = tpu.matmul %19, %21, %cst_18 {dimension_numbers = #tpu.dot_dimension_numbers<[1], [0], [0], [1], [0, 0, 1, 1], [], []>} : vector<28x30xbf16>, vector<30x896xbf16>, vector<28x896xf32> -> vector<28x896xf32>
    %23 = arith.addf %16, %22 : vector<28x896xf32>
    %cst_19 = arith.constant 0.000000e+00 : f32
    %24 = vector.broadcast %cst_19 : f32 to vector<28x896xf32>
    %25 = arith.maximumf %23, %24 : vector<28x896xf32>
    %26 = arith.truncf %25 : vector<28x896xf32> to vector<28x896xbf16>
    %c0_20 = arith.constant 0 : index
    %c0_21 = arith.constant 0 : index
    %27 = vector.load %arg4[%c0_20, %c0_21] : memref<14x28xbf16, #tpu.memory_space<vmem>>, vector<14x28xbf16>
    %cst_22 = arith.constant dense<0.000000e+00> : vector<14x896xf32>
    %28 = tpu.matmul %27, %26, %cst_22 {dimension_numbers = #tpu.dot_dimension_numbers<[1], [0], [0], [1], [0, 0, 1, 1], [], []>} : vector<14x28xbf16>, vector<28x896xbf16>, vector<14x896xf32> -> vector<14x896xf32>
    %c0_23 = arith.constant 0 : index
    %c0_24 = arith.constant 0 : index
    %29 = vector.load %arg5[%c0_23, %c0_24] : memref<14x28xbf16, #tpu.memory_space<vmem>>, vector<14x28xbf16>
    %cst_25 = arith.constant dense<0.000000e+00> : vector<14x896xf32>
    %30 = tpu.matmul %29, %26, %cst_25 {dimension_numbers = #tpu.dot_dimension_numbers<[1], [0], [0], [1], [0, 0, 1, 1], [], []>} : vector<14x28xbf16>, vector<28x896xbf16>, vector<14x896xf32> -> vector<14x896xf32>
    %31 = arith.maximumf %28, %30 : vector<14x896xf32>
    %32 = arith.truncf %31 : vector<14x896xf32> to vector<14x896xbf16>
    %c0_26 = arith.constant 0 : index
    %c0_27 = arith.constant 0 : index
    %33 = vector.load %arg6[%c0_26, %c0_27] : memref<896x512xbf16, #tpu.memory_space<vmem>>, vector<896x512xbf16>
    %cst_28 = arith.constant dense<0.000000e+00> : vector<14x512xf32>
    %34 = tpu.matmul %32, %33, %cst_28 {dimension_numbers = #tpu.dot_dimension_numbers<[1], [0], [0], [1], [0, 0, 1, 1], [], []>} : vector<14x896xbf16>, vector<896x512xbf16>, vector<14x512xf32> -> vector<14x512xf32>
    %c0_29 = arith.constant 0 : index
    %c0_30 = arith.constant 0 : index
    %35 = vector.load %arg7[%c0_29, %c0_30] : memref<896x512xbf16, #tpu.memory_space<vmem>>, vector<896x512xbf16>
    %cst_31 = arith.constant dense<0.000000e+00> : vector<14x512xf32>
    %36 = tpu.matmul %32, %35, %cst_31 {dimension_numbers = #tpu.dot_dimension_numbers<[1], [0], [0], [1], [0, 0, 1, 1], [], []>} : vector<14x896xbf16>, vector<896x512xbf16>, vector<14x512xf32> -> vector<14x512xf32>
    %37 = arith.maximumf %34, %36 : vector<14x512xf32>
    %38 = arith.truncf %37 : vector<14x512xf32> to vector<14x512xbf16>
    %c0_32 = arith.constant 0 : index
    %c0_33 = arith.constant 0 : index
    %39 = vector.load %arg11[%c0_32, %c0_33] : memref<1x896xf32, #tpu.memory_space<vmem>>, vector<1x896xf32>
    %40 = vector.shape_cast %39 : vector<1x896xf32> to vector<1x896xf32>
    %41 = vector.broadcast %40 : vector<1x896xf32> to vector<14x896xf32>
    %c1_34 = arith.constant 1 : index
    %c0_35 = arith.constant 0 : index
    %c0_36 = arith.constant 0 : index
    %42 = vector.load %arg10[%c1_34, %c0_35, %c0_36] : memref<3x512x896xbf16, #tpu.memory_space<vmem>>, vector<1x512x896xbf16>
    %43 = vector.shape_cast %42 : vector<1x512x896xbf16> to vector<512x896xbf16>
    %cst_37 = arith.constant dense<0.000000e+00> : vector<14x896xf32>
    %44 = tpu.matmul %38, %43, %cst_37 {dimension_numbers = #tpu.dot_dimension_numbers<[1], [0], [0], [1], [0, 0, 1, 1], [], []>} : vector<14x512xbf16>, vector<512x896xbf16>, vector<14x896xf32> -> vector<14x896xf32>
    %45 = arith.addf %41, %44 : vector<14x896xf32>
    %c0_38 = arith.constant 0 : index
    %c0_39 = arith.constant 0 : index
    %46 = vector.load %arg8[%c0_38, %c0_39] : memref<14x14xbf16, #tpu.memory_space<vmem>>, vector<14x14xbf16>
    %cst_40 = arith.constant dense<0.000000e+00> : vector<14x512xf32>
    %47 = tpu.matmul %46, %38, %cst_40 {dimension_numbers = #tpu.dot_dimension_numbers<[1], [0], [0], [1], [0, 0, 1, 1], [], []>} : vector<14x14xbf16>, vector<14x512xbf16>, vector<14x512xf32> -> vector<14x512xf32>
    %48 = arith.truncf %47 : vector<14x512xf32> to vector<14x512xbf16>
    %c0_41 = arith.constant 0 : index
    %c0_42 = arith.constant 0 : index
    %c0_43 = arith.constant 0 : index
    %49 = vector.load %arg10[%c0_41, %c0_42, %c0_43] : memref<3x512x896xbf16, #tpu.memory_space<vmem>>, vector<1x512x896xbf16>
    %50 = vector.shape_cast %49 : vector<1x512x896xbf16> to vector<512x896xbf16>
    %cst_44 = arith.constant dense<0.000000e+00> : vector<14x896xf32>
    %51 = tpu.matmul %48, %50, %cst_44 {dimension_numbers = #tpu.dot_dimension_numbers<[1], [0], [0], [1], [0, 0, 1, 1], [], []>} : vector<14x512xbf16>, vector<512x896xbf16>, vector<14x896xf32> -> vector<14x896xf32>
    %52 = arith.addf %45, %51 : vector<14x896xf32>
    %c0_45 = arith.constant 0 : index
    %c0_46 = arith.constant 0 : index
    %53 = vector.load %arg9[%c0_45, %c0_46] : memref<14x14xbf16, #tpu.memory_space<vmem>>, vector<14x14xbf16>
    %cst_47 = arith.constant dense<0.000000e+00> : vector<14x512xf32>
    %54 = tpu.matmul %53, %38, %cst_47 {dimension_numbers = #tpu.dot_dimension_numbers<[1], [0], [0], [1], [0, 0, 1, 1], [], []>} : vector<14x14xbf16>, vector<14x512xbf16>, vector<14x512xf32> -> vector<14x512xf32>
    %55 = arith.truncf %54 : vector<14x512xf32> to vector<14x512xbf16>
    %c2_48 = arith.constant 2 : index
    %c0_49 = arith.constant 0 : index
    %c0_50 = arith.constant 0 : index
    %56 = vector.load %arg10[%c2_48, %c0_49, %c0_50] : memref<3x512x896xbf16, #tpu.memory_space<vmem>>, vector<1x512x896xbf16>
    %57 = vector.shape_cast %56 : vector<1x512x896xbf16> to vector<512x896xbf16>
    %cst_51 = arith.constant dense<0.000000e+00> : vector<14x896xf32>
    %58 = tpu.matmul %55, %57, %cst_51 {dimension_numbers = #tpu.dot_dimension_numbers<[1], [0], [0], [1], [0, 0, 1, 1], [], []>} : vector<14x512xbf16>, vector<512x896xbf16>, vector<14x896xf32> -> vector<14x896xf32>
    %59 = arith.addf %52, %58 : vector<14x896xf32>
    %cst_52 = arith.constant 0.000000e+00 : f32
    %60 = vector.broadcast %cst_52 : f32 to vector<14x896xf32>
    %61 = arith.maximumf %59, %60 : vector<14x896xf32>
    %62 = arith.truncf %61 : vector<14x896xf32> to vector<14x896xbf16>
    %c0_53 = arith.constant 0 : index
    %c0_54 = arith.constant 0 : index
    %63 = vector.load %arg12[%c0_53, %c0_54] : memref<7x14xbf16, #tpu.memory_space<vmem>>, vector<7x14xbf16>
    %cst_55 = arith.constant dense<0.000000e+00> : vector<7x896xf32>
    %64 = tpu.matmul %63, %62, %cst_55 {dimension_numbers = #tpu.dot_dimension_numbers<[1], [0], [0], [1], [0, 0, 1, 1], [], []>} : vector<7x14xbf16>, vector<14x896xbf16>, vector<7x896xf32> -> vector<7x896xf32>
    %c0_56 = arith.constant 0 : index
    %c0_57 = arith.constant 0 : index
    %65 = vector.load %arg13[%c0_56, %c0_57] : memref<7x14xbf16, #tpu.memory_space<vmem>>, vector<7x14xbf16>
    %cst_58 = arith.constant dense<0.000000e+00> : vector<7x896xf32>
    %66 = tpu.matmul %65, %62, %cst_58 {dimension_numbers = #tpu.dot_dimension_numbers<[1], [0], [0], [1], [0, 0, 1, 1], [], []>} : vector<7x14xbf16>, vector<14x896xbf16>, vector<7x896xf32> -> vector<7x896xf32>
    %67 = arith.maximumf %64, %66 : vector<7x896xf32>
    %68 = arith.truncf %67 : vector<7x896xf32> to vector<7x896xbf16>
    %c0_59 = arith.constant 0 : index
    %c0_60 = arith.constant 0 : index
    %69 = vector.load %arg14[%c0_59, %c0_60] : memref<896x448xbf16, #tpu.memory_space<vmem>>, vector<896x448xbf16>
    %cst_61 = arith.constant dense<0.000000e+00> : vector<7x448xf32>
    %70 = tpu.matmul %68, %69, %cst_61 {dimension_numbers = #tpu.dot_dimension_numbers<[1], [0], [0], [1], [0, 0, 1, 1], [], []>} : vector<7x896xbf16>, vector<896x448xbf16>, vector<7x448xf32> -> vector<7x448xf32>
    %c0_62 = arith.constant 0 : index
    %c0_63 = arith.constant 0 : index
    %71 = vector.load %arg15[%c0_62, %c0_63] : memref<896x448xbf16, #tpu.memory_space<vmem>>, vector<896x448xbf16>
    %cst_64 = arith.constant dense<0.000000e+00> : vector<7x448xf32>
    %72 = tpu.matmul %68, %71, %cst_64 {dimension_numbers = #tpu.dot_dimension_numbers<[1], [0], [0], [1], [0, 0, 1, 1], [], []>} : vector<7x896xbf16>, vector<896x448xbf16>, vector<7x448xf32> -> vector<7x448xf32>
    %73 = arith.maximumf %70, %72 : vector<7x448xf32>
    %c0_65 = arith.constant 0 : index
    %c0_66 = arith.constant 0 : index
    %74 = vector.load %arg17[%c0_65, %c0_66] : memref<1x128xf32, #tpu.memory_space<vmem>>, vector<1x128xf32>
    %75 = vector.extract_strided_slice %73 {offsets = [0, 0], sizes = [1, 448], strides = [1, 1]} : vector<7x448xf32> to vector<1x448xf32>
    %76 = arith.truncf %75 : vector<1x448xf32> to vector<1x448xbf16>
    %c0_67 = arith.constant 0 : index
    %c0_68 = arith.constant 0 : index
    %c0_69 = arith.constant 0 : index
    %77 = vector.load %arg16[%c0_67, %c0_68, %c0_69] : memref<7x448x128xbf16, #tpu.memory_space<vmem>>, vector<1x448x128xbf16>
    %78 = vector.shape_cast %77 : vector<1x448x128xbf16> to vector<448x128xbf16>
    %cst_70 = arith.constant dense<0.000000e+00> : vector<1x128xf32>
    %79 = tpu.matmul %76, %78, %cst_70 {dimension_numbers = #tpu.dot_dimension_numbers<[1], [0], [0], [1], [0, 0, 1, 1], [], []>} : vector<1x448xbf16>, vector<448x128xbf16>, vector<1x128xf32> -> vector<1x128xf32>
    %80 = arith.addf %74, %79 : vector<1x128xf32>
    %81 = vector.extract_strided_slice %73 {offsets = [1, 0], sizes = [1, 448], strides = [1, 1]} : vector<7x448xf32> to vector<1x448xf32>
    %82 = arith.truncf %81 : vector<1x448xf32> to vector<1x448xbf16>
    %c1_71 = arith.constant 1 : index
    %c0_72 = arith.constant 0 : index
    %c0_73 = arith.constant 0 : index
    %83 = vector.load %arg16[%c1_71, %c0_72, %c0_73] : memref<7x448x128xbf16, #tpu.memory_space<vmem>>, vector<1x448x128xbf16>
    %84 = vector.shape_cast %83 : vector<1x448x128xbf16> to vector<448x128xbf16>
    %cst_74 = arith.constant dense<0.000000e+00> : vector<1x128xf32>
    %85 = tpu.matmul %82, %84, %cst_74 {dimension_numbers = #tpu.dot_dimension_numbers<[1], [0], [0], [1], [0, 0, 1, 1], [], []>} : vector<1x448xbf16>, vector<448x128xbf16>, vector<1x128xf32> -> vector<1x128xf32>
    %86 = arith.addf %80, %85 : vector<1x128xf32>
    %87 = vector.extract_strided_slice %73 {offsets = [2, 0], sizes = [1, 448], strides = [1, 1]} : vector<7x448xf32> to vector<1x448xf32>
    %88 = arith.truncf %87 : vector<1x448xf32> to vector<1x448xbf16>
    %c2_75 = arith.constant 2 : index
    %c0_76 = arith.constant 0 : index
    %c0_77 = arith.constant 0 : index
    %89 = vector.load %arg16[%c2_75, %c0_76, %c0_77] : memref<7x448x128xbf16, #tpu.memory_space<vmem>>, vector<1x448x128xbf16>
    %90 = vector.shape_cast %89 : vector<1x448x128xbf16> to vector<448x128xbf16>
    %cst_78 = arith.constant dense<0.000000e+00> : vector<1x128xf32>
    %91 = tpu.matmul %88, %90, %cst_78 {dimension_numbers = #tpu.dot_dimension_numbers<[1], [0], [0], [1], [0, 0, 1, 1], [], []>} : vector<1x448xbf16>, vector<448x128xbf16>, vector<1x128xf32> -> vector<1x128xf32>
    %92 = arith.addf %86, %91 : vector<1x128xf32>
    %93 = vector.extract_strided_slice %73 {offsets = [3, 0], sizes = [1, 448], strides = [1, 1]} : vector<7x448xf32> to vector<1x448xf32>
    %94 = arith.truncf %93 : vector<1x448xf32> to vector<1x448xbf16>
    %c3 = arith.constant 3 : index
    %c0_79 = arith.constant 0 : index
    %c0_80 = arith.constant 0 : index
    %95 = vector.load %arg16[%c3, %c0_79, %c0_80] : memref<7x448x128xbf16, #tpu.memory_space<vmem>>, vector<1x448x128xbf16>
    %96 = vector.shape_cast %95 : vector<1x448x128xbf16> to vector<448x128xbf16>
    %cst_81 = arith.constant dense<0.000000e+00> : vector<1x128xf32>
    %97 = tpu.matmul %94, %96, %cst_81 {dimension_numbers = #tpu.dot_dimension_numbers<[1], [0], [0], [1], [0, 0, 1, 1], [], []>} : vector<1x448xbf16>, vector<448x128xbf16>, vector<1x128xf32> -> vector<1x128xf32>
    %98 = arith.addf %92, %97 : vector<1x128xf32>
    %99 = vector.extract_strided_slice %73 {offsets = [4, 0], sizes = [1, 448], strides = [1, 1]} : vector<7x448xf32> to vector<1x448xf32>
    %100 = arith.truncf %99 : vector<1x448xf32> to vector<1x448xbf16>
    %c4 = arith.constant 4 : index
    %c0_82 = arith.constant 0 : index
    %c0_83 = arith.constant 0 : index
    %101 = vector.load %arg16[%c4, %c0_82, %c0_83] : memref<7x448x128xbf16, #tpu.memory_space<vmem>>, vector<1x448x128xbf16>
    %102 = vector.shape_cast %101 : vector<1x448x128xbf16> to vector<448x128xbf16>
    %cst_84 = arith.constant dense<0.000000e+00> : vector<1x128xf32>
    %103 = tpu.matmul %100, %102, %cst_84 {dimension_numbers = #tpu.dot_dimension_numbers<[1], [0], [0], [1], [0, 0, 1, 1], [], []>} : vector<1x448xbf16>, vector<448x128xbf16>, vector<1x128xf32> -> vector<1x128xf32>
    %104 = arith.addf %98, %103 : vector<1x128xf32>
    %105 = vector.extract_strided_slice %73 {offsets = [5, 0], sizes = [1, 448], strides = [1, 1]} : vector<7x448xf32> to vector<1x448xf32>
    %106 = arith.truncf %105 : vector<1x448xf32> to vector<1x448xbf16>
    %c5 = arith.constant 5 : index
    %c0_85 = arith.constant 0 : index
    %c0_86 = arith.constant 0 : index
    %107 = vector.load %arg16[%c5, %c0_85, %c0_86] : memref<7x448x128xbf16, #tpu.memory_space<vmem>>, vector<1x448x128xbf16>
    %108 = vector.shape_cast %107 : vector<1x448x128xbf16> to vector<448x128xbf16>
    %cst_87 = arith.constant dense<0.000000e+00> : vector<1x128xf32>
    %109 = tpu.matmul %106, %108, %cst_87 {dimension_numbers = #tpu.dot_dimension_numbers<[1], [0], [0], [1], [0, 0, 1, 1], [], []>} : vector<1x448xbf16>, vector<448x128xbf16>, vector<1x128xf32> -> vector<1x128xf32>
    %110 = arith.addf %104, %109 : vector<1x128xf32>
    %111 = vector.extract_strided_slice %73 {offsets = [6, 0], sizes = [1, 448], strides = [1, 1]} : vector<7x448xf32> to vector<1x448xf32>
    %112 = arith.truncf %111 : vector<1x448xf32> to vector<1x448xbf16>
    %c6 = arith.constant 6 : index
    %c0_88 = arith.constant 0 : index
    %c0_89 = arith.constant 0 : index
    %113 = vector.load %arg16[%c6, %c0_88, %c0_89] : memref<7x448x128xbf16, #tpu.memory_space<vmem>>, vector<1x448x128xbf16>
    %114 = vector.shape_cast %113 : vector<1x448x128xbf16> to vector<448x128xbf16>
    %cst_90 = arith.constant dense<0.000000e+00> : vector<1x128xf32>
    %115 = tpu.matmul %112, %114, %cst_90 {dimension_numbers = #tpu.dot_dimension_numbers<[1], [0], [0], [1], [0, 0, 1, 1], [], []>} : vector<1x448xbf16>, vector<448x128xbf16>, vector<1x128xf32> -> vector<1x128xf32>
    %116 = arith.addf %110, %115 : vector<1x128xf32>
    %cst_91 = arith.constant 0.000000e+00 : f32
    %117 = vector.broadcast %cst_91 : f32 to vector<1x128xf32>
    %118 = arith.maximumf %116, %117 : vector<1x128xf32>
    %119 = arith.truncf %118 : vector<1x128xf32> to vector<1x128xbf16>
    %c0_92 = arith.constant 0 : index
    %c0_93 = arith.constant 0 : index
    %120 = vector.load %arg18[%c0_92, %c0_93] : memref<128x10xbf16, #tpu.memory_space<vmem>>, vector<128x10xbf16>
    %cst_94 = arith.constant dense<0.000000e+00> : vector<1x10xf32>
    %121 = tpu.matmul %119, %120, %cst_94 {dimension_numbers = #tpu.dot_dimension_numbers<[1], [0], [0], [1], [0, 0, 1, 1], [], []>} : vector<1x128xbf16>, vector<128x10xbf16>, vector<1x10xf32> -> vector<1x10xf32>
    %c0_95 = arith.constant 0 : index
    %c0_96 = arith.constant 0 : index
    %122 = vector.load %arg19[%c0_95, %c0_96] : memref<1x10xf32, #tpu.memory_space<vmem>>, vector<1x10xf32>
    %123 = arith.addf %121, %122 : vector<1x10xf32>
    %c0_97 = arith.constant 0 : index
    %c0_98 = arith.constant 0 : index
    %c0_99 = arith.constant 0 : index
    %124 = vector.load %arg20[%c0_97, %c0_98, %c0_99] : memref<1x1x10xf32, #tpu.memory_space<vmem>>, vector<1x1x10xf32>
    %125 = vector.shape_cast %124 : vector<1x1x10xf32> to vector<1x10xf32>
    %126 = vector.shape_cast %123 : vector<1x10xf32> to vector<1x1x10xf32>
    tpu.vector_store %arg20[%c0_97, %c0_98, %c0_99], %126 {strides = array<i32>} : memref<1x1x10xf32, #tpu.memory_space<vmem>>, vector<1x1x10xf32>,
    return
  }
  func.func @transform_0(%arg0: i32) -> (i32, i32, i32) {
    %c0_i32 = arith.constant 0 : i32
    %c0_i32_0 = arith.constant 0 : i32
    %c0_i32_1 = arith.constant 0 : i32
    return %arg0, %c0_i32, %c0_i32_0 : i32, i32, i32
  }
  func.func @transform_1(%arg0: i32) -> (i32, i32, i32) {
    %c0_i32 = arith.constant 0 : i32
    %c0_i32_0 = arith.constant 0 : i32
    %c0_i32_1 = arith.constant 0 : i32
    %c0_i32_2 = arith.constant 0 : i32
    return %c0_i32, %c0_i32_0, %c0_i32_1 : i32, i32, i32
  }
  func.func @transform_2(%arg0: i32) -> (i32, i32) {
    %c0_i32 = arith.constant 0 : i32
    %c0_i32_0 = arith.constant 0 : i32
    %c0_i32_1 = arith.constant 0 : i32
    return %c0_i32, %c0_i32_0 : i32, i32
  }
  func.func @transform_3(%arg0: i32) -> (i32, i32) {
    %c0_i32 = arith.constant 0 : i32
    %c0_i32_0 = arith.constant 0 : i32
    %c0_i32_1 = arith.constant 0 : i32
    return %c0_i32, %c0_i32_0 : i32, i32
  }
  func.func @transform_4(%arg0: i32) -> (i32, i32) {
    %c0_i32 = arith.constant 0 : i32
    %c0_i32_0 = arith.constant 0 : i32
    %c0_i32_1 = arith.constant 0 : i32
    return %c0_i32, %c0_i32_0 : i32, i32
  }
  func.func @transform_5(%arg0: i32) -> (i32, i32) {
    %c0_i32 = arith.constant 0 : i32
    %c0_i32_0 = arith.constant 0 : i32
    %c0_i32_1 = arith.constant 0 : i32
    return %c0_i32, %c0_i32_0 : i32, i32
  }
  func.func @transform_6(%arg0: i32) -> (i32, i32) {
    %c0_i32 = arith.constant 0 : i32
    %c0_i32_0 = arith.constant 0 : i32
    %c0_i32_1 = arith.constant 0 : i32
    return %c0_i32, %c0_i32_0 : i32, i32
  }
  func.func @transform_7(%arg0: i32) -> (i32, i32) {
    %c0_i32 = arith.constant 0 : i32
    %c0_i32_0 = arith.constant 0 : i32
    %c0_i32_1 = arith.constant 0 : i32
    return %c0_i32, %c0_i32_0 : i32, i32
  }
  func.func @transform_8(%arg0: i32) -> (i32, i32) {
    %c0_i32 = arith.constant 0 : i32
    %c0_i32_0 = arith.constant 0 : i32
    %c0_i32_1 = arith.constant 0 : i32
    return %c0_i32, %c0_i32_0 : i32, i32
  }
  func.func @transform_9(%arg0: i32) -> (i32, i32, i32) {
    %c0_i32 = arith.constant 0 : i32
    %c0_i32_0 = arith.constant 0 : i32
    %c0_i32_1 = arith.constant 0 : i32
    %c0_i32_2 = arith.constant 0 : i32
    return %c0_i32, %c0_i32_0, %c0_i32_1 : i32, i32, i32
  }
  func.func @transform_10(%arg0: i32) -> (i32, i32) {
    %c0_i32 = arith.constant 0 : i32
    %c0_i32_0 = arith.constant 0 : i32
    %c0_i32_1 = arith.constant 0 : i32
    return %c0_i32, %c0_i32_0 : i32, i32
  }
  func.func @transform_11(%arg0: i32) -> (i32, i32) {
    %c0_i32 = arith.constant 0 : i32
    %c0_i32_0 = arith.constant 0 : i32
    %c0_i32_1 = arith.constant 0 : i32
    return %c0_i32, %c0_i32_0 : i32, i32
  }
  func.func @transform_12(%arg0: i32) -> (i32, i32) {
    %c0_i32 = arith.constant 0 : i32
    %c0_i32_0 = arith.constant 0 : i32
    %c0_i32_1 = arith.constant 0 : i32
    return %c0_i32, %c0_i32_0 : i32, i32
  }
  func.func @transform_13(%arg0: i32) -> (i32, i32) {
    %c0_i32 = arith.constant 0 : i32
    %c0_i32_0 = arith.constant 0 : i32
    %c0_i32_1 = arith.constant 0 : i32
    return %c0_i32, %c0_i32_0 : i32, i32
  }
  func.func @transform_14(%arg0: i32) -> (i32, i32) {
    %c0_i32 = arith.constant 0 : i32
    %c0_i32_0 = arith.constant 0 : i32
    %c0_i32_1 = arith.constant 0 : i32
    return %c0_i32, %c0_i32_0 : i32, i32
  }
  func.func @transform_15(%arg0: i32) -> (i32, i32, i32) {
    %c0_i32 = arith.constant 0 : i32
    %c0_i32_0 = arith.constant 0 : i32
    %c0_i32_1 = arith.constant 0 : i32
    %c0_i32_2 = arith.constant 0 : i32
    return %c0_i32, %c0_i32_0, %c0_i32_1 : i32, i32, i32
  }
  func.func @transform_16(%arg0: i32) -> (i32, i32) {
    %c0_i32 = arith.constant 0 : i32
    %c0_i32_0 = arith.constant 0 : i32
    %c0_i32_1 = arith.constant 0 : i32
    return %c0_i32, %c0_i32_0 : i32, i32
  }
  func.func @transform_17(%arg0: i32) -> (i32, i32) {
    %c0_i32 = arith.constant 0 : i32
    %c0_i32_0 = arith.constant 0 : i32
    %c0_i32_1 = arith.constant 0 : i32
    return %c0_i32, %c0_i32_0 : i32, i32
  }
  func.func @transform_18(%arg0: i32) -> (i32, i32) {
    %c0_i32 = arith.constant 0 : i32
    %c0_i32_0 = arith.constant 0 : i32
    %c0_i32_1 = arith.constant 0 : i32
    return %c0_i32, %c0_i32_0 : i32, i32
  }
  func.func @transform_19(%arg0: i32) -> (i32, i32, i32) {
    %c0_i32 = arith.constant 0 : i32
    %c0_i32_0 = arith.constant 0 : i32
    %c0_i32_1 = arith.constant 0 : i32
    return %arg0, %c0_i32, %c0_i32_0 : i32, i32, i32
  }
}

</mosaic_0001>

<bundles_post_ra>
// kernel: conv_net_forward.1
= control target key start
LH: loop header
LB: loop body
LE: loop exit
PB: predicated region body
PF: predicated region fallthrough
CT: control target
= control target key end

     0   :  { %s28532_s0 = inlined_call_operand.vmem [shape: f32[2,30,30], index: 0, kind: input, shape index: {}]   ;;  %s28533_s1 = inlined_call_operand.hbm [shape: bf16[3,30,896], index: 1, kind: input, shape index: {}]   ;;  %s28534_s2 = inlined_call_operand.vmem [shape: f32[1,896], index: 2, kind: input, shape index: {}]   ;;  %s28535_s3 = inlined_call_operand.vmem [shape: bf16[14,28], index: 3, kind: input, shape index: {}]   ;;  %s28536_s4 = inlined_call_operand.vmem [shape: bf16[14,28], index: 4, kind: input, shape index: {}]   ;;  %s28537_s5 = inlined_call_operand.vmem [shape: bf16[896,512], index: 5, kind: input, shape index: {}]   ;;  %s28538_s6 = inlined_call_operand.hbm [shape: bf16[896,512], index: 6, kind: input, shape index: {}]   ;;  %s28539_s7 = inlined_call_operand.vmem [shape: bf16[14,14], index: 7, kind: input, shape index: {}]   ;;  %s28540_s8 = inlined_call_operand.vmem [shape: bf16[14,14], index: 8, kind: input, shape index: {}]   ;;  %s28541_s9 = inlined_call_operand.vmem [shape: bf16[3,512,896], index: 9, kind: input, shape index: {}]   ;;  %s28542_s10 = inlined_call_operand.hbm [shape: f32[1,896], index: 10, kind: input, shape index: {}]   ;;  %s28543_s11 = inlined_call_operand.hbm [shape: bf16[7,14], index: 11, kind: input, shape index: {}]   ;;  %s28544_s12 = inlined_call_operand.hbm [shape: bf16[7,14], index: 12, kind: input, shape index: {}]   ;;  %s28545_s13 = inlined_call_operand.vmem [shape: bf16[896,448], index: 13, kind: input, shape index: {}]   ;;  %s28546_s14 = inlined_call_operand.vmem [shape: bf16[896,448], index: 14, kind: input, shape index: {}]   ;;  %s28547_s15 = inlined_call_operand.hbm [shape: bf16[7,448,128], index: 15, kind: input, shape index: {}]   ;;  %s28548_s16 = inlined_call_operand.vmem [shape: f32[1,128], index: 16, kind: input, shape index: {}]   ;;  %s28549_s17 = inlined_call_operand.vmem [shape: bf16[128,10], index: 17, kind: input, shape index: {}]   ;;  %s28550_s18 = inlined_call_operand.vmem [shape: f32[1,10], index: 18, kind: input, shape index: {}]   ;;  %s28551_s19 = inlined_call_operand.hbm [shape: f32[2,1,10], index: 19, kind: output, shape index: {}]  }
   0x1   :  { %28567 = sst [smem:[#allocation27_spill]] %s28532_s0 }
   0x2   :  { %28568 = sst [smem:[#allocation28_spill]] %s28533_s1 }
   0x3   :  { %28569 = sst [smem:[#allocation29_spill]] %s28534_s2 }
   0x4   :  { %28570 = sst [smem:[#allocation30_spill]] %s28535_s3 }
   0x5   :  { %28571 = sst [smem:[#allocation31_spill]] %s28538_s6 }
   0x6   :  { %28572 = sst [smem:[#allocation32_spill]] %s28543_s11 }
   0x7   :  { %28573 = sst [smem:[#allocation33_spill]] %s28548_s16 }
   0x8   :  { %28574 = sst [smem:[#allocation34_spill]] %s28549_s17 }
   0x9   :  { %28575 = sst [smem:[#allocation35_spill]] %s28550_s18 }
   0xa   :  { %28576 = sst [smem:[#allocation36_spill]] %s28551_s19 }
   0xb   :  { %24 = vsyncpa [#allocation3], 0 }
   0xc   :  { %25 = vsyncpa [#allocation6], 0 }
   0xd   :  { %26 = vsyncpa [#allocation9], 0 }
   0xe   :  { %27 = vsyncpa [#allocation12], 0 }
   0xf   :  { %28 = vsyncpa [#allocation4], 0 }
  0x10   :  { %30 = vsyncpa [#allocation4 + $0x1], 0  ;;  %s23491_s0 = smov 0   ;;  %s23493_s30 = smov 0  }
  0x11   :  { %s23495_s20 = smov 0   ;;  %s23497_s21 = smov 0  }
  0x12 LB: > { %28577 = sst [smem:[#allocation19_spill]] %s23361_s0  ;;  %s23512_s1 = sadd.s32 4294967295, %s23373_s21   ;;  %s23373_s21 = sphi %s23497_s21, %s28617_s21   ;;  %s23369_s20 = sphi %s23495_s20, %s28620_s20   ;;  %s23365_s30 = sphi %s23493_s30, %s28619_s30   ;;  %s23361_s0 = sphi %s23491_s0, %s28618_s0  }
  0x13   : > { %28578 = sst [smem:[#allocation20_spill]] %s23365_s30  ;;  %s17342_s22 = sadd.s32 4294967294, %s23373_s21  }
  0x14   : > { %28579 = sst [smem:[#allocation21_spill]] %s23369_s20  ;;  %s23516_s2 = sadd.s32 1, %s23373_s21  }
  0x15   : > { %28580 = sst [smem:[#allocation22_spill]] %s23373_s21  ;;  %s447_s23 = sadd.s32 1, %s23369_s20 }
  0x16   : > { %28581 = sst [smem:[#allocation23_spill]] %s23516_s2  ;;  %s444_s24 = ssub.s32 %s23373_s21, %s23516_s2 }
  0x17   : > { %p457_p0 = scmp.ne.s32.totalorder %s23369_s20, %s23365_s30  ;;  %p445_p1 = scmp.eq.s32.totalorder %s444_s24, 0 }
  0x18   : > { %p458_p2 = scmp.eq.s32.totalorder %s23512_s1, 1  ;;  %p463_p3 = scmp.ne.s32.totalorder %s23365_s30, %s23361_s0 }
  0x19   : > { %p464_p4 = scmp.eq.s32.totalorder %s17342_s22, 1  ;;  %p17343_p7 = scmp.ge.s32.totalorder %s23373_s21, 1 }
  0x1a   : > { %s23527_s25 = scalar_select %p445_p1, %s23369_s20, %s447_s23  }
  0x1b   : > { %p23529_p5 = por %p458_p2, %p457_p0  ;;  %p23533_p6 = por %p464_p4, %p463_p3 }
  0x1c   : > { %28582 = sst [smem:[#allocation24_spill]] %s23527_s25  ;;  %p471_p8 = scmp.lt.s32.totalorder %s23373_s21, 3 }
  0x1d   : > { %s28583_s3 = scalar_select %p23529_p5, 1, 0 }
  0x1e   : > { %s28585_s26 = scalar_select %p23533_p6, 1, 0 }
  0x1f   : > { %28584 = sst [smem:[#allocation25_spill]] %s28583_s3  ;;  %p28560_p9 = scmp.eq.s32.totalorder %s23512_s1, 0 }
  0x20   : > { %28586 = sst [smem:[#allocation26_spill]] %s28585_s26  ;;  %p23540_p10 = pnand %p17343_p7, %p471_p8 }
  0x21   : > { %s23375_s28 = smov [#allocation5]   ;;  %s23376_s23 = smov [#allocation8]  }
  0x22   : > { %s28587_s27 = scalar_select %p23540_p10, 1, 0 }
  0x23   : > { %s508_s29 = sshll.u32 %s23375_s28, 4  ;;  %p20472_p11 = pneg %p23540_p10  ;;  %s23546_s29 = int_to_ptr.vmem [resolvable:$true] %s508_s29 }
  0x24   : > { %s542_s24 = sshll.u32 %s23376_s23, 4  ;;  %s23377_s25 = smov [#allocation2]   ;;  %s23554_s24 = int_to_ptr.vmem [resolvable:$true] %s542_s24 }
  0x25   : > { %p23550_p12 = pnand %p28560_p9, %p20472_p11  ;;  %s23556_s20 = sshll.u32 %s23377_s25, 4  ;;  %s484_s20 = int_to_ptr.vmem [resolvable:$true] %s23556_s20 }
  0x26   : > { %s28589_s6 = sld [smem:[#allocation31_spill]] }
  0x27   : > { %p23566_p0 = pneg %p23550_p12 }
  0x2c   : > { %s23127_s28 = scalar_lea.hbm %s28589_s6, 28672 }
  0x2d   : > { %p23128_p13 = scmp.ne.s32.totalorder %s28589_s6, %s23127_s28  ;;  %p23134_p3 = scmp.lt.u32.totalorder %s23127_s28, %s28589_s6 }
  0x2f   : > { %p23130_p1 = pnand %p23566_p0, %p23128_p13 }
  0x31   : > { %p23131_p2 = pneg %p23130_p1 }
  0x33   : > { %p23136_p4 = pnand %p23134_p3, %p23131_p2 }
  0x35   : > { %23139 = shalt.err (!%p23136_p4)
}
  0x36   : > { %s23140_s0 = scalar_lea.vmem %s23546_s29, 28672  ;;  %p23148_p9 = scmp.lt.s32.totalorder %s23546_s29, %s23546_s29 }
  0x37   : > { %p23141_p7 = scmp.ne.s32.totalorder %s23546_s29, %s23140_s0  ;;  %p23149_p6 = scmp.lt.s32.totalorder %s23140_s0, %s23140_s0 }
  0x39   : > { %p23143_p8 = pnand %p23141_p7, %p23566_p0  ;;  %p23150_p13 = por %p23149_p6, %p23148_p9 }
  0x3b   : > { %p23144_p11 = pneg %p23143_p8 }
  0x3d   : > { %p23151_p1 = pnand %p23150_p13, %p23144_p11 }
  0x3f   : > { %23154 = shalt.err (!%p23151_p1)
}
  0x40   : > { %s23378_s21 = smov 256   ;;  %s23379_s2 = smov 16  }
  0x41   : > { %20478 = dma.hbm_to_vmem [thread:$0]  (!%p23550_p12), %s28589_s6, 28672, %s23546_s29, [#allocation6], %s23378_s21, %s23378_s21, %s23379_s2  }
  0x42   : > { %s28591_s11 = sld [smem:[#allocation32_spill]] }
  0x48   : > { %s23155_s3 = scalar_lea.hbm %s28591_s11, 64 }
  0x49   : > { %p23156_p6 = scmp.ne.s32.totalorder %s28591_s11, %s23155_s3  ;;  %p23162_p3 = scmp.lt.u32.totalorder %s23155_s3, %s28591_s11 }
  0x4b   : > { %p23158_p9 = pnand %p23156_p6, %p23566_p0 }
  0x4d   : > { %p23159_p2 = pneg %p23158_p9 }
  0x4f   : > { %p23164_p4 = pnand %p23162_p3, %p23159_p2 }
  0x51   : > { %23167 = shalt.err (!%p23164_p4)
}
  0x52   : > { %s23168_s29 = scalar_lea.vmem %s23554_s24, 64  ;;  %p23176_p13 = scmp.lt.s32.totalorder %s23554_s24, %s23554_s24 }
  0x53   : > { %p23169_p7 = scmp.ne.s32.totalorder %s23554_s24, %s23168_s29  ;;  %p23177_p1 = scmp.lt.s32.totalorder %s23168_s29, %s23168_s29 }
  0x55   : > { %p23171_p8 = pnand %p23169_p7, %p23566_p0  ;;  %p23178_p6 = por %p23177_p1, %p23176_p13 }
  0x57   : > { %p23172_p11 = pneg %p23171_p8 }
  0x59   : > { %p23179_p9 = pnand %p23178_p6, %p23172_p11 }
  0x5b   : > { %23182 = shalt.err (!%p23179_p9)
}
  0x5c   : > { %20484 = dma.hbm_to_vmem [thread:$0]  (!%p23550_p12), %s28591_s11, 64, %s23554_s24, [#allocation9]  }
  0x5d   : > { %s28592_s21 = sld [smem:[#allocation28_spill]] }
  0x63   : > { %s28593_s2 = smov %s28592_s21  ;;  %s23183_s26 = scalar_lea.hbm %s28592_s21, 5376 }
  0x64   : > { %p23184_p2 = scmp.ne.s32.totalorder %s28593_s2, %s23183_s26  ;;  %p23190_p7 = scmp.lt.u32.totalorder %s23183_s26, %s28593_s2 }
  0x66   : > { %p23186_p3 = pnand %p23184_p2, %p23566_p0 }
  0x68   : > { %p23187_p4 = pneg %p23186_p3 }
  0x6a   : > { %p23192_p8 = pnand %p23190_p7, %p23187_p4 }
  0x6c   : > { %23195 = shalt.err (!%p23192_p8)
}
  0x6d   : > { %s23196_s29 = scalar_lea.vmem %s484_s20, 5376  ;;  %p23204_p6 = scmp.lt.s32.totalorder %s484_s20, %s484_s20 }
  0x6e   : > { %p23197_p11 = scmp.ne.s32.totalorder %s484_s20, %s23196_s29  ;;  %p23205_p9 = scmp.lt.s32.totalorder %s23196_s29, %s23196_s29 }
  0x70   : > { %p23199_p13 = pnand %p23197_p11, %p23566_p0  ;;  %p23206_p5 = por %p23205_p9, %p23204_p6 }
  0x72   : > { %p23200_p1 = pneg %p23199_p13 }
  0x74   : > { %p23207_p10 = pnand %p23206_p5, %p23200_p1 }
  0x76   : > { %23210 = shalt.err (!%p23207_p10)
}
  0x77   : > { %s23380_s24 = smov 448   ;;  %s23381_s16 = smov 28  }
  0x78   : > { %20475 = dma.hbm_to_vmem [thread:$0]  (!%p23550_p12), %s28593_s2, 5376, %s484_s20, [#allocation3], %s23380_s24, %s23380_s24, %s23381_s16  }
  0x79   : > { %s23382_s3 = smov [#allocation7]   ;;  %s23383_s26 = smov [#allocation10]  }
  0x7a   : > { %s531_s21 = sshll.u32 %s23382_s3, 4  ;;  %s553_s28 = sshll.u32 %s23383_s26, 4  ;;  %s532_s21 = int_to_ptr.vmem [resolvable:$true] %s531_s21  ;;  %s554_s28 = int_to_ptr.vmem [resolvable:$true] %s553_s28 }
  0x7b   : > { %s23211_s0 = scalar_lea.hbm %s28542_s10, 112 }
  0x7c   : > { %p23212_p5 = scmp.ne.s32.totalorder %s28542_s10, %s23211_s0  ;;  %p23218_p3 = scmp.lt.u32.totalorder %s23211_s0, %s28542_s10 }
  0x7e   : > { %p23214_p10 = pnand %p23212_p5, %p23566_p0 }
  0x80   : > { %p23215_p2 = pneg %p23214_p10 }
  0x82   : > { %p23220_p4 = pnand %p23218_p3, %p23215_p2 }
  0x84   : > { %23223 = shalt.err (!%p23220_p4)
}
  0x85   : > { %s23224_s20 = scalar_lea.vmem %s532_s21, 112  ;;  %s23231_s24 = scalar_lea.vmem %s532_s21, 128 }
  0x86   : > { %p23225_p7 = scmp.ne.s32.totalorder %s532_s21, %s23224_s20  ;;  %p23232_p13 = scmp.lt.s32.totalorder %s532_s21, %s532_s21 }
  0x87   : > { %p23233_p1 = scmp.lt.s32.totalorder %s23231_s24, %s23224_s20 }
  0x88   : > { %p23227_p8 = pnand %p23225_p7, %p23566_p0 }
  0x89   : > { %p23234_p6 = por %p23233_p1, %p23232_p13 }
  0x8a   : > { %p23228_p11 = pneg %p23227_p8 }
  0x8c   : > { %p23235_p9 = pnand %p23234_p6, %p23228_p11 }
  0x8e   : > { %23238 = shalt.err (!%p23235_p9)
}
  0x8f   : > { %20481 = dma.hbm_to_vmem [thread:$0]  (!%p23550_p12), %s28542_s10, 112, %s532_s21, [#allocation6]  }
  0x90   : > { %s23239_s18 = scalar_lea.hbm %s28544_s12, 64 }
  0x91   : > { %p23240_p5 = scmp.ne.s32.totalorder %s28544_s12, %s23239_s18  ;;  %p23246_p3 = scmp.lt.u32.totalorder %s23239_s18, %s28544_s12 }
  0x93   : > { %p23242_p10 = pnand %p23240_p5, %p23566_p0 }
  0x95   : > { %p23243_p2 = pneg %p23242_p10 }
  0x97   : > { %p23248_p4 = pnand %p23246_p3, %p23243_p2 }
  0x99   : > { %23251 = shalt.err (!%p23248_p4)
}
  0x9a   : > { %s23252_s25 = scalar_lea.vmem %s554_s28, 64  ;;  %p23260_p13 = scmp.lt.s32.totalorder %s554_s28, %s554_s28 }
  0x9b   : > { %p23253_p7 = scmp.ne.s32.totalorder %s554_s28, %s23252_s25  ;;  %p23261_p1 = scmp.lt.s32.totalorder %s23252_s25, %s23252_s25 }
  0x9d   : > { %p23255_p8 = pnand %p23253_p7, %p23566_p0  ;;  %p23262_p6 = por %p23261_p1, %p23260_p13 }
  0x9f   : > { %p23256_p11 = pneg %p23255_p8 }
  0xa1   : > { %p23263_p9 = pnand %p23262_p6, %p23256_p11 }
  0xa3   : > { %23266 = shalt.err (!%p23263_p9)
}
  0xa4   : > { %20487 = dma.hbm_to_vmem [thread:$0]  (!%p23550_p12), %s28544_s12, 64, %s554_s28, [#allocation9]  }
  0xa5   : > { %s23384_s29 = smov [#allocation11]   ;;  %s23267_s16 = scalar_lea.hbm %s28547_s15, 25088 }
  0xa6   : > { %s569_s20 = sshll.u32 %s23384_s29, 4  ;;  %p23268_p5 = scmp.ne.s32.totalorder %s28547_s15, %s23267_s16  ;;  %s570_s20 = int_to_ptr.vmem [resolvable:$true] %s569_s20 }
  0xa7   : > { %p23274_p3 = scmp.lt.u32.totalorder %s23267_s16, %s28547_s15 }
  0xa8   : > { %p23270_p10 = pnand %p23268_p5, %p23566_p0 }
  0xaa   : > { %p23271_p2 = pneg %p23270_p10 }
  0xac   : > { %p23276_p4 = pnand %p23274_p3, %p23271_p2 }
  0xae   : > { %23279 = shalt.err (!%p23276_p4)
}
  0xaf   : > { %s23280_s28 = scalar_lea.vmem %s570_s20, 25088  ;;  %p23288_p13 = scmp.lt.s32.totalorder %s570_s20, %s570_s20 }
  0xb0   : > { %p23281_p7 = scmp.ne.s32.totalorder %s570_s20, %s23280_s28  ;;  %p23289_p1 = scmp.lt.s32.totalorder %s23280_s28, %s23280_s28 }
  0xb2   : > { %p23283_p8 = pnand %p23281_p7, %p23566_p0  ;;  %p23290_p6 = por %p23289_p1, %p23288_p13 }
  0xb4   : > { %p23284_p11 = pneg %p23283_p8 }
  0xb6   : > { %p23291_p9 = pnand %p23290_p6, %p23284_p11 }
  0xb8   : > { %23294 = shalt.err (!%p23291_p9)
}
  0xb9   : > { %s23385_s3 = smov 64   ;;  %s23386_s26 = smov 4  }
  0xba   : > { %20490 = dma.hbm_to_vmem [thread:$0]  (!%p23550_p12), %s28547_s15, 25088, %s570_s20, [#allocation12], %s23385_s3, %s23385_s3, %s23386_s26  }
  0xbb   : > { %p28594_p5 = scmp.ne.s32.totalorder %s28587_s27, 0 }
  0xbc   : > { %p28595_p10 = scmp.eq.s32.totalorder (!%p28594_p5), %s23512_s1, 0 }
  0xbd   : > { %602 = sbr.rel (%p28594_p5) target bundleno = 4204 (0x106c), region = 96 }
  0xc4   : > { %23340 = dma.done.wait (%p28595_p10), [#allocation3], 5376   ;;  %p28596_p0 = pmov %p28595_p10 }
  0xc6   : > { %23342 = vsyncadd (%p28596_p0), [#allocation3], 4294961920  ;;  %p28597_p2 = pmov %p28596_p0 }
  0xc7   : > { %p28598_p3 = pmov %p28596_p0 }
  0xc8   : > { %23344 = dma.done.wait (%p28597_p2), [#allocation6], 28784  }
  0xc9   : > { %23346 = vsyncadd (%p28598_p3), [#allocation6], 4294938512  ;;  %p28599_p4 = pmov %p28596_p0 }
  0xca   : > { %p28600_p12 = pmov %p28596_p0 }
  0xcb   : > { %23348 = dma.done.wait (%p28599_p4), [#allocation9], 128  }
  0xcc   : > { %23350 = vsyncadd (%p28600_p12), [#allocation9], 4294967168  ;;  %p28601_p7 = pmov %p28596_p0 }
  0xcd   : > { %p28602_p8 = pmov %p28596_p0 }
  0xce   : > { %23352 = dma.done.wait (%p28601_p7), [#allocation12], 25088  }
  0xcf   : > { %23354 = vsyncadd (%p28602_p8), [#allocation12], 4294942208  ;;  %p677_p11 = scmp.lt.s32.totalorder %s23512_s1, 1  ;;  %v23387_v0 = vmov 0   ;;  %v20555_v1 = vld [vmem:[#allocation2 + $0x4] ss:$28 sps:$4 sm:$0xff]  }
  0xd0   : > { %868 = vmatprep.mubr.bf16.mxu0 %v23387_v0  ;;  %921 = vmatprep.mubr.bf16.mxu1 %v23387_v0  ;;  %v20557_v2 = vld [vmem:[#allocation2 + $0xc] ss:$28 sps:$4 sm:$0xff]   ;;  %s28603_s0 = sld [smem:[#allocation27_spill]]  ;;  %v20559_v3 = vld [vmem:[#allocation2] ss:$28 sps:$4 sm:$0xff]   ;;  %vm814_vm0 = vcmask 1046528  }
  0xd1   : > { %s678_s19 = scalar_select %p677_p11, %s23512_s1, 1  ;;  %836 = vmatprep.subr.bf16.mxu0 %v20555_v1  ;;  %v20560_v4 = vld [vmem:[#allocation2 + $0x8] ss:$28 sps:$4 sm:$0xff]   ;;  %889 = vmatprep.subr.bf16.mxu1 %v20557_v2  ;;  %v20561_v5 = vld [vmem:[#allocation2 + $0x3c] ss:$28 sps:$4 sm:$0x7f]  }
  0xd2   : > { %837 = vmatpush1.bf16.msra.mxu0 %v20559_v3  ;;  %890 = vmatpush1.bf16.msra.mxu1 %v20560_v4  ;;  %v20563_v6 = vld [vmem:[#allocation2 + $0x44] ss:$28 sps:$4 sm:$0x7f]   ;;  %v20565_v8 = vld [vmem:[#allocation2 + $0x38] ss:$28 sps:$4 sm:$0x7f]  }
  0xd3   : > { %s19769_s27 = sshll.u32 %s678_s19, 5  ;;  %17374 = vmatprep.subr.msk.bf16.mxu0 %vm814_vm0, %v20561_v5  ;;  %v20566_v9 = vld [vmem:[#allocation2 + $0x40] ss:$28 sps:$4 sm:$0x7f]   ;;  %17377 = vmatprep.subr.msk.bf16.mxu1 %vm814_vm0, %v20563_v6  ;;  %v816_v11 = vsel %vm814_vm0, %v20565_v8, 0  ;;  %vm807_vm1 = vcmask 244736  }
  0xd4   : > { %v822_v12 = vsel %vm814_vm0, %v20566_v9, 0  ;;  %v20569_v14 = vld [vmem:[#allocation2 + $0x14] ss:$28 sps:$4 sm:$0xff]   ;;  %v20571_v19 = vld [vmem:[#allocation2 + $0x4c] ss:$28 sps:$4 sm:$0x7f]  }
  0xd5   : > { %v20567_v15 = vld [vmem:[#allocation2 + $0x10] ss:$28 sps:$4 sm:$0xff]   ;;  %v20570_v16 = vld [vmem:[#allocation2 + $0x18] ss:$28 sps:$4 sm:$0xff]   ;;  %v20587_v37 = vld [vmem:[#allocation2 + $0x88] ss:$28 sps:$4 sm:$0xff]  }
  0xd6   : > { %s23708_s29 = scalar_lea.vmem %s28603_s0, %s19769_s27  ;;  %839 = vmatpush1.bf16.msra.mxu0 %v816_v11  ;;  %892 = vmatpush1.bf16.msra.mxu1 %v822_v12  ;;  %v20573_v20 = vld [vmem:[#allocation2 + $0x50] ss:$28 sps:$4 sm:$0x7f]   ;;  %v20574_v21 = vld [vmem:[#allocation2 + $0x48] ss:$28 sps:$4 sm:$0x7f]   ;;  %v685_v11 = vlaneseq }
  0xd7   : > { %v720_v7 = vld [vmem:[%s23708_s29] sm:$0xff]  ;;  %v721_v10 = vld [vmem:[%s23708_s29 + $0x8] sm:$0xff]  ;;  %942 = vmatprep.subr.bf16.mxu0 %v20569_v14  ;;  %v722_v17 = vld [vmem:[%s23708_s29 + $0x10] sm:$0xff]  ;;  %20087 = vmatprep.subr.bf16.mxu1 %v20570_v16  ;;  %v828_v22 = vsel %vm814_vm0, %v20574_v21, 0  ;;  %v834_v24 = vsel %vm814_vm0, %v20573_v20, 0  ;;  %vm23389_vm2 = vmmov 0  }
  0xd8   : > { %v724_v13 = vpack.c.bf16 %v721_v10, %v720_v7  ;;  %v723_v18 = vld [vmem:[%s23708_s29 + $0x18] sm:$0xf]  ;;  %v20580_v25 = vld [vmem:[#allocation2 + $0x74] ss:$28 sps:$4 sm:$0xff]   ;;  %v1072_v33 = vld [vmem:[%s23708_s29 + $0x1] sm:$0xff]  ;;  %v23388_v10 = vmov 0.0  }
  0xd9   : > { %v725_v23 = vpack.c.bf16 %v723_v18, %v722_v17  ;;  %v20577_v26 = vld [vmem:[#allocation2 + $0x7c] ss:$28 sps:$4 sm:$0xff]   ;;  %v20578_v28 = vld [vmem:[#allocation2 + $0x70] ss:$28 sps:$4 sm:$0xff]   ;;  %v20590_v38 = vld [vmem:[#allocation2 + $0x84] ss:$28 sps:$4 sm:$0xff]  }
  0xda   : > { %17375 = vmatmul.mubr.msk.bf16.vlgmr.msra.gmra.mrb[0].mxu0 %vm807_vm1, %v724_v13  ;;  %17378 = vmatmul.mubr.msk.bf16.vlgmr.msra.gmra.mrb[0].mxu1 %vm807_vm1, %v724_v13  ;;  %v20575_v27 = vld [vmem:[#allocation2 + $0x78] ss:$28 sps:$4 sm:$0xff]   ;;  %v20583_v30 = vld [vmem:[#allocation2 + $0xb0] ss:$28 sps:$4 sm:$0x7f]   ;;  %v1423_v54 = vld [vmem:[%s23708_s29 + $0x2] sm:$0xff] }
  0xdb   : > { %943 = vmatpush1.bf16.msra.mxu0 %v20567_v15  ;;  %878 = vmatprep.mubr.bf16.mxu0 %v23387_v0  ;;  %v20581_v29 = vld [vmem:[#allocation2 + $0xb4] ss:$28 sps:$4 sm:$0x7f]   ;;  %v20586_v31 = vld [vmem:[#allocation2 + $0xa8] ss:$28 sps:$4 sm:$0x7f]  }
  0xdc   : > { %931 = vmatprep.mubr.bf16.mxu1 %v23387_v0  ;;  %20088 = vmatpush3.bf16.msra.mxu1 %v20570_v16  ;;  %v20584_v32 = vld [vmem:[#allocation2 + $0xac] ss:$28 sps:$4 sm:$0x7f]   ;;  %v1173_v35 = vsel %vm814_vm0, %v20583_v30, 0  ;;  %v1167_v36 = vsel %vm814_vm0, %v20586_v31, 0  ;;  %v1074_v41 = vld [vmem:[%s23708_s29 + $0x11] sm:$0xff] }
  0xdd   : > { %17380 = vmatprep.subr.msk.bf16.mxu0 %vm814_vm0, %v20571_v19  ;;  %20443 = vmatprep.subr.msk.bf16.mxu1 %vm814_vm0, %v20573_v20  ;;  %v1073_v34 = vld [vmem:[%s23708_s29 + $0x9] sm:$0xff]  ;;  %v20591_v40 = vld [vmem:[#allocation2 + $0xc0] ss:$28 sps:$4 sm:$0x7f]   ;;  %v20604_v56 = vld [vmem:[#allocation2 + $0xf8] ss:$28 sps:$4 sm:$0xff]  }
  0xde   : > { %v1076_v39 = vpack.c.bf16 %v1073_v34, %v1072_v33  ;;  %v1075_v42 = vld [vmem:[%s23708_s29 + $0x19] sm:$0xf]  ;;  %v20594_v43 = vld [vmem:[#allocation2 + $0xec] ss:$28 sps:$4 sm:$0xff]   ;;  %v1185_v45 = vsel %vm814_vm0, %v20591_v40, 0  ;;  %v23790_v12 = vshrl.u32 %v685_v11, 7 }
  0xdf   : > { %945 = vmatpush1.bf16.msra.mxu0 %v828_v22  ;;  %v20588_v44 = vld [vmem:[#allocation2 + $0x80] ss:$28 sps:$4 sm:$0xff]   ;;  %v1077_v46 = vpack.c.bf16 %v1075_v42, %v1074_v41  ;;  %v20599_v48 = vld [vmem:[#allocation2 + $0xb8] ss:$28 sps:$4 sm:$0x7f]   ;;  %v1424_v55 = vld [vmem:[%s23708_s29 + $0xa] sm:$0xff] }
  0xe0   : > { %1187 = vmatprep.subr.bf16.mxu0 %v20580_v25  ;;  %20090 = vmatpush3.bf16.msra.mxu1 %v834_v24  ;;  %v20595_v47 = vld [vmem:[#allocation2 + $0xbc] ss:$28 sps:$4 sm:$0x7f]   ;;  %v20603_v49 = vld [vmem:[#allocation2 + $0xe4] ss:$28 sps:$4 sm:$0xff]   ;;  %v1179_v50 = vsel %vm814_vm0, %v20599_v48, 0  ;;  %v1427_v59 = vpack.c.bf16 %v1424_v55, %v1423_v54 }
  0xe1   : > { %1240 = vmatprep.subr.bf16.mxu1 %v20577_v26  ;;  %v20592_v51 = vld [vmem:[#allocation2 + $0xe8] ss:$28 sps:$4 sm:$0xff]   ;;  %v20600_v53 = vld [vmem:[#allocation2 + $0x120] ss:$28 sps:$4 sm:$0x7f]   ;;  %v1425_v63 = vld [vmem:[%s23708_s29 + $0x12] sm:$0xff] }
  0xe2   : > { %17376 = vmatmul.mubr.msk.bf16.gmra.mrb[4].mxu0 %vm807_vm1, %v725_v23  ;;  %17379 = vmatmul.mubr.msk.bf16.gmra.mrb[4].mxu1 %vm807_vm1, %v725_v23  ;;  %v20597_v52 = vld [vmem:[#allocation2 + $0x124] ss:$28 sps:$4 sm:$0x7f]   ;;  %v1524_v57 = vsel %vm814_vm0, %v20600_v53, 0  ;;  %v1426_v1 = vld [vmem:[%s23708_s29 + $0x1a] sm:$0xf] }
  0xe3   : > { %974 = vmatprep.mubr.bf16.mxu0 %v23387_v0  ;;  %20091 = vmatprep.mubr.msk.bf16.mxu1 %vm807_vm1, %v724_v13  ;;  %v20601_v58 = vld [vmem:[#allocation2 + $0xe0] ss:$28 sps:$4 sm:$0xff]   ;;  %v20608_v60 = vld [vmem:[#allocation2 + $0x118] ss:$28 sps:$4 sm:$0x7f]   ;;  %v1428_v5 = vpack.c.bf16 %v1426_v1, %v1425_v63  ;;  %s28604_s6 = sld [smem:[#allocation29_spill]] }
  0xe4   : > { %v20605_v61 = vld [vmem:[#allocation2 + $0x11c] ss:$28 sps:$4 sm:$0x7f]   ;;  %v20607_v62 = vld [vmem:[#allocation2 + $0x130] ss:$28 sps:$4 sm:$0x7f]  }
  0xe5   : > { %v20611_v2 = vld [vmem:[#allocation2 + $0xf4] ss:$28 sps:$4 sm:$0xff]   ;;  %v1518_v3 = vsel %vm814_vm0, %v20608_v60, 0  ;;  %v1536_v4 = vsel %vm814_vm0, %v20607_v62, 0  ;;  %v695_v14 = vsub.s32 2, %v23790_v12  ;;  %v699_v15 = vsub.s32 3, %v23790_v12 }
  0xe6   : > { %v20609_v6 = vld [vmem:[#allocation2 + $0xf0] ss:$28 sps:$4 sm:$0xff]   ;;  %v20614_v8 = vld [vmem:[#allocation2 + $0x128] ss:$28 sps:$4 sm:$0x7f]   ;;  %v687_v33 = vsub.s32 0, %v23790_v12 }
  0xe7   : > { %v20612_v7 = vld [vmem:[#allocation2 + $0x12c] ss:$28 sps:$4 sm:$0x7f]   ;;  %v1530_v9 = vsel %vm814_vm0, %v20614_v8, 0  ;;  %s28605_s17 = sld [smem:[#allocation30_spill]]  ;;  %vm1827_vm3 = vcmask 1045504  }
  0xe8   : > { %vm1823_vm4 = vcmask 228352   ;;  %vm7415_vm5 = vcmask 113664   ;;  %vm15113_vm6 = vcmask 523264   ;;  %s28606_s11 = sld [smem:[#allocation34_spill]]  ;;  %s28607_s0 = sld [smem:[#allocation33_spill]]  ;;  %vm17212_vm7 = vcmask 73728  }
  0xe9   : > { %s28608_s29 = sld [smem:[#allocation20_spill]]  ;;  %s28609_s28 = sld [smem:[#allocation35_spill]] }
  0xea   : > { %17381 = vmatmul.mubr.msk.bf16.vlgmr.msra.gmra.mrb[8].mxu0 %vm807_vm1, %v724_v13  ;;  %20092 = vmatmul.mubr.msk.bf16.vlgmr.msra.gmra.mrb[8].mxu1 %vm807_vm1, %v725_v23  ;;  %v23795_v13 = vld [vmem:[%s28604_s6] sm:$0xff]  ;;  %s28610_s3 = sld [smem:[#allocation25_spill]]  ;;  %s19766_s26 = sshll.u32 %s23512_s1, 4 }
  0xeb   : > { %1241 = vmatpush1.bf16.msra.mxu1 %v20575_v27  ;;  %1188 = vmatpush1.bf16.msra.mxu0 %v20578_v28  ;;  %v696_v16 = vrot.slane %v23795_v13, %v695_v14  ;;  %v700_v17 = vrot.slane %v23795_v13, %v699_v15  ;;  %s28611_s22 = sld [smem:[#allocation36_spill]] }
  0xec   : > { %17402 = vmatprep.subr.msk.bf16.mxu1 %vm814_vm0, %v20581_v29  ;;  %984 = vmatprep.mubr.bf16.mxu0 %v23387_v0 }
  0xed   : > { %1272 = vmatprep.mubr.bf16.mxu1 %v23387_v0  ;;  %17399 = vmatprep.subr.msk.bf16.mxu0 %vm814_vm0, %v20584_v32 }
  0xef   : > { %1243 = vmatpush1.bf16.msra.mxu1 %v1173_v35  ;;  %1190 = vmatpush1.bf16.msra.mxu0 %v1167_v36  ;;  %v711_v36 = vsub.s32 6, %v23790_v12 }
  0xf0   : > { %20095 = vmatprep.subr.bf16.mxu1 %v20587_v37  ;;  %1293 = vmatprep.subr.bf16.mxu0 %v20590_v38  ;;  %p28612_p1 = scmp.ne.s32.totalorder %s28610_s3, 0 }
  0xf1   : > { %s28490_s21 = scalar_lea.hbm %s28611_s22, %s19766_s26 }
  0xf2   : > { %17382 = vmatmul.mubr.msk.bf16.gmra.mrb[12].mxu0 %vm807_vm1, %v725_v23  ;;  %17403 = vmatmul.mubr.msk.bf16.vlgmr.msra.gmra.mrb[0].mxu1 %vm807_vm1, %v1076_v39 }
  0xf3   : > { %1219 = vmatprep.mubr.bf16.mxu0 %v23387_v0  ;;  %1282 = vmatprep.mubr.bf16.mxu1 %v23387_v0 }
  0xf4   : > { %20096 = vmatpush3.bf16.msra.mxu1 %v20587_v37 }
  0xf5   : > { %20444 = vmatprep.subr.msk.bf16.mxu1 %vm814_vm0, %v20591_v40 }
  0xf8   : > { %20098 = vmatpush3.bf16.msra.mxu1 %v1185_v45  ;;  %v688_v45 = vrot.slane %v23795_v13, %v687_v33 }
  0xf9   : > { %1591 = vmatprep.subr.bf16.mxu1 %v20594_v43 }
  0xfa   : > { %17400 = vmatmul.mubr.msk.bf16.vlgmr.msra.gmra.mrb[0].mxu0 %vm807_vm1, %v1076_v39  ;;  %17404 = vmatmul.mubr.msk.bf16.gmra.mrb[4].mxu1 %vm807_vm1, %v1077_v46 }
  0xfb   : > { %1294 = vmatpush1.bf16.msra.mxu0 %v20588_v44  ;;  %1229 = vmatprep.mubr.bf16.mxu0 %v23387_v0 }
  0xfc   : > { %20099 = vmatprep.mubr.msk.bf16.mxu1 %vm807_vm1, %v1076_v39  ;;  %17405 = vmatprep.subr.msk.bf16.mxu0 %vm814_vm0, %v20595_v47 }
  0xff   : > { %1296 = vmatpush1.bf16.msra.mxu0 %v1179_v50 }
 0x100   : > { %1538 = vmatprep.subr.bf16.mxu0 %v20603_v49 }
 0x102   : > { %17401 = vmatmul.mubr.msk.bf16.gmra.mrb[4].mxu0 %vm807_vm1, %v1077_v46  ;;  %20100 = vmatmul.mubr.msk.bf16.vlgmr.msra.gmra.mrb[8].mxu1 %vm807_vm1, %v1077_v46 }
 0x103   : > { %1592 = vmatpush1.bf16.msra.mxu1 %v20592_v51  ;;  %1325 = vmatprep.mubr.bf16.mxu0 %v23387_v0 }
 0x104   : > { %17427 = vmatprep.subr.msk.bf16.mxu1 %vm814_vm0, %v20597_v52  ;;  %1623 = vmatprep.mubr.bf16.mxu1 %v23387_v0 }
 0x107   : > { %1594 = vmatpush1.bf16.msra.mxu1 %v1524_v57 }
 0x108   : > { %20103 = vmatprep.subr.bf16.mxu1 %v20604_v56 }
 0x10a   : > { %17406 = vmatmul.mubr.msk.bf16.vlgmr.msra.gmra.mrb[8].mxu0 %vm807_vm1, %v1076_v39  ;;  %17428 = vmatmul.mubr.msk.bf16.vlgmr.msra.gmra.mrb[0].mxu1 %vm807_vm1, %v1427_v59  ;;  %v691_v39 = vsub.s32 1, %v23790_v12 }
 0x10b   : > { %1539 = vmatpush1.bf16.msra.mxu0 %v20601_v58  ;;  %1335 = vmatprep.mubr.bf16.mxu0 %v23387_v0 }
 0x10c   : > { %1633 = vmatprep.mubr.bf16.mxu1 %v23387_v0  ;;  %20104 = vmatpush3.bf16.msra.mxu1 %v20604_v56  ;;  %v692_v49 = vrot.slane %v23795_v13, %v691_v39 }
 0x10d   : > { %17424 = vmatprep.subr.msk.bf16.mxu0 %vm814_vm0, %v20605_v61  ;;  %20445 = vmatprep.subr.msk.bf16.mxu1 %vm814_vm0, %v20607_v62 }
 0x10f   : > { %1541 = vmatpush1.bf16.msra.mxu0 %v1518_v3 }
 0x110   : > { %20106 = vmatpush3.bf16.msra.mxu1 %v1536_v4  ;;  %1644 = vmatprep.subr.bf16.mxu0 %v20611_v2 }
 0x112   : > { %17407 = vmatmul.mubr.msk.bf16.gmra.mrb[12].mxu0 %vm807_vm1, %v1077_v46  ;;  %17429 = vmatmul.mubr.msk.bf16.gmra.mrb[4].mxu1 %vm807_vm1, %v1428_v5  ;;  %v712_v46 = vrot.slane %v23795_v13, %v711_v36 }
 0x113   : > { %1570 = vmatprep.mubr.bf16.mxu0 %v23387_v0  ;;  %20107 = vmatprep.mubr.msk.bf16.mxu1 %vm807_vm1, %v1427_v59 }
 0x11a   : > { %17425 = vmatmul.mubr.msk.bf16.vlgmr.msra.gmra.mrb[0].mxu0 %vm807_vm1, %v1427_v59  ;;  %20108 = vmatmul.mubr.msk.bf16.vlgmr.msra.gmra.mrb[8].mxu1 %vm807_vm1, %v1428_v5 }
 0x11b   : > { %1645 = vmatpush1.bf16.msra.mxu0 %v20609_v6  ;;  %1580 = vmatprep.mubr.bf16.mxu0 %v23387_v0 }
 0x11c   : > { %17430 = vmatprep.subr.msk.bf16.mxu0 %vm814_vm0, %v20612_v7  ;;  %1881 = vmatprep.mubr.bf16.mxu1 %v23387_v0 }
 0x11f   : > { %1647 = vmatpush1.bf16.msra.mxu0 %v1530_v9 }
 0x120   : > { %20111 = vmatprep.subr.bf16.mxu0 %v23388_v10 }
 0x122   : > { %17426 = vmatmul.mubr.msk.bf16.gmra.mrb[4].mxu0 %vm807_vm1, %v1428_v5 }
 0x123   : > { %1676 = vmatprep.mubr.bf16.mxu0 %v23387_v0 }
 0x12a   : > { %17431 = vmatmul.mubr.msk.bf16.vlgmr.msra.gmra.mrb[8].mxu0 %vm807_vm1, %v1427_v59 }
 0x12b   : > { %1686 = vmatprep.mubr.bf16.mxu0 %v23387_v0 }
 0x132   : > { %17432 = vmatmul.mubr.msk.bf16.gmra.mrb[12].mxu0 %vm807_vm1, %v1428_v5 }
 0x133   : > { %20115 = vmatprep.mubr.msk.bf16.mxu0 %vm23389_vm2, %v23388_v10 }
 0x1dd   : > { %v1625_v18 = vpop.f32.mrb[0].mxu1 }
 0x1de   : > { %v20167_v19 = vadd.f32 %v1625_v18, %v696_v16  ;;  %v1627_v20 = vpop.f32.mrb[1].mxu1 }
 0x1df   : > { %v20168_v21 = vadd.f32 %v1627_v20, %v700_v17  ;;  %v1629_v22 = vpop.f32.mrb[2].mxu1 }
 0x1e0   : > { %v1776_v23 = vmax.f32 %v20167_v19, 0.0  ;;  %v20169_v24 = vadd.f32 %v1629_v22, %v696_v16  ;;  %v1631_v25 = vpop.f32.mrb[3].mxu1 }
 0x1e1   : > { %v1777_v26 = vmax.f32 %v20168_v21, 0.0  ;;  %v20170_v27 = vadd.f32 %v1631_v25, %v700_v17  ;;  %v703_v25 = vsub.s32 4, %v23790_v12 }
 0x1e2   : > { %v1783_v28 = vmax.f32 %v20169_v24, 0.0 }
 0x1e3   : > { %v1784_v29 = vmax.f32 %v20170_v27, 0.0 }
 0x1e4   : > { %v23805_v30 = vpack.c.bf16 %v1783_v28, %v1776_v23  ;;  %v707_v28 = vsub.s32 5, %v23790_v12 }
 0x1e5   : > { %v23807_v31 = vpack.c.bf16 %v1784_v29, %v1777_v26  ;;  %v1635_v32 = vpop.f32.mrb[4].mxu1 }
 0x1e6   : > { %v20171_v34 = vadd.f32 %v1635_v32, %v696_v16  ;;  %v1637_v35 = vpop.f32.mrb[5].mxu1 }
 0x1e7   : > { %v20172_v37 = vadd.f32 %v1637_v35, %v700_v17  ;;  %v1639_v38 = vpop.f32.mrb[6].mxu1 }
 0x1e8   : > { %v20173_v40 = vadd.f32 %v1639_v38, %v696_v16  ;;  %v1641_v41 = vpop.f32.mrb[7].mxu1  ;;  %v1790_v43 = vmax.f32 %v20171_v34, 0.0  ;;  %v23840_v34 = vld [vmem:[%s28605_s17] sm:$0x7f]   ;;  %s675_s17 = sand.u32 1, %s28608_s29   ;;  %s23390_s29 = smov [#allocation13]  }
 0x1e9   : > { %v20174_v42 = vadd.f32 %v1641_v41, %v700_v17  ;;  %v1791_v47 = vmax.f32 %v20172_v37, 0.0  ;;  %v704_v41 = vrot.slane %v23795_v13, %v703_v25  ;;  %s676_s23 = scalar_lea.vmem [#allocation13], %s675_s17  ;;  %s17215_s1 = scalar_lea.sflag [#allocation4], %s675_s17 }
 0x1ea   : > { %v1797_v44 = vmax.f32 %v20173_v40, 0.0  ;;  %s17227_s25 = sshll.u32 %s676_s23, 4  ;;  %s23299_s20 = sshll.u32 %s23390_s29, 4  ;;  %s28492_s25 = int_to_ptr.vmem [resolvable:$true] %s17227_s25  ;;  %s23300_s20 = int_to_ptr.vmem [resolvable:$false] %s23299_s20 }
 0x1eb   : > { %v1798_v48 = vmax.f32 %v20174_v42, 0.0  ;;  %s23301_s24 = scalar_lea.vmem %s23300_s20, 32  ;;  %p23302_p5 = scmp.lt.s32.totalorder %s28492_s25, %s23300_s20 }
 0x1ec   : > { %v23821_v50 = vpack.c.bf16 %v1797_v44, %v1790_v43  ;;  %v708_v44 = vrot.slane %v23795_v13, %v707_v28 }
 0x1ed   : > { %v23823_v51 = vpack.c.bf16 %v1798_v48, %v1791_v47  ;;  %v1572_v52 = vpop.f32.mrb[0].mxu0  ;;  %v20109_v53 = vpop.f32.mrb[8].mxu1 }
 0x1ee   : > { %v20159_v54 = vadd.f32 %v1572_v52, %v688_v45  ;;  %v20183_v55 = vadd.f32 %v20109_v53, %v712_v46  ;;  %v1574_v56 = vpop.f32.mrb[1].mxu0  ;;  %v1731_v57 = vpop.f32.mrb[9].mxu1 }
 0x1ef   : > { %v20160_v58 = vadd.f32 %v1574_v56, %v692_v49  ;;  %v20184_v59 = vadd.f32 %v1731_v57, %v712_v46  ;;  %v1576_v60 = vpop.f32.mrb[2].mxu0  ;;  %v20110_v61 = vpop.f32.mrb[10].mxu1  ;;  %v23866_v56 = vld [vmem:[%s28536_s4] sm:$0x7f]  }
 0x1f0   : > { %v20161_v62 = vadd.f32 %v1576_v60, %v688_v45  ;;  %v20185_v63 = vadd.f32 %v20110_v61, %v712_v46  ;;  %v1578_v1 = vpop.f32.mrb[3].mxu0  ;;  %v1734_v2 = vpop.f32.mrb[11].mxu1  ;;  %v1774_v3 = vmax.f32 %v20159_v54, 0.0  ;;  %v1794_v4 = vmax.f32 %v20183_v55, 0.0 }
 0x1f1   : > { %v20162_v5 = vadd.f32 %v1578_v1, %v692_v49  ;;  %v20186_v6 = vadd.f32 %v1734_v2, %v712_v46  ;;  %v1775_v7 = vmax.f32 %v20160_v58, 0.0  ;;  %v1780_v11 = vmax.f32 %v20184_v59, 0.0 }
 0x1f2   : > { %v1781_v8 = vmax.f32 %v20161_v62, 0.0  ;;  %v1801_v9 = vmax.f32 %v20185_v63, 0.0  ;;  %v1835_v60 = vsel %vm1827_vm3, %v23821_v50, 0 }
 0x1f3   : > { %v1782_v16 = vmax.f32 %v20162_v5, 0.0  ;;  %v1787_v17 = vmax.f32 %v20186_v6, 0.0 }
 0x1f4   : > { %v23825_v18 = vpack.c.bf16 %v1781_v8, %v1774_v3  ;;  %v1815_v19 = vpack.c.bf16 %v1801_v9, %v1794_v4 }
 0x1f5   : > { %v23827_v20 = vpack.c.bf16 %v1782_v16, %v1775_v7  ;;  %v23829_v21 = vpack.c.bf16 %v1787_v17, %v1780_v11  ;;  %v1582_v22 = vpop.f32.mrb[4].mxu0  ;;  %v20617_v7 = vld [vmem:[%s28537_s5 + $0x208] ss:$16 sps:$4 sm:$0xff]   ;;  %v20622_v11 = vld [vmem:[%s28537_s5 + $0x22c] ss:$16 sps:$4 sm:$0xff]  }
 0x1f6   : > { %v20163_v23 = vadd.f32 %v1582_v22, %v688_v45  ;;  %v1584_v24 = vpop.f32.mrb[5].mxu0  ;;  %v1847_v40 = vsel %vm1827_vm3, %v1815_v19, 0  ;;  %v20620_v22 = vld [vmem:[%s28537_s5 + $0x228] ss:$16 sps:$4 sm:$0xff]  }
 0x1f7   : > { %v20164_v26 = vadd.f32 %v1584_v24, %v692_v49  ;;  %v1586_v27 = vpop.f32.mrb[6].mxu0  ;;  %1849 = vmatprep.subr.bf16.mxu1 %v23827_v20  ;;  %20112 = vmatpush3.bf16.msra.mxu0 %v23829_v21  ;;  %v20625_v24 = vld [vmem:[%s28537_s5 + $0x24c] ss:$16 sps:$4 sm:$0xff]  }
 0x1f8   : > { %v20165_v29 = vadd.f32 %v1586_v27, %v688_v45  ;;  %v1588_v32 = vpop.f32.mrb[7].mxu0  ;;  %1850 = vmatpush1.bf16.msra.mxu1 %v23825_v18  ;;  %20113 = vmatprep.subr.bf16.mxu0 %v23388_v10  ;;  %v1788_v37 = vmax.f32 %v20163_v23, 0.0  ;;  %v20628_v27 = vld [vmem:[%s28537_s5 + $0x26c] ss:$16 sps:$4 sm:$0xff]  }
 0x1f9   : > { %v20166_v35 = vadd.f32 %v1588_v32, %v692_v49  ;;  %v1789_v42 = vmax.f32 %v20164_v26, 0.0  ;;  %v20623_v26 = vld [vmem:[%s28537_s5 + $0x248] ss:$16 sps:$4 sm:$0xff]   ;;  %v20640_v32 = vld [vmem:[%s28537_s5 + $0x2ac] ss:$16 sps:$4 sm:$0xff]  }
 0x1fa   : > { %v1795_v38 = vmax.f32 %v20165_v29, 0.0  ;;  %v20634_v29 = vld [vmem:[%s28537_s5 + $0x28c] ss:$16 sps:$4 sm:$0xff]  }
 0x1fb   : > { %v1796_v43 = vmax.f32 %v20166_v35, 0.0  ;;  %20114 = vmatpush3.bf16.msra.mxu0 %v1847_v40  ;;  %v20638_v35 = vld [vmem:[%s28537_s5 + $0x2a8] ss:$16 sps:$4 sm:$0xff]  }
 0x1fc   : > { %v1809_v45 = vpack.c.bf16 %v1795_v38, %v1788_v37  ;;  %2072 = vmatprep.subr.bf16.mxu0 %v23807_v31  ;;  %v20629_v37 = vld [vmem:[%s28537_s5] ss:$16 sps:$4 sm:$0xff]   ;;  %v20646_v38 = vld [vmem:[%s28537_s5 + $0x2cc] ss:$16 sps:$4 sm:$0xff]  }
 0x1fd   : > { %v23850_v46 = vpack.c.bf16 %v1796_v43, %v1789_v42  ;;  %v1678_v47 = vpop.f32.mrb[8].mxu0  ;;  %v20635_v42 = vld [vmem:[%s28537_s5 + $0x20] ss:$16 sps:$4 sm:$0xff]   ;;  %v20652_v43 = vld [vmem:[%s28537_s5 + $0x2ec] ss:$16 sps:$4 sm:$0xff]  }
 0x1fe   : > { %v20175_v48 = vadd.f32 %v1678_v47, %v704_v41  ;;  %v1680_v49 = vpop.f32.mrb[9].mxu0  ;;  %20116 = vmatmul.mubr.msk.bf16.vlgmr.msra.gmra.mrb[16].mxu0 %vm1823_vm4, %v23840_v34  ;;  %v23855_v52 = vsel %vm1827_vm3, %v1809_v45, 0  ;;  %v20650_v45 = vld [vmem:[%s28537_s5 + $0x2e8] ss:$16 sps:$4 sm:$0xff]   ;;  %v20658_v47 = vld [vmem:[%s28537_s5 + $0x30c] ss:$16 sps:$4 sm:$0xff]  }
 0x1ff   : > { %v20176_v53 = vadd.f32 %v1680_v49, %v708_v44  ;;  %v1682_v54 = vpop.f32.mrb[10].mxu0  ;;  %17436 = vmatprep.subr.msk.bf16.mxu1 %vm1827_vm3, %v23850_v46  ;;  %2073 = vmatpush1.bf16.msra.mxu0 %v23805_v30  ;;  %v20656_v49 = vld [vmem:[%s28537_s5 + $0x308] ss:$16 sps:$4 sm:$0xff]  }
 0x200   : > { %v20177_v13 = vadd.f32 %v1682_v54, %v704_v41  ;;  %v1684_v55 = vpop.f32.mrb[11].mxu0  ;;  %1852 = vmatpush1.bf16.msra.mxu1 %v23855_v52  ;;  %17446 = vmatprep.subr.msk.bf16.mxu0 %vm1827_vm3, %v23823_v51  ;;  %v1778_v58 = vmax.f32 %v20175_v48, 0.0  ;;  %v20649_v48 = vld [vmem:[%s28537_s5 + $0x64] ss:$16 sps:$4 sm:$0xff]  }
 0x201   : > { %v20178_v57 = vadd.f32 %v1684_v55, %v708_v44  ;;  %1892 = vmatprep.subr.bf16.mxu1 %v23807_v31  ;;  %2104 = vmatprep.mubr.bf16.mxu0 %v23387_v0  ;;  %v1779_v61 = vmax.f32 %v20176_v53, 0.0  ;;  %v20664_v53 = vld [vmem:[%s28537_s5 + $0x32c] ss:$16 sps:$4 sm:$0xff]   ;;  %v20655_v54 = vld [vmem:[%s28537_s5 + $0x84] ss:$16 sps:$4 sm:$0xff]  }
 0x202   : > { %v1785_v59 = vmax.f32 %v20177_v13, 0.0  ;;  %v20662_v13 = vld [vmem:[%s28537_s5 + $0x328] ss:$16 sps:$4 sm:$0xff]   ;;  %v20653_v55 = vld [vmem:[%s28537_s5 + $0x80] ss:$16 sps:$4 sm:$0xff]  }
 0x203   : > { %v1786_v62 = vmax.f32 %v20178_v57, 0.0  ;;  %17437 = vmatmul.mubr.msk.bf16.vlgmr.msra.gmra.mrb[12].mxu1 %vm1823_vm4, %v23840_v34  ;;  %2075 = vmatpush1.bf16.msra.mxu0 %v1835_v60  ;;  %v20661_v57 = vld [vmem:[%s28537_s5 + $0xa4] ss:$16 sps:$4 sm:$0xff]  }
 0x204   : > { %v1806_v63 = vpack.c.bf16 %v1785_v59, %v1778_v58  ;;  %1893 = vmatpush1.bf16.msra.mxu1 %v23805_v30  ;;  %20119 = vmatprep.subr.bf16.mxu0 %v23388_v10  ;;  %v20619_v30 = vld [vmem:[%s28537_s5 + $0x20c] ss:$16 sps:$4 sm:$0xff]   ;;  %v20668_v58 = vld [vmem:[%s28537_s5 + $0x348] ss:$16 sps:$4 sm:$0xff]   ;;  %v20659_v59 = vld [vmem:[%s28537_s5 + $0xa0] ss:$16 sps:$4 sm:$0xff]  }
 0x205   : > { %v1807_v1 = vpack.c.bf16 %v1786_v62, %v1779_v61  ;;  %v1688_v31 = vpop.f32.mrb[12].mxu0  ;;  %17438 = vmatprep.subr.msk.bf16.mxu1 %vm1827_vm3, %v23823_v51  ;;  %1924 = vmatprep.mubr.bf16.mxu1 %v23387_v0  ;;  %v20667_v61 = vld [vmem:[%s28537_s5 + $0xc4] ss:$16 sps:$4 sm:$0xff]   ;;  %v20674_v62 = vld [vmem:[%s28537_s5 + $0x368] ss:$16 sps:$4 sm:$0xff]  }
 0x206   : > { %v20179_v2 = vadd.f32 %v1688_v31, %v704_v41  ;;  %v1690_v50 = vpop.f32.mrb[13].mxu0  ;;  %17447 = vmatmul.mubr.msk.bf16.vlgmr.msra.gmra.mrb[20].mxu0 %vm1823_vm4, %v23866_v56  ;;  %v20671_v31 = vld [vmem:[%s28537_s5 + $0xe0] ss:$16 sps:$4 sm:$0xff]  }
 0x207   : > { %v20180_v3 = vadd.f32 %v1690_v50, %v708_v44  ;;  %v1692_v4 = vpop.f32.mrb[14].mxu0  ;;  %20120 = vmatpush3.bf16.msra.mxu0 %v23829_v21  ;;  %20123 = vmatprep.mubr.msk.bf16.mxu0 %vm23389_vm2, %v23388_v10  ;;  %v20682_v50 = vld [vmem:[%s28537_s5 + $0x38c] ss:$16 sps:$4 sm:$0xff]  }
 0x208   : > { %v20181_v5 = vadd.f32 %v1692_v4, %v704_v41  ;;  %v1694_v51 = vpop.f32.mrb[15].mxu0  ;;  %1895 = vmatpush1.bf16.msra.mxu1 %v1835_v60  ;;  %20121 = vmatprep.subr.bf16.mxu0 %v23388_v10  ;;  %v1792_v8 = vmax.f32 %v20179_v2, 0.0  ;;  %v20644_v41 = vld [vmem:[%s28537_s5 + $0x2c8] ss:$16 sps:$4 sm:$0xff]   ;;  %v20676_v60 = vld [vmem:[%s28537_s5 + $0x36c] ss:$16 sps:$4 sm:$0xff]  }
 0x209   : > { %v20182_v6 = vadd.f32 %v1694_v51, %v708_v44  ;;  %1935 = vmatprep.subr.bf16.mxu1 %v1807_v1  ;;  %v1793_v16 = vmax.f32 %v20180_v3, 0.0  ;;  %v20643_v44 = vld [vmem:[%s28537_s5 + $0x44] ss:$16 sps:$4 sm:$0xff]   ;;  %v20677_v3 = vld [vmem:[%s28537_s5 + $0x100] ss:$16 sps:$4 sm:$0xff]  }
 0x20a   : > { %v1799_v9 = vmax.f32 %v20181_v5, 0.0  ;;  %v20679_v2 = vld [vmem:[%s28537_s5 + $0x104] ss:$16 sps:$4 sm:$0xff]   ;;  %v20680_v4 = vld [vmem:[%s28537_s5 + $0x388] ss:$16 sps:$4 sm:$0xff]  }
 0x20b   : > { %v1800_v17 = vmax.f32 %v20182_v6, 0.0  ;;  %17439 = vmatmul.mubr.msk.bf16.vlgmr.msra.gmra.mrb[16].mxu1 %vm1823_vm4, %v23840_v34  ;;  %20122 = vmatpush3.bf16.msra.mxu0 %v1847_v40  ;;  %v20637_v40 = vld [vmem:[%s28537_s5 + $0x24] ss:$16 sps:$4 sm:$0xff]   ;;  %v20688_v5 = vld [vmem:[%s28537_s5 + $0x3ac] ss:$16 sps:$4 sm:$0xff]  }
 0x20c   : > { %v1813_v19 = vpack.c.bf16 %v1799_v9, %v1792_v8  ;;  %1936 = vmatpush1.bf16.msra.mxu1 %v1806_v63  ;;  %1967 = vmatprep.mubr.bf16.mxu1 %v23387_v0  ;;  %v20683_v51 = vld [vmem:[%s28537_s5 + $0x120] ss:$16 sps:$4 sm:$0xff]   ;;  %v20686_v6 = vld [vmem:[%s28537_s5 + $0x3a8] ss:$16 sps:$4 sm:$0xff]   ;;  %v20694_v8 = vld [vmem:[%s28537_s5 + $0x3cc] ss:$16 sps:$4 sm:$0xff]  }
 0x20d   : > { %v1814_v21 = vpack.c.bf16 %v1800_v17, %v1793_v16  ;;  %3779 = vmatprep.subr.bf16.mxu0 %v20619_v30  ;;  %v20685_v30 = vld [vmem:[%s28537_s5 + $0x124] ss:$16 sps:$4 sm:$0xff]   ;;  %v20689_v9 = vld [vmem:[%s28537_s5 + $0x140] ss:$16 sps:$4 sm:$0xff]   ;;  %v20700_v17 = vld [vmem:[%s28537_s5 + $0x3ec] ss:$16 sps:$4 sm:$0xff]  }
 0x20e   : > { %v1841_v23 = vsel %vm1827_vm3, %v1813_v19, 0  ;;  %20124 = vmatmul.mubr.msk.bf16.vlgmr.msra.gmra.mrb[24].mxu0 %vm1823_vm4, %v23866_v56  ;;  %v20697_v16 = vld [vmem:[%s28537_s5 + $0x164] ss:$16 sps:$4 sm:$0xff]   ;;  %v20695_v19 = vld [vmem:[%s28537_s5 + $0x160] ss:$16 sps:$4 sm:$0xff]  }
 0x20f   : > { %17440 = vmatprep.subr.msk.bf16.mxu1 %vm1827_vm3, %v1814_v21  ;;  %3780 = vmatpush1.bf16.msra.mxu0 %v20617_v7  ;;  %v20691_v7 = vld [vmem:[%s28537_s5 + $0x144] ss:$16 sps:$4 sm:$0xff]  }
 0x210   : > { %1938 = vmatpush1.bf16.msra.mxu1 %v1841_v23  ;;  %3781 = vmatprep.subr.bf16.mxu0 %v20622_v11  ;;  %v20692_v11 = vld [vmem:[%s28537_s5 + $0x3c8] ss:$16 sps:$4 sm:$0xff]  }
 0x211   : > { %2029 = vmatprep.subr.bf16.mxu1 %v23827_v20  ;;  %v20626_v20 = vld [vmem:[%s28537_s5 + $0x268] ss:$16 sps:$4 sm:$0xff]  }
 0x213   : > { %17441 = vmatmul.mubr.msk.bf16.vlgmr.msra.gmra.mrb[20].mxu1 %vm1823_vm4, %v23840_v34  ;;  %3782 = vmatpush1.bf16.msra.mxu0 %v20620_v22  ;;  %v20631_v34 = vld [vmem:[%s28537_s5 + $0x4] ss:$16 sps:$4 sm:$0xff]  }
 0x214   : > { %2030 = vmatpush1.bf16.msra.mxu1 %v23825_v18  ;;  %2061 = vmatprep.mubr.bf16.mxu1 %v23387_v0  ;;  %v20632_v18 = vld [vmem:[%s28537_s5 + $0x288] ss:$16 sps:$4 sm:$0xff]   ;;  %v20703_v22 = vld [vmem:[%s28537_s5 + $0x184] ss:$16 sps:$4 sm:$0xff]  }
 0x215   : > { %17444 = vmatprep.subr.msk.bf16.mxu1 %vm1827_vm3, %v23850_v46  ;;  %3783 = vmatprep.subr.bf16.mxu0 %v20625_v24  ;;  %v20641_v46 = vld [vmem:[%s28537_s5 + $0x40] ss:$16 sps:$4 sm:$0xff]  }
 0x216   : > { %v20701_v24 = vld [vmem:[%s28537_s5 + $0x180] ss:$16 sps:$4 sm:$0xff]  }
 0x217   : > { %3784 = vmatpush1.bf16.msra.mxu0 %v20623_v26  ;;  %v20707_v26 = vld [vmem:[%s28537_s5 + $0x1a0] ss:$16 sps:$4 sm:$0xff]  }
 0x218   : > { %2032 = vmatpush1.bf16.msra.mxu1 %v23855_v52  ;;  %3785 = vmatprep.subr.bf16.mxu0 %v20628_v27  ;;  %v20647_v52 = vld [vmem:[%s28537_s5 + $0x60] ss:$16 sps:$4 sm:$0xff]   ;;  %v20709_v27 = vld [vmem:[%s28537_s5 + $0x1a4] ss:$16 sps:$4 sm:$0xff]  }
 0x219   : > { %2115 = vmatprep.subr.bf16.mxu1 %v1807_v1  ;;  %v20673_v1 = vld [vmem:[%s28537_s5 + $0xe4] ss:$16 sps:$4 sm:$0xff]  }
 0x21b   : > { %17445 = vmatmul.mubr.msk.bf16.vlgmr.msra.gmra.mrb[24].mxu1 %vm1823_vm4, %v23866_v56  ;;  %3786 = vmatpush1.bf16.msra.mxu0 %v20626_v20  ;;  %v20715_v20 = vld [vmem:[%s28537_s5 + $0x1c4] ss:$16 sps:$4 sm:$0xff]  }
 0x21c   : > { %2116 = vmatpush1.bf16.msra.mxu1 %v1806_v63  ;;  %2147 = vmatprep.mubr.bf16.mxu1 %v23387_v0  ;;  %v20665_v63 = vld [vmem:[%s28537_s5 + $0xc0] ss:$16 sps:$4 sm:$0xff]  }
 0x21d   : > { %17448 = vmatprep.subr.msk.bf16.mxu1 %vm1827_vm3, %v1814_v21  ;;  %3787 = vmatprep.subr.bf16.mxu0 %v20634_v29  ;;  %v20698_v21 = vld [vmem:[%s28537_s5 + $0x3e8] ss:$16 sps:$4 sm:$0xff]   ;;  %v20713_v29 = vld [vmem:[%s28537_s5 + $0x1c0] ss:$16 sps:$4 sm:$0xff]  }
 0x21f   : > { %3788 = vmatpush1.bf16.msra.mxu0 %v20632_v18  ;;  %v20721_v18 = vld [vmem:[%s28537_s5 + $0x1e4] ss:$16 sps:$4 sm:$0xff]  }
 0x220   : > { %2118 = vmatpush1.bf16.msra.mxu1 %v1841_v23  ;;  %3789 = vmatprep.subr.bf16.mxu0 %v20640_v32  ;;  %v20706_v23 = vld [vmem:[%s28537_s5 + $0x40c] ss:$16 sps:$4 sm:$0xff]   ;;  %v20719_v32 = vld [vmem:[%s28537_s5 + $0x1e0] ss:$16 sps:$4 sm:$0xff]  }
 0x221   : > { %3564 = vmatprep.subr.bf16.mxu1 %v20631_v34  ;;  %v20727_v34 = vld [vmem:[%s28537_s5 + $0x204] ss:$16 sps:$4 sm:$0xff]  }
 0x223   : > { %17449 = vmatmul.mubr.msk.bf16.vlgmr.msra.gmra.mrb[28].mxu1 %vm1823_vm4, %v23866_v56  ;;  %3790 = vmatpush1.bf16.msra.mxu0 %v20638_v35  ;;  %v20670_v56 = vld [vmem:[%s28537_s5 + $0x34c] ss:$16 sps:$4 sm:$0xff]  }
 0x224   : > { %3565 = vmatpush1.bf16.msra.mxu1 %v20629_v37  ;;  %3791 = vmatprep.subr.bf16.mxu0 %v20646_v38 }
 0x225   : > { %3566 = vmatprep.subr.bf16.mxu1 %v20637_v40 }
 0x227   : > { %3792 = vmatpush1.bf16.msra.mxu0 %v20644_v41 }
 0x228   : > { %3567 = vmatpush1.bf16.msra.mxu1 %v20635_v42  ;;  %3793 = vmatprep.subr.bf16.mxu0 %v20652_v43 }
 0x229   : > { %3568 = vmatprep.subr.bf16.mxu1 %v20643_v44 }
 0x22b   : > { %3794 = vmatpush1.bf16.msra.mxu0 %v20650_v45 }
 0x22c   : > { %3569 = vmatpush1.bf16.msra.mxu1 %v20641_v46  ;;  %3795 = vmatprep.subr.bf16.mxu0 %v20658_v47 }
 0x22d   : > { %3570 = vmatprep.subr.bf16.mxu1 %v20649_v48 }
 0x22f   : > { %3796 = vmatpush1.bf16.msra.mxu0 %v20656_v49 }
 0x230   : > { %3571 = vmatpush1.bf16.msra.mxu1 %v20647_v52  ;;  %3797 = vmatprep.subr.bf16.mxu0 %v20664_v53 }
 0x231   : > { %3572 = vmatprep.subr.bf16.mxu1 %v20655_v54 }
 0x233   : > { %3798 = vmatpush1.bf16.msra.mxu0 %v20662_v13 }
 0x234   : > { %3573 = vmatpush1.bf16.msra.mxu1 %v20653_v55  ;;  %3799 = vmatprep.subr.bf16.mxu0 %v20670_v56 }
 0x235   : > { %3574 = vmatprep.subr.bf16.mxu1 %v20661_v57 }
 0x237   : > { %3800 = vmatpush1.bf16.msra.mxu0 %v20668_v58 }
 0x238   : > { %3575 = vmatpush1.bf16.msra.mxu1 %v20659_v59  ;;  %3801 = vmatprep.subr.bf16.mxu0 %v20676_v60  ;;  %v20704_v59 = vld [vmem:[%s28537_s5 + $0x408] ss:$16 sps:$4 sm:$0xff]  }
 0x239   : > { %3576 = vmatprep.subr.bf16.mxu1 %v20667_v61 }
 0x23b   : > { %3802 = vmatpush1.bf16.msra.mxu0 %v20674_v62 }
 0x23c   : > { %3577 = vmatpush1.bf16.msra.mxu1 %v20665_v63  ;;  %3803 = vmatprep.subr.bf16.mxu0 %v20682_v50  ;;  %v20712_v50 = vld [vmem:[%s28537_s5 + $0x42c] ss:$16 sps:$4 sm:$0xff]  }
 0x23d   : > { %3578 = vmatprep.subr.bf16.mxu1 %v20673_v1 }
 0x23f   : > { %3804 = vmatpush1.bf16.msra.mxu0 %v20680_v4  ;;  %v20710_v4 = vld [vmem:[%s28537_s5 + $0x428] ss:$16 sps:$4 sm:$0xff]  }
 0x240   : > { %3579 = vmatpush1.bf16.msra.mxu1 %v20671_v31  ;;  %3805 = vmatprep.subr.bf16.mxu0 %v20688_v5 }
 0x241   : > { %3580 = vmatprep.subr.bf16.mxu1 %v20679_v2 }
 0x243   : > { %3806 = vmatpush1.bf16.msra.mxu0 %v20686_v6 }
 0x244   : > { %3581 = vmatpush1.bf16.msra.mxu1 %v20677_v3  ;;  %3807 = vmatprep.subr.bf16.mxu0 %v20694_v8  ;;  %v20716_v8 = vld [vmem:[%s28537_s5 + $0x448] ss:$16 sps:$4 sm:$0xff]  }
 0x245   : > { %3582 = vmatprep.subr.bf16.mxu1 %v20685_v30 }
 0x247   : > { %3808 = vmatpush1.bf16.msra.mxu0 %v20692_v11 }
 0x248   : > { %3583 = vmatpush1.bf16.msra.mxu1 %v20683_v51  ;;  %3809 = vmatprep.subr.bf16.mxu0 %v20700_v17 }
 0x249   : > { %3584 = vmatprep.subr.bf16.mxu1 %v20691_v7  ;;  %v20718_v7 = vld [vmem:[%s28537_s5 + $0x44c] ss:$16 sps:$4 sm:$0xff]  }
 0x24b   : > { %3810 = vmatpush1.bf16.msra.mxu0 %v20698_v21 }
 0x24c   : > { %3585 = vmatpush1.bf16.msra.mxu1 %v20689_v9  ;;  %3822 = vmatprep.subr.bf16.mxu0 %v20706_v23  ;;  %v20724_v9 = vld [vmem:[%s28537_s5 + $0x46c] ss:$16 sps:$4 sm:$0xff]  }
 0x24d   : > { %3586 = vmatprep.subr.bf16.mxu1 %v20697_v16  ;;  %v20722_v16 = vld [vmem:[%s28537_s5 + $0x468] ss:$16 sps:$4 sm:$0xff]  }
 0x250   : > { %3587 = vmatpush1.bf16.msra.mxu1 %v20695_v19 }
 0x251   : > { %3588 = vmatprep.subr.bf16.mxu1 %v20703_v22 }
 0x254   : > { %3589 = vmatpush1.bf16.msra.mxu1 %v20701_v24 }
 0x255   : > { %3590 = vmatprep.subr.bf16.mxu1 %v20709_v27 }
 0x258   : > { %3591 = vmatpush1.bf16.msra.mxu1 %v20707_v26  ;;  %v20730_v26 = vld [vmem:[%s28537_s5 + $0x48c] ss:$16 sps:$4 sm:$0xff]  }
 0x259   : > { %3592 = vmatprep.subr.bf16.mxu1 %v20715_v20  ;;  %v20725_v20 = vld [vmem:[%s28537_s5 + $0x200] ss:$16 sps:$4 sm:$0xff]  }
 0x25c   : > { %3593 = vmatpush1.bf16.msra.mxu1 %v20713_v29  ;;  %v20728_v29 = vld [vmem:[%s28537_s5 + $0x488] ss:$16 sps:$4 sm:$0xff]  }
 0x25d   : > { %3594 = vmatprep.subr.bf16.mxu1 %v20721_v18 }
 0x260   : > { %3595 = vmatpush1.bf16.msra.mxu1 %v20719_v32  ;;  %v20733_v32 = vld [vmem:[%s28537_s5 + $0x224] ss:$16 sps:$4 sm:$0xff]  }
 0x261   : > { %3607 = vmatprep.subr.bf16.mxu1 %v20727_v34 }
 0x2d1   : > { %v2012_v35 = vpop.f32.mrb[16].mxu0 }
 0x2d2   : > { %v20117_v37 = vpop.f32.mrb[17].mxu0 }
 0x2d3   : > { %v2015_v38 = vpop.f32.mrb[18].mxu0  ;;  %v20736_v37 = vld [vmem:[%s28537_s5 + $0x4ac] ss:$16 sps:$4 sm:$0xff]  }
 0x2d4   : > { %v20118_v40 = vpop.f32.mrb[19].mxu0 }
 0x2d6   : > { %v1883_v41 = vpop.f32.mrb[12].mxu1 }
 0x2d7   : > { %v1885_v42 = vpop.f32.mrb[13].mxu1 }
 0x2d8   : > { %v1887_v43 = vpop.f32.mrb[14].mxu1 }
 0x2d9   : > { %v1889_v44 = vpop.f32.mrb[15].mxu1  ;;  %v2106_v45 = vpop.f32.mrb[20].mxu0 }
 0x2da   : > { %v2108_v46 = vpop.f32.mrb[21].mxu0 }
 0x2db   : > { %v2110_v47 = vpop.f32.mrb[22].mxu0 }
 0x2dc   : > { %v2112_v48 = vpop.f32.mrb[23].mxu0 }
 0x2de   : > { %v1926_v49 = vpop.f32.mrb[16].mxu1 }
 0x2df   : > { %v2201_v52 = vmax.f32 %v1926_v49, %v2106_v45  ;;  %v1928_v53 = vpop.f32.mrb[17].mxu1 }
 0x2e0   : > { %v2202_v54 = vmax.f32 %v1928_v53, %v2108_v46  ;;  %v1930_v13 = vpop.f32.mrb[18].mxu1  ;;  %v20740_v53 = vld [vmem:[%s28537_s5 + $0x4c8] ss:$16 sps:$4 sm:$0xff]  }
 0x2e1   : > { %v2208_v55 = vmax.f32 %v1930_v13, %v2110_v47  ;;  %v1932_v56 = vpop.f32.mrb[19].mxu1  ;;  %v2192_v57 = vpop.f32.mrb[24].mxu0  ;;  %v20739_v47 = vld [vmem:[%s28537_s5 + $0x244] ss:$16 sps:$4 sm:$0xff]  }
 0x2e2   : > { %v2209_v58 = vmax.f32 %v1932_v56, %v2112_v48  ;;  %v2205_v60 = vmax.f32 %v2012_v35, %v2192_v57  ;;  %v20125_v61 = vpop.f32.mrb[25].mxu0  ;;  %v20742_v48 = vld [vmem:[%s28537_s5 + $0x4cc] ss:$16 sps:$4 sm:$0xff]   ;;  %v20743_v57 = vld [vmem:[%s28537_s5 + $0x260] ss:$16 sps:$4 sm:$0xff]  }
 0x2e3   : > { %v24107_v62 = vpack.c.bf16 %v2208_v55, %v2201_v52  ;;  %v2195_v63 = vpop.f32.mrb[26].mxu0  ;;  %v20737_v52 = vld [vmem:[%s28537_s5 + $0x240] ss:$16 sps:$4 sm:$0xff]   ;;  %v20745_v55 = vld [vmem:[%s28537_s5 + $0x264] ss:$16 sps:$4 sm:$0xff]  }
 0x2e4   : > { %v24109_v1 = vpack.c.bf16 %v2209_v58, %v2202_v54  ;;  %v2212_v31 = vmax.f32 %v2015_v38, %v2195_v63  ;;  %v20126_v2 = vpop.f32.mrb[27].mxu0  ;;  %v20748_v56 = vld [vmem:[%s28537_s5 + $0x4ec] ss:$16 sps:$4 sm:$0xff]   ;;  %v20746_v58 = vld [vmem:[%s28537_s5 + $0x4e8] ss:$16 sps:$4 sm:$0xff]  }
 0x2e5   : > { %v20749_v61 = vld [vmem:[%s28537_s5 + $0x280] ss:$16 sps:$4 sm:$0xff]   ;;  %v20752_v63 = vld [vmem:[%s28537_s5 + $0x508] ss:$16 sps:$4 sm:$0xff]   ;;  %v20760_v2 = vld [vmem:[%s28537_s5 + $0x52c] ss:$16 sps:$4 sm:$0xff]  }
 0x2e6   : > { %v1969_v3 = vpop.f32.mrb[20].mxu1  ;;  %3811 = vmatprep.mubr.bf16.mxu0 %v24109_v1  ;;  %v24118_v30 = vpack.c.bf16 %v2212_v31, %v2205_v60  ;;  %v20754_v60 = vld [vmem:[%s28537_s5 + $0x50c] ss:$16 sps:$4 sm:$0xff]   ;;  %v20757_v31 = vld [vmem:[%s28537_s5 + $0x2a4] ss:$16 sps:$4 sm:$0xff]  }
 0x2e7   : > { %v1971_v5 = vpop.f32.mrb[21].mxu1  ;;  %3812 = vmatmul.mubr.bf16.vlgmr.msra.gmra.mrb[28].mxu0 %v24107_v62 }
 0x2e8   : > { %3823 = vmatpush1.bf16.msra.mxu0 %v20704_v59  ;;  %v1973_v51 = vpop.f32.mrb[22].mxu1  ;;  %v20751_v59 = vld [vmem:[%s28537_s5 + $0x284] ss:$16 sps:$4 sm:$0xff]  }
 0x2e9   : > { %v1975_v6 = vpop.f32.mrb[23].mxu1  ;;  %3824 = vmatprep.subr.bf16.mxu0 %v20712_v50  ;;  %v20755_v50 = vld [vmem:[%s28537_s5 + $0x2a0] ss:$16 sps:$4 sm:$0xff]  }
 0x2ec   : > { %3825 = vmatpush1.bf16.msra.mxu0 %v20710_v4  ;;  %v20763_v4 = vld [vmem:[%s28537_s5 + $0x2c4] ss:$16 sps:$4 sm:$0xff]  }
 0x2ed   : > { %3826 = vmatprep.subr.bf16.mxu0 %v20718_v7  ;;  %v20769_v7 = vld [vmem:[%s28537_s5 + $0x2e4] ss:$16 sps:$4 sm:$0xff]  }
 0x2ee   : > { %v2063_v11 = vpop.f32.mrb[24].mxu1 }
 0x2ef   : > { %v2199_v17 = vmax.f32 %v1883_v41, %v2063_v11  ;;  %v2065_v19 = vpop.f32.mrb[25].mxu1  ;;  %v20731_v41 = vld [vmem:[%s28537_s5 + $0x220] ss:$16 sps:$4 sm:$0xff]   ;;  %v20770_v11 = vld [vmem:[%s28537_s5 + $0x568] ss:$16 sps:$4 sm:$0xff]  }
 0x2f0   : > { %v2200_v21 = vmax.f32 %v1885_v42, %v2065_v19  ;;  %3827 = vmatpush1.bf16.msra.mxu0 %v20716_v8  ;;  %v2067_v22 = vpop.f32.mrb[26].mxu1  ;;  %v20734_v42 = vld [vmem:[%s28537_s5 + $0x4a8] ss:$16 sps:$4 sm:$0xff]   ;;  %v20772_v8 = vld [vmem:[%s28537_s5 + $0x56c] ss:$16 sps:$4 sm:$0xff]  }
 0x2f1   : > { %v2206_v23 = vmax.f32 %v1887_v43, %v2067_v22  ;;  %v2069_v24 = vpop.f32.mrb[27].mxu1  ;;  %3828 = vmatprep.subr.bf16.mxu0 %v20724_v9  ;;  %v20767_v9 = vld [vmem:[%s28537_s5 + $0x2e0] ss:$16 sps:$4 sm:$0xff]   ;;  %v20781_v22 = vld [vmem:[%s28537_s5 + $0x324] ss:$16 sps:$4 sm:$0xff]  }
 0x2f2   : > { %v2207_v27 = vmax.f32 %v1889_v44, %v2069_v24  ;;  %v20773_v19 = vld [vmem:[%s28537_s5 + $0x300] ss:$16 sps:$4 sm:$0xff]  }
 0x2f3   : > { %v24142_v18 = vpack.c.bf16 %v2206_v23, %v2199_v17  ;;  %v20778_v17 = vld [vmem:[%s28537_s5 + $0x58c] ss:$16 sps:$4 sm:$0xff]   ;;  %v20779_v24 = vld [vmem:[%s28537_s5 + $0x320] ss:$16 sps:$4 sm:$0xff]  }
 0x2f4   : > { %v24147_v34 = vpack.c.bf16 %v2207_v27, %v2200_v21  ;;  %3829 = vmatpush1.bf16.msra.mxu0 %v20722_v16  ;;  %v20775_v16 = vld [vmem:[%s28537_s5 + $0x304] ss:$16 sps:$4 sm:$0xff]   ;;  %v20776_v21 = vld [vmem:[%s28537_s5 + $0x588] ss:$16 sps:$4 sm:$0xff]   ;;  %v20784_v23 = vld [vmem:[%s28537_s5 + $0x5ac] ss:$16 sps:$4 sm:$0xff]  }
 0x2f5   : > { %3830 = vmatprep.subr.bf16.mxu0 %v20730_v26  ;;  %v20782_v26 = vld [vmem:[%s28537_s5 + $0x5a8] ss:$16 sps:$4 sm:$0xff]   ;;  %v20787_v27 = vld [vmem:[%s28537_s5 + $0x344] ss:$16 sps:$4 sm:$0xff]  }
 0x2f6   : > { %v2149_v35 = vpop.f32.mrb[28].mxu1  ;;  %3596 = vmatprep.mubr.bf16.mxu1 %v24147_v34 }
 0x2f7   : > { %v2203_v38 = vmax.f32 %v1969_v3, %v2149_v35  ;;  %v2151_v40 = vpop.f32.mrb[29].mxu1  ;;  %3597 = vmatmul.mubr.bf16.vlgmr.msra.gmra.mrb[32].mxu1 %v24142_v18  ;;  %v20758_v3 = vld [vmem:[%s28537_s5 + $0x528] ss:$16 sps:$4 sm:$0xff]   ;;  %v20793_v35 = vld [vmem:[%s28537_s5 + $0x364] ss:$16 sps:$4 sm:$0xff]  }
 0x2f8   : > { %v2204_v43 = vmax.f32 %v1971_v5, %v2151_v40  ;;  %3608 = vmatpush1.bf16.msra.mxu1 %v20725_v20  ;;  %3831 = vmatpush1.bf16.msra.mxu0 %v20728_v29  ;;  %v2153_v44 = vpop.f32.mrb[30].mxu1  ;;  %v20766_v5 = vld [vmem:[%s28537_s5 + $0x54c] ss:$16 sps:$4 sm:$0xff]   ;;  %v20785_v29 = vld [vmem:[%s28537_s5 + $0x340] ss:$16 sps:$4 sm:$0xff]  }
 0x2f9   : > { %v2210_v45 = vmax.f32 %v1973_v51, %v2153_v44  ;;  %3639 = vmatprep.mubr.bf16.mxu1 %v24109_v1  ;;  %v2155_v46 = vpop.f32.mrb[31].mxu1  ;;  %3609 = vmatprep.subr.bf16.mxu1 %v20733_v32  ;;  %v20761_v51 = vld [vmem:[%s28537_s5 + $0x2c0] ss:$16 sps:$4 sm:$0xff]   ;;  %v20790_v20 = vld [vmem:[%s28537_s5 + $0x5cc] ss:$16 sps:$4 sm:$0xff]  }
 0x2fa   : > { %v2211_v49 = vmax.f32 %v1975_v6, %v2155_v46  ;;  %3832 = vmatprep.subr.bf16.mxu0 %v20736_v37  ;;  %v20764_v6 = vld [vmem:[%s28537_s5 + $0x548] ss:$16 sps:$4 sm:$0xff]   ;;  %v20796_v37 = vld [vmem:[%s28537_s5 + $0x5ec] ss:$16 sps:$4 sm:$0xff]  }
 0x2fb   : > { %v24173_v54 = vpack.c.bf16 %v2210_v45, %v2203_v38  ;;  %v20788_v32 = vld [vmem:[%s28537_s5 + $0x5c8] ss:$16 sps:$4 sm:$0xff]   ;;  %v20791_v38 = vld [vmem:[%s28537_s5 + $0x360] ss:$16 sps:$4 sm:$0xff]   ;;  %v20805_v45 = vld [vmem:[%s28537_s5 + $0x3a4] ss:$16 sps:$4 sm:$0xff]  }
 0x2fc   : > { %v24175_v13 = vpack.c.bf16 %v2211_v49, %v2204_v43  ;;  %3610 = vmatpush1.bf16.msra.mxu1 %v20731_v41  ;;  %3833 = vmatpush1.bf16.msra.mxu0 %v20734_v42  ;;  %v20794_v40 = vld [vmem:[%s28537_s5 + $0x5e8] ss:$16 sps:$4 sm:$0xff]   ;;  %v20799_v41 = vld [vmem:[%s28537_s5 + $0x384] ss:$16 sps:$4 sm:$0xff]   ;;  %v20802_v42 = vld [vmem:[%s28537_s5 + $0x60c] ss:$16 sps:$4 sm:$0xff]  }
 0x2fd   : > { %3611 = vmatprep.subr.bf16.mxu1 %v20739_v47  ;;  %3834 = vmatprep.subr.bf16.mxu0 %v20742_v48  ;;  %v20797_v43 = vld [vmem:[%s28537_s5 + $0x380] ss:$16 sps:$4 sm:$0xff]   ;;  %v20800_v44 = vld [vmem:[%s28537_s5 + $0x608] ss:$16 sps:$4 sm:$0xff]   ;;  %v20808_v46 = vld [vmem:[%s28537_s5 + $0x62c] ss:$16 sps:$4 sm:$0xff]  }
 0x2fe   : > { %3854 = vmatprep.mubr.bf16.mxu0 %v24175_v13  ;;  %v20803_v47 = vld [vmem:[%s28537_s5 + $0x3a0] ss:$16 sps:$4 sm:$0xff]   ;;  %v20806_v48 = vld [vmem:[%s28537_s5 + $0x628] ss:$16 sps:$4 sm:$0xff]   ;;  %v20811_v49 = vld [vmem:[%s28537_s5 + $0x3c4] ss:$16 sps:$4 sm:$0xff]  }
 0x300   : > { %3612 = vmatpush1.bf16.msra.mxu1 %v20737_v52  ;;  %3835 = vmatpush1.bf16.msra.mxu0 %v20740_v53  ;;  %v20814_v52 = vld [vmem:[%s28537_s5 + $0x64c] ss:$16 sps:$4 sm:$0xff]   ;;  %v20809_v53 = vld [vmem:[%s28537_s5 + $0x3c0] ss:$16 sps:$4 sm:$0xff]  }
 0x301   : > { %3613 = vmatprep.subr.bf16.mxu1 %v20745_v55  ;;  %3836 = vmatprep.subr.bf16.mxu0 %v20748_v56  ;;  %v20812_v55 = vld [vmem:[%s28537_s5 + $0x648] ss:$16 sps:$4 sm:$0xff]   ;;  %v20817_v56 = vld [vmem:[%s28537_s5 + $0x3e4] ss:$16 sps:$4 sm:$0xff]  }
 0x304   : > { %3614 = vmatpush1.bf16.msra.mxu1 %v20743_v57  ;;  %3837 = vmatpush1.bf16.msra.mxu0 %v20746_v58  ;;  %v20820_v57 = vld [vmem:[%s28537_s5 + $0x66c] ss:$16 sps:$4 sm:$0xff]   ;;  %v20815_v58 = vld [vmem:[%s28537_s5 + $0x3e0] ss:$16 sps:$4 sm:$0xff]  }
 0x305   : > { %3615 = vmatprep.subr.bf16.mxu1 %v20751_v59  ;;  %3838 = vmatprep.subr.bf16.mxu0 %v20754_v60  ;;  %v20818_v59 = vld [vmem:[%s28537_s5 + $0x668] ss:$16 sps:$4 sm:$0xff]   ;;  %v20823_v60 = vld [vmem:[%s28537_s5 + $0x404] ss:$16 sps:$4 sm:$0xff]  }
 0x308   : > { %3616 = vmatpush1.bf16.msra.mxu1 %v20749_v61  ;;  %3839 = vmatpush1.bf16.msra.mxu0 %v20752_v63  ;;  %v20826_v61 = vld [vmem:[%s28537_s5 + $0x68c] ss:$16 sps:$4 sm:$0xff]   ;;  %v20821_v63 = vld [vmem:[%s28537_s5 + $0x400] ss:$16 sps:$4 sm:$0xff]  }
 0x309   : > { %3617 = vmatprep.subr.bf16.mxu1 %v20757_v31  ;;  %3840 = vmatprep.subr.bf16.mxu0 %v20760_v2  ;;  %v20824_v31 = vld [vmem:[%s28537_s5 + $0x688] ss:$16 sps:$4 sm:$0xff]   ;;  %v20829_v2 = vld [vmem:[%s28537_s5 + $0x424] ss:$16 sps:$4 sm:$0xff]  }
 0x30c   : > { %3618 = vmatpush1.bf16.msra.mxu1 %v20755_v50  ;;  %3841 = vmatpush1.bf16.msra.mxu0 %v20758_v3  ;;  %v20827_v50 = vld [vmem:[%s28537_s5 + $0x420] ss:$16 sps:$4 sm:$0xff]   ;;  %v20832_v3 = vld [vmem:[%s28537_s5 + $0x6ac] ss:$16 sps:$4 sm:$0xff]  }
 0x30d   : > { %3619 = vmatprep.subr.bf16.mxu1 %v20763_v4  ;;  %3842 = vmatprep.subr.bf16.mxu0 %v20766_v5  ;;  %v20830_v4 = vld [vmem:[%s28537_s5 + $0x6a8] ss:$16 sps:$4 sm:$0xff]   ;;  %v20835_v5 = vld [vmem:[%s28537_s5 + $0x444] ss:$16 sps:$4 sm:$0xff]  }
 0x310   : > { %3620 = vmatpush1.bf16.msra.mxu1 %v20761_v51  ;;  %3843 = vmatpush1.bf16.msra.mxu0 %v20764_v6  ;;  %v20833_v51 = vld [vmem:[%s28537_s5 + $0x440] ss:$16 sps:$4 sm:$0xff]   ;;  %v20838_v6 = vld [vmem:[%s28537_s5 + $0x6cc] ss:$16 sps:$4 sm:$0xff]  }
 0x311   : > { %3621 = vmatprep.subr.bf16.mxu1 %v20769_v7  ;;  %3844 = vmatprep.subr.bf16.mxu0 %v20772_v8  ;;  %v20836_v7 = vld [vmem:[%s28537_s5 + $0x6c8] ss:$16 sps:$4 sm:$0xff]   ;;  %v20841_v8 = vld [vmem:[%s28537_s5 + $0x464] ss:$16 sps:$4 sm:$0xff]  }
 0x314   : > { %3622 = vmatpush1.bf16.msra.mxu1 %v20767_v9  ;;  %3845 = vmatpush1.bf16.msra.mxu0 %v20770_v11  ;;  %v20839_v9 = vld [vmem:[%s28537_s5 + $0x460] ss:$16 sps:$4 sm:$0xff]   ;;  %v20844_v11 = vld [vmem:[%s28537_s5 + $0x6ec] ss:$16 sps:$4 sm:$0xff]  }
 0x315   : > { %3623 = vmatprep.subr.bf16.mxu1 %v20775_v16  ;;  %3846 = vmatprep.subr.bf16.mxu0 %v20778_v17  ;;  %v20842_v16 = vld [vmem:[%s28537_s5 + $0x6e8] ss:$16 sps:$4 sm:$0xff]   ;;  %v20847_v17 = vld [vmem:[%s28537_s5 + $0x484] ss:$16 sps:$4 sm:$0xff]  }
 0x318   : > { %3624 = vmatpush1.bf16.msra.mxu1 %v20773_v19  ;;  %3847 = vmatpush1.bf16.msra.mxu0 %v20776_v21  ;;  %v20845_v19 = vld [vmem:[%s28537_s5 + $0x480] ss:$16 sps:$4 sm:$0xff]   ;;  %v20850_v21 = vld [vmem:[#allocation5 + $0xc] ss:$16 sps:$4 sm:$0xff]  }
 0x319   : > { %3625 = vmatprep.subr.bf16.mxu1 %v20781_v22  ;;  %3848 = vmatprep.subr.bf16.mxu0 %v20784_v23  ;;  %v20848_v22 = vld [vmem:[#allocation5 + $0x8] ss:$16 sps:$4 sm:$0xff]   ;;  %v20853_v23 = vld [vmem:[%s28537_s5 + $0x4a4] ss:$16 sps:$4 sm:$0xff]  }
 0x31c   : > { %3626 = vmatpush1.bf16.msra.mxu1 %v20779_v24  ;;  %3849 = vmatpush1.bf16.msra.mxu0 %v20782_v26  ;;  %v20856_v24 = vld [vmem:[#allocation5 + $0x2c] ss:$16 sps:$4 sm:$0xff]   ;;  %v20851_v26 = vld [vmem:[%s28537_s5 + $0x4a0] ss:$16 sps:$4 sm:$0xff]  }
 0x31d   : > { %3627 = vmatprep.subr.bf16.mxu1 %v20787_v27  ;;  %3850 = vmatprep.subr.bf16.mxu0 %v20790_v20  ;;  %v20854_v27 = vld [vmem:[#allocation5 + $0x28] ss:$16 sps:$4 sm:$0xff]   ;;  %v20859_v20 = vld [vmem:[%s28537_s5 + $0x4c4] ss:$16 sps:$4 sm:$0xff]  }
 0x320   : > { %3628 = vmatpush1.bf16.msra.mxu1 %v20785_v29  ;;  %3851 = vmatpush1.bf16.msra.mxu0 %v20788_v32  ;;  %v20857_v29 = vld [vmem:[%s28537_s5 + $0x4c0] ss:$16 sps:$4 sm:$0xff]   ;;  %v20862_v32 = vld [vmem:[#allocation5 + $0x4c] ss:$16 sps:$4 sm:$0xff]  }
 0x321   : > { %3629 = vmatprep.subr.bf16.mxu1 %v20793_v35  ;;  %3852 = vmatprep.subr.bf16.mxu0 %v20796_v37  ;;  %v20860_v35 = vld [vmem:[#allocation5 + $0x48] ss:$16 sps:$4 sm:$0xff]   ;;  %v20865_v37 = vld [vmem:[%s28537_s5 + $0x4e4] ss:$16 sps:$4 sm:$0xff]  }
 0x324   : > { %3630 = vmatpush1.bf16.msra.mxu1 %v20791_v38  ;;  %3853 = vmatpush1.bf16.msra.mxu0 %v20794_v40  ;;  %v20863_v38 = vld [vmem:[%s28537_s5 + $0x4e0] ss:$16 sps:$4 sm:$0xff]   ;;  %v20868_v40 = vld [vmem:[#allocation5 + $0x6c] ss:$16 sps:$4 sm:$0xff]  }
 0x325   : > { %3631 = vmatprep.subr.bf16.mxu1 %v20799_v41  ;;  %3865 = vmatprep.subr.bf16.mxu0 %v20802_v42  ;;  %v20866_v41 = vld [vmem:[#allocation5 + $0x68] ss:$16 sps:$4 sm:$0xff]   ;;  %v20871_v42 = vld [vmem:[%s28537_s5 + $0x504] ss:$16 sps:$4 sm:$0xff]  }
 0x327   : > { %3855 = vmatmul.mubr.bf16.vlgmr.msra.gmra.mrb[28].mxu0 %v24173_v54 }
 0x328   : > { %3632 = vmatpush1.bf16.msra.mxu1 %v20797_v43  ;;  %3866 = vmatpush1.bf16.msra.mxu0 %v20800_v44  ;;  %v20869_v43 = vld [vmem:[%s28537_s5 + $0x500] ss:$16 sps:$4 sm:$0xff]   ;;  %v20874_v44 = vld [vmem:[#allocation5 + $0x8c] ss:$16 sps:$4 sm:$0xff]  }
 0x329   : > { %3633 = vmatprep.subr.bf16.mxu1 %v20805_v45  ;;  %3867 = vmatprep.subr.bf16.mxu0 %v20808_v46  ;;  %v20872_v45 = vld [vmem:[#allocation5 + $0x88] ss:$16 sps:$4 sm:$0xff]   ;;  %v20877_v46 = vld [vmem:[%s28537_s5 + $0x524] ss:$16 sps:$4 sm:$0xff]  }
 0x32a   : > { %3897 = vmatprep.mubr.bf16.mxu0 %v23387_v0 }
 0x32c   : > { %3634 = vmatpush1.bf16.msra.mxu1 %v20803_v47  ;;  %3868 = vmatpush1.bf16.msra.mxu0 %v20806_v48  ;;  %v20880_v47 = vld [vmem:[#allocation5 + $0xac] ss:$16 sps:$4 sm:$0xff]   ;;  %v20875_v48 = vld [vmem:[%s28537_s5 + $0x520] ss:$16 sps:$4 sm:$0xff]  }
 0x32d   : > { %3635 = vmatprep.subr.bf16.mxu1 %v20811_v49  ;;  %3869 = vmatprep.subr.bf16.mxu0 %v20814_v52  ;;  %v20878_v49 = vld [vmem:[#allocation5 + $0xa8] ss:$16 sps:$4 sm:$0xff]   ;;  %v20883_v52 = vld [vmem:[%s28537_s5 + $0x544] ss:$16 sps:$4 sm:$0xff]  }
 0x330   : > { %3636 = vmatpush1.bf16.msra.mxu1 %v20809_v53  ;;  %3870 = vmatpush1.bf16.msra.mxu0 %v20812_v55  ;;  %v20881_v53 = vld [vmem:[%s28537_s5 + $0x540] ss:$16 sps:$4 sm:$0xff]   ;;  %v20886_v55 = vld [vmem:[#allocation5 + $0xcc] ss:$16 sps:$4 sm:$0xff]  }
 0x331   : > { %3637 = vmatprep.subr.bf16.mxu1 %v20817_v56  ;;  %3871 = vmatprep.subr.bf16.mxu0 %v20820_v57  ;;  %v20884_v56 = vld [vmem:[#allocation5 + $0xc8] ss:$16 sps:$4 sm:$0xff]   ;;  %v20889_v57 = vld [vmem:[%s28537_s5 + $0x564] ss:$16 sps:$4 sm:$0xff]  }
 0x334   : > { %3638 = vmatpush1.bf16.msra.mxu1 %v20815_v58  ;;  %3872 = vmatpush1.bf16.msra.mxu0 %v20818_v59  ;;  %v20887_v58 = vld [vmem:[%s28537_s5 + $0x560] ss:$16 sps:$4 sm:$0xff]   ;;  %v20892_v59 = vld [vmem:[#allocation5 + $0xec] ss:$16 sps:$4 sm:$0xff]  }
 0x335   : > { %3650 = vmatprep.subr.bf16.mxu1 %v20823_v60  ;;  %3873 = vmatprep.subr.bf16.mxu0 %v20826_v61  ;;  %v20890_v60 = vld [vmem:[#allocation5 + $0xe8] ss:$16 sps:$4 sm:$0xff]   ;;  %v20895_v61 = vld [vmem:[%s28537_s5 + $0x584] ss:$16 sps:$4 sm:$0xff]  }
 0x337   : > { %3640 = vmatmul.mubr.bf16.vlgmr.msra.gmra.mrb[32].mxu1 %v24107_v62 }
 0x338   : > { %3651 = vmatpush1.bf16.msra.mxu1 %v20821_v63  ;;  %3682 = vmatprep.mubr.bf16.mxu1 %v24175_v13  ;;  %v20893_v63 = vld [vmem:[%s28537_s5 + $0x580] ss:$16 sps:$4 sm:$0xff]  }
 0x339   : > { %3874 = vmatpush1.bf16.msra.mxu0 %v20824_v31  ;;  %3652 = vmatprep.subr.bf16.mxu1 %v20829_v2  ;;  %v20898_v31 = vld [vmem:[#allocation5 + $0x10c] ss:$16 sps:$4 sm:$0xff]   ;;  %v20896_v2 = vld [vmem:[#allocation5 + $0x108] ss:$16 sps:$4 sm:$0xff]  }
 0x33a   : > { %3875 = vmatprep.subr.bf16.mxu0 %v20832_v3  ;;  %v20899_v3 = vld [vmem:[%s28537_s5 + $0x5a0] ss:$16 sps:$4 sm:$0xff]  }
 0x33c   : > { %3653 = vmatpush1.bf16.msra.mxu1 %v20827_v50  ;;  %v20901_v50 = vld [vmem:[%s28537_s5 + $0x5a4] ss:$16 sps:$4 sm:$0xff]  }
 0x33d   : > { %3876 = vmatpush1.bf16.msra.mxu0 %v20830_v4  ;;  %3654 = vmatprep.subr.bf16.mxu1 %v20835_v5  ;;  %v20904_v4 = vld [vmem:[#allocation5 + $0x12c] ss:$16 sps:$4 sm:$0xff]   ;;  %v20902_v5 = vld [vmem:[#allocation5 + $0x128] ss:$16 sps:$4 sm:$0xff]  }
 0x33e   : > { %3877 = vmatprep.subr.bf16.mxu0 %v20838_v6  ;;  %v20905_v6 = vld [vmem:[%s28537_s5 + $0x5c0] ss:$16 sps:$4 sm:$0xff]  }
 0x340   : > { %3655 = vmatpush1.bf16.msra.mxu1 %v20833_v51  ;;  %v20907_v51 = vld [vmem:[%s28537_s5 + $0x5c4] ss:$16 sps:$4 sm:$0xff]  }
 0x341   : > { %3878 = vmatpush1.bf16.msra.mxu0 %v20836_v7  ;;  %3656 = vmatprep.subr.bf16.mxu1 %v20841_v8  ;;  %v20910_v7 = vld [vmem:[#allocation5 + $0x14c] ss:$16 sps:$4 sm:$0xff]   ;;  %v20908_v8 = vld [vmem:[#allocation5 + $0x148] ss:$16 sps:$4 sm:$0xff]  }
 0x342   : > { %3879 = vmatprep.subr.bf16.mxu0 %v20844_v11  ;;  %v20911_v11 = vld [vmem:[%s28537_s5 + $0x5e0] ss:$16 sps:$4 sm:$0xff]  }
 0x344   : > { %3657 = vmatpush1.bf16.msra.mxu1 %v20839_v9  ;;  %v20913_v9 = vld [vmem:[%s28537_s5 + $0x5e4] ss:$16 sps:$4 sm:$0xff]  }
 0x345   : > { %3880 = vmatpush1.bf16.msra.mxu0 %v20842_v16  ;;  %3658 = vmatprep.subr.bf16.mxu1 %v20847_v17  ;;  %v20916_v16 = vld [vmem:[#allocation5 + $0x16c] ss:$16 sps:$4 sm:$0xff]   ;;  %v20914_v17 = vld [vmem:[#allocation5 + $0x168] ss:$16 sps:$4 sm:$0xff]  }
 0x346   : > { %5424 = vmatprep.subr.bf16.mxu0 %v20850_v21  ;;  %v20922_v21 = vld [vmem:[#allocation5 + $0x18c] ss:$16 sps:$4 sm:$0xff]  }
 0x348   : > { %3898 = vmatmul.mubr.bf16.vlgmr.msra.gmra.mrb[28].mxu0 %v24118_v30  ;;  %3659 = vmatpush1.bf16.msra.mxu1 %v20845_v19  ;;  %v20919_v19 = vld [vmem:[%s28537_s5 + $0x604] ss:$16 sps:$4 sm:$0xff]  }
 0x349   : > { %5425 = vmatpush1.bf16.msra.mxu0 %v20848_v22  ;;  %5456 = vmatprep.mubr.bf16.mxu0 %v24147_v34  ;;  %v20917_v22 = vld [vmem:[%s28537_s5 + $0x600] ss:$16 sps:$4 sm:$0xff]  }
 0x34a   : > { %3660 = vmatprep.subr.bf16.mxu1 %v20853_v23  ;;  %5426 = vmatprep.subr.bf16.mxu0 %v20856_v24  ;;  %v20920_v23 = vld [vmem:[#allocation5 + $0x188] ss:$16 sps:$4 sm:$0xff]   ;;  %v20925_v24 = vld [vmem:[%s28537_s5 + $0x624] ss:$16 sps:$4 sm:$0xff]  }
 0x34c   : > { %3661 = vmatpush1.bf16.msra.mxu1 %v20851_v26  ;;  %v20923_v26 = vld [vmem:[%s28537_s5 + $0x620] ss:$16 sps:$4 sm:$0xff]  }
 0x34d   : > { %5427 = vmatpush1.bf16.msra.mxu0 %v20854_v27  ;;  %3662 = vmatprep.subr.bf16.mxu1 %v20859_v20  ;;  %v20928_v27 = vld [vmem:[#allocation5 + $0x1ac] ss:$16 sps:$4 sm:$0xff]   ;;  %v20926_v20 = vld [vmem:[#allocation5 + $0x1a8] ss:$16 sps:$4 sm:$0xff]  }
 0x34e   : > { %5428 = vmatprep.subr.bf16.mxu0 %v20862_v32  ;;  %v20929_v32 = vld [vmem:[%s28537_s5 + $0x640] ss:$16 sps:$4 sm:$0xff]  }
 0x350   : > { %3663 = vmatpush1.bf16.msra.mxu1 %v20857_v29  ;;  %v20931_v29 = vld [vmem:[%s28537_s5 + $0x644] ss:$16 sps:$4 sm:$0xff]  }
 0x351   : > { %5429 = vmatpush1.bf16.msra.mxu0 %v20860_v35  ;;  %3664 = vmatprep.subr.bf16.mxu1 %v20865_v37  ;;  %v20934_v35 = vld [vmem:[#allocation5 + $0x1cc] ss:$16 sps:$4 sm:$0xff]   ;;  %v20932_v37 = vld [vmem:[#allocation5 + $0x1c8] ss:$16 sps:$4 sm:$0xff]  }
 0x352   : > { %5430 = vmatprep.subr.bf16.mxu0 %v20868_v40  ;;  %v20935_v40 = vld [vmem:[%s28537_s5 + $0x660] ss:$16 sps:$4 sm:$0xff]  }
 0x354   : > { %3665 = vmatpush1.bf16.msra.mxu1 %v20863_v38  ;;  %v20937_v38 = vld [vmem:[%s28537_s5 + $0x664] ss:$16 sps:$4 sm:$0xff]  }
 0x355   : > { %5431 = vmatpush1.bf16.msra.mxu0 %v20866_v41  ;;  %3666 = vmatprep.subr.bf16.mxu1 %v20871_v42  ;;  %v20940_v41 = vld [vmem:[#allocation5 + $0x1ec] ss:$16 sps:$4 sm:$0xff]   ;;  %v20938_v42 = vld [vmem:[#allocation5 + $0x1e8] ss:$16 sps:$4 sm:$0xff]  }
 0x356   : > { %5432 = vmatprep.subr.bf16.mxu0 %v20874_v44  ;;  %v20941_v44 = vld [vmem:[%s28537_s5 + $0x680] ss:$16 sps:$4 sm:$0xff]  }
 0x358   : > { %3667 = vmatpush1.bf16.msra.mxu1 %v20869_v43  ;;  %v20943_v43 = vld [vmem:[%s28537_s5 + $0x684] ss:$16 sps:$4 sm:$0xff]  }
 0x359   : > { %5433 = vmatpush1.bf16.msra.mxu0 %v20872_v45  ;;  %3668 = vmatprep.subr.bf16.mxu1 %v20877_v46  ;;  %v20946_v45 = vld [vmem:[#allocation5 + $0x20c] ss:$16 sps:$4 sm:$0xff]   ;;  %v20944_v46 = vld [vmem:[#allocation5 + $0x208] ss:$16 sps:$4 sm:$0xff]  }
 0x35a   : > { %5434 = vmatprep.subr.bf16.mxu0 %v20880_v47  ;;  %v20949_v47 = vld [vmem:[%s28537_s5 + $0x6a4] ss:$16 sps:$4 sm:$0xff]  }
 0x35c   : > { %3669 = vmatpush1.bf16.msra.mxu1 %v20875_v48  ;;  %v20952_v48 = vld [vmem:[#allocation5 + $0x22c] ss:$16 sps:$4 sm:$0xff]  }
 0x35d   : > { %5435 = vmatpush1.bf16.msra.mxu0 %v20878_v49  ;;  %3670 = vmatprep.subr.bf16.mxu1 %v20883_v52  ;;  %v20947_v49 = vld [vmem:[%s28537_s5 + $0x6a0] ss:$16 sps:$4 sm:$0xff]   ;;  %v20950_v52 = vld [vmem:[#allocation5 + $0x228] ss:$16 sps:$4 sm:$0xff]  }
 0x35e   : > { %5436 = vmatprep.subr.bf16.mxu0 %v20886_v55  ;;  %v20953_v55 = vld [vmem:[%s28537_s5 + $0x6c0] ss:$16 sps:$4 sm:$0xff]  }
 0x360   : > { %3671 = vmatpush1.bf16.msra.mxu1 %v20881_v53  ;;  %v20955_v53 = vld [vmem:[%s28537_s5 + $0x6c4] ss:$16 sps:$4 sm:$0xff]  }
 0x361   : > { %5437 = vmatpush1.bf16.msra.mxu0 %v20884_v56  ;;  %3672 = vmatprep.subr.bf16.mxu1 %v20889_v57  ;;  %v20958_v56 = vld [vmem:[#allocation5 + $0x24c] ss:$16 sps:$4 sm:$0xff]   ;;  %v20956_v57 = vld [vmem:[#allocation5 + $0x248] ss:$16 sps:$4 sm:$0xff]  }
 0x362   : > { %5438 = vmatprep.subr.bf16.mxu0 %v20892_v59  ;;  %v20959_v59 = vld [vmem:[%s28537_s5 + $0x6e0] ss:$16 sps:$4 sm:$0xff]  }
 0x364   : > { %3673 = vmatpush1.bf16.msra.mxu1 %v20887_v58  ;;  %v20961_v58 = vld [vmem:[%s28537_s5 + $0x6e4] ss:$16 sps:$4 sm:$0xff]  }
 0x365   : > { %5439 = vmatpush1.bf16.msra.mxu0 %v20890_v60  ;;  %3674 = vmatprep.subr.bf16.mxu1 %v20895_v61  ;;  %v20964_v60 = vld [vmem:[#allocation5 + $0x26c] ss:$16 sps:$4 sm:$0xff]   ;;  %v20962_v61 = vld [vmem:[#allocation5 + $0x268] ss:$16 sps:$4 sm:$0xff]  }
 0x366   : > { %5440 = vmatprep.subr.bf16.mxu0 %v20898_v31  ;;  %v20970_v31 = vld [vmem:[#allocation5 + $0x28c] ss:$16 sps:$4 sm:$0xff]  }
 0x368   : > { %3675 = vmatpush1.bf16.msra.mxu1 %v20893_v63  ;;  %v20967_v63 = vld [vmem:[%s28537_s5 + $0xc] ss:$16 sps:$4 sm:$0xff]  }
 0x369   : > { %5441 = vmatpush1.bf16.msra.mxu0 %v20896_v2  ;;  %3676 = vmatprep.subr.bf16.mxu1 %v20901_v50  ;;  %v20965_v2 = vld [vmem:[%s28537_s5 + $0x8] ss:$16 sps:$4 sm:$0xff]  }
 0x36a   : > { %5442 = vmatprep.subr.bf16.mxu0 %v20904_v4  ;;  %v20968_v50 = vld [vmem:[#allocation5 + $0x288] ss:$16 sps:$4 sm:$0xff]  }
 0x36b   : > { %v20971_v4 = vld [vmem:[%s28537_s5 + $0x28] ss:$16 sps:$4 sm:$0xff]  }
 0x36c   : > { %3677 = vmatpush1.bf16.msra.mxu1 %v20899_v3  ;;  %v20973_v3 = vld [vmem:[%s28537_s5 + $0x2c] ss:$16 sps:$4 sm:$0xff]  }
 0x36d   : > { %5443 = vmatpush1.bf16.msra.mxu0 %v20902_v5  ;;  %3678 = vmatprep.subr.bf16.mxu1 %v20907_v51  ;;  %v20976_v5 = vld [vmem:[#allocation5 + $0x2ac] ss:$16 sps:$4 sm:$0xff]   ;;  %v20974_v51 = vld [vmem:[#allocation5 + $0x2a8] ss:$16 sps:$4 sm:$0xff]  }
 0x36e   : > { %5444 = vmatprep.subr.bf16.mxu0 %v20910_v7  ;;  %v20977_v7 = vld [vmem:[%s28537_s5 + $0x48] ss:$16 sps:$4 sm:$0xff]  }
 0x370   : > { %3679 = vmatpush1.bf16.msra.mxu1 %v20905_v6  ;;  %v20979_v6 = vld [vmem:[%s28537_s5 + $0x4c] ss:$16 sps:$4 sm:$0xff]  }
 0x371   : > { %5445 = vmatpush1.bf16.msra.mxu0 %v20908_v8  ;;  %3680 = vmatprep.subr.bf16.mxu1 %v20913_v9  ;;  %v20982_v8 = vld [vmem:[#allocation5 + $0x2cc] ss:$16 sps:$4 sm:$0xff]   ;;  %v20980_v9 = vld [vmem:[#allocation5 + $0x2c8] ss:$16 sps:$4 sm:$0xff]  }
 0x372   : > { %5446 = vmatprep.subr.bf16.mxu0 %v20916_v16  ;;  %v20988_v16 = vld [vmem:[#allocation5 + $0x2ec] ss:$16 sps:$4 sm:$0xff]  }
 0x374   : > { %3681 = vmatpush1.bf16.msra.mxu1 %v20911_v11  ;;  %v20985_v11 = vld [vmem:[%s28537_s5 + $0x6c] ss:$16 sps:$4 sm:$0xff]  }
 0x375   : > { %5447 = vmatpush1.bf16.msra.mxu0 %v20914_v17  ;;  %3693 = vmatprep.subr.bf16.mxu1 %v20919_v19  ;;  %v20983_v17 = vld [vmem:[%s28537_s5 + $0x68] ss:$16 sps:$4 sm:$0xff]  }
 0x376   : > { %5448 = vmatprep.subr.bf16.mxu0 %v20922_v21  ;;  %v20986_v19 = vld [vmem:[#allocation5 + $0x2e8] ss:$16 sps:$4 sm:$0xff]   ;;  %v20991_v21 = vld [vmem:[%s28537_s5 + $0x8c] ss:$16 sps:$4 sm:$0xff]  }
 0x377   : > { %3683 = vmatmul.mubr.bf16.vlgmr.msra.gmra.mrb[32].mxu1 %v24173_v54 }
 0x378   : > { %3694 = vmatpush1.bf16.msra.mxu1 %v20917_v22  ;;  %3725 = vmatprep.mubr.bf16.mxu1 %v23387_v0  ;;  %v20989_v22 = vld [vmem:[%s28537_s5 + $0x88] ss:$16 sps:$4 sm:$0xff]  }
 0x379   : > { %5449 = vmatpush1.bf16.msra.mxu0 %v20920_v23  ;;  %3695 = vmatprep.subr.bf16.mxu1 %v20925_v24  ;;  %v20994_v23 = vld [vmem:[#allocation5 + $0x30c] ss:$16 sps:$4 sm:$0xff]   ;;  %v20992_v24 = vld [vmem:[#allocation5 + $0x308] ss:$16 sps:$4 sm:$0xff]  }
 0x37a   : > { %5450 = vmatprep.subr.bf16.mxu0 %v20928_v27  ;;  %v21000_v27 = vld [vmem:[#allocation5 + $0x32c] ss:$16 sps:$4 sm:$0xff]  }
 0x37c   : > { %3696 = vmatpush1.bf16.msra.mxu1 %v20923_v26  ;;  %v20997_v26 = vld [vmem:[%s28537_s5 + $0xac] ss:$16 sps:$4 sm:$0xff]  }
 0x37d   : > { %5451 = vmatpush1.bf16.msra.mxu0 %v20926_v20  ;;  %3697 = vmatprep.subr.bf16.mxu1 %v20931_v29  ;;  %v20995_v20 = vld [vmem:[%s28537_s5 + $0xa8] ss:$16 sps:$4 sm:$0xff]  }
 0x37e   : > { %5452 = vmatprep.subr.bf16.mxu0 %v20934_v35  ;;  %v20998_v29 = vld [vmem:[#allocation5 + $0x328] ss:$16 sps:$4 sm:$0xff]   ;;  %v21006_v35 = vld [vmem:[#allocation5 + $0x34c] ss:$16 sps:$4 sm:$0xff]  }
 0x380   : > { %3698 = vmatpush1.bf16.msra.mxu1 %v20929_v32  ;;  %v21003_v32 = vld [vmem:[%s28537_s5 + $0xcc] ss:$16 sps:$4 sm:$0xff]  }
 0x381   : > { %5453 = vmatpush1.bf16.msra.mxu0 %v20932_v37  ;;  %3699 = vmatprep.subr.bf16.mxu1 %v20937_v38  ;;  %v21001_v37 = vld [vmem:[%s28537_s5 + $0xc8] ss:$16 sps:$4 sm:$0xff]  }
 0x382   : > { %5454 = vmatprep.subr.bf16.mxu0 %v20940_v41  ;;  %v21004_v38 = vld [vmem:[#allocation5 + $0x348] ss:$16 sps:$4 sm:$0xff]   ;;  %v21012_v41 = vld [vmem:[#allocation5 + $0x36c] ss:$16 sps:$4 sm:$0xff]  }
 0x384   : > { %3700 = vmatpush1.bf16.msra.mxu1 %v20935_v40  ;;  %v21009_v40 = vld [vmem:[%s28537_s5 + $0xec] ss:$16 sps:$4 sm:$0xff]  }
 0x385   : > { %5455 = vmatpush1.bf16.msra.mxu0 %v20938_v42  ;;  %3701 = vmatprep.subr.bf16.mxu1 %v20943_v43  ;;  %v21007_v42 = vld [vmem:[%s28537_s5 + $0xe8] ss:$16 sps:$4 sm:$0xff]  }
 0x386   : > { %5467 = vmatprep.subr.bf16.mxu0 %v20946_v45  ;;  %v21010_v43 = vld [vmem:[#allocation5 + $0x368] ss:$16 sps:$4 sm:$0xff]   ;;  %v21018_v45 = vld [vmem:[#allocation5 + $0x38c] ss:$16 sps:$4 sm:$0xff]  }
 0x388   : > { %5457 = vmatmul.mubr.bf16.vlgmr.msra.gmra.mrb[32].mxu0 %v24142_v18  ;;  %3702 = vmatpush1.bf16.msra.mxu1 %v20941_v44  ;;  %v21015_v44 = vld [vmem:[%s28537_s5 + $0x10c] ss:$16 sps:$4 sm:$0xff]  }
 0x389   : > { %5468 = vmatpush1.bf16.msra.mxu0 %v20944_v46  ;;  %5499 = vmatprep.mubr.bf16.mxu0 %v24109_v1  ;;  %v21013_v46 = vld [vmem:[%s28537_s5 + $0x108] ss:$16 sps:$4 sm:$0xff]  }
 0x38a   : > { %3703 = vmatprep.subr.bf16.mxu1 %v20949_v47  ;;  %5469 = vmatprep.subr.bf16.mxu0 %v20952_v48  ;;  %v21016_v47 = vld [vmem:[#allocation5 + $0x388] ss:$16 sps:$4 sm:$0xff]   ;;  %v21021_v48 = vld [vmem:[%s28537_s5 + $0x12c] ss:$16 sps:$4 sm:$0xff]  }
 0x38c   : > { %3704 = vmatpush1.bf16.msra.mxu1 %v20947_v49  ;;  %v21024_v49 = vld [vmem:[#allocation5 + $0x3ac] ss:$16 sps:$4 sm:$0xff]  }
 0x38d   : > { %5470 = vmatpush1.bf16.msra.mxu0 %v20950_v52  ;;  %3705 = vmatprep.subr.bf16.mxu1 %v20955_v53  ;;  %v21019_v52 = vld [vmem:[%s28537_s5 + $0x128] ss:$16 sps:$4 sm:$0xff]  }
 0x38e   : > { %5471 = vmatprep.subr.bf16.mxu0 %v20958_v56  ;;  %v21022_v53 = vld [vmem:[#allocation5 + $0x3a8] ss:$16 sps:$4 sm:$0xff]   ;;  %v21030_v56 = vld [vmem:[#allocation5 + $0x3cc] ss:$16 sps:$4 sm:$0xff]  }
 0x390   : > { %3706 = vmatpush1.bf16.msra.mxu1 %v20953_v55  ;;  %v21027_v55 = vld [vmem:[%s28537_s5 + $0x14c] ss:$16 sps:$4 sm:$0xff]  }
 0x391   : > { %5472 = vmatpush1.bf16.msra.mxu0 %v20956_v57  ;;  %3707 = vmatprep.subr.bf16.mxu1 %v20961_v58  ;;  %v21025_v57 = vld [vmem:[%s28537_s5 + $0x148] ss:$16 sps:$4 sm:$0xff]  }
 0x392   : > { %5473 = vmatprep.subr.bf16.mxu0 %v20964_v60  ;;  %v21028_v58 = vld [vmem:[#allocation5 + $0x3c8] ss:$16 sps:$4 sm:$0xff]   ;;  %v21036_v60 = vld [vmem:[#allocation5 + $0x3ec] ss:$16 sps:$4 sm:$0xff]  }
 0x394   : > { %3708 = vmatpush1.bf16.msra.mxu1 %v20959_v59  ;;  %v21033_v59 = vld [vmem:[%s28537_s5 + $0x16c] ss:$16 sps:$4 sm:$0xff]  }
 0x395   : > { %5474 = vmatpush1.bf16.msra.mxu0 %v20962_v61  ;;  %3736 = vmatprep.subr.bf16.mxu1 %v20967_v63  ;;  %v21031_v61 = vld [vmem:[%s28537_s5 + $0x168] ss:$16 sps:$4 sm:$0xff]  }
 0x396   : > { %5475 = vmatprep.subr.bf16.mxu0 %v20970_v31  ;;  %v21034_v63 = vld [vmem:[#allocation5 + $0x3e8] ss:$16 sps:$4 sm:$0xff]   ;;  %v21039_v31 = vld [vmem:[%s28537_s5 + $0x18c] ss:$16 sps:$4 sm:$0xff]  }
 0x397   : > { %3726 = vmatmul.mubr.bf16.vlgmr.msra.gmra.mrb[32].mxu1 %v24118_v30 }
 0x398   : > { %3737 = vmatpush1.bf16.msra.mxu1 %v20965_v2  ;;  %3768 = vmatprep.mubr.bf16.mxu1 %v24147_v34  ;;  %v21042_v2 = vld [vmem:[#allocation5 + $0x40c] ss:$16 sps:$4 sm:$0xff]  }
 0x399   : > { %5476 = vmatpush1.bf16.msra.mxu0 %v20968_v50  ;;  %3738 = vmatprep.subr.bf16.mxu1 %v20973_v3  ;;  %v21037_v50 = vld [vmem:[%s28537_s5 + $0x188] ss:$16 sps:$4 sm:$0xff]  }
 0x39a   : > { %5477 = vmatprep.subr.bf16.mxu0 %v20976_v5  ;;  %v21040_v3 = vld [vmem:[#allocation5 + $0x408] ss:$16 sps:$4 sm:$0xff]   ;;  %v21048_v5 = vld [vmem:[#allocation5 + $0x42c] ss:$16 sps:$4 sm:$0xff]  }
 0x39c   : > { %3739 = vmatpush1.bf16.msra.mxu1 %v20971_v4  ;;  %v21045_v4 = vld [vmem:[%s28537_s5 + $0x1ac] ss:$16 sps:$4 sm:$0xff]  }
 0x39d   : > { %5478 = vmatpush1.bf16.msra.mxu0 %v20974_v51  ;;  %3740 = vmatprep.subr.bf16.mxu1 %v20979_v6  ;;  %v21043_v51 = vld [vmem:[%s28537_s5 + $0x1a8] ss:$16 sps:$4 sm:$0xff]  }
 0x39e   : > { %5479 = vmatprep.subr.bf16.mxu0 %v20982_v8  ;;  %v21046_v6 = vld [vmem:[#allocation5 + $0x428] ss:$16 sps:$4 sm:$0xff]   ;;  %v21054_v8 = vld [vmem:[#allocation5 + $0x44c] ss:$16 sps:$4 sm:$0xff]  }
 0x3a0   : > { %3741 = vmatpush1.bf16.msra.mxu1 %v20977_v7  ;;  %v21051_v7 = vld [vmem:[%s28537_s5 + $0x1cc] ss:$16 sps:$4 sm:$0xff]  }
 0x3a1   : > { %5480 = vmatpush1.bf16.msra.mxu0 %v20980_v9  ;;  %3742 = vmatprep.subr.bf16.mxu1 %v20985_v11  ;;  %v21049_v9 = vld [vmem:[%s28537_s5 + $0x1c8] ss:$16 sps:$4 sm:$0xff]  }
 0x3a2   : > { %5481 = vmatprep.subr.bf16.mxu0 %v20988_v16  ;;  %v21052_v11 = vld [vmem:[#allocation5 + $0x448] ss:$16 sps:$4 sm:$0xff]   ;;  %v21057_v16 = vld [vmem:[%s28537_s5 + $0x1ec] ss:$16 sps:$4 sm:$0xff]  }
 0x3a4   : > { %3743 = vmatpush1.bf16.msra.mxu1 %v20983_v17  ;;  %v21060_v17 = vld [vmem:[#allocation5 + $0x46c] ss:$16 sps:$4 sm:$0xff]  }
 0x3a5   : > { %5482 = vmatpush1.bf16.msra.mxu0 %v20986_v19  ;;  %3744 = vmatprep.subr.bf16.mxu1 %v20991_v21  ;;  %v21055_v19 = vld [vmem:[%s28537_s5 + $0x1e8] ss:$16 sps:$4 sm:$0xff]  }
 0x3a6   : > { %5483 = vmatprep.subr.bf16.mxu0 %v20994_v23  ;;  %v21058_v21 = vld [vmem:[#allocation5 + $0x468] ss:$16 sps:$4 sm:$0xff]   ;;  %v21066_v23 = vld [vmem:[#allocation5 + $0x48c] ss:$16 sps:$4 sm:$0xff]  }
 0x3a8   : > { %3745 = vmatpush1.bf16.msra.mxu1 %v20989_v22  ;;  %v21063_v22 = vld [vmem:[#allocation5 + $0x4] ss:$16 sps:$4 sm:$0xff]  }
 0x3a9   : > { %5484 = vmatpush1.bf16.msra.mxu0 %v20992_v24  ;;  %3746 = vmatprep.subr.bf16.mxu1 %v20997_v26  ;;  %v21061_v24 = vld [vmem:[#allocation5] ss:$16 sps:$4 sm:$0xff]   ;;  %v21064_v26 = vld [vmem:[#allocation5 + $0x488] ss:$16 sps:$4 sm:$0xff]  }
 0x3aa   : > { %5485 = vmatprep.subr.bf16.mxu0 %v21000_v27  ;;  %v21069_v27 = vld [vmem:[#allocation5 + $0x24] ss:$16 sps:$4 sm:$0xff]  }
 0x3ac   : > { %3747 = vmatpush1.bf16.msra.mxu1 %v20995_v20  ;;  %v21067_v20 = vld [vmem:[#allocation5 + $0x20] ss:$16 sps:$4 sm:$0xff]  }
 0x3ad   : > { %5486 = vmatpush1.bf16.msra.mxu0 %v20998_v29  ;;  %3748 = vmatprep.subr.bf16.mxu1 %v21003_v32  ;;  %v21072_v29 = vld [vmem:[#allocation5 + $0x4ac] ss:$16 sps:$4 sm:$0xff]   ;;  %v21070_v32 = vld [vmem:[#allocation5 + $0x4a8] ss:$16 sps:$4 sm:$0xff]  }
 0x3ae   : > { %5487 = vmatprep.subr.bf16.mxu0 %v21006_v35  ;;  %v21075_v35 = vld [vmem:[#allocation5 + $0x44] ss:$16 sps:$4 sm:$0xff]  }
 0x3b0   : > { %3749 = vmatpush1.bf16.msra.mxu1 %v21001_v37  ;;  %v21078_v37 = vld [vmem:[#allocation5 + $0x4cc] ss:$16 sps:$4 sm:$0xff]  }
 0x3b1   : > { %5488 = vmatpush1.bf16.msra.mxu0 %v21004_v38  ;;  %3750 = vmatprep.subr.bf16.mxu1 %v21009_v40  ;;  %v21073_v38 = vld [vmem:[#allocation5 + $0x40] ss:$16 sps:$4 sm:$0xff]   ;;  %v21076_v40 = vld [vmem:[#allocation5 + $0x4c8] ss:$16 sps:$4 sm:$0xff]  }
 0x3b2   : > { %5489 = vmatprep.subr.bf16.mxu0 %v21012_v41  ;;  %v21081_v41 = vld [vmem:[#allocation5 + $0x64] ss:$16 sps:$4 sm:$0xff]  }
 0x3b4   : > { %3751 = vmatpush1.bf16.msra.mxu1 %v21007_v42  ;;  %v21084_v42 = vld [vmem:[#allocation5 + $0x4ec] ss:$16 sps:$4 sm:$0xff]  }
 0x3b5   : > { %5490 = vmatpush1.bf16.msra.mxu0 %v21010_v43  ;;  %3752 = vmatprep.subr.bf16.mxu1 %v21015_v44  ;;  %v21079_v43 = vld [vmem:[#allocation5 + $0x60] ss:$16 sps:$4 sm:$0xff]   ;;  %v21082_v44 = vld [vmem:[#allocation5 + $0x4e8] ss:$16 sps:$4 sm:$0xff]  }
 0x3b6   : > { %5491 = vmatprep.subr.bf16.mxu0 %v21018_v45  ;;  %v21087_v45 = vld [vmem:[#allocation5 + $0x84] ss:$16 sps:$4 sm:$0xff]  }
 0x3b8   : > { %3753 = vmatpush1.bf16.msra.mxu1 %v21013_v46  ;;  %v21090_v46 = vld [vmem:[#allocation5 + $0x50c] ss:$16 sps:$4 sm:$0xff]  }
 0x3b9   : > { %5492 = vmatpush1.bf16.msra.mxu0 %v21016_v47  ;;  %3754 = vmatprep.subr.bf16.mxu1 %v21021_v48  ;;  %v21088_v47 = vld [vmem:[#allocation5 + $0x508] ss:$16 sps:$4 sm:$0xff]   ;;  %v21093_v48 = vld [vmem:[#allocation5 + $0xa4] ss:$16 sps:$4 sm:$0xff]  }
 0x3ba   : > { %5493 = vmatprep.subr.bf16.mxu0 %v21024_v49  ;;  %v21096_v49 = vld [vmem:[#allocation5 + $0x52c] ss:$16 sps:$4 sm:$0xff]  }
 0x3bc   : > { %3755 = vmatpush1.bf16.msra.mxu1 %v21019_v52  ;;  %v21091_v52 = vld [vmem:[#allocation5 + $0xa0] ss:$16 sps:$4 sm:$0xff]  }
 0x3bd   : > { %5494 = vmatpush1.bf16.msra.mxu0 %v21022_v53  ;;  %3756 = vmatprep.subr.bf16.mxu1 %v21027_v55  ;;  %v21094_v53 = vld [vmem:[#allocation5 + $0x528] ss:$16 sps:$4 sm:$0xff]   ;;  %v21099_v55 = vld [vmem:[#allocation5 + $0xc4] ss:$16 sps:$4 sm:$0xff]  }
 0x3be   : > { %5495 = vmatprep.subr.bf16.mxu0 %v21030_v56  ;;  %v21097_v56 = vld [vmem:[#allocation5 + $0xc0] ss:$16 sps:$4 sm:$0xff]  }
 0x3c0   : > { %3757 = vmatpush1.bf16.msra.mxu1 %v21025_v57  ;;  %v21102_v57 = vld [vmem:[#allocation5 + $0x54c] ss:$16 sps:$4 sm:$0xff]  }
 0x3c1   : > { %5496 = vmatpush1.bf16.msra.mxu0 %v21028_v58  ;;  %3758 = vmatprep.subr.bf16.mxu1 %v21033_v59  ;;  %v21100_v58 = vld [vmem:[#allocation5 + $0x548] ss:$16 sps:$4 sm:$0xff]   ;;  %v21105_v59 = vld [vmem:[#allocation5 + $0xe4] ss:$16 sps:$4 sm:$0xff]  }
 0x3c2   : > { %5497 = vmatprep.subr.bf16.mxu0 %v21036_v60  ;;  %v21108_v60 = vld [vmem:[#allocation5 + $0x56c] ss:$16 sps:$4 sm:$0xff]  }
 0x3c4   : > { %3759 = vmatpush1.bf16.msra.mxu1 %v21031_v61  ;;  %v21103_v61 = vld [vmem:[#allocation5 + $0xe0] ss:$16 sps:$4 sm:$0xff]  }
 0x3c5   : > { %5498 = vmatpush1.bf16.msra.mxu0 %v21034_v63  ;;  %3760 = vmatprep.subr.bf16.mxu1 %v21039_v31  ;;  %v21106_v63 = vld [vmem:[#allocation5 + $0x568] ss:$16 sps:$4 sm:$0xff]   ;;  %v21111_v31 = vld [vmem:[#allocation5 + $0x104] ss:$16 sps:$4 sm:$0xff]  }
 0x3c6   : > { %5510 = vmatprep.subr.bf16.mxu0 %v21042_v2  ;;  %v21114_v2 = vld [vmem:[#allocation5 + $0x58c] ss:$16 sps:$4 sm:$0xff]  }
 0x3c8   : > { %5500 = vmatmul.mubr.bf16.vlgmr.msra.gmra.mrb[32].mxu0 %v24107_v62  ;;  %3761 = vmatpush1.bf16.msra.mxu1 %v21037_v50  ;;  %v21109_v50 = vld [vmem:[#allocation5 + $0x100] ss:$16 sps:$4 sm:$0xff]  }
 0x3c9   : > { %5511 = vmatpush1.bf16.msra.mxu0 %v21040_v3  ;;  %5542 = vmatprep.mubr.bf16.mxu0 %v24175_v13  ;;  %v21112_v3 = vld [vmem:[#allocation5 + $0x588] ss:$16 sps:$4 sm:$0xff]  }
 0x3ca   : > { %3762 = vmatprep.subr.bf16.mxu1 %v21045_v4  ;;  %5512 = vmatprep.subr.bf16.mxu0 %v21048_v5  ;;  %v21117_v4 = vld [vmem:[#allocation5 + $0x124] ss:$16 sps:$4 sm:$0xff]   ;;  %v21120_v5 = vld [vmem:[#allocation5 + $0x5ac] ss:$16 sps:$4 sm:$0xff]  }
 0x3cc   : > { %3763 = vmatpush1.bf16.msra.mxu1 %v21043_v51  ;;  %v21115_v51 = vld [vmem:[#allocation5 + $0x120] ss:$16 sps:$4 sm:$0xff]  }
 0x3cd   : > { %5513 = vmatpush1.bf16.msra.mxu0 %v21046_v6  ;;  %3764 = vmatprep.subr.bf16.mxu1 %v21051_v7  ;;  %v21118_v6 = vld [vmem:[#allocation5 + $0x5a8] ss:$16 sps:$4 sm:$0xff]   ;;  %v21123_v7 = vld [vmem:[#allocation5 + $0x144] ss:$16 sps:$4 sm:$0xff]  }
 0x3ce   : > { %5514 = vmatprep.subr.bf16.mxu0 %v21054_v8  ;;  %v21126_v8 = vld [vmem:[#allocation5 + $0x5cc] ss:$16 sps:$4 sm:$0xff]  }
 0x3d0   : > { %3765 = vmatpush1.bf16.msra.mxu1 %v21049_v9  ;;  %v21121_v9 = vld [vmem:[#allocation5 + $0x140] ss:$16 sps:$4 sm:$0xff]  }
 0x3d1   : > { %5515 = vmatpush1.bf16.msra.mxu0 %v21052_v11  ;;  %3766 = vmatprep.subr.bf16.mxu1 %v21057_v16  ;;  %v21124_v11 = vld [vmem:[#allocation5 + $0x5c8] ss:$16 sps:$4 sm:$0xff]   ;;  %v21129_v16 = vld [vmem:[#allocation5 + $0x164] ss:$16 sps:$4 sm:$0xff]  }
 0x3d2   : > { %5516 = vmatprep.subr.bf16.mxu0 %v21060_v17  ;;  %v21132_v17 = vld [vmem:[#allocation5 + $0x5ec] ss:$16 sps:$4 sm:$0xff]  }
 0x3d4   : > { %3767 = vmatpush1.bf16.msra.mxu1 %v21055_v19  ;;  %v21127_v19 = vld [vmem:[#allocation5 + $0x160] ss:$16 sps:$4 sm:$0xff]  }
 0x3d5   : > { %5517 = vmatpush1.bf16.msra.mxu0 %v21058_v21  ;;  %5252 = vmatprep.subr.bf16.mxu1 %v21063_v22  ;;  %v21130_v21 = vld [vmem:[#allocation5 + $0x5e8] ss:$16 sps:$4 sm:$0xff]   ;;  %v21135_v22 = vld [vmem:[#allocation5 + $0x184] ss:$16 sps:$4 sm:$0xff]  }
 0x3d6   : > { %5518 = vmatprep.subr.bf16.mxu0 %v21066_v23  ;;  %v21138_v23 = vld [vmem:[#allocation5 + $0x60c] ss:$16 sps:$4 sm:$0xff]  }
 0x3d7   : > { %3769 = vmatmul.mubr.bf16.vlgmr.msra.gmra.mrb[36].mxu1 %v24142_v18 }
 0x3d8   : > { %5253 = vmatpush1.bf16.msra.mxu1 %v21061_v24  ;;  %5284 = vmatprep.mubr.bf16.mxu1 %v24147_v34  ;;  %v21085_v34 = vld [vmem:[#allocation5 + $0x80] ss:$16 sps:$4 sm:$0xff]  }
 0x3d9   : > { %5519 = vmatpush1.bf16.msra.mxu0 %v21064_v26  ;;  %5254 = vmatprep.subr.bf16.mxu1 %v21069_v27  ;;  %v21133_v24 = vld [vmem:[#allocation5 + $0x180] ss:$16 sps:$4 sm:$0xff]   ;;  %v21136_v26 = vld [vmem:[#allocation5 + $0x608] ss:$16 sps:$4 sm:$0xff]   ;;  %v21141_v27 = vld [vmem:[#allocation5 + $0x1a4] ss:$16 sps:$4 sm:$0xff]  }
 0x3da   : > { %5520 = vmatprep.subr.bf16.mxu0 %v21072_v29  ;;  %v21139_v29 = vld [vmem:[#allocation5 + $0x1a0] ss:$16 sps:$4 sm:$0xff]  }
 0x3dc   : > { %5255 = vmatpush1.bf16.msra.mxu1 %v21067_v20  ;;  %v21144_v20 = vld [vmem:[#allocation5 + $0x62c] ss:$16 sps:$4 sm:$0xff]  }
 0x3dd   : > { %5521 = vmatpush1.bf16.msra.mxu0 %v21070_v32  ;;  %5256 = vmatprep.subr.bf16.mxu1 %v21075_v35  ;;  %v21142_v32 = vld [vmem:[#allocation5 + $0x628] ss:$16 sps:$4 sm:$0xff]   ;;  %v21147_v35 = vld [vmem:[#allocation5 + $0x1c4] ss:$16 sps:$4 sm:$0xff]  }
 0x3de   : > { %5522 = vmatprep.subr.bf16.mxu0 %v21078_v37  ;;  %v21150_v37 = vld [vmem:[#allocation5 + $0x64c] ss:$16 sps:$4 sm:$0xff]  }
 0x3e0   : > { %5257 = vmatpush1.bf16.msra.mxu1 %v21073_v38  ;;  %v21145_v38 = vld [vmem:[#allocation5 + $0x1c0] ss:$16 sps:$4 sm:$0xff]  }
 0x3e1   : > { %5523 = vmatpush1.bf16.msra.mxu0 %v21076_v40  ;;  %5258 = vmatprep.subr.bf16.mxu1 %v21081_v41  ;;  %v21148_v40 = vld [vmem:[#allocation5 + $0x648] ss:$16 sps:$4 sm:$0xff]   ;;  %v21153_v41 = vld [vmem:[#allocation5 + $0x1e4] ss:$16 sps:$4 sm:$0xff]  }
 0x3e2   : > { %5524 = vmatprep.subr.bf16.mxu0 %v21084_v42  ;;  %v21156_v42 = vld [vmem:[#allocation5 + $0x66c] ss:$16 sps:$4 sm:$0xff]  }
 0x3e4   : > { %5259 = vmatpush1.bf16.msra.mxu1 %v21079_v43  ;;  %v21151_v43 = vld [vmem:[#allocation5 + $0x1e0] ss:$16 sps:$4 sm:$0xff]  }
 0x3e5   : > { %5525 = vmatpush1.bf16.msra.mxu0 %v21082_v44  ;;  %5260 = vmatprep.subr.bf16.mxu1 %v21087_v45  ;;  %v21154_v44 = vld [vmem:[#allocation5 + $0x668] ss:$16 sps:$4 sm:$0xff]   ;;  %v21159_v45 = vld [vmem:[#allocation5 + $0x204] ss:$16 sps:$4 sm:$0xff]  }
 0x3e6   : > { %5526 = vmatprep.subr.bf16.mxu0 %v21090_v46  ;;  %v21162_v46 = vld [vmem:[#allocation5 + $0x68c] ss:$16 sps:$4 sm:$0xff]  }
 0x3e8   : > { %5261 = vmatpush1.bf16.msra.mxu1 %v21085_v34  ;;  %v21157_v34 = vld [vmem:[#allocation5 + $0x200] ss:$16 sps:$4 sm:$0xff]  }
 0x3e9   : > { %5527 = vmatpush1.bf16.msra.mxu0 %v21088_v47  ;;  %5262 = vmatprep.subr.bf16.mxu1 %v21093_v48  ;;  %v21160_v47 = vld [vmem:[#allocation5 + $0x688] ss:$16 sps:$4 sm:$0xff]   ;;  %v21165_v48 = vld [vmem:[#allocation5 + $0x224] ss:$16 sps:$4 sm:$0xff]  }
 0x3ea   : > { %5528 = vmatprep.subr.bf16.mxu0 %v21096_v49  ;;  %v21168_v49 = vld [vmem:[#allocation5 + $0x6ac] ss:$16 sps:$4 sm:$0xff]  }
 0x3ec   : > { %5263 = vmatpush1.bf16.msra.mxu1 %v21091_v52  ;;  %v21163_v52 = vld [vmem:[#allocation5 + $0x220] ss:$16 sps:$4 sm:$0xff]  }
 0x3ed   : > { %5529 = vmatpush1.bf16.msra.mxu0 %v21094_v53  ;;  %5264 = vmatprep.subr.bf16.mxu1 %v21099_v55  ;;  %v21166_v53 = vld [vmem:[#allocation5 + $0x6a8] ss:$16 sps:$4 sm:$0xff]   ;;  %v21171_v55 = vld [vmem:[#allocation5 + $0x244] ss:$16 sps:$4 sm:$0xff]  }
 0x3ee   : > { %5530 = vmatprep.subr.bf16.mxu0 %v21102_v57  ;;  %v21169_v57 = vld [vmem:[#allocation5 + $0x240] ss:$16 sps:$4 sm:$0xff]  }
 0x3f0   : > { %5265 = vmatpush1.bf16.msra.mxu1 %v21097_v56  ;;  %v21174_v56 = vld [vmem:[#allocation5 + $0x6cc] ss:$16 sps:$4 sm:$0xff]  }
 0x3f1   : > { %5531 = vmatpush1.bf16.msra.mxu0 %v21100_v58  ;;  %5266 = vmatprep.subr.bf16.mxu1 %v21105_v59  ;;  %v21172_v59 = vld [vmem:[#allocation5 + $0x6c8] ss:$16 sps:$4 sm:$0xff]  }
 0x3f2   : > { %5532 = vmatprep.subr.bf16.mxu0 %v21108_v60 }
 0x3f4   : > { %5267 = vmatpush1.bf16.msra.mxu1 %v21103_v61  ;;  %v21177_v61 = vld [vmem:[#allocation5 + $0x264] ss:$16 sps:$4 sm:$0xff]  }
 0x3f5   : > { %5533 = vmatpush1.bf16.msra.mxu0 %v21106_v63  ;;  %5268 = vmatprep.subr.bf16.mxu1 %v21111_v31  ;;  %v21180_v63 = vld [vmem:[#allocation5 + $0x6ec] ss:$16 sps:$4 sm:$0xff]  }
 0x3f6   : > { %5534 = vmatprep.subr.bf16.mxu0 %v21114_v2  ;;  %v21178_v2 = vld [vmem:[#allocation5 + $0x6e8] ss:$16 sps:$4 sm:$0xff]  }
 0x3f8   : > { %5269 = vmatpush1.bf16.msra.mxu1 %v21109_v50  ;;  %v21183_v50 = vld [vmem:[#allocation5 + $0x284] ss:$16 sps:$4 sm:$0xff]  }
 0x3f9   : > { %5535 = vmatpush1.bf16.msra.mxu0 %v21112_v3  ;;  %5270 = vmatprep.subr.bf16.mxu1 %v21117_v4  ;;  %v21181_v3 = vld [vmem:[#allocation5 + $0x280] ss:$16 sps:$4 sm:$0xff]   ;;  %v21186_v4 = vld [vmem:[#allocation5 + $0x2a4] ss:$16 sps:$4 sm:$0xff]  }
 0x3fa   : > { %5536 = vmatprep.subr.bf16.mxu0 %v21120_v5  ;;  %v21184_v5 = vld [vmem:[#allocation5 + $0x2a0] ss:$16 sps:$4 sm:$0xff]  }
 0x3fc   : > { %5271 = vmatpush1.bf16.msra.mxu1 %v21115_v51  ;;  %v21189_v51 = vld [vmem:[#allocation5 + $0x2c4] ss:$16 sps:$4 sm:$0xff]  }
 0x3fd   : > { %5537 = vmatpush1.bf16.msra.mxu0 %v21118_v6  ;;  %5272 = vmatprep.subr.bf16.mxu1 %v21123_v7  ;;  %v21187_v6 = vld [vmem:[#allocation5 + $0x2c0] ss:$16 sps:$4 sm:$0xff]   ;;  %v21192_v7 = vld [vmem:[#allocation5 + $0x2e4] ss:$16 sps:$4 sm:$0xff]  }
 0x3fe   : > { %5538 = vmatprep.subr.bf16.mxu0 %v21126_v8  ;;  %v21190_v8 = vld [vmem:[#allocation5 + $0x2e0] ss:$16 sps:$4 sm:$0xff]  }
 0x400   : > { %5273 = vmatpush1.bf16.msra.mxu1 %v21121_v9  ;;  %v21195_v9 = vld [vmem:[#allocation5 + $0x304] ss:$16 sps:$4 sm:$0xff]  }
 0x401   : > { %5539 = vmatpush1.bf16.msra.mxu0 %v21124_v11  ;;  %5274 = vmatprep.subr.bf16.mxu1 %v21129_v16  ;;  %v21193_v11 = vld [vmem:[#allocation5 + $0x300] ss:$16 sps:$4 sm:$0xff]   ;;  %v21198_v16 = vld [vmem:[#allocation5 + $0x324] ss:$16 sps:$4 sm:$0xff]  }
 0x402   : > { %5540 = vmatprep.subr.bf16.mxu0 %v21132_v17  ;;  %v21196_v17 = vld [vmem:[#allocation5 + $0x320] ss:$16 sps:$4 sm:$0xff]  }
 0x404   : > { %5275 = vmatpush1.bf16.msra.mxu1 %v21127_v19  ;;  %v21201_v19 = vld [vmem:[#allocation5 + $0x344] ss:$16 sps:$4 sm:$0xff]  }
 0x405   : > { %5541 = vmatpush1.bf16.msra.mxu0 %v21130_v21  ;;  %5276 = vmatprep.subr.bf16.mxu1 %v21135_v22  ;;  %v21199_v21 = vld [vmem:[#allocation5 + $0x340] ss:$16 sps:$4 sm:$0xff]   ;;  %v21204_v22 = vld [vmem:[#allocation5 + $0x364] ss:$16 sps:$4 sm:$0xff]  }
 0x406   : > { %5553 = vmatprep.subr.bf16.mxu0 %v21138_v23  ;;  %v21202_v23 = vld [vmem:[#allocation5 + $0x360] ss:$16 sps:$4 sm:$0xff]  }
 0x408   : > { %5543 = vmatmul.mubr.bf16.vlgmr.msra.gmra.mrb[32].mxu0 %v24173_v54  ;;  %5277 = vmatpush1.bf16.msra.mxu1 %v21133_v24  ;;  %v21207_v24 = vld [vmem:[#allocation5 + $0x384] ss:$16 sps:$4 sm:$0xff]  }
 0x409   : > { %5554 = vmatpush1.bf16.msra.mxu0 %v21136_v26  ;;  %5278 = vmatprep.subr.bf16.mxu1 %v21141_v27  ;;  %v21205_v26 = vld [vmem:[#allocation5 + $0x380] ss:$16 sps:$4 sm:$0xff]   ;;  %v21210_v27 = vld [vmem:[#allocation5 + $0x3a4] ss:$16 sps:$4 sm:$0xff]  }
 0x40a   : > { %5555 = vmatprep.subr.bf16.mxu0 %v21144_v20  ;;  %5585 = vmatprep.mubr.bf16.mxu0 %v23387_v0  ;;  %v21208_v20 = vld [vmem:[#allocation5 + $0x3a0] ss:$16 sps:$4 sm:$0xff]  }
 0x40c   : > { %5279 = vmatpush1.bf16.msra.mxu1 %v21139_v29  ;;  %v21213_v29 = vld [vmem:[#allocation5 + $0x3c4] ss:$16 sps:$4 sm:$0xff]  }
 0x40d   : > { %5556 = vmatpush1.bf16.msra.mxu0 %v21142_v32  ;;  %5280 = vmatprep.subr.bf16.mxu1 %v21147_v35  ;;  %v21211_v32 = vld [vmem:[#allocation5 + $0x3c0] ss:$16 sps:$4 sm:$0xff]   ;;  %v21216_v35 = vld [vmem:[#allocation5 + $0x3e4] ss:$16 sps:$4 sm:$0xff]  }
 0x40e   : > { %5557 = vmatprep.subr.bf16.mxu0 %v21150_v37  ;;  %v21214_v37 = vld [vmem:[#allocation5 + $0x3e0] ss:$16 sps:$4 sm:$0xff]  }
 0x410   : > { %5281 = vmatpush1.bf16.msra.mxu1 %v21145_v38  ;;  %v21219_v38 = vld [vmem:[#allocation5 + $0x404] ss:$16 sps:$4 sm:$0xff]  }
 0x411   : > { %5558 = vmatpush1.bf16.msra.mxu0 %v21148_v40  ;;  %5282 = vmatprep.subr.bf16.mxu1 %v21153_v41  ;;  %v21217_v40 = vld [vmem:[#allocation5 + $0x400] ss:$16 sps:$4 sm:$0xff]   ;;  %v21222_v41 = vld [vmem:[#allocation5 + $0x424] ss:$16 sps:$4 sm:$0xff]  }
 0x412   : > { %5559 = vmatprep.subr.bf16.mxu0 %v21156_v42  ;;  %v21220_v42 = vld [vmem:[#allocation5 + $0x420] ss:$16 sps:$4 sm:$0xff]  }
 0x414   : > { %5283 = vmatpush1.bf16.msra.mxu1 %v21151_v43  ;;  %v21225_v43 = vld [vmem:[#allocation5 + $0x444] ss:$16 sps:$4 sm:$0xff]  }
 0x415   : > { %5560 = vmatpush1.bf16.msra.mxu0 %v21154_v44  ;;  %5295 = vmatprep.subr.bf16.mxu1 %v21159_v45  ;;  %v21223_v44 = vld [vmem:[#allocation5 + $0x440] ss:$16 sps:$4 sm:$0xff]   ;;  %v21228_v45 = vld [vmem:[#allocation5 + $0x464] ss:$16 sps:$4 sm:$0xff]  }
 0x416   : > { %5561 = vmatprep.subr.bf16.mxu0 %v21162_v46  ;;  %v21226_v46 = vld [vmem:[#allocation5 + $0x460] ss:$16 sps:$4 sm:$0xff]  }
 0x417   : > { %5285 = vmatmul.mubr.bf16.vlgmr.msra.gmra.mrb[40].mxu1 %v24142_v18 }
 0x418   : > { %5296 = vmatpush1.bf16.msra.mxu1 %v21157_v34  ;;  %5327 = vmatprep.mubr.bf16.mxu1 %v24109_v1  ;;  %v21175_v1 = vld [vmem:[#allocation5 + $0x260] ss:$16 sps:$4 sm:$0xff]   ;;  %v21231_v34 = vld [vmem:[#allocation5 + $0x484] ss:$16 sps:$4 sm:$0xff]  }
 0x419   : > { %5562 = vmatpush1.bf16.msra.mxu0 %v21160_v47  ;;  %5297 = vmatprep.subr.bf16.mxu1 %v21165_v48  ;;  %v21229_v47 = vld [vmem:[#allocation5 + $0x480] ss:$16 sps:$4 sm:$0xff]   ;;  %v21234_v48 = vld [vmem:[#allocation5 + $0x4a4] ss:$16 sps:$4 sm:$0xff]  }
 0x41a   : > { %5563 = vmatprep.subr.bf16.mxu0 %v21168_v49  ;;  %v21237_v49 = vld [vmem:[#allocation5 + $0x4c4] ss:$16 sps:$4 sm:$0xff]  }
 0x41b   : > { %v24618_v58 = vpop.f32.mrb[28].mxu0 }
 0x41c   : > { %v24620_v60 = vpop.f32.mrb[29].mxu0  ;;  %5298 = vmatpush1.bf16.msra.mxu1 %v21163_v52 }
 0x41d   : > { %v24622_v31 = vpop.f32.mrb[30].mxu0  ;;  %5564 = vmatpush1.bf16.msra.mxu0 %v21166_v53  ;;  %5299 = vmatprep.subr.bf16.mxu1 %v21171_v55  ;;  %v21235_v55 = vld [vmem:[#allocation5 + $0x4c0] ss:$16 sps:$4 sm:$0xff]  }
 0x41e   : > { %v24624_v18 = vpop.f32.mrb[31].mxu0  ;;  %5565 = vmatprep.subr.bf16.mxu0 %v21174_v56 }
 0x420   : > { %5300 = vmatpush1.bf16.msra.mxu1 %v21169_v57  ;;  %v21240_v57 = vld [vmem:[#allocation5 + $0x4e4] ss:$16 sps:$4 sm:$0xff]  }
 0x421   : > { %5566 = vmatpush1.bf16.msra.mxu0 %v21172_v59  ;;  %5301 = vmatprep.subr.bf16.mxu1 %v21177_v61  ;;  %v21238_v59 = vld [vmem:[#allocation5 + $0x4e0] ss:$16 sps:$4 sm:$0xff]   ;;  %v21243_v61 = vld [vmem:[#allocation5 + $0x504] ss:$16 sps:$4 sm:$0xff]  }
 0x422   : > { %5567 = vmatprep.subr.bf16.mxu0 %v21180_v63  ;;  %v21241_v63 = vld [vmem:[#allocation5 + $0x500] ss:$16 sps:$4 sm:$0xff]  }
 0x424   : > { %5302 = vmatpush1.bf16.msra.mxu1 %v21175_v1  ;;  %v21246_v1 = vld [vmem:[#allocation5 + $0x524] ss:$16 sps:$4 sm:$0xff]  }
 0x425   : > { %5568 = vmatpush1.bf16.msra.mxu0 %v21178_v2  ;;  %5303 = vmatprep.subr.bf16.mxu1 %v21183_v50  ;;  %v21244_v2 = vld [vmem:[#allocation5 + $0x520] ss:$16 sps:$4 sm:$0xff]   ;;  %v21249_v50 = vld [vmem:[#allocation5 + $0x544] ss:$16 sps:$4 sm:$0xff]  }
 0x428   : > { %5586 = vmatmul.mubr.bf16.vlgmr.msra.gmra.mrb[32].mxu0 %v24118_v30  ;;  %5304 = vmatpush1.bf16.msra.mxu1 %v21181_v3  ;;  %v21247_v3 = vld [vmem:[#allocation5 + $0x540] ss:$16 sps:$4 sm:$0xff]  }
 0x429   : > { %5305 = vmatprep.subr.bf16.mxu1 %v21186_v4  ;;  %v21252_v4 = vld [vmem:[#allocation5 + $0x564] ss:$16 sps:$4 sm:$0xff]  }
 0x42c   : > { %5306 = vmatpush1.bf16.msra.mxu1 %v21184_v5  ;;  %v21250_v5 = vld [vmem:[#allocation5 + $0x560] ss:$16 sps:$4 sm:$0xff]  }
 0x42d   : > { %5307 = vmatprep.subr.bf16.mxu1 %v21189_v51  ;;  %v21255_v51 = vld [vmem:[#allocation5 + $0x584] ss:$16 sps:$4 sm:$0xff]  }
 0x430   : > { %5308 = vmatpush1.bf16.msra.mxu1 %v21187_v6  ;;  %v21292_v6 = vld [vmem:[%s28541_s9 + $0x708] ss:$28 sps:$4 sm:$0xff]  }
 0x431   : > { %5309 = vmatprep.subr.bf16.mxu1 %v21192_v7  ;;  %v21294_v7 = vld [vmem:[%s28541_s9 + $0x70c] ss:$28 sps:$4 sm:$0xff]  }
 0x432   : > { %7140 = vmatprep.subr.bf16.mxu0 %v21294_v7 }
 0x433   : > { %7141 = vmatpush1.bf16.msra.mxu0 %v21292_v6 }
 0x434   : > { %5310 = vmatpush1.bf16.msra.mxu1 %v21190_v8  ;;  %v21300_v8 = vld [vmem:[%s28541_s9 + $0x744] ss:$28 sps:$4 sm:$0xff]  }
 0x435   : > { %5311 = vmatprep.subr.bf16.mxu1 %v21195_v9  ;;  %v21253_v9 = vld [vmem:[#allocation5 + $0x580] ss:$16 sps:$4 sm:$0xff]   ;;  %7142 = vmatprep.subr.bf16.mxu0 %v21300_v8 }
 0x438   : > { %5312 = vmatpush1.bf16.msra.mxu1 %v21193_v11  ;;  %v21258_v11 = vld [vmem:[#allocation5 + $0x5a4] ss:$16 sps:$4 sm:$0xff]  }
 0x439   : > { %5313 = vmatprep.subr.bf16.mxu1 %v21198_v16  ;;  %v21298_v16 = vld [vmem:[%s28541_s9 + $0x740] ss:$28 sps:$4 sm:$0xff]  }
 0x43a   : > { %7143 = vmatpush1.bf16.msra.mxu0 %v21298_v16 }
 0x43c   : > { %5314 = vmatpush1.bf16.msra.mxu1 %v21196_v17  ;;  %v21306_v17 = vld [vmem:[%s28541_s9 + $0x77c] ss:$28 sps:$4 sm:$0xff]  }
 0x43d   : > { %5315 = vmatprep.subr.bf16.mxu1 %v21201_v19  ;;  %v21256_v19 = vld [vmem:[#allocation5 + $0x5a0] ss:$16 sps:$4 sm:$0xff]   ;;  %7144 = vmatprep.subr.bf16.mxu0 %v21306_v17  ;;  %v21288_v17 = vld [vmem:[#allocation5 + $0x6e4] ss:$16 sps:$4 sm:$0xff]  }
 0x440   : > { %5316 = vmatpush1.bf16.msra.mxu1 %v21199_v21  ;;  %v21261_v21 = vld [vmem:[#allocation5 + $0x5c4] ss:$16 sps:$4 sm:$0xff]  }
 0x441   : > { %5317 = vmatprep.subr.bf16.mxu1 %v21204_v22  ;;  %v21304_v22 = vld [vmem:[%s28541_s9 + $0x778] ss:$28 sps:$4 sm:$0xff]  }
 0x442   : > { %7145 = vmatpush1.bf16.msra.mxu0 %v21304_v22  ;;  %v21364_v22 = vld [vmem:[%s28541_s9 + $0x9a8] ss:$28 sps:$4 sm:$0xff]  }
 0x444   : > { %5318 = vmatpush1.bf16.msra.mxu1 %v21202_v23  ;;  %v21312_v23 = vld [vmem:[%s28541_s9 + $0x7b4] ss:$28 sps:$4 sm:$0xff]  }
 0x445   : > { %5319 = vmatprep.subr.bf16.mxu1 %v21207_v24  ;;  %v21259_v24 = vld [vmem:[#allocation5 + $0x5c0] ss:$16 sps:$4 sm:$0xff]   ;;  %7146 = vmatprep.subr.bf16.mxu0 %v21312_v23 }
 0x446   : > { %v21289_v23 = vld [vmem:[%s28541_s9 + $0x700] ss:$28 sps:$4 sm:$0xff]  }
 0x448   : > { %5320 = vmatpush1.bf16.msra.mxu1 %v21205_v26  ;;  %v21264_v26 = vld [vmem:[#allocation5 + $0x5e4] ss:$16 sps:$4 sm:$0xff]  }
 0x449   : > { %5321 = vmatprep.subr.bf16.mxu1 %v21210_v27  ;;  %v21310_v27 = vld [vmem:[%s28541_s9 + $0x7b0] ss:$28 sps:$4 sm:$0xff]  }
 0x44a   : > { %7147 = vmatpush1.bf16.msra.mxu0 %v21310_v27  ;;  %v21295_v27 = vld [vmem:[%s28541_s9 + $0x738] ss:$28 sps:$4 sm:$0xff]  }
 0x44c   : > { %5322 = vmatpush1.bf16.msra.mxu1 %v21208_v20  ;;  %v21318_v20 = vld [vmem:[%s28541_s9 + $0x7ec] ss:$28 sps:$4 sm:$0xff]  }
 0x44d   : > { %5323 = vmatprep.subr.bf16.mxu1 %v21213_v29  ;;  %v21262_v29 = vld [vmem:[#allocation5 + $0x5e0] ss:$16 sps:$4 sm:$0xff]   ;;  %7148 = vmatprep.subr.bf16.mxu0 %v21318_v20 }
 0x44e   : > { %v21303_v20 = vld [vmem:[%s28541_s9 + $0x774] ss:$28 sps:$4 sm:$0xff]  }
 0x450   : > { %5324 = vmatpush1.bf16.msra.mxu1 %v21211_v32  ;;  %v21267_v32 = vld [vmem:[#allocation5 + $0x604] ss:$16 sps:$4 sm:$0xff]  }
 0x451   : > { %5325 = vmatprep.subr.bf16.mxu1 %v21216_v35  ;;  %v21316_v35 = vld [vmem:[%s28541_s9 + $0x7e8] ss:$28 sps:$4 sm:$0xff]  }
 0x452   : > { %7149 = vmatpush1.bf16.msra.mxu0 %v21316_v35  ;;  %v21315_v35 = vld [vmem:[%s28541_s9 + $0x7e4] ss:$28 sps:$4 sm:$0xff]  }
 0x454   : > { %5326 = vmatpush1.bf16.msra.mxu1 %v21214_v37  ;;  %v21324_v37 = vld [vmem:[%s28541_s9 + $0x824] ss:$28 sps:$4 sm:$0xff]  }
 0x455   : > { %5338 = vmatprep.subr.bf16.mxu1 %v21219_v38  ;;  %v21265_v38 = vld [vmem:[#allocation5 + $0x600] ss:$16 sps:$4 sm:$0xff]   ;;  %7150 = vmatprep.subr.bf16.mxu0 %v21324_v37 }
 0x456   : > { %v21313_v37 = vld [vmem:[%s28541_s9 + $0x7e0] ss:$28 sps:$4 sm:$0xff]  }
 0x457   : > { %5328 = vmatmul.mubr.bf16.vlgmr.msra.gmra.mrb[40].mxu1 %v24107_v62  ;;  %v21232_v62 = vld [vmem:[#allocation5 + $0x4a0] ss:$16 sps:$4 sm:$0xff]  }
 0x458   : > { %5339 = vmatpush1.bf16.msra.mxu1 %v21217_v40  ;;  %5370 = vmatprep.mubr.bf16.mxu1 %v24175_v13  ;;  %v21270_v40 = vld [vmem:[#allocation5 + $0x624] ss:$16 sps:$4 sm:$0xff]  }
 0x459   : > { %5340 = vmatprep.subr.bf16.mxu1 %v21222_v41  ;;  %v21322_v41 = vld [vmem:[%s28541_s9 + $0x820] ss:$28 sps:$4 sm:$0xff]  }
 0x45a   : > { %7151 = vmatpush1.bf16.msra.mxu0 %v21322_v41  ;;  %v21327_v41 = vld [vmem:[%s28541_s9 + $0x854] ss:$28 sps:$4 sm:$0xff]  }
 0x45c   : > { %5341 = vmatpush1.bf16.msra.mxu1 %v21220_v42  ;;  %v21330_v42 = vld [vmem:[%s28541_s9 + $0x85c] ss:$28 sps:$4 sm:$0xff]  }
 0x45d   : > { %5342 = vmatprep.subr.bf16.mxu1 %v21225_v43  ;;  %v21268_v43 = vld [vmem:[#allocation5 + $0x620] ss:$16 sps:$4 sm:$0xff]   ;;  %7152 = vmatprep.subr.bf16.mxu0 %v21330_v42 }
 0x45e   : > { %v21325_v42 = vld [vmem:[%s28541_s9 + $0x850] ss:$28 sps:$4 sm:$0xff]  }
 0x460   : > { %5343 = vmatpush1.bf16.msra.mxu1 %v21223_v44  ;;  %v21273_v44 = vld [vmem:[#allocation5 + $0x644] ss:$16 sps:$4 sm:$0xff]  }
 0x461   : > { %5344 = vmatprep.subr.bf16.mxu1 %v21228_v45  ;;  %v21328_v45 = vld [vmem:[%s28541_s9 + $0x858] ss:$28 sps:$4 sm:$0xff]  }
 0x462   : > { %7153 = vmatpush1.bf16.msra.mxu0 %v21328_v45  ;;  %v21339_v45 = vld [vmem:[%s28541_s9 + $0x8c4] ss:$28 sps:$4 sm:$0xff]  }
 0x464   : > { %5345 = vmatpush1.bf16.msra.mxu1 %v21226_v46  ;;  %v21336_v46 = vld [vmem:[%s28541_s9 + $0x894] ss:$28 sps:$4 sm:$0xff]  }
 0x465   : > { %5346 = vmatprep.subr.bf16.mxu1 %v21231_v34  ;;  %v21271_v34 = vld [vmem:[#allocation5 + $0x640] ss:$16 sps:$4 sm:$0xff]   ;;  %7154 = vmatprep.subr.bf16.mxu0 %v21336_v46 }
 0x466   : > { %v21337_v46 = vld [vmem:[%s28541_s9 + $0x8c0] ss:$28 sps:$4 sm:$0xff]  }
 0x468   : > { %5347 = vmatpush1.bf16.msra.mxu1 %v21229_v47  ;;  %v21334_v47 = vld [vmem:[%s28541_s9 + $0x890] ss:$28 sps:$4 sm:$0xff]  }
 0x469   : > { %5348 = vmatprep.subr.bf16.mxu1 %v21234_v48  ;;  %v21342_v48 = vld [vmem:[%s28541_s9 + $0x8cc] ss:$28 sps:$4 sm:$0xff]   ;;  %7155 = vmatpush1.bf16.msra.mxu0 %v21334_v47  ;;  %v21351_v47 = vld [vmem:[%s28541_s9 + $0x934] ss:$28 sps:$4 sm:$0xff]  }
 0x46a   : > { %v24629_v13 = vpop.f32.mrb[32].mxu1  ;;  %7156 = vmatprep.subr.bf16.mxu0 %v21342_v48  ;;  %v21349_v48 = vld [vmem:[%s28541_s9 + $0x930] ss:$28 sps:$4 sm:$0xff]  }
 0x46b   : > { %v24631_v52 = vpop.f32.mrb[33].mxu1 }
 0x46c   : > { %v24633_v53 = vpop.f32.mrb[34].mxu1  ;;  %5349 = vmatpush1.bf16.msra.mxu1 %v21232_v62  ;;  %v21274_v62 = vld [vmem:[#allocation5 + $0x660] ss:$16 sps:$4 sm:$0xff]  }
 0x46d   : > { %v24635_v56 = vpop.f32.mrb[35].mxu1  ;;  %5350 = vmatprep.subr.bf16.mxu1 %v21237_v49  ;;  %v21279_v49 = vld [vmem:[#allocation5 + $0x684] ss:$16 sps:$4 sm:$0xff]  }
 0x470   : > { %5351 = vmatpush1.bf16.msra.mxu1 %v21235_v55  ;;  %v21340_v55 = vld [vmem:[%s28541_s9 + $0x8c8] ss:$28 sps:$4 sm:$0xff]  }
 0x471   : > { %5352 = vmatprep.subr.bf16.mxu1 %v21240_v57  ;;  %v21348_v57 = vld [vmem:[%s28541_s9 + $0x904] ss:$28 sps:$4 sm:$0xff]   ;;  %7157 = vmatpush1.bf16.msra.mxu0 %v21340_v55 }
 0x472   : > { %7158 = vmatprep.subr.bf16.mxu0 %v21348_v57  ;;  %v21363_v55 = vld [vmem:[%s28541_s9 + $0x9a4] ss:$28 sps:$4 sm:$0xff]  }
 0x473   : > { %v21361_v57 = vld [vmem:[%s28541_s9 + $0x9a0] ss:$28 sps:$4 sm:$0xff]  }
 0x474   : > { %5353 = vmatpush1.bf16.msra.mxu1 %v21238_v59  ;;  %v21277_v59 = vld [vmem:[#allocation5 + $0x680] ss:$16 sps:$4 sm:$0xff]  }
 0x475   : > { %5354 = vmatprep.subr.bf16.mxu1 %v21243_v61  ;;  %v21282_v61 = vld [vmem:[#allocation5 + $0x6a4] ss:$16 sps:$4 sm:$0xff]  }
 0x478   : > { %5355 = vmatpush1.bf16.msra.mxu1 %v21241_v63  ;;  %v21346_v63 = vld [vmem:[%s28541_s9 + $0x900] ss:$28 sps:$4 sm:$0xff]  }
 0x479   : > { %5356 = vmatprep.subr.bf16.mxu1 %v21246_v1  ;;  %v21354_v1 = vld [vmem:[%s28541_s9 + $0x93c] ss:$28 sps:$4 sm:$0xff]   ;;  %7159 = vmatpush1.bf16.msra.mxu0 %v21346_v63 }
 0x47a   : > { %7160 = vmatprep.subr.bf16.mxu0 %v21354_v1 }
 0x47c   : > { %5357 = vmatpush1.bf16.msra.mxu1 %v21244_v2  ;;  %v21280_v2 = vld [vmem:[#allocation5 + $0x6a0] ss:$16 sps:$4 sm:$0xff]  }
 0x47d   : > { %5358 = vmatprep.subr.bf16.mxu1 %v21249_v50  ;;  %v21285_v50 = vld [vmem:[#allocation5 + $0x6c4] ss:$16 sps:$4 sm:$0xff]  }
 0x480   : > { %5359 = vmatpush1.bf16.msra.mxu1 %v21247_v3  ;;  %v21352_v3 = vld [vmem:[%s28541_s9 + $0x938] ss:$28 sps:$4 sm:$0xff]  }
 0x481   : > { %5360 = vmatprep.subr.bf16.mxu1 %v21252_v4  ;;  %7161 = vmatpush1.bf16.msra.mxu0 %v21352_v3 }
 0x484   : > { %5361 = vmatpush1.bf16.msra.mxu1 %v21250_v5  ;;  %v21360_v5 = vld [vmem:[%s28541_s9 + $0x974] ss:$28 sps:$4 sm:$0xff]  }
 0x485   : > { %5362 = vmatprep.subr.bf16.mxu1 %v21255_v51  ;;  %7162 = vmatprep.subr.bf16.mxu0 %v21360_v5 }
 0x488   : > { %5363 = vmatpush1.bf16.msra.mxu1 %v21253_v9  ;;  %v21283_v9 = vld [vmem:[#allocation5 + $0x6c0] ss:$16 sps:$4 sm:$0xff]  }
 0x489   : > { %5364 = vmatprep.subr.bf16.mxu1 %v21258_v11 }
 0x48c   : > { %5365 = vmatpush1.bf16.msra.mxu1 %v21256_v19  ;;  %v21358_v19 = vld [vmem:[%s28541_s9 + $0x970] ss:$28 sps:$4 sm:$0xff]  }
 0x48d   : > { %5366 = vmatprep.subr.bf16.mxu1 %v21261_v21  ;;  %v21286_v21 = vld [vmem:[#allocation5 + $0x6e0] ss:$16 sps:$4 sm:$0xff]   ;;  %7163 = vmatpush1.bf16.msra.mxu0 %v21358_v19 }
 0x48e   : > { %v21384_v19 = vld [vmem:[%s28541_s9 + $0xa54] ss:$28 sps:$4 sm:$0xff]  }
 0x490   : > { %5367 = vmatpush1.bf16.msra.mxu1 %v21259_v24  ;;  %v21297_v24 = vld [vmem:[%s28541_s9 + $0x73c] ss:$28 sps:$4 sm:$0xff]  }
 0x491   : > { %5368 = vmatprep.subr.bf16.mxu1 %v21264_v26  ;;  %v21370_v26 = vld [vmem:[%s28541_s9 + $0x9e0] ss:$28 sps:$4 sm:$0xff]  }
 0x494   : > { %5369 = vmatpush1.bf16.msra.mxu1 %v21262_v29  ;;  %v21301_v29 = vld [vmem:[%s28541_s9 + $0x770] ss:$28 sps:$4 sm:$0xff]  }
 0x495   : > { %5381 = vmatprep.subr.bf16.mxu1 %v21267_v32  ;;  %v21307_v32 = vld [vmem:[%s28541_s9 + $0x7a8] ss:$28 sps:$4 sm:$0xff]  }
 0x497   : > { %5371 = vmatmul.mubr.bf16.vlgmr.msra.gmra.mrb[40].mxu1 %v24173_v54  ;;  %v21276_v54 = vld [vmem:[#allocation5 + $0x664] ss:$16 sps:$4 sm:$0xff]  }
 0x498   : > { %5382 = vmatpush1.bf16.msra.mxu1 %v21265_v38  ;;  %5413 = vmatprep.mubr.bf16.mxu1 %v23387_v0  ;;  %v21321_v38 = vld [vmem:[%s28541_s9 + $0x81c] ss:$28 sps:$4 sm:$0xff]  }
 0x499   : > { %5383 = vmatprep.subr.bf16.mxu1 %v21270_v40  ;;  %v21319_v40 = vld [vmem:[%s28541_s9 + $0x818] ss:$28 sps:$4 sm:$0xff]  }
 0x49c   : > { %5384 = vmatpush1.bf16.msra.mxu1 %v21268_v43  ;;  %v21333_v43 = vld [vmem:[%s28541_s9 + $0x88c] ss:$28 sps:$4 sm:$0xff]  }
 0x49d   : > { %5385 = vmatprep.subr.bf16.mxu1 %v21273_v44  ;;  %v21331_v44 = vld [vmem:[%s28541_s9 + $0x888] ss:$28 sps:$4 sm:$0xff]  }
 0x4a0   : > { %5386 = vmatpush1.bf16.msra.mxu1 %v21271_v34  ;;  %v21345_v34 = vld [vmem:[%s28541_s9 + $0x8fc] ss:$28 sps:$4 sm:$0xff]  }
 0x4a1   : > { %5387 = vmatprep.subr.bf16.mxu1 %v21276_v54  ;;  %v21343_v54 = vld [vmem:[%s28541_s9 + $0x8f8] ss:$28 sps:$4 sm:$0xff]  }
 0x4a4   : > { %5388 = vmatpush1.bf16.msra.mxu1 %v21274_v62  ;;  %v21357_v62 = vld [vmem:[%s28541_s9 + $0x96c] ss:$28 sps:$4 sm:$0xff]  }
 0x4a5   : > { %5389 = vmatprep.subr.bf16.mxu1 %v21279_v49  ;;  %v21355_v49 = vld [vmem:[%s28541_s9 + $0x968] ss:$28 sps:$4 sm:$0xff]  }
 0x4a8   : > { %5390 = vmatpush1.bf16.msra.mxu1 %v21277_v59  ;;  %v21369_v59 = vld [vmem:[%s28541_s9 + $0x9dc] ss:$28 sps:$4 sm:$0xff]  }
 0x4a9   : > { %5391 = vmatprep.subr.bf16.mxu1 %v21282_v61  ;;  %v21367_v61 = vld [vmem:[%s28541_s9 + $0x9d8] ss:$28 sps:$4 sm:$0xff]  }
 0x4aa   : > { %v3770_v4 = vpop.f32.mrb[36].mxu1 }
 0x4ab   : > { %v24709_v51 = vadd.f32 %v24618_v58, %v3770_v4  ;;  %v3772_v6 = vpop.f32.mrb[37].mxu1 }
 0x4ac   : > { %v24712_v7 = vadd.f32 %v24620_v60, %v3772_v6  ;;  %v3774_v8 = vpop.f32.mrb[38].mxu1  ;;  %5392 = vmatpush1.bf16.msra.mxu1 %v21280_v2  ;;  %v21366_v60 = vld [vmem:[%s28541_s9 + $0x9ac] ss:$28 sps:$4 sm:$0xff]  }
 0x4ad   : > { %v24715_v11 = vadd.f32 %v24622_v31, %v3774_v8  ;;  %v3776_v16 = vpop.f32.mrb[39].mxu1  ;;  %5393 = vmatprep.subr.bf16.mxu1 %v21285_v50  ;;  %v21291_v31 = vld [vmem:[%s28541_s9 + $0x704] ss:$28 sps:$4 sm:$0xff]   ;;  %7164 = vmatprep.subr.bf16.mxu0 %v21366_v60  ;;  %v21382_v60 = vld [vmem:[%s28541_s9 + $0xa50] ss:$28 sps:$4 sm:$0xff]  }
 0x4ae   : > { %v24721_v58 = vadd.f32 %v24624_v18, %v3776_v16  ;;  %v21372_v18 = vld [vmem:[%s28541_s9 + $0x9e4] ss:$28 sps:$4 sm:$0xff]   ;;  %7165 = vmatpush1.bf16.msra.mxu0 %v21364_v22  ;;  %v21375_v16 = vld [vmem:[%s28541_s9 + $0xa14] ss:$28 sps:$4 sm:$0xff]  }
 0x4af   : > { %7166 = vmatprep.subr.bf16.mxu0 %v21372_v18 }
 0x4b0   : > { %5394 = vmatpush1.bf16.msra.mxu1 %v21283_v9 }
 0x4b1   : > { %5395 = vmatprep.subr.bf16.mxu1 %v21288_v17  ;;  %v21381_v17 = vld [vmem:[%s28541_s9 + $0xa4c] ss:$28 sps:$4 sm:$0xff]  }
 0x4b2   : > { %7167 = vmatpush1.bf16.msra.mxu0 %v21370_v26 }
 0x4b4   : > { %5396 = vmatpush1.bf16.msra.mxu1 %v21286_v21  ;;  %v21387_v21 = vld [vmem:[%s28541_s9 + $0xa84] ss:$28 sps:$4 sm:$0xff]  }
 0x4b5   : > { %7054 = vmatprep.subr.bf16.mxu1 %v21291_v31  ;;  %v21390_v31 = vld [vmem:[%s28541_s9 + $0xa8c] ss:$28 sps:$4 sm:$0xff]  }
 0x4b7   : > { %5414 = vmatmul.mubr.bf16.vlgmr.msra.gmra.mrb[40].mxu1 %v24118_v30  ;;  %v21309_v30 = vld [vmem:[%s28541_s9 + $0x7ac] ss:$28 sps:$4 sm:$0xff]  }
 0x4b8   : > { %7055 = vmatpush1.bf16.msra.mxu1 %v21289_v23 }
 0x4b9   : > { %7056 = vmatprep.subr.bf16.mxu1 %v21297_v24 }
 0x4bc   : > { %7057 = vmatpush1.bf16.msra.mxu1 %v21295_v27 }
 0x4bd   : > { %7058 = vmatprep.subr.bf16.mxu1 %v21303_v20 }
 0x4c0   : > { %7059 = vmatpush1.bf16.msra.mxu1 %v21301_v29 }
 0x4c1   : > { %7060 = vmatprep.subr.bf16.mxu1 %v21309_v30 }
 0x4c4   : > { %7061 = vmatpush1.bf16.msra.mxu1 %v21307_v32 }
 0x4c5   : > { %7062 = vmatprep.subr.bf16.mxu1 %v21315_v35  ;;  %v21385_v35 = vld [vmem:[%s28541_s9 + $0xa80] ss:$28 sps:$4 sm:$0xff]  }
 0x4c8   : > { %7063 = vmatpush1.bf16.msra.mxu1 %v21313_v37  ;;  %v21394_v37 = vld [vmem:[%s28541_s9 + $0xac0] ss:$28 sps:$4 sm:$0xff]  }
 0x4c9   : > { %7064 = vmatprep.subr.bf16.mxu1 %v21321_v38  ;;  %v21399_v38 = vld [vmem:[%s28541_s9 + $0xaf4] ss:$28 sps:$4 sm:$0xff]  }
 0x4cc   : > { %7065 = vmatpush1.bf16.msra.mxu1 %v21319_v40  ;;  %v21402_v40 = vld [vmem:[%s28541_s9 + $0xafc] ss:$28 sps:$4 sm:$0xff]  }
 0x4cd   : > { %7066 = vmatprep.subr.bf16.mxu1 %v21327_v41  ;;  %v21397_v41 = vld [vmem:[%s28541_s9 + $0xaf0] ss:$28 sps:$4 sm:$0xff]  }
 0x4d0   : > { %7067 = vmatpush1.bf16.msra.mxu1 %v21325_v42  ;;  %v21400_v42 = vld [vmem:[%s28541_s9 + $0xaf8] ss:$28 sps:$4 sm:$0xff]  }
 0x4d1   : > { %7068 = vmatprep.subr.bf16.mxu1 %v21333_v43  ;;  %v21405_v43 = vld [vmem:[%s28541_s9 + $0xb2c] ss:$28 sps:$4 sm:$0xff]  }
 0x4d4   : > { %7069 = vmatpush1.bf16.msra.mxu1 %v21331_v44  ;;  %v21408_v44 = vld [vmem:[%s28541_s9 + $0xb34] ss:$28 sps:$4 sm:$0xff]  }
 0x4d5   : > { %7070 = vmatprep.subr.bf16.mxu1 %v21339_v45  ;;  %v21403_v45 = vld [vmem:[%s28541_s9 + $0xb28] ss:$28 sps:$4 sm:$0xff]  }
 0x4d8   : > { %7071 = vmatpush1.bf16.msra.mxu1 %v21337_v46  ;;  %v21406_v46 = vld [vmem:[%s28541_s9 + $0xb30] ss:$28 sps:$4 sm:$0xff]  }
 0x4d9   : > { %7072 = vmatprep.subr.bf16.mxu1 %v21345_v34  ;;  %v21411_v34 = vld [vmem:[%s28541_s9 + $0xb64] ss:$28 sps:$4 sm:$0xff]  }
 0x4dc   : > { %7073 = vmatpush1.bf16.msra.mxu1 %v21343_v54  ;;  %v21414_v54 = vld [vmem:[%s28541_s9 + $0xb6c] ss:$28 sps:$4 sm:$0xff]  }
 0x4dd   : > { %7074 = vmatprep.subr.bf16.mxu1 %v21351_v47  ;;  %v21409_v47 = vld [vmem:[%s28541_s9 + $0xb60] ss:$28 sps:$4 sm:$0xff]  }
 0x4e0   : > { %7075 = vmatpush1.bf16.msra.mxu1 %v21349_v48  ;;  %v21412_v48 = vld [vmem:[%s28541_s9 + $0xb68] ss:$28 sps:$4 sm:$0xff]  }
 0x4e1   : > { %7076 = vmatprep.subr.bf16.mxu1 %v21357_v62  ;;  %v21417_v62 = vld [vmem:[%s28541_s9 + $0xb9c] ss:$28 sps:$4 sm:$0xff]  }
 0x4e4   : > { %7077 = vmatpush1.bf16.msra.mxu1 %v21355_v49  ;;  %v21420_v49 = vld [vmem:[%s28541_s9 + $0xba4] ss:$28 sps:$4 sm:$0xff]  }
 0x4e5   : > { %7078 = vmatprep.subr.bf16.mxu1 %v21363_v55  ;;  %v21415_v55 = vld [vmem:[%s28541_s9 + $0xb98] ss:$28 sps:$4 sm:$0xff]  }
 0x4e8   : > { %7079 = vmatpush1.bf16.msra.mxu1 %v21361_v57  ;;  %v21418_v57 = vld [vmem:[%s28541_s9 + $0xba0] ss:$28 sps:$4 sm:$0xff]  }
 0x4e9   : > { %7080 = vmatprep.subr.bf16.mxu1 %v21369_v59  ;;  %v21423_v59 = vld [vmem:[%s28541_s9 + $0xbd4] ss:$28 sps:$4 sm:$0xff]  }
 0x4ec   : > { %7081 = vmatpush1.bf16.msra.mxu1 %v21367_v61  ;;  %v21426_v61 = vld [vmem:[%s28541_s9 + $0xbdc] ss:$28 sps:$4 sm:$0xff]  }
 0x4ed   : > { %7082 = vmatprep.subr.bf16.mxu1 %v21375_v16  ;;  %v21433_v16 = vld [vmem:[%s28541_s9 + $0xc40] ss:$28 sps:$4 sm:$0xff]  }
 0x4fb   : > { %v5587_v63 = vpop.f32.mrb[32].mxu0 }
 0x4fc   : > { %v5598_v1 = vmax.f32 %v24709_v51, %v5587_v63  ;;  %v5589_v2 = vpop.f32.mrb[33].mxu0  ;;  %v21378_v51 = vld [vmem:[%s28541_s9 + $0xa1c] ss:$28 sps:$4 sm:$0xff]   ;;  %v21421_v63 = vld [vmem:[%s28541_s9 + $0xbd0] ss:$28 sps:$4 sm:$0xff]  }
 0x4fd   : > { %v5599_v50 = vmax.f32 %v24712_v7, %v5589_v2  ;;  %v5591_v3 = vpop.f32.mrb[34].mxu0  ;;  %v21373_v7 = vld [vmem:[%s28541_s9 + $0xa10] ss:$28 sps:$4 sm:$0xff]   ;;  %7168 = vmatprep.subr.bf16.mxu0 %v21378_v51  ;;  %v21436_v51 = vld [vmem:[%s28541_s9 + $0xc48] ss:$28 sps:$4 sm:$0xff]  }
 0x4fe   : > { %v5602_v4 = vmax.f32 %v24715_v11, %v5591_v3  ;;  %v5593_v5 = vpop.f32.mrb[35].mxu0  ;;  %v21376_v11 = vld [vmem:[%s28541_s9 + $0xa18] ss:$28 sps:$4 sm:$0xff]   ;;  %7083 = vmatpush1.bf16.msra.mxu1 %v21373_v7  ;;  %v21429_v2 = vld [vmem:[%s28541_s9 + $0xc0c] ss:$28 sps:$4 sm:$0xff]  }
 0x4ff   : > { %v5603_v6 = vmax.f32 %v24721_v58, %v5593_v5  ;;  %7169 = vmatpush1.bf16.msra.mxu0 %v21376_v11  ;;  %v21379_v58 = vld [vmem:[%s28541_s9 + $0xa48] ss:$28 sps:$4 sm:$0xff]   ;;  %7084 = vmatprep.subr.bf16.mxu1 %v21381_v17  ;;  %v21441_v7 = vld [vmem:[%s28541_s9 + $0xc7c] ss:$28 sps:$4 sm:$0xff]  }
 0x500   : > { %v24824_v8 = vpack.c.bf16 %v5602_v4, %v5598_v1  ;;  %7170 = vmatprep.subr.bf16.mxu0 %v21384_v19  ;;  %v21424_v1 = vld [vmem:[%s28541_s9 + $0xbd8] ss:$28 sps:$4 sm:$0xff]   ;;  %v21427_v3 = vld [vmem:[%s28541_s9 + $0xc08] ss:$28 sps:$4 sm:$0xff]   ;;  %v21430_v4 = vld [vmem:[%s28541_s9 + $0xc10] ss:$28 sps:$4 sm:$0xff]  }
 0x501   : > { %v24826_v9 = vpack.c.bf16 %v5603_v6, %v5599_v50  ;;  %v21432_v50 = vld [vmem:[%s28541_s9 + $0xc14] ss:$28 sps:$4 sm:$0xff]   ;;  %v21435_v5 = vld [vmem:[%s28541_s9 + $0xc44] ss:$28 sps:$4 sm:$0xff]   ;;  %v21438_v6 = vld [vmem:[%s28541_s9 + $0xc4c] ss:$28 sps:$4 sm:$0xff]  }
 0x502   : > { %7085 = vmatpush1.bf16.msra.mxu1 %v21379_v58  ;;  %v21444_v11 = vld [vmem:[%s28541_s9 + $0xc84] ss:$28 sps:$4 sm:$0xff]   ;;  %v21439_v17 = vld [vmem:[%s28541_s9 + $0xc78] ss:$28 sps:$4 sm:$0xff]  }
 0x503   : > { %7171 = vmatpush1.bf16.msra.mxu0 %v21382_v60  ;;  %7097 = vmatprep.subr.bf16.mxu1 %v21387_v21  ;;  %v21442_v19 = vld [vmem:[%s28541_s9 + $0xc80] ss:$28 sps:$4 sm:$0xff]   ;;  %v21447_v58 = vld [vmem:[%s28541_s9 + $0xcb4] ss:$28 sps:$4 sm:$0xff]  }
 0x504   : > { %7183 = vmatprep.subr.bf16.mxu0 %v21390_v31  ;;  %v21450_v60 = vld [vmem:[%s28541_s9 + $0xcbc] ss:$28 sps:$4 sm:$0xff]   ;;  %v21445_v21 = vld [vmem:[%s28541_s9 + $0xcb0] ss:$28 sps:$4 sm:$0xff]  }
 0x505   : > { %v21448_v31 = vld [vmem:[%s28541_s9 + $0xcb8] ss:$28 sps:$4 sm:$0xff]  }
 0x58a   : > { %v5415_v22 = vpop.f32.mrb[40].mxu1 }
 0x58b   : > { %v5596_v18 = vmax.f32 %v24629_v13, %v5415_v22  ;;  %v5417_v23 = vpop.f32.mrb[41].mxu1  ;;  %v21388_v13 = vld [vmem:[%s28541_s9 + $0xa88] ss:$28 sps:$4 sm:$0xff]  }
 0x58c   : > { %v5597_v24 = vmax.f32 %v24631_v52, %v5417_v23  ;;  %v5419_v26 = vpop.f32.mrb[42].mxu1  ;;  %v21393_v52 = vld [vmem:[%s28541_s9 + $0xabc] ss:$28 sps:$4 sm:$0xff]   ;;  %v21453_v22 = vld [vmem:[%s28541_s9 + $0xcec] ss:$28 sps:$4 sm:$0xff]  }
 0x58d   : > { %v5600_v27 = vmax.f32 %v24633_v53, %v5419_v26  ;;  %v5421_v20 = vpop.f32.mrb[43].mxu1  ;;  %v21396_v53 = vld [vmem:[%s28541_s9 + $0xac4] ss:$28 sps:$4 sm:$0xff]  }
 0x58e   : > { %v5601_v29 = vmax.f32 %v24635_v56, %v5421_v20  ;;  %v21391_v56 = vld [vmem:[%s28541_s9 + $0xab8] ss:$28 sps:$4 sm:$0xff]   ;;  %v21451_v23 = vld [vmem:[%s28541_s9 + $0xce8] ss:$28 sps:$4 sm:$0xff]   ;;  %v21457_v20 = vld [vmem:[%s28541_s9 + $0xd20] ss:$28 sps:$4 sm:$0xff]  }
 0x58f   : > { %v24862_v30 = vpack.c.bf16 %v5600_v27, %v5596_v18  ;;  %v21456_v18 = vld [vmem:[%s28541_s9 + $0xcf4] ss:$28 sps:$4 sm:$0xff]   ;;  %v21459_v26 = vld [vmem:[%s28541_s9 + $0xd24] ss:$28 sps:$4 sm:$0xff]   ;;  %v21462_v27 = vld [vmem:[%s28541_s9 + $0xd2c] ss:$28 sps:$4 sm:$0xff]  }
 0x590   : > { %v24864_v32 = vpack.c.bf16 %v5601_v29, %v5597_v24  ;;  %v21454_v24 = vld [vmem:[%s28541_s9 + $0xcf0] ss:$28 sps:$4 sm:$0xff]   ;;  %v21460_v29 = vld [vmem:[%s28541_s9 + $0xd28] ss:$28 sps:$4 sm:$0xff]  }
 0x592   : > { %7086 = vmatprep.mubr.bf16.mxu1 %v24864_v32  ;;  %7172 = vmatprep.mubr.bf16.mxu0 %v24864_v32 }
 0x593   : > { %7087 = vmatmul.mubr.bf16.vlgmr.msra.gmra.mrb[44].mxu1 %v24862_v30  ;;  %7173 = vmatmul.mubr.bf16.vlgmr.msra.gmra.mrb[36].mxu0 %v24862_v30 }
 0x594   : > { %7098 = vmatpush1.bf16.msra.mxu1 %v21385_v35  ;;  %7184 = vmatpush1.bf16.msra.mxu0 %v21388_v13  ;;  %v21465_v35 = vld [vmem:[%s28541_s9 + $0xd5c] ss:$28 sps:$4 sm:$0xff]   ;;  %v21468_v13 = vld [vmem:[%s28541_s9 + $0xd64] ss:$28 sps:$4 sm:$0xff]  }
 0x595   : > { %7129 = vmatprep.mubr.bf16.mxu1 %v24826_v9  ;;  %7215 = vmatprep.mubr.bf16.mxu0 %v24826_v9 }
 0x596   : > { %7099 = vmatprep.subr.bf16.mxu1 %v21393_v52  ;;  %7185 = vmatprep.subr.bf16.mxu0 %v21396_v53  ;;  %v21463_v52 = vld [vmem:[%s28541_s9 + $0xd58] ss:$28 sps:$4 sm:$0xff]   ;;  %v21466_v53 = vld [vmem:[%s28541_s9 + $0xd60] ss:$28 sps:$4 sm:$0xff]  }
 0x598   : > { %7100 = vmatpush1.bf16.msra.mxu1 %v21391_v56  ;;  %7186 = vmatpush1.bf16.msra.mxu0 %v21394_v37  ;;  %v21471_v56 = vld [vmem:[%s28541_s9 + $0xd94] ss:$28 sps:$4 sm:$0xff]   ;;  %v21474_v37 = vld [vmem:[%s28541_s9 + $0xd9c] ss:$28 sps:$4 sm:$0xff]  }
 0x599   : > { %7101 = vmatprep.subr.bf16.mxu1 %v21399_v38  ;;  %7187 = vmatprep.subr.bf16.mxu0 %v21402_v40  ;;  %v21469_v38 = vld [vmem:[%s28541_s9 + $0xd90] ss:$28 sps:$4 sm:$0xff]   ;;  %v21472_v40 = vld [vmem:[%s28541_s9 + $0xd98] ss:$28 sps:$4 sm:$0xff]  }
 0x59c   : > { %7102 = vmatpush1.bf16.msra.mxu1 %v21397_v41  ;;  %7188 = vmatpush1.bf16.msra.mxu0 %v21400_v42  ;;  %v21477_v41 = vld [vmem:[%s28541_s9 + $0xdcc] ss:$28 sps:$4 sm:$0xff]   ;;  %v21480_v42 = vld [vmem:[%s28541_s9 + $0xdd4] ss:$28 sps:$4 sm:$0xff]  }
 0x59d   : > { %7103 = vmatprep.subr.bf16.mxu1 %v21405_v43  ;;  %7189 = vmatprep.subr.bf16.mxu0 %v21408_v44  ;;  %v21475_v43 = vld [vmem:[%s28541_s9 + $0xdc8] ss:$28 sps:$4 sm:$0xff]   ;;  %v21478_v44 = vld [vmem:[%s28541_s9 + $0xdd0] ss:$28 sps:$4 sm:$0xff]  }
 0x5a0   : > { %7104 = vmatpush1.bf16.msra.mxu1 %v21403_v45  ;;  %7190 = vmatpush1.bf16.msra.mxu0 %v21406_v46  ;;  %v21483_v45 = vld [vmem:[%s28541_s9 + $0x714] ss:$28 sps:$4 sm:$0xff]  }
 0x5a1   : > { %7105 = vmatprep.subr.bf16.mxu1 %v21411_v34  ;;  %7191 = vmatprep.subr.bf16.mxu0 %v21414_v54  ;;  %v21484_v46 = vld [vmem:[%s28541_s9 + $0x8d8] ss:$28 sps:$4 sm:$0xff]   ;;  %v21481_v34 = vld [vmem:[%s28541_s9 + $0x710] ss:$28 sps:$4 sm:$0xff]  }
 0x5a2   : > { %v21485_v54 = vld [vmem:[%s28541_s9 + $0x718] ss:$28 sps:$4 sm:$0xff]  }
 0x5a4   : > { %7106 = vmatpush1.bf16.msra.mxu1 %v21409_v47  ;;  %7192 = vmatpush1.bf16.msra.mxu0 %v21412_v48  ;;  %v21488_v47 = vld [vmem:[%s28541_s9 + $0x74c] ss:$28 sps:$4 sm:$0xff]  }
 0x5a5   : > { %7107 = vmatprep.subr.bf16.mxu1 %v21417_v62  ;;  %7193 = vmatprep.subr.bf16.mxu0 %v21420_v49  ;;  %v21489_v48 = vld [vmem:[%s28541_s9 + $0x910] ss:$28 sps:$4 sm:$0xff]   ;;  %v21486_v62 = vld [vmem:[%s28541_s9 + $0x748] ss:$28 sps:$4 sm:$0xff]  }
 0x5a6   : > { %v21490_v49 = vld [vmem:[%s28541_s9 + $0x750] ss:$28 sps:$4 sm:$0xff]  }
 0x5a8   : > { %7108 = vmatpush1.bf16.msra.mxu1 %v21415_v55  ;;  %7194 = vmatpush1.bf16.msra.mxu0 %v21418_v57  ;;  %v21493_v55 = vld [vmem:[%s28541_s9 + $0x784] ss:$28 sps:$4 sm:$0xff]  }
 0x5a9   : > { %7109 = vmatprep.subr.bf16.mxu1 %v21423_v59  ;;  %7195 = vmatprep.subr.bf16.mxu0 %v21426_v61  ;;  %v21494_v57 = vld [vmem:[%s28541_s9 + $0x948] ss:$28 sps:$4 sm:$0xff]   ;;  %v21491_v59 = vld [vmem:[%s28541_s9 + $0x780] ss:$28 sps:$4 sm:$0xff]  }
 0x5aa   : > { %v21495_v61 = vld [vmem:[%s28541_s9 + $0x788] ss:$28 sps:$4 sm:$0xff]  }
 0x5ac   : > { %7110 = vmatpush1.bf16.msra.mxu1 %v21421_v63  ;;  %7196 = vmatpush1.bf16.msra.mxu0 %v21424_v1  ;;  %v21498_v63 = vld [vmem:[%s28541_s9 + $0x7bc] ss:$28 sps:$4 sm:$0xff]  }
 0x5ad   : > { %7111 = vmatprep.subr.bf16.mxu1 %v21429_v2  ;;  %7197 = vmatprep.subr.bf16.mxu0 %v21432_v50  ;;  %v21499_v1 = vld [vmem:[%s28541_s9 + $0x980] ss:$28 sps:$4 sm:$0xff]   ;;  %v21496_v2 = vld [vmem:[%s28541_s9 + $0x7b8] ss:$28 sps:$4 sm:$0xff]  }
 0x5ae   : > { %v21500_v50 = vld [vmem:[%s28541_s9 + $0x7c0] ss:$28 sps:$4 sm:$0xff]  }
 0x5b0   : > { %7112 = vmatpush1.bf16.msra.mxu1 %v21427_v3  ;;  %7198 = vmatpush1.bf16.msra.mxu0 %v21430_v4  ;;  %v21503_v3 = vld [vmem:[%s28541_s9 + $0x7f4] ss:$28 sps:$4 sm:$0xff]  }
 0x5b1   : > { %7113 = vmatprep.subr.bf16.mxu1 %v21435_v5  ;;  %7199 = vmatprep.subr.bf16.mxu0 %v21438_v6  ;;  %v21504_v4 = vld [vmem:[%s28541_s9 + $0x9b8] ss:$28 sps:$4 sm:$0xff]   ;;  %v21501_v5 = vld [vmem:[%s28541_s9 + $0x7f0] ss:$28 sps:$4 sm:$0xff]  }
 0x5b2   : > { %v21505_v6 = vld [vmem:[%s28541_s9 + $0x7f8] ss:$28 sps:$4 sm:$0xff]  }
 0x5b4   : > { %7114 = vmatpush1.bf16.msra.mxu1 %v21433_v16  ;;  %7200 = vmatpush1.bf16.msra.mxu0 %v21436_v51  ;;  %v21508_v16 = vld [vmem:[%s28541_s9 + $0x82c] ss:$28 sps:$4 sm:$0xff]  }
 0x5b5   : > { %7115 = vmatprep.subr.bf16.mxu1 %v21441_v7  ;;  %7201 = vmatprep.subr.bf16.mxu0 %v21444_v11  ;;  %v21509_v51 = vld [vmem:[%s28541_s9 + $0x9f0] ss:$28 sps:$4 sm:$0xff]   ;;  %v21506_v7 = vld [vmem:[%s28541_s9 + $0x828] ss:$28 sps:$4 sm:$0xff]  }
 0x5b6   : > { %v21510_v11 = vld [vmem:[%s28541_s9 + $0x830] ss:$28 sps:$4 sm:$0xff]  }
 0x5b8   : > { %7116 = vmatpush1.bf16.msra.mxu1 %v21439_v17  ;;  %7202 = vmatpush1.bf16.msra.mxu0 %v21442_v19  ;;  %v21513_v17 = vld [vmem:[%s28541_s9 + $0x864] ss:$28 sps:$4 sm:$0xff]  }
 0x5b9   : > { %7117 = vmatprep.subr.bf16.mxu1 %v21447_v58  ;;  %7203 = vmatprep.subr.bf16.mxu0 %v21450_v60  ;;  %v21514_v19 = vld [vmem:[%s28541_s9 + $0xa28] ss:$28 sps:$4 sm:$0xff]   ;;  %v21511_v58 = vld [vmem:[%s28541_s9 + $0x860] ss:$28 sps:$4 sm:$0xff]  }
 0x5ba   : > { %v21515_v60 = vld [vmem:[%s28541_s9 + $0x868] ss:$28 sps:$4 sm:$0xff]  }
 0x5bc   : > { %7118 = vmatpush1.bf16.msra.mxu1 %v21445_v21  ;;  %7204 = vmatpush1.bf16.msra.mxu0 %v21448_v31  ;;  %v21518_v21 = vld [vmem:[%s28541_s9 + $0x89c] ss:$28 sps:$4 sm:$0xff]  }
 0x5bd   : > { %7119 = vmatprep.subr.bf16.mxu1 %v21453_v22  ;;  %7205 = vmatprep.subr.bf16.mxu0 %v21456_v18  ;;  %v21519_v31 = vld [vmem:[%s28541_s9 + $0xa60] ss:$28 sps:$4 sm:$0xff]   ;;  %v21516_v22 = vld [vmem:[%s28541_s9 + $0x898] ss:$28 sps:$4 sm:$0xff]  }
 0x5be   : > { %v21520_v18 = vld [vmem:[%s28541_s9 + $0x8a0] ss:$28 sps:$4 sm:$0xff]  }
 0x5c0   : > { %7120 = vmatpush1.bf16.msra.mxu1 %v21451_v23  ;;  %7206 = vmatpush1.bf16.msra.mxu0 %v21454_v24  ;;  %v21523_v23 = vld [vmem:[%s28541_s9 + $0x8d4] ss:$28 sps:$4 sm:$0xff]  }
 0x5c1   : > { %7121 = vmatprep.subr.bf16.mxu1 %v21459_v26  ;;  %7207 = vmatprep.subr.bf16.mxu0 %v21462_v27  ;;  %v21524_v24 = vld [vmem:[%s28541_s9 + $0xc58] ss:$28 sps:$4 sm:$0xff]   ;;  %v21521_v26 = vld [vmem:[%s28541_s9 + $0x8d0] ss:$28 sps:$4 sm:$0xff]  }
 0x5c2   : > { %v21525_v27 = vld [vmem:[%s28541_s9 + $0xa98] ss:$28 sps:$4 sm:$0xff]  }
 0x5c4   : > { %7122 = vmatpush1.bf16.msra.mxu1 %v21457_v20  ;;  %7208 = vmatpush1.bf16.msra.mxu0 %v21460_v29  ;;  %v21528_v20 = vld [vmem:[%s28541_s9 + $0x90c] ss:$28 sps:$4 sm:$0xff]  }
 0x5c5   : > { %7123 = vmatprep.subr.bf16.mxu1 %v21465_v35  ;;  %7209 = vmatprep.subr.bf16.mxu0 %v21468_v13  ;;  %v21529_v29 = vld [vmem:[%s28541_s9 + $0xc90] ss:$28 sps:$4 sm:$0xff]   ;;  %v21526_v35 = vld [vmem:[%s28541_s9 + $0x908] ss:$28 sps:$4 sm:$0xff]  }
 0x5c6   : > { %v21530_v13 = vld [vmem:[%s28541_s9 + $0xad0] ss:$28 sps:$4 sm:$0xff]  }
 0x5c8   : > { %7124 = vmatpush1.bf16.msra.mxu1 %v21463_v52  ;;  %7210 = vmatpush1.bf16.msra.mxu0 %v21466_v53  ;;  %v21533_v52 = vld [vmem:[%s28541_s9 + $0x944] ss:$28 sps:$4 sm:$0xff]  }
 0x5c9   : > { %7125 = vmatprep.subr.bf16.mxu1 %v21471_v56  ;;  %7211 = vmatprep.subr.bf16.mxu0 %v21474_v37  ;;  %v21534_v53 = vld [vmem:[%s28541_s9 + $0xcc8] ss:$28 sps:$4 sm:$0xff]   ;;  %v21531_v56 = vld [vmem:[%s28541_s9 + $0x940] ss:$28 sps:$4 sm:$0xff]  }
 0x5ca   : > { %v21535_v37 = vld [vmem:[%s28541_s9 + $0xb08] ss:$28 sps:$4 sm:$0xff]  }
 0x5cc   : > { %7126 = vmatpush1.bf16.msra.mxu1 %v21469_v38  ;;  %7212 = vmatpush1.bf16.msra.mxu0 %v21472_v40  ;;  %v21538_v38 = vld [vmem:[%s28541_s9 + $0x97c] ss:$28 sps:$4 sm:$0xff]  }
 0x5cd   : > { %7127 = vmatprep.subr.bf16.mxu1 %v21477_v41  ;;  %7213 = vmatprep.subr.bf16.mxu0 %v21480_v42  ;;  %v21539_v40 = vld [vmem:[%s28541_s9 + $0xd00] ss:$28 sps:$4 sm:$0xff]   ;;  %v21536_v41 = vld [vmem:[%s28541_s9 + $0x978] ss:$28 sps:$4 sm:$0xff]  }
 0x5ce   : > { %v21540_v42 = vld [vmem:[%s28541_s9 + $0xb40] ss:$28 sps:$4 sm:$0xff]  }
 0x5d0   : > { %7128 = vmatpush1.bf16.msra.mxu1 %v21475_v43  ;;  %7214 = vmatpush1.bf16.msra.mxu0 %v21478_v44  ;;  %v21543_v43 = vld [vmem:[%s28541_s9 + $0x9b4] ss:$28 sps:$4 sm:$0xff]  }
 0x5d1   : > { %7226 = vmatprep.subr.bf16.mxu1 %v21483_v45  ;;  %19788 = vmatprep.subr.bf16.mxu0 %v21484_v46  ;;  %v21544_v44 = vld [vmem:[%s28541_s9 + $0xd38] ss:$28 sps:$4 sm:$0xff]   ;;  %v21541_v45 = vld [vmem:[%s28541_s9 + $0x9b0] ss:$28 sps:$4 sm:$0xff]  }
 0x5d2   : > { %v21545_v46 = vld [vmem:[%s28541_s9 + $0xb78] ss:$28 sps:$4 sm:$0xff]  }
 0x5d3   : > { %7130 = vmatmul.mubr.bf16.vlgmr.msra.gmra.mrb[44].mxu1 %v24824_v8  ;;  %7216 = vmatmul.mubr.bf16.vlgmr.msra.gmra.mrb[36].mxu0 %v24824_v8 }
 0x5d4   : > { %7227 = vmatpush1.bf16.msra.mxu1 %v21481_v34  ;;  %7258 = vmatprep.mubr.bf16.mxu1 %v24864_v32  ;;  %v21548_v34 = vld [vmem:[%s28541_s9 + $0x9ec] ss:$28 sps:$4 sm:$0xff]  }
 0x5d5   : > { %19789 = vmatpush3.bf16.msra.mxu0 %v21485_v54  ;;  %7344 = vmatprep.mubr.bf16.mxu0 %v24864_v32  ;;  %v21549_v54 = vld [vmem:[%s28541_s9 + $0xd70] ss:$28 sps:$4 sm:$0xff]  }
 0x5d6   : > { %7228 = vmatprep.subr.bf16.mxu1 %v21488_v47  ;;  %19790 = vmatprep.subr.bf16.mxu0 %v21489_v48  ;;  %v21546_v47 = vld [vmem:[%s28541_s9 + $0x9e8] ss:$28 sps:$4 sm:$0xff]   ;;  %v21550_v48 = vld [vmem:[%s28541_s9 + $0xbb0] ss:$28 sps:$4 sm:$0xff]  }
 0x5d8   : > { %7229 = vmatpush1.bf16.msra.mxu1 %v21486_v62  ;;  %v21553_v62 = vld [vmem:[%s28541_s9 + $0xa24] ss:$28 sps:$4 sm:$0xff]  }
 0x5d9   : > { %19791 = vmatpush3.bf16.msra.mxu0 %v21490_v49  ;;  %7230 = vmatprep.subr.bf16.mxu1 %v21493_v55  ;;  %v21554_v49 = vld [vmem:[%s28541_s9 + $0xda8] ss:$28 sps:$4 sm:$0xff]   ;;  %v21551_v55 = vld [vmem:[%s28541_s9 + $0xa20] ss:$28 sps:$4 sm:$0xff]  }
 0x5da   : > { %19792 = vmatprep.subr.bf16.mxu0 %v21494_v57  ;;  %v21555_v57 = vld [vmem:[%s28541_s9 + $0xbe8] ss:$28 sps:$4 sm:$0xff]  }
 0x5dc   : > { %7231 = vmatpush1.bf16.msra.mxu1 %v21491_v59  ;;  %v21558_v59 = vld [vmem:[%s28541_s9 + $0xa5c] ss:$28 sps:$4 sm:$0xff]  }
 0x5dd   : > { %19793 = vmatpush3.bf16.msra.mxu0 %v21495_v61  ;;  %7232 = vmatprep.subr.bf16.mxu1 %v21498_v63  ;;  %v21559_v61 = vld [vmem:[%s28541_s9 + $0xde0] ss:$28 sps:$4 sm:$0xff]   ;;  %v21556_v63 = vld [vmem:[%s28541_s9 + $0xa58] ss:$28 sps:$4 sm:$0xff]  }
 0x5de   : > { %19794 = vmatprep.subr.bf16.mxu0 %v21499_v1  ;;  %v21560_v1 = vld [vmem:[%s28541_s9 + $0xc20] ss:$28 sps:$4 sm:$0xff]  }
 0x5e0   : > { %7233 = vmatpush1.bf16.msra.mxu1 %v21496_v2  ;;  %v21563_v2 = vld [vmem:[%s28541_s9 + $0xa94] ss:$28 sps:$4 sm:$0xff]  }
 0x5e1   : > { %19795 = vmatpush3.bf16.msra.mxu0 %v21500_v50  ;;  %7234 = vmatprep.subr.bf16.mxu1 %v21503_v3  ;;  %v21561_v50 = vld [vmem:[%s28541_s9 + $0xa90] ss:$28 sps:$4 sm:$0xff]  }
 0x5e2   : > { %19796 = vmatprep.subr.bf16.mxu0 %v21504_v4  ;;  %v21566_v3 = vld [vmem:[%s28541_s9 + $0xacc] ss:$28 sps:$4 sm:$0xff]   ;;  %v25271_v4 = vsel %vm814_vm0, %v24862_v30, 0 }
 0x5e4   : > { %7235 = vmatpush1.bf16.msra.mxu1 %v21501_v5  ;;  %v21564_v5 = vld [vmem:[%s28541_s9 + $0xac8] ss:$28 sps:$4 sm:$0xff]  }
 0x5e5   : > { %19797 = vmatpush3.bf16.msra.mxu0 %v21505_v6  ;;  %7236 = vmatprep.subr.bf16.mxu1 %v21508_v16  ;;  %v21569_v6 = vld [vmem:[%s28541_s9 + $0xb04] ss:$28 sps:$4 sm:$0xff]  }
 0x5e6   : > { %19798 = vmatprep.subr.bf16.mxu0 %v21509_v51  ;;  %v21570_v16 = vld [vmem:[%s28539_s7] sm:$0x7f]   ;;  %v21573_v51 = vld [vmem:[%s28541_s9 + $0xb3c] ss:$28 sps:$4 sm:$0xff]  }
 0x5e8   : > { %7237 = vmatpush1.bf16.msra.mxu1 %v21506_v7  ;;  %v21615_v7 = vld [vmem:[%s28541_s9 + $0xc] ss:$28 sps:$4 sm:$0xff]  }
 0x5e9   : > { %19799 = vmatpush3.bf16.msra.mxu0 %v21510_v11  ;;  %7238 = vmatprep.subr.bf16.mxu1 %v21513_v17  ;;  %v25299_v11 = vsel %vm814_vm0, %v24824_v8, 0  ;;  %v21571_v17 = vld [vmem:[%s28541_s9 + $0xb38] ss:$28 sps:$4 sm:$0xff]  }
 0x5ea   : > { %19800 = vmatprep.subr.bf16.mxu0 %v21514_v19  ;;  %v21576_v19 = vld [vmem:[%s28541_s9 + $0xb74] ss:$28 sps:$4 sm:$0xff]  }
 0x5ec   : > { %7239 = vmatpush1.bf16.msra.mxu1 %v21511_v58  ;;  %v21574_v58 = vld [vmem:[%s28541_s9 + $0xb70] ss:$28 sps:$4 sm:$0xff]  }
 0x5ed   : > { %19801 = vmatpush3.bf16.msra.mxu0 %v21515_v60  ;;  %7240 = vmatprep.subr.bf16.mxu1 %v21518_v21  ;;  %v21579_v60 = vld [vmem:[%s28541_s9 + $0xbac] ss:$28 sps:$4 sm:$0xff]  }
 0x5ee   : > { %19802 = vmatprep.subr.bf16.mxu0 %v21519_v31  ;;  %v21613_v21 = vld [vmem:[%s28541_s9 + $0x8] ss:$28 sps:$4 sm:$0xff]  }
 0x5ef   : > { %v21621_v31 = vld [vmem:[%s28541_s9 + $0x44] ss:$28 sps:$4 sm:$0xff]  }
 0x5f0   : > { %7241 = vmatpush1.bf16.msra.mxu1 %v21516_v22  ;;  %v21577_v22 = vld [vmem:[%s28541_s9 + $0xba8] ss:$28 sps:$4 sm:$0xff]  }
 0x5f1   : > { %19803 = vmatpush3.bf16.msra.mxu0 %v21520_v18  ;;  %7242 = vmatprep.subr.bf16.mxu1 %v21523_v23  ;;  %v21582_v18 = vld [vmem:[%s28541_s9 + $0xbe4] ss:$28 sps:$4 sm:$0xff]  }
 0x5f2   : > { %19810 = vmatprep.subr.bf16.mxu0 %v21524_v24  ;;  %v21619_v23 = vld [vmem:[%s28541_s9 + $0x40] ss:$28 sps:$4 sm:$0xff]  }
 0x5f3   : > { %v21627_v24 = vld [vmem:[%s28541_s9 + $0x7c] ss:$28 sps:$4 sm:$0xff]  }
 0x5f4   : > { %7345 = vmatmul.mubr.bf16.vlgmr.msra.gmra.mrb[40].mxu0 %v24862_v30  ;;  %7243 = vmatpush1.bf16.msra.mxu1 %v21521_v26  ;;  %v21580_v26 = vld [vmem:[%s28541_s9 + $0xbe0] ss:$28 sps:$4 sm:$0xff]  }
 0x5f5   : > { %19811 = vmatpush3.bf16.msra.mxu0 %v21525_v27  ;;  %7385 = vmatprep.mubr.bf16.mxu0 %v24826_v9  ;;  %v21585_v27 = vld [vmem:[%s28541_s9 + $0xc1c] ss:$28 sps:$4 sm:$0xff]  }
 0x5f6   : > { %7244 = vmatprep.subr.bf16.mxu1 %v21528_v20  ;;  %19812 = vmatprep.subr.bf16.mxu0 %v21529_v29  ;;  %v21625_v20 = vld [vmem:[%s28541_s9 + $0x78] ss:$28 sps:$4 sm:$0xff]  }
 0x5f7   : > { %v21633_v29 = vld [vmem:[%s28541_s9 + $0xb4] ss:$28 sps:$4 sm:$0xff]  }
 0x5f8   : > { %7245 = vmatpush1.bf16.msra.mxu1 %v21526_v35  ;;  %v21583_v35 = vld [vmem:[%s28541_s9 + $0xc18] ss:$28 sps:$4 sm:$0xff]  }
 0x5f9   : > { %19813 = vmatpush3.bf16.msra.mxu0 %v21530_v13  ;;  %7246 = vmatprep.subr.bf16.mxu1 %v21533_v52  ;;  %v21588_v13 = vld [vmem:[%s28541_s9 + $0xc54] ss:$28 sps:$4 sm:$0xff]  }
 0x5fa   : > { %19814 = vmatprep.subr.bf16.mxu0 %v21534_v53  ;;  %v21631_v52 = vld [vmem:[%s28541_s9 + $0xb0] ss:$28 sps:$4 sm:$0xff]  }
 0x5fb   : > { %v21639_v53 = vld [vmem:[%s28541_s9 + $0xec] ss:$28 sps:$4 sm:$0xff]  }
 0x5fc   : > { %7247 = vmatpush1.bf16.msra.mxu1 %v21531_v56  ;;  %v21586_v56 = vld [vmem:[%s28541_s9 + $0xc50] ss:$28 sps:$4 sm:$0xff]  }
 0x5fd   : > { %19815 = vmatpush3.bf16.msra.mxu0 %v21535_v37  ;;  %7248 = vmatprep.subr.bf16.mxu1 %v21538_v38  ;;  %v21591_v37 = vld [vmem:[%s28541_s9 + $0xc8c] ss:$28 sps:$4 sm:$0xff]  }
 0x5fe   : > { %19816 = vmatprep.subr.bf16.mxu0 %v21539_v40  ;;  %v21637_v38 = vld [vmem:[%s28541_s9 + $0xe8] ss:$28 sps:$4 sm:$0xff]  }
 0x5ff   : > { %v21589_v40 = vld [vmem:[%s28541_s9 + $0xc88] ss:$28 sps:$4 sm:$0xff]  }
 0x600   : > { %7249 = vmatpush1.bf16.msra.mxu1 %v21536_v41  ;;  %v21594_v41 = vld [vmem:[%s28541_s9 + $0xcc4] ss:$28 sps:$4 sm:$0xff]  }
 0x601   : > { %19817 = vmatpush3.bf16.msra.mxu0 %v21540_v42  ;;  %7250 = vmatprep.subr.bf16.mxu1 %v21543_v43  ;;  %v21592_v42 = vld [vmem:[%s28541_s9 + $0xcc0] ss:$28 sps:$4 sm:$0xff]  }
 0x602   : > { %19818 = vmatprep.subr.bf16.mxu0 %v21544_v44  ;;  %v21597_v43 = vld [vmem:[%s28541_s9 + $0xcfc] ss:$28 sps:$4 sm:$0xff]  }
 0x603   : > { %v21595_v44 = vld [vmem:[%s28541_s9 + $0xcf8] ss:$28 sps:$4 sm:$0xff]  }
 0x604   : > { %7251 = vmatpush1.bf16.msra.mxu1 %v21541_v45  ;;  %v21600_v45 = vld [vmem:[%s28541_s9 + $0xd34] ss:$28 sps:$4 sm:$0xff]  }
 0x605   : > { %19819 = vmatpush3.bf16.msra.mxu0 %v21545_v46  ;;  %7252 = vmatprep.subr.bf16.mxu1 %v21548_v34  ;;  %v21598_v46 = vld [vmem:[%s28541_s9 + $0xd30] ss:$28 sps:$4 sm:$0xff]  }
 0x606   : > { %19820 = vmatprep.subr.bf16.mxu0 %v21549_v54  ;;  %v21603_v34 = vld [vmem:[%s28541_s9 + $0xd6c] ss:$28 sps:$4 sm:$0xff]  }
 0x607   : > { %v21601_v54 = vld [vmem:[%s28541_s9 + $0xd68] ss:$28 sps:$4 sm:$0xff]  }
 0x608   : > { %7253 = vmatpush1.bf16.msra.mxu1 %v21546_v47  ;;  %v21606_v47 = vld [vmem:[%s28541_s9 + $0xda4] ss:$28 sps:$4 sm:$0xff]  }
 0x609   : > { %19821 = vmatpush3.bf16.msra.mxu0 %v21550_v48  ;;  %7254 = vmatprep.subr.bf16.mxu1 %v21553_v62  ;;  %v21604_v48 = vld [vmem:[%s28541_s9 + $0xda0] ss:$28 sps:$4 sm:$0xff]  }
 0x60a   : > { %19822 = vmatprep.subr.bf16.mxu0 %v21554_v49  ;;  %v21645_v62 = vld [vmem:[%s28541_s9 + $0x124] ss:$28 sps:$4 sm:$0xff]   ;;  %v21609_v49 = vld [vmem:[%s28541_s9 + $0xddc] ss:$28 sps:$4 sm:$0xff]  }
 0x60c   : > { %7255 = vmatpush1.bf16.msra.mxu1 %v21551_v55  ;;  %v21643_v55 = vld [vmem:[%s28541_s9 + $0x120] ss:$28 sps:$4 sm:$0xff]  }
 0x60d   : > { %19823 = vmatpush3.bf16.msra.mxu0 %v21555_v57  ;;  %7256 = vmatprep.subr.bf16.mxu1 %v21558_v59  ;;  %v21649_v57 = vld [vmem:[%s28541_s9 + $0x158] ss:$28 sps:$4 sm:$0xff]  }
 0x60e   : > { %19824 = vmatprep.subr.bf16.mxu0 %v21559_v61  ;;  %v21607_v59 = vld [vmem:[%s28541_s9 + $0xdd8] ss:$28 sps:$4 sm:$0xff]  }
 0x60f   : > { %v21651_v61 = vld [vmem:[%s28541_s9 + $0x15c] ss:$28 sps:$4 sm:$0xff]  }
 0x610   : > { %7257 = vmatpush1.bf16.msra.mxu1 %v21556_v63  ;;  %v21612_v63 = vld [vmem:[%s28541_s9 + $0x4] ss:$28 sps:$4 sm:$0xff]  }
 0x611   : > { %19825 = vmatpush3.bf16.msra.mxu0 %v21560_v1  ;;  %7269 = vmatprep.subr.bf16.mxu1 %v21563_v2  ;;  %v21657_v1 = vld [vmem:[%s28541_s9 + $0x194] ss:$28 sps:$4 sm:$0xff]  }
 0x612   : > { %18380 = vmatprep.subr.msk.bf16.mxu0 %vm814_vm0, %v24864_v32  ;;  %v21655_v2 = vld [vmem:[%s28541_s9 + $0x190] ss:$28 sps:$4 sm:$0xff]  }
 0x613   : > { %7259 = vmatmul.mubr.bf16.vlgmr.msra.gmra.mrb[48].mxu1 %v24862_v30  ;;  %v21567_v30 = vld [vmem:[%s28541_s9 + $0xb00] ss:$28 sps:$4 sm:$0xff]  }
 0x614   : > { %7386 = vmatmul.mubr.bf16.vlgmr.msra.gmra.mrb[44].mxu0 %v24824_v8  ;;  %7270 = vmatpush1.bf16.msra.mxu1 %v21561_v50  ;;  %v21610_v50 = vld [vmem:[%s28541_s9] ss:$28 sps:$4 sm:$0xff]  }
 0x615   : > { %7301 = vmatprep.mubr.bf16.mxu1 %v24826_v9  ;;  %7432 = vmatpush1.bf16.msra.mxu0 %v25271_v4 }
 0x616   : > { %18382 = vmatprep.subr.msk.bf16.mxu0 %vm814_vm0, %v24826_v9  ;;  %7271 = vmatprep.subr.bf16.mxu1 %v21566_v3  ;;  %v21663_v3 = vld [vmem:[%s28541_s9 + $0x1cc] ss:$28 sps:$4 sm:$0xff]  }
 0x617   : > { %7463 = vmatprep.mubr.bf16.mxu0 %v23387_v0 }
 0x618   : > { %7272 = vmatpush1.bf16.msra.mxu1 %v21564_v5  ;;  %v21618_v5 = vld [vmem:[%s28541_s9 + $0x3c] ss:$28 sps:$4 sm:$0xff]  }
 0x619   : > { %7273 = vmatprep.subr.bf16.mxu1 %v21569_v6  ;;  %v21661_v6 = vld [vmem:[%s28541_s9 + $0x1c8] ss:$28 sps:$4 sm:$0xff]  }
 0x61c   : > { %18381 = vmatmul.mubr.msk.bf16.vlgmr.msra.gmra.mrb[48].mxu0 %vm7415_vm5, %v21570_v16  ;;  %7274 = vmatpush1.bf16.msra.mxu1 %v21567_v30  ;;  %v21616_v30 = vld [vmem:[%s28541_s9 + $0x38] ss:$28 sps:$4 sm:$0xff]  }
 0x61d   : > { %7475 = vmatpush1.bf16.msra.mxu0 %v25299_v11  ;;  %7275 = vmatprep.subr.bf16.mxu1 %v21573_v51  ;;  %v21667_v51 = vld [vmem:[%s28541_s9 + $0x200] ss:$28 sps:$4 sm:$0xff]  }
 0x61e   : > { %7506 = vmatprep.mubr.bf16.mxu0 %v23387_v0  ;;  %9015 = vmatprep.subr.bf16.mxu0 %v21615_v7  ;;  %v21622_v7 = vld [vmem:[%s28541_s9 + $0x70] ss:$28 sps:$4 sm:$0xff]  }
 0x620   : > { %7276 = vmatpush1.bf16.msra.mxu1 %v21571_v17  ;;  %v21675_v17 = vld [vmem:[%s28541_s9 + $0x23c] ss:$28 sps:$4 sm:$0xff]  }
 0x621   : > { %7277 = vmatprep.subr.bf16.mxu1 %v21576_v19  ;;  %v21630_v19 = vld [vmem:[%s28541_s9 + $0xac] ss:$28 sps:$4 sm:$0xff]  }
 0x624   : > { %7278 = vmatpush1.bf16.msra.mxu1 %v21574_v58  ;;  %18383 = vmatmul.mubr.msk.bf16.vlgmr.msra.gmra.mrb[52].mxu0 %vm7415_vm5, %v21570_v16  ;;  %v21669_v16 = vld [vmem:[%s28541_s9 + $0x204] ss:$28 sps:$4 sm:$0xff]   ;;  %v21673_v58 = vld [vmem:[%s28541_s9 + $0x238] ss:$28 sps:$4 sm:$0xff]  }
 0x625   : > { %7279 = vmatprep.subr.bf16.mxu1 %v21579_v60  ;;  %9016 = vmatpush1.bf16.msra.mxu0 %v21613_v21  ;;  %v21628_v60 = vld [vmem:[%s28541_s9 + $0xa8] ss:$28 sps:$4 sm:$0xff]   ;;  %v21681_v21 = vld [vmem:[%s28541_s9 + $0x274] ss:$28 sps:$4 sm:$0xff]  }
 0x626   : > { %9017 = vmatprep.subr.bf16.mxu0 %v21621_v31  ;;  %v21636_v31 = vld [vmem:[%s28541_s9 + $0xe4] ss:$28 sps:$4 sm:$0xff]  }
 0x628   : > { %7280 = vmatpush1.bf16.msra.mxu1 %v21577_v22  ;;  %v21679_v22 = vld [vmem:[%s28541_s9 + $0x270] ss:$28 sps:$4 sm:$0xff]  }
 0x629   : > { %7281 = vmatprep.subr.bf16.mxu1 %v21582_v18  ;;  %9018 = vmatpush1.bf16.msra.mxu0 %v21619_v23  ;;  %v21634_v18 = vld [vmem:[%s28541_s9 + $0xe0] ss:$28 sps:$4 sm:$0xff]   ;;  %v21687_v23 = vld [vmem:[%s28541_s9 + $0x2ac] ss:$28 sps:$4 sm:$0xff]  }
 0x62a   : > { %9019 = vmatprep.subr.bf16.mxu0 %v21627_v24  ;;  %v21642_v24 = vld [vmem:[%s28541_s9 + $0x11c] ss:$28 sps:$4 sm:$0xff]  }
 0x62c   : > { %7282 = vmatpush1.bf16.msra.mxu1 %v21580_v26  ;;  %v21685_v26 = vld [vmem:[%s28541_s9 + $0x2a8] ss:$28 sps:$4 sm:$0xff]  }
 0x62d   : > { %7283 = vmatprep.subr.bf16.mxu1 %v21585_v27  ;;  %9020 = vmatpush1.bf16.msra.mxu0 %v21625_v20  ;;  %v21640_v27 = vld [vmem:[%s28541_s9 + $0x118] ss:$28 sps:$4 sm:$0xff]  }
 0x62e   : > { %9021 = vmatprep.subr.bf16.mxu0 %v21633_v29  ;;  %v21648_v20 = vld [vmem:[%s28541_s9 + $0x154] ss:$28 sps:$4 sm:$0xff]  }
 0x62f   : > { %v21646_v29 = vld [vmem:[%s28541_s9 + $0x150] ss:$28 sps:$4 sm:$0xff]  }
 0x630   : > { %7284 = vmatpush1.bf16.msra.mxu1 %v21583_v35  ;;  %v21693_v35 = vld [vmem:[%s28541_s9 + $0x2e4] ss:$28 sps:$4 sm:$0xff]  }
 0x631   : > { %7285 = vmatprep.subr.bf16.mxu1 %v21588_v13  ;;  %9022 = vmatpush1.bf16.msra.mxu0 %v21631_v52  ;;  %v21654_v13 = vld [vmem:[%s28541_s9 + $0x18c] ss:$28 sps:$4 sm:$0xff]   ;;  %v21691_v52 = vld [vmem:[%s28541_s9 + $0x2e0] ss:$28 sps:$4 sm:$0xff]  }
 0x632   : > { %9023 = vmatprep.subr.bf16.mxu0 %v21639_v53  ;;  %v21652_v53 = vld [vmem:[%s28541_s9 + $0x188] ss:$28 sps:$4 sm:$0xff]  }
 0x634   : > { %7286 = vmatpush1.bf16.msra.mxu1 %v21586_v56  ;;  %v21699_v56 = vld [vmem:[%s28541_s9 + $0x31c] ss:$28 sps:$4 sm:$0xff]  }
 0x635   : > { %7287 = vmatprep.subr.bf16.mxu1 %v21591_v37  ;;  %9024 = vmatpush1.bf16.msra.mxu0 %v21637_v38  ;;  %v21660_v37 = vld [vmem:[%s28541_s9 + $0x1c4] ss:$28 sps:$4 sm:$0xff]   ;;  %v21697_v38 = vld [vmem:[%s28541_s9 + $0x318] ss:$28 sps:$4 sm:$0xff]  }
 0x636   : > { %9025 = vmatprep.subr.bf16.mxu0 %v21645_v62  ;;  %v21682_v62 = vld [vmem:[%s28541_s9 + $0x2a0] ss:$28 sps:$4 sm:$0xff]  }
 0x638   : > { %7288 = vmatpush1.bf16.msra.mxu1 %v21589_v40  ;;  %v21658_v40 = vld [vmem:[%s28541_s9 + $0x1c0] ss:$28 sps:$4 sm:$0xff]  }
 0x639   : > { %7289 = vmatprep.subr.bf16.mxu1 %v21594_v41  ;;  %9026 = vmatpush1.bf16.msra.mxu0 %v21643_v55  ;;  %v21705_v41 = vld [vmem:[%s28541_s9 + $0x354] ss:$28 sps:$4 sm:$0xff]  }
 0x63a   : > { %9027 = vmatprep.subr.bf16.mxu0 %v21651_v61  ;;  %v21688_v55 = vld [vmem:[%s28541_s9 + $0x2d8] ss:$28 sps:$4 sm:$0xff]   ;;  %v21702_v61 = vld [vmem:[%s28541_s9 + $0x34c] ss:$28 sps:$4 sm:$0xff]  }
 0x63c   : > { %7290 = vmatpush1.bf16.msra.mxu1 %v21592_v42  ;;  %v21666_v42 = vld [vmem:[%s28541_s9 + $0x1fc] ss:$28 sps:$4 sm:$0xff]  }
 0x63d   : > { %7291 = vmatprep.subr.bf16.mxu1 %v21597_v43  ;;  %9028 = vmatpush1.bf16.msra.mxu0 %v21649_v57  ;;  %v21703_v43 = vld [vmem:[%s28541_s9 + $0x350] ss:$28 sps:$4 sm:$0xff]  }
 0x63e   : > { %9029 = vmatprep.subr.bf16.mxu0 %v21657_v1  ;;  %v21696_v57 = vld [vmem:[%s28541_s9 + $0x314] ss:$28 sps:$4 sm:$0xff]   ;;  %v21708_v1 = vld [vmem:[%s28541_s9 + $0x384] ss:$28 sps:$4 sm:$0xff]  }
 0x640   : > { %7292 = vmatpush1.bf16.msra.mxu1 %v21595_v44  ;;  %v21664_v44 = vld [vmem:[%s28541_s9 + $0x1f8] ss:$28 sps:$4 sm:$0xff]  }
 0x641   : > { %7293 = vmatprep.subr.bf16.mxu1 %v21600_v45  ;;  %9030 = vmatpush1.bf16.msra.mxu0 %v21655_v2  ;;  %v21711_v45 = vld [vmem:[%s28541_s9 + $0x38c] ss:$28 sps:$4 sm:$0xff]  }
 0x642   : > { %9031 = vmatprep.subr.bf16.mxu0 %v21663_v3 }
 0x644   : > { %7294 = vmatpush1.bf16.msra.mxu1 %v21598_v46  ;;  %v21672_v46 = vld [vmem:[%s28541_s9 + $0x234] ss:$28 sps:$4 sm:$0xff]  }
 0x645   : > { %7295 = vmatprep.subr.bf16.mxu1 %v21603_v34  ;;  %9032 = vmatpush1.bf16.msra.mxu0 %v21661_v6  ;;  %v21670_v34 = vld [vmem:[%s28541_s9 + $0x230] ss:$28 sps:$4 sm:$0xff]  }
 0x646   : > { %9033 = vmatprep.subr.bf16.mxu0 %v21669_v16 }
 0x648   : > { %7296 = vmatpush1.bf16.msra.mxu1 %v21601_v54  ;;  %v21678_v54 = vld [vmem:[%s28541_s9 + $0x26c] ss:$28 sps:$4 sm:$0xff]  }
 0x649   : > { %7297 = vmatprep.subr.bf16.mxu1 %v21606_v47  ;;  %9034 = vmatpush1.bf16.msra.mxu0 %v21667_v51  ;;  %v21676_v47 = vld [vmem:[%s28541_s9 + $0x268] ss:$28 sps:$4 sm:$0xff]  }
 0x64a   : > { %9035 = vmatprep.subr.bf16.mxu0 %v21675_v17 }
 0x64c   : > { %7298 = vmatpush1.bf16.msra.mxu1 %v21604_v48  ;;  %v21684_v48 = vld [vmem:[%s28541_s9 + $0x2a4] ss:$28 sps:$4 sm:$0xff]  }
 0x64d   : > { %7299 = vmatprep.subr.bf16.mxu1 %v21609_v49  ;;  %9036 = vmatpush1.bf16.msra.mxu0 %v21673_v58  ;;  %v21690_v49 = vld [vmem:[%s28541_s9 + $0x2dc] ss:$28 sps:$4 sm:$0xff]  }
 0x64e   : > { %9037 = vmatprep.subr.bf16.mxu0 %v21681_v21 }
 0x650   : > { %7300 = vmatpush1.bf16.msra.mxu1 %v21607_v59  ;;  %v21694_v59 = vld [vmem:[%s28541_s9 + $0x310] ss:$28 sps:$4 sm:$0xff]  }
 0x651   : > { %8929 = vmatprep.subr.bf16.mxu1 %v21612_v63  ;;  %9038 = vmatpush1.bf16.msra.mxu0 %v21679_v22  ;;  %v21700_v63 = vld [vmem:[%s28541_s9 + $0x348] ss:$28 sps:$4 sm:$0xff]  }
 0x652   : > { %9039 = vmatprep.subr.bf16.mxu0 %v21687_v23 }
 0x653   : > { %7302 = vmatmul.mubr.bf16.vlgmr.msra.gmra.mrb[48].mxu1 %v24824_v8  ;;  %v21624_v8 = vld [vmem:[%s28541_s9 + $0x74] ss:$28 sps:$4 sm:$0xff]  }
 0x654   : > { %8930 = vmatpush1.bf16.msra.mxu1 %v21610_v50 }
 0x655   : > { %8931 = vmatprep.subr.bf16.mxu1 %v21618_v5  ;;  %9040 = vmatpush1.bf16.msra.mxu0 %v21685_v26  ;;  %v21706_v26 = vld [vmem:[%s28541_s9 + $0x380] ss:$28 sps:$4 sm:$0xff]  }
 0x656   : > { %9041 = vmatprep.subr.bf16.mxu0 %v21693_v35  ;;  %v21712_v35 = vld [vmem:[%s28541_s9 + $0x3b8] ss:$28 sps:$4 sm:$0xff]  }
 0x658   : > { %8932 = vmatpush1.bf16.msra.mxu1 %v21616_v30 }
 0x659   : > { %8933 = vmatprep.subr.bf16.mxu1 %v21624_v8  ;;  %9042 = vmatpush1.bf16.msra.mxu0 %v21691_v52 }
 0x65a   : > { %9043 = vmatprep.subr.bf16.mxu0 %v21699_v56  ;;  %v21723_v56 = vld [vmem:[%s28541_s9 + $0x3fc] ss:$28 sps:$4 sm:$0xff]  }
 0x65c   : > { %8934 = vmatpush1.bf16.msra.mxu1 %v21622_v7 }
 0x65d   : > { %8935 = vmatprep.subr.bf16.mxu1 %v21630_v19  ;;  %9044 = vmatpush1.bf16.msra.mxu0 %v21697_v38 }
 0x65e   : > { %9045 = vmatprep.subr.bf16.mxu0 %v21705_v41 }
 0x660   : > { %8936 = vmatpush1.bf16.msra.mxu1 %v21628_v60 }
 0x661   : > { %8937 = vmatprep.subr.bf16.mxu1 %v21636_v31  ;;  %9046 = vmatpush1.bf16.msra.mxu0 %v21703_v43  ;;  %v21721_v43 = vld [vmem:[%s28541_s9 + $0x3f8] ss:$28 sps:$4 sm:$0xff]  }
 0x662   : > { %9058 = vmatprep.subr.bf16.mxu0 %v21711_v45  ;;  %v21726_v45 = vld [vmem:[%s28541_s9 + $0x42c] ss:$28 sps:$4 sm:$0xff]  }
 0x664   : > { %8938 = vmatpush1.bf16.msra.mxu1 %v21634_v18 }
 0x665   : > { %8939 = vmatprep.subr.bf16.mxu1 %v21642_v24 }
 0x668   : > { %8940 = vmatpush1.bf16.msra.mxu1 %v21640_v27  ;;  %v21709_v27 = vld [vmem:[%s28541_s9 + $0x388] ss:$28 sps:$4 sm:$0xff]  }
 0x669   : > { %8941 = vmatprep.subr.bf16.mxu1 %v21648_v20  ;;  %v21714_v20 = vld [vmem:[%s28541_s9 + $0x3bc] ss:$28 sps:$4 sm:$0xff]  }
 0x66c   : > { %8942 = vmatpush1.bf16.msra.mxu1 %v21646_v29  ;;  %v21717_v29 = vld [vmem:[%s28541_s9 + $0x3c4] ss:$28 sps:$4 sm:$0xff]  }
 0x66d   : > { %8943 = vmatprep.subr.bf16.mxu1 %v21654_v13  ;;  %v21715_v13 = vld [vmem:[%s28541_s9 + $0x3c0] ss:$28 sps:$4 sm:$0xff]  }
 0x670   : > { %8944 = vmatpush1.bf16.msra.mxu1 %v21652_v53  ;;  %v21720_v53 = vld [vmem:[%s28541_s9 + $0x3f4] ss:$28 sps:$4 sm:$0xff]  }
 0x671   : > { %8945 = vmatprep.subr.bf16.mxu1 %v21660_v37 }
 0x674   : > { %8946 = vmatpush1.bf16.msra.mxu1 %v21658_v40 }
 0x675   : > { %8947 = vmatprep.subr.bf16.mxu1 %v21666_v42  ;;  %v21718_v42 = vld [vmem:[%s28541_s9 + $0x3f0] ss:$28 sps:$4 sm:$0xff]  }
 0x678   : > { %8948 = vmatpush1.bf16.msra.mxu1 %v21664_v44 }
 0x679   : > { %8949 = vmatprep.subr.bf16.mxu1 %v21672_v46  ;;  %v21729_v46 = vld [vmem:[%s28541_s9 + $0x434] ss:$28 sps:$4 sm:$0xff]  }
 0x67c   : > { %8950 = vmatpush1.bf16.msra.mxu1 %v21670_v34  ;;  %v21724_v34 = vld [vmem:[%s28541_s9 + $0x428] ss:$28 sps:$4 sm:$0xff]  }
 0x67d   : > { %8951 = vmatprep.subr.bf16.mxu1 %v21678_v54  ;;  %v21727_v54 = vld [vmem:[%s28541_s9 + $0x430] ss:$28 sps:$4 sm:$0xff]  }
 0x680   : > { %8952 = vmatpush1.bf16.msra.mxu1 %v21676_v47  ;;  %v21732_v47 = vld [vmem:[%s28541_s9 + $0x464] ss:$28 sps:$4 sm:$0xff]  }
 0x681   : > { %8953 = vmatprep.subr.bf16.mxu1 %v21684_v48  ;;  %v21735_v48 = vld [vmem:[%s28541_s9 + $0x46c] ss:$28 sps:$4 sm:$0xff]  }
 0x684   : > { %8954 = vmatpush1.bf16.msra.mxu1 %v21682_v62  ;;  %v21730_v62 = vld [vmem:[%s28541_s9 + $0x460] ss:$28 sps:$4 sm:$0xff]  }
 0x685   : > { %8955 = vmatprep.subr.bf16.mxu1 %v21690_v49  ;;  %v21733_v49 = vld [vmem:[%s28541_s9 + $0x468] ss:$28 sps:$4 sm:$0xff]  }
 0x688   : > { %8956 = vmatpush1.bf16.msra.mxu1 %v21688_v55  ;;  %v21738_v55 = vld [vmem:[%s28541_s9 + $0x49c] ss:$28 sps:$4 sm:$0xff]  }
 0x689   : > { %8957 = vmatprep.subr.bf16.mxu1 %v21696_v57  ;;  %v21741_v57 = vld [vmem:[%s28541_s9 + $0x4a4] ss:$28 sps:$4 sm:$0xff]  }
 0x68c   : > { %8958 = vmatpush1.bf16.msra.mxu1 %v21694_v59  ;;  %v21736_v59 = vld [vmem:[%s28541_s9 + $0x498] ss:$28 sps:$4 sm:$0xff]  }
 0x68d   : > { %8959 = vmatprep.subr.bf16.mxu1 %v21702_v61  ;;  %v21739_v61 = vld [vmem:[%s28541_s9 + $0x4a0] ss:$28 sps:$4 sm:$0xff]  }
 0x690   : > { %8960 = vmatpush1.bf16.msra.mxu1 %v21700_v63  ;;  %v21744_v63 = vld [vmem:[%s28541_s9 + $0x4d4] ss:$28 sps:$4 sm:$0xff]  }
 0x691   : > { %8972 = vmatprep.subr.bf16.mxu1 %v21708_v1  ;;  %v21747_v1 = vld [vmem:[%s28541_s9 + $0x4dc] ss:$28 sps:$4 sm:$0xff]  }
 0x6c7   : > { %v19804_v2 = vpop.f32.mrb[40].mxu0 }
 0x6c8   : > { %v19805_v50 = vpop.f32.mrb[41].mxu0 }
 0x6c9   : > { %v19806_v3 = vadd.f32 %v19805_v50, %v19804_v2  ;;  %v19807_v5 = vpop.f32.mrb[42].mxu0  ;;  %v21742_v2 = vld [vmem:[%s28541_s9 + $0x4d0] ss:$28 sps:$4 sm:$0xff]   ;;  %v21745_v50 = vld [vmem:[%s28541_s9 + $0x4d8] ss:$28 sps:$4 sm:$0xff]  }
 0x6ca   : > { %v19808_v6 = vpop.f32.mrb[43].mxu0 }
 0x6cb   : > { %v19809_v30 = vadd.f32 %v19808_v6, %v19807_v5  ;;  %v21753_v5 = vld [vmem:[%s28541_s9 + $0x514] ss:$28 sps:$4 sm:$0xff]   ;;  %v21748_v6 = vld [vmem:[%s28541_s9 + $0x508] ss:$28 sps:$4 sm:$0xff]  }
 0x6e7   : > { %v19826_v16 = vpop.f32.mrb[44].mxu0 }
 0x6e8   : > { %v19827_v8 = vpop.f32.mrb[45].mxu0 }
 0x6e9   : > { %v19828_v51 = vadd.f32 %v19827_v8, %v19826_v16  ;;  %v19829_v7 = vpop.f32.mrb[46].mxu0  ;;  %v21756_v16 = vld [vmem:[%s28541_s9 + $0x544] ss:$28 sps:$4 sm:$0xff]   ;;  %v21759_v8 = vld [vmem:[%s28541_s9 + $0x54c] ss:$28 sps:$4 sm:$0xff]  }
 0x6ea   : > { %v19830_v17 = vpop.f32.mrb[47].mxu0 }
 0x6eb   : > { %v25575_v19 = vadd.f32 %v19828_v51, %v19806_v3  ;;  %v19831_v58 = vadd.f32 %v19830_v17, %v19829_v7  ;;  %v21750_v3 = vld [vmem:[%s28541_s9 + $0x50c] ss:$28 sps:$4 sm:$0xff]   ;;  %v21754_v51 = vld [vmem:[%s28541_s9 + $0x540] ss:$28 sps:$4 sm:$0xff]  }
 0x6ec   : > { %v21757_v7 = vld [vmem:[%s28541_s9 + $0x548] ss:$28 sps:$4 sm:$0xff]   ;;  %v21762_v17 = vld [vmem:[%s28541_s9 + $0x57c] ss:$28 sps:$4 sm:$0xff]  }
 0x6ed   : > { %v25577_v60 = vadd.f32 %v19831_v58, %v19809_v30  ;;  %v21751_v30 = vld [vmem:[%s28541_s9 + $0x510] ss:$28 sps:$4 sm:$0xff]   ;;  %v21765_v58 = vld [vmem:[%s28541_s9 + $0x584] ss:$28 sps:$4 sm:$0xff]  }
 0x6ef   : > { %v7465_v21 = vpop.f32.mrb[48].mxu0 }
 0x6f0   : > { %v7467_v31 = vpop.f32.mrb[49].mxu0 }
 0x6f1   : > { %v7469_v22 = vpop.f32.mrb[50].mxu0 }
 0x6f2   : > { %v25579_v18 = vpack.c.bf16 %v7469_v22, %v7465_v21  ;;  %v7471_v23 = vpop.f32.mrb[51].mxu0  ;;  %v21760_v21 = vld [vmem:[%s28541_s9 + $0x578] ss:$28 sps:$4 sm:$0xff]  }
 0x6f3   : > { %v25581_v24 = vpack.c.bf16 %v7471_v23, %v7467_v31  ;;  %v21763_v31 = vld [vmem:[%s28541_s9 + $0x580] ss:$28 sps:$4 sm:$0xff]   ;;  %v21768_v22 = vld [vmem:[%s28541_s9 + $0x5b4] ss:$28 sps:$4 sm:$0xff]  }
 0x6f4   : > { %v21771_v23 = vld [vmem:[%s28541_s9 + $0x5bc] ss:$28 sps:$4 sm:$0xff]  }
 0x6f5   : > { %8961 = vmatprep.mubr.bf16.mxu1 %v25581_v24  ;;  %9047 = vmatprep.mubr.bf16.mxu0 %v25581_v24 }
 0x6f6   : > { %8962 = vmatmul.mubr.bf16.vlgmr.msra.gmra.mrb[44].mxu1 %v25579_v18  ;;  %9048 = vmatmul.mubr.bf16.vlgmr.msra.gmra.mrb[36].mxu0 %v25579_v18 }
 0x6f7   : > { %8973 = vmatpush1.bf16.msra.mxu1 %v21706_v26  ;;  %9059 = vmatpush1.bf16.msra.mxu0 %v21709_v27  ;;  %v7508_v52 = vpop.f32.mrb[52].mxu0  ;;  %v21766_v26 = vld [vmem:[%s28541_s9 + $0x5b0] ss:$28 sps:$4 sm:$0xff]   ;;  %v21769_v27 = vld [vmem:[%s28541_s9 + $0x5b8] ss:$28 sps:$4 sm:$0xff]  }
 0x6f8   : > { %8974 = vmatprep.subr.bf16.mxu1 %v21714_v20  ;;  %9060 = vmatprep.subr.bf16.mxu0 %v21717_v29  ;;  %v7510_v37 = vpop.f32.mrb[53].mxu0  ;;  %v21774_v20 = vld [vmem:[%s28541_s9 + $0x5ec] ss:$28 sps:$4 sm:$0xff]   ;;  %v21777_v29 = vld [vmem:[%s28541_s9 + $0x5f4] ss:$28 sps:$4 sm:$0xff]  }
 0x6f9   : > { %v7512_v38 = vpop.f32.mrb[54].mxu0 }
 0x6fa   : > { %v25611_v40 = vpack.c.bf16 %v7512_v38, %v7508_v52  ;;  %v7514_v41 = vpop.f32.mrb[55].mxu0  ;;  %v21780_v52 = vld [vmem:[%s28541_s9 + $0x624] ss:$28 sps:$4 sm:$0xff]   ;;  %v21786_v38 = vld [vmem:[%s28541_s9 + $0x65c] ss:$28 sps:$4 sm:$0xff]  }
 0x6fb   : > { %8975 = vmatpush1.bf16.msra.mxu1 %v21712_v35  ;;  %9061 = vmatpush1.bf16.msra.mxu0 %v21715_v13  ;;  %v25619_v44 = vpack.c.bf16 %v7514_v41, %v7510_v37  ;;  %v21772_v35 = vld [vmem:[%s28541_s9 + $0x5e8] ss:$28 sps:$4 sm:$0xff]   ;;  %v21775_v13 = vld [vmem:[%s28541_s9 + $0x5f0] ss:$28 sps:$4 sm:$0xff]  }
 0x6fc   : > { %8976 = vmatprep.subr.bf16.mxu1 %v21720_v53  ;;  %9062 = vmatprep.subr.bf16.mxu0 %v21723_v56  ;;  %v21783_v53 = vld [vmem:[%s28541_s9 + $0x62c] ss:$28 sps:$4 sm:$0xff]   ;;  %v21778_v56 = vld [vmem:[%s28541_s9 + $0x620] ss:$28 sps:$4 sm:$0xff]  }
 0x6fd   : > { %9004 = vmatprep.mubr.bf16.mxu1 %v25619_v44  ;;  %9090 = vmatprep.mubr.bf16.mxu0 %v25619_v44  ;;  %v21781_v37 = vld [vmem:[%s28541_s9 + $0x628] ss:$28 sps:$4 sm:$0xff]  }
 0x6fe   : > { %v21789_v41 = vld [vmem:[%s28541_s9 + $0x664] ss:$28 sps:$4 sm:$0xff]  }
 0x6ff   : > { %8977 = vmatpush1.bf16.msra.mxu1 %v21718_v42  ;;  %9063 = vmatpush1.bf16.msra.mxu0 %v21721_v43  ;;  %v21784_v42 = vld [vmem:[%s28541_s9 + $0x658] ss:$28 sps:$4 sm:$0xff]   ;;  %v21787_v43 = vld [vmem:[%s28541_s9 + $0x660] ss:$28 sps:$4 sm:$0xff]  }
 0x700   : > { %8978 = vmatprep.subr.bf16.mxu1 %v21726_v45  ;;  %9064 = vmatprep.subr.bf16.mxu0 %v21729_v46  ;;  %v21792_v45 = vld [vmem:[%s28541_s9 + $0x694] ss:$28 sps:$4 sm:$0xff]   ;;  %v21795_v46 = vld [vmem:[%s28541_s9 + $0x69c] ss:$28 sps:$4 sm:$0xff]  }
 0x703   : > { %8979 = vmatpush1.bf16.msra.mxu1 %v21724_v34  ;;  %9065 = vmatpush1.bf16.msra.mxu0 %v21727_v54  ;;  %v21790_v34 = vld [vmem:[%s28541_s9 + $0x690] ss:$28 sps:$4 sm:$0xff]   ;;  %v21793_v54 = vld [vmem:[%s28541_s9 + $0x698] ss:$28 sps:$4 sm:$0xff]  }
 0x704   : > { %8980 = vmatprep.subr.bf16.mxu1 %v21732_v47  ;;  %9066 = vmatprep.subr.bf16.mxu0 %v21735_v48  ;;  %v21798_v47 = vld [vmem:[%s28541_s9 + $0x6cc] ss:$28 sps:$4 sm:$0xff]   ;;  %v21801_v48 = vld [vmem:[%s28541_s9 + $0x6d4] ss:$28 sps:$4 sm:$0xff]  }
 0x707   : > { %8981 = vmatpush1.bf16.msra.mxu1 %v21730_v62  ;;  %9067 = vmatpush1.bf16.msra.mxu0 %v21733_v49  ;;  %v21796_v62 = vld [vmem:[%s28541_s9 + $0x6c8] ss:$28 sps:$4 sm:$0xff]   ;;  %v21799_v49 = vld [vmem:[%s28541_s9 + $0x6d0] ss:$28 sps:$4 sm:$0xff]  }
 0x708   : > { %8982 = vmatprep.subr.bf16.mxu1 %v21738_v55  ;;  %9068 = vmatprep.subr.bf16.mxu0 %v21741_v57  ;;  %v21804_v55 = vld [vmem:[%s28541_s9 + $0x14] ss:$28 sps:$4 sm:$0xff]  }
 0x709   : > { %v21805_v57 = vld [vmem:[%s28541_s9 + $0x1d8] ss:$28 sps:$4 sm:$0xff]  }
 0x70b   : > { %8983 = vmatpush1.bf16.msra.mxu1 %v21736_v59  ;;  %9069 = vmatpush1.bf16.msra.mxu0 %v21739_v61  ;;  %v21802_v59 = vld [vmem:[%s28541_s9 + $0x10] ss:$28 sps:$4 sm:$0xff]   ;;  %v21806_v61 = vld [vmem:[%s28541_s9 + $0x18] ss:$28 sps:$4 sm:$0xff]  }
 0x70c   : > { %8984 = vmatprep.subr.bf16.mxu1 %v21744_v63  ;;  %9070 = vmatprep.subr.bf16.mxu0 %v21747_v1  ;;  %v21809_v63 = vld [vmem:[%s28541_s9 + $0x4c] ss:$28 sps:$4 sm:$0xff]  }
 0x70d   : > { %v21810_v1 = vld [vmem:[%s28541_s9 + $0x210] ss:$28 sps:$4 sm:$0xff]  }
 0x70f   : > { %8985 = vmatpush1.bf16.msra.mxu1 %v21742_v2  ;;  %9071 = vmatpush1.bf16.msra.mxu0 %v21745_v50  ;;  %v21807_v2 = vld [vmem:[%s28541_s9 + $0x48] ss:$28 sps:$4 sm:$0xff]   ;;  %v21811_v50 = vld [vmem:[%s28541_s9 + $0x50] ss:$28 sps:$4 sm:$0xff]  }
 0x710   : > { %8986 = vmatprep.subr.bf16.mxu1 %v21750_v3  ;;  %9072 = vmatprep.subr.bf16.mxu0 %v21753_v5  ;;  %v21814_v3 = vld [vmem:[%s28541_s9 + $0x84] ss:$28 sps:$4 sm:$0xff]  }
 0x711   : > { %v21815_v5 = vld [vmem:[%s28541_s9 + $0x248] ss:$28 sps:$4 sm:$0xff]  }
 0x713   : > { %8987 = vmatpush1.bf16.msra.mxu1 %v21748_v6  ;;  %9073 = vmatpush1.bf16.msra.mxu0 %v21751_v30  ;;  %v21812_v6 = vld [vmem:[%s28541_s9 + $0x80] ss:$28 sps:$4 sm:$0xff]  }
 0x714   : > { %8988 = vmatprep.subr.bf16.mxu1 %v21756_v16  ;;  %9074 = vmatprep.subr.bf16.mxu0 %v21759_v8  ;;  %v21819_v30 = vld [vmem:[%s28541_s9 + $0xbc] ss:$28 sps:$4 sm:$0xff]  }
 0x715   : > { %v21820_v16 = vld [vmem:[%s28541_s9 + $0x280] ss:$28 sps:$4 sm:$0xff]   ;;  %v21817_v8 = vld [vmem:[%s28541_s9 + $0xb8] ss:$28 sps:$4 sm:$0xff]  }
 0x717   : > { %8989 = vmatpush1.bf16.msra.mxu1 %v21754_v51  ;;  %9075 = vmatpush1.bf16.msra.mxu0 %v21757_v7  ;;  %v21821_v51 = vld [vmem:[%s28541_s9 + $0xc0] ss:$28 sps:$4 sm:$0xff]   ;;  %v21824_v7 = vld [vmem:[%s28541_s9 + $0xf4] ss:$28 sps:$4 sm:$0xff]  }
 0x718   : > { %8990 = vmatprep.subr.bf16.mxu1 %v21762_v17  ;;  %9076 = vmatprep.subr.bf16.mxu0 %v21765_v58  ;;  %v21825_v17 = vld [vmem:[%s28541_s9 + $0x2b8] ss:$28 sps:$4 sm:$0xff]   ;;  %v21822_v58 = vld [vmem:[%s28541_s9 + $0xf0] ss:$28 sps:$4 sm:$0xff]  }
 0x71b   : > { %8991 = vmatpush1.bf16.msra.mxu1 %v21760_v21  ;;  %9077 = vmatpush1.bf16.msra.mxu0 %v21763_v31  ;;  %v21826_v21 = vld [vmem:[%s28541_s9 + $0xf8] ss:$28 sps:$4 sm:$0xff]   ;;  %v21829_v31 = vld [vmem:[%s28541_s9 + $0x12c] ss:$28 sps:$4 sm:$0xff]  }
 0x71c   : > { %8992 = vmatprep.subr.bf16.mxu1 %v21768_v22  ;;  %9078 = vmatprep.subr.bf16.mxu0 %v21771_v23  ;;  %v21830_v22 = vld [vmem:[%s28541_s9 + $0x2f0] ss:$28 sps:$4 sm:$0xff]   ;;  %v21827_v23 = vld [vmem:[%s28541_s9 + $0x128] ss:$28 sps:$4 sm:$0xff]  }
 0x71f   : > { %8993 = vmatpush1.bf16.msra.mxu1 %v21766_v26  ;;  %9079 = vmatpush1.bf16.msra.mxu0 %v21769_v27  ;;  %v21831_v26 = vld [vmem:[%s28541_s9 + $0x130] ss:$28 sps:$4 sm:$0xff]   ;;  %v21834_v27 = vld [vmem:[%s28541_s9 + $0x164] ss:$28 sps:$4 sm:$0xff]  }
 0x720   : > { %8994 = vmatprep.subr.bf16.mxu1 %v21774_v20  ;;  %9080 = vmatprep.subr.bf16.mxu0 %v21777_v29  ;;  %v21835_v20 = vld [vmem:[%s28541_s9 + $0x328] ss:$28 sps:$4 sm:$0xff]   ;;  %v21832_v29 = vld [vmem:[%s28541_s9 + $0x160] ss:$28 sps:$4 sm:$0xff]  }
 0x723   : > { %8995 = vmatpush1.bf16.msra.mxu1 %v21772_v35  ;;  %9081 = vmatpush1.bf16.msra.mxu0 %v21775_v13  ;;  %v21836_v35 = vld [vmem:[%s28541_s9 + $0x168] ss:$28 sps:$4 sm:$0xff]   ;;  %v21839_v13 = vld [vmem:[%s28541_s9 + $0x19c] ss:$28 sps:$4 sm:$0xff]  }
 0x724   : > { %8996 = vmatprep.subr.bf16.mxu1 %v21780_v52  ;;  %9082 = vmatprep.subr.bf16.mxu0 %v21783_v53  ;;  %v21840_v52 = vld [vmem:[%s28541_s9 + $0x360] ss:$28 sps:$4 sm:$0xff]   ;;  %v21837_v53 = vld [vmem:[%s28541_s9 + $0x198] ss:$28 sps:$4 sm:$0xff]  }
 0x727   : > { %8997 = vmatpush1.bf16.msra.mxu1 %v21778_v56  ;;  %9083 = vmatpush1.bf16.msra.mxu0 %v21781_v37  ;;  %v21841_v56 = vld [vmem:[%s28541_s9 + $0x1a0] ss:$28 sps:$4 sm:$0xff]   ;;  %v21844_v37 = vld [vmem:[%s28541_s9 + $0x1d4] ss:$28 sps:$4 sm:$0xff]  }
 0x728   : > { %8998 = vmatprep.subr.bf16.mxu1 %v21786_v38  ;;  %9084 = vmatprep.subr.bf16.mxu0 %v21789_v41  ;;  %v21845_v38 = vld [vmem:[%s28541_s9 + $0x558] ss:$28 sps:$4 sm:$0xff]   ;;  %v21842_v41 = vld [vmem:[%s28541_s9 + $0x1d0] ss:$28 sps:$4 sm:$0xff]  }
 0x72b   : > { %8999 = vmatpush1.bf16.msra.mxu1 %v21784_v42  ;;  %9085 = vmatpush1.bf16.msra.mxu0 %v21787_v43  ;;  %v21846_v42 = vld [vmem:[%s28541_s9 + $0x398] ss:$28 sps:$4 sm:$0xff]   ;;  %v21849_v43 = vld [vmem:[%s28541_s9 + $0x20c] ss:$28 sps:$4 sm:$0xff]  }
 0x72c   : > { %9000 = vmatprep.subr.bf16.mxu1 %v21792_v45  ;;  %9086 = vmatprep.subr.bf16.mxu0 %v21795_v46  ;;  %v21850_v45 = vld [vmem:[%s28541_s9 + $0x590] ss:$28 sps:$4 sm:$0xff]   ;;  %v21847_v46 = vld [vmem:[%s28541_s9 + $0x208] ss:$28 sps:$4 sm:$0xff]  }
 0x72f   : > { %9001 = vmatpush1.bf16.msra.mxu1 %v21790_v34  ;;  %9087 = vmatpush1.bf16.msra.mxu0 %v21793_v54  ;;  %v21851_v34 = vld [vmem:[%s28541_s9 + $0x3d0] ss:$28 sps:$4 sm:$0xff]   ;;  %v21854_v54 = vld [vmem:[%s28541_s9 + $0x244] ss:$28 sps:$4 sm:$0xff]  }
 0x730   : > { %9002 = vmatprep.subr.bf16.mxu1 %v21798_v47  ;;  %9088 = vmatprep.subr.bf16.mxu0 %v21801_v48  ;;  %v21855_v47 = vld [vmem:[%s28541_s9 + $0x5c8] ss:$28 sps:$4 sm:$0xff]   ;;  %v21852_v48 = vld [vmem:[%s28541_s9 + $0x240] ss:$28 sps:$4 sm:$0xff]  }
 0x733   : > { %9003 = vmatpush1.bf16.msra.mxu1 %v21796_v62  ;;  %9089 = vmatpush1.bf16.msra.mxu0 %v21799_v49  ;;  %v21856_v62 = vld [vmem:[%s28541_s9 + $0x408] ss:$28 sps:$4 sm:$0xff]   ;;  %v21859_v49 = vld [vmem:[%s28541_s9 + $0x27c] ss:$28 sps:$4 sm:$0xff]  }
 0x734   : > { %9101 = vmatprep.subr.bf16.mxu1 %v21804_v55  ;;  %19832 = vmatprep.subr.bf16.mxu0 %v21805_v57  ;;  %v21860_v55 = vld [vmem:[%s28541_s9 + $0x600] ss:$28 sps:$4 sm:$0xff]   ;;  %v21857_v57 = vld [vmem:[%s28541_s9 + $0x278] ss:$28 sps:$4 sm:$0xff]  }
 0x736   : > { %9005 = vmatmul.mubr.bf16.vlgmr.msra.gmra.mrb[44].mxu1 %v25611_v40  ;;  %9091 = vmatmul.mubr.bf16.vlgmr.msra.gmra.mrb[36].mxu0 %v25611_v40 }
 0x737   : > { %9102 = vmatpush1.bf16.msra.mxu1 %v21802_v59  ;;  %9133 = vmatprep.mubr.bf16.mxu1 %v25581_v24  ;;  %v21861_v59 = vld [vmem:[%s28541_s9 + $0x440] ss:$28 sps:$4 sm:$0xff]  }
 0x738   : > { %19833 = vmatpush3.bf16.msra.mxu0 %v21806_v61  ;;  %9219 = vmatprep.mubr.bf16.mxu0 %v25581_v24  ;;  %v21816_v24 = vld [vmem:[%s28541_s9 + $0x88] ss:$28 sps:$4 sm:$0xff]   ;;  %v21864_v61 = vld [vmem:[%s28541_s9 + $0x2b4] ss:$28 sps:$4 sm:$0xff]  }
 0x739   : > { %9103 = vmatprep.subr.bf16.mxu1 %v21809_v63  ;;  %19834 = vmatprep.subr.bf16.mxu0 %v21810_v1  ;;  %v21865_v63 = vld [vmem:[%s28541_s9 + $0x638] ss:$28 sps:$4 sm:$0xff]   ;;  %v21862_v1 = vld [vmem:[%s28541_s9 + $0x2b0] ss:$28 sps:$4 sm:$0xff]  }
 0x73b   : > { %9104 = vmatpush1.bf16.msra.mxu1 %v21807_v2  ;;  %v21866_v2 = vld [vmem:[%s28541_s9 + $0x478] ss:$28 sps:$4 sm:$0xff]  }
 0x73c   : > { %19835 = vmatpush3.bf16.msra.mxu0 %v21811_v50  ;;  %9105 = vmatprep.subr.bf16.mxu1 %v21814_v3  ;;  %v21869_v50 = vld [vmem:[%s28541_s9 + $0x2ec] ss:$28 sps:$4 sm:$0xff]  }
 0x73d   : > { %19836 = vmatprep.subr.bf16.mxu0 %v21815_v5  ;;  %v21870_v3 = vld [vmem:[%s28541_s9 + $0x670] ss:$28 sps:$4 sm:$0xff]   ;;  %v21867_v5 = vld [vmem:[%s28541_s9 + $0x2e8] ss:$28 sps:$4 sm:$0xff]  }
 0x73f   : > { %9106 = vmatpush1.bf16.msra.mxu1 %v21812_v6  ;;  %v21871_v6 = vld [vmem:[%s28541_s9 + $0x4b0] ss:$28 sps:$4 sm:$0xff]  }
 0x740   : > { %19837 = vmatpush3.bf16.msra.mxu0 %v21816_v24  ;;  %9107 = vmatprep.subr.bf16.mxu1 %v21819_v30  ;;  %v21874_v24 = vld [vmem:[%s28541_s9 + $0x324] ss:$28 sps:$4 sm:$0xff]  }
 0x741   : > { %19838 = vmatprep.subr.bf16.mxu0 %v21820_v16  ;;  %v21875_v30 = vld [vmem:[%s28541_s9 + $0x6a8] ss:$28 sps:$4 sm:$0xff]   ;;  %v21872_v16 = vld [vmem:[%s28541_s9 + $0x320] ss:$28 sps:$4 sm:$0xff]  }
 0x743   : > { %9108 = vmatpush1.bf16.msra.mxu1 %v21817_v8  ;;  %v21876_v8 = vld [vmem:[%s28541_s9 + $0x4e8] ss:$28 sps:$4 sm:$0xff]  }
 0x744   : > { %19839 = vmatpush3.bf16.msra.mxu0 %v21821_v51  ;;  %9109 = vmatprep.subr.bf16.mxu1 %v21824_v7  ;;  %v21879_v51 = vld [vmem:[%s28541_s9 + $0x35c] ss:$28 sps:$4 sm:$0xff]  }
 0x745   : > { %19840 = vmatprep.subr.bf16.mxu0 %v21825_v17  ;;  %v21880_v7 = vld [vmem:[%s28541_s9 + $0x6e0] ss:$28 sps:$4 sm:$0xff]   ;;  %v21877_v17 = vld [vmem:[%s28541_s9 + $0x358] ss:$28 sps:$4 sm:$0xff]  }
 0x747   : > { %9110 = vmatpush1.bf16.msra.mxu1 %v21822_v58  ;;  %v21881_v58 = vld [vmem:[%s28541_s9 + $0x520] ss:$28 sps:$4 sm:$0xff]  }
 0x748   : > { %19841 = vmatpush3.bf16.msra.mxu0 %v21826_v21  ;;  %9111 = vmatprep.subr.bf16.mxu1 %v21829_v31  ;;  %v21884_v21 = vld [vmem:[%s28541_s9 + $0x394] ss:$28 sps:$4 sm:$0xff]  }
 0x749   : > { %19842 = vmatprep.subr.bf16.mxu0 %v21830_v22  ;;  %v21882_v31 = vld [vmem:[%s28541_s9 + $0x390] ss:$28 sps:$4 sm:$0xff]  }
 0x74a   : > { %v21887_v22 = vld [vmem:[%s28541_s9 + $0x3cc] ss:$28 sps:$4 sm:$0xff]  }
 0x74b   : > { %9112 = vmatpush1.bf16.msra.mxu1 %v21827_v23  ;;  %v21885_v23 = vld [vmem:[%s28541_s9 + $0x3c8] ss:$28 sps:$4 sm:$0xff]  }
 0x74c   : > { %19843 = vmatpush3.bf16.msra.mxu0 %v21831_v26  ;;  %9113 = vmatprep.subr.bf16.mxu1 %v21834_v27  ;;  %v21892_v26 = vld [vmem:[%s28541_s9 + $0x438] ss:$28 sps:$4 sm:$0xff]  }
 0x74d   : > { %19844 = vmatprep.subr.bf16.mxu0 %v21835_v20  ;;  %v21897_v27 = vld [vmem:[%s28541_s9 + $0x474] ss:$28 sps:$4 sm:$0xff]  }
 0x74e   : > { %v21895_v20 = vld [vmem:[%s28541_s9 + $0x470] ss:$28 sps:$4 sm:$0xff]  }
 0x74f   : > { %9114 = vmatpush1.bf16.msra.mxu1 %v21832_v29  ;;  %v21900_v29 = vld [vmem:[%s28541_s9 + $0x4ac] ss:$28 sps:$4 sm:$0xff]  }
 0x750   : > { %19845 = vmatpush3.bf16.msra.mxu0 %v21836_v35  ;;  %9115 = vmatprep.subr.bf16.mxu1 %v21839_v13  ;;  %v21942_v35 = vld [vmem:[%s28541_s9 + $0xe44] ss:$28 sps:$4 sm:$0xff]  }
 0x751   : > { %19846 = vmatprep.subr.bf16.mxu0 %v21840_v52  ;;  %v21898_v13 = vld [vmem:[%s28541_s9 + $0x4a8] ss:$28 sps:$4 sm:$0xff]  }
 0x752   : > { %v21903_v52 = vld [vmem:[%s28541_s9 + $0x4e4] ss:$28 sps:$4 sm:$0xff]  }
 0x753   : > { %9116 = vmatpush1.bf16.msra.mxu1 %v21837_v53  ;;  %v21940_v53 = vld [vmem:[%s28541_s9 + $0xe40] ss:$28 sps:$4 sm:$0xff]  }
 0x754   : > { %19847 = vmatpush3.bf16.msra.mxu0 %v21841_v56  ;;  %9117 = vmatprep.subr.bf16.mxu1 %v21844_v37  ;;  %v21948_v56 = vld [vmem:[%s28541_s9 + $0xe7c] ss:$28 sps:$4 sm:$0xff]  }
 0x755   : > { %19854 = vmatprep.subr.bf16.mxu0 %v21845_v38  ;;  %v21901_v37 = vld [vmem:[%s28541_s9 + $0x4e0] ss:$28 sps:$4 sm:$0xff]  }
 0x756   : > { %v21906_v38 = vld [vmem:[%s28541_s9 + $0x51c] ss:$28 sps:$4 sm:$0xff]  }
 0x757   : > { %9220 = vmatmul.mubr.bf16.vlgmr.msra.gmra.mrb[56].mxu0 %v25579_v18  ;;  %9118 = vmatpush1.bf16.msra.mxu1 %v21842_v41  ;;  %v21946_v41 = vld [vmem:[%s28541_s9 + $0xe78] ss:$28 sps:$4 sm:$0xff]  }
 0x758   : > { %19855 = vmatpush3.bf16.msra.mxu0 %v21846_v42  ;;  %9260 = vmatprep.mubr.bf16.mxu0 %v25619_v44  ;;  %v21954_v42 = vld [vmem:[%s28541_s9 + $0xeb4] ss:$28 sps:$4 sm:$0xff]  }
 0x759   : > { %9119 = vmatprep.subr.bf16.mxu1 %v21849_v43  ;;  %19856 = vmatprep.subr.bf16.mxu0 %v21850_v45  ;;  %v21904_v43 = vld [vmem:[%s28541_s9 + $0x518] ss:$28 sps:$4 sm:$0xff]  }
 0x75a   : > { %v21909_v45 = vld [vmem:[%s28541_s9 + $0x554] ss:$28 sps:$4 sm:$0xff]  }
 0x75b   : > { %9120 = vmatpush1.bf16.msra.mxu1 %v21847_v46  ;;  %v21952_v46 = vld [vmem:[%s28541_s9 + $0xeb0] ss:$28 sps:$4 sm:$0xff]  }
 0x75c   : > { %19857 = vmatpush3.bf16.msra.mxu0 %v21851_v34  ;;  %9121 = vmatprep.subr.bf16.mxu1 %v21854_v54  ;;  %v21960_v34 = vld [vmem:[%s28541_s9 + $0xeec] ss:$28 sps:$4 sm:$0xff]  }
 0x75d   : > { %19858 = vmatprep.subr.bf16.mxu0 %v21855_v47  ;;  %v21907_v54 = vld [vmem:[%s28541_s9 + $0x550] ss:$28 sps:$4 sm:$0xff]  }
 0x75e   : > { %v21912_v47 = vld [vmem:[%s28541_s9 + $0x58c] ss:$28 sps:$4 sm:$0xff]  }
 0x75f   : > { %9122 = vmatpush1.bf16.msra.mxu1 %v21852_v48  ;;  %v21958_v48 = vld [vmem:[%s28541_s9 + $0xee8] ss:$28 sps:$4 sm:$0xff]  }
 0x760   : > { %19859 = vmatpush3.bf16.msra.mxu0 %v21856_v62  ;;  %9123 = vmatprep.subr.bf16.mxu1 %v21859_v49  ;;  %v21910_v62 = vld [vmem:[%s28541_s9 + $0x588] ss:$28 sps:$4 sm:$0xff]  }
 0x761   : > { %19860 = vmatprep.subr.bf16.mxu0 %v21860_v55  ;;  %v21915_v49 = vld [vmem:[%s28541_s9 + $0x5c4] ss:$28 sps:$4 sm:$0xff]  }
 0x762   : > { %v21913_v55 = vld [vmem:[%s28541_s9 + $0x5c0] ss:$28 sps:$4 sm:$0xff]  }
 0x763   : > { %9124 = vmatpush1.bf16.msra.mxu1 %v21857_v57  ;;  %v21918_v57 = vld [vmem:[%s28541_s9 + $0x5fc] ss:$28 sps:$4 sm:$0xff]  }
 0x764   : > { %19861 = vmatpush3.bf16.msra.mxu0 %v21861_v59  ;;  %9125 = vmatprep.subr.bf16.mxu1 %v21864_v61  ;;  %v21916_v59 = vld [vmem:[%s28541_s9 + $0x5f8] ss:$28 sps:$4 sm:$0xff]  }
 0x765   : > { %19862 = vmatprep.subr.bf16.mxu0 %v21865_v63  ;;  %v21921_v61 = vld [vmem:[%s28541_s9 + $0x634] ss:$28 sps:$4 sm:$0xff]  }
 0x766   : > { %v21919_v63 = vld [vmem:[%s28541_s9 + $0x630] ss:$28 sps:$4 sm:$0xff]  }
 0x767   : > { %9126 = vmatpush1.bf16.msra.mxu1 %v21862_v1  ;;  %v21924_v1 = vld [vmem:[%s28541_s9 + $0x66c] ss:$28 sps:$4 sm:$0xff]  }
 0x768   : > { %19863 = vmatpush3.bf16.msra.mxu0 %v21866_v2  ;;  %9127 = vmatprep.subr.bf16.mxu1 %v21869_v50  ;;  %v21922_v2 = vld [vmem:[%s28541_s9 + $0x668] ss:$28 sps:$4 sm:$0xff]  }
 0x769   : > { %19864 = vmatprep.subr.bf16.mxu0 %v21870_v3  ;;  %v21927_v50 = vld [vmem:[%s28541_s9 + $0x6a4] ss:$28 sps:$4 sm:$0xff]  }
 0x76a   : > { %v21925_v3 = vld [vmem:[%s28541_s9 + $0x6a0] ss:$28 sps:$4 sm:$0xff]  }
 0x76b   : > { %9128 = vmatpush1.bf16.msra.mxu1 %v21867_v5  ;;  %v21966_v5 = vld [vmem:[%s28541_s9 + $0xf24] ss:$28 sps:$4 sm:$0xff]  }
 0x76c   : > { %19865 = vmatpush3.bf16.msra.mxu0 %v21871_v6  ;;  %9129 = vmatprep.subr.bf16.mxu1 %v21874_v24  ;;  %v21930_v6 = vld [vmem:[%s28541_s9 + $0x6dc] ss:$28 sps:$4 sm:$0xff]  }
 0x76d   : > { %19866 = vmatprep.subr.bf16.mxu0 %v21875_v30  ;;  %v21964_v24 = vld [vmem:[%s28541_s9 + $0xf20] ss:$28 sps:$4 sm:$0xff]   ;;  %v21970_v30 = vld [vmem:[%s28541_s9 + $0xf58] ss:$28 sps:$4 sm:$0xff]  }
 0x76f   : > { %9130 = vmatpush1.bf16.msra.mxu1 %v21872_v16  ;;  %v21928_v16 = vld [vmem:[%s28541_s9 + $0x6d8] ss:$28 sps:$4 sm:$0xff]  }
 0x770   : > { %19867 = vmatpush3.bf16.msra.mxu0 %v21876_v8  ;;  %9131 = vmatprep.subr.bf16.mxu1 %v21879_v51  ;;  %v21972_v8 = vld [vmem:[%s28541_s9 + $0xf5c] ss:$28 sps:$4 sm:$0xff]   ;;  %v21933_v51 = vld [vmem:[%s28541_s9 + $0xe04] ss:$28 sps:$4 sm:$0xff]  }
 0x771   : > { %19868 = vmatprep.subr.bf16.mxu0 %v21880_v7  ;;  %v21978_v7 = vld [vmem:[%s28541_s9 + $0xf94] ss:$28 sps:$4 sm:$0xff]  }
 0x773   : > { %9132 = vmatpush1.bf16.msra.mxu1 %v21877_v17  ;;  %v21976_v17 = vld [vmem:[%s28541_s9 + $0xf90] ss:$28 sps:$4 sm:$0xff]  }
 0x774   : > { %19869 = vmatpush3.bf16.msra.mxu0 %v21881_v58  ;;  %9144 = vmatprep.subr.bf16.mxu1 %v21884_v21  ;;  %v21931_v58 = vld [vmem:[%s28541_s9 + $0xe00] ss:$28 sps:$4 sm:$0xff]   ;;  %v21984_v21 = vld [vmem:[%s28541_s9 + $0xfcc] ss:$28 sps:$4 sm:$0xff]  }
 0x775   : > { %18609 = vmatprep.subr.msk.bf16.mxu0 %vm814_vm0, %v24864_v32  ;;  %v21890_v32 = vld [vmem:[%s28541_s9 + $0x404] ss:$28 sps:$4 sm:$0xff]  }
 0x776   : > { %9134 = vmatmul.mubr.bf16.vlgmr.msra.gmra.mrb[48].mxu1 %v25579_v18  ;;  %v21888_v18 = vld [vmem:[%s28541_s9 + $0x400] ss:$28 sps:$4 sm:$0xff]  }
 0x777   : > { %9261 = vmatmul.mubr.bf16.vlgmr.msra.gmra.mrb[60].mxu0 %v25611_v40  ;;  %9145 = vmatpush1.bf16.msra.mxu1 %v21882_v31  ;;  %v21939_v31 = vld [vmem:[%s28541_s9 + $0xe3c] ss:$28 sps:$4 sm:$0xff]  }
 0x778   : > { %9176 = vmatprep.mubr.bf16.mxu1 %v25619_v44  ;;  %9294 = vmatpush1.bf16.msra.mxu0 %v25271_v4  ;;  %v21891_v44 = vld [vmem:[%s28540_s8] sm:$0x7f]   ;;  %v21894_v4 = vld [vmem:[%s28541_s9 + $0x43c] ss:$28 sps:$4 sm:$0xff]  }
 0x779   : > { %18611 = vmatprep.subr.msk.bf16.mxu0 %vm814_vm0, %v24826_v9  ;;  %9146 = vmatprep.subr.bf16.mxu1 %v21887_v22  ;;  %v21936_v9 = vld [vmem:[%s28541_s9 + $0xe0c] ss:$28 sps:$4 sm:$0xff]  }
 0x77a   : > { %9325 = vmatprep.mubr.bf16.mxu0 %v23387_v0  ;;  %v21982_v22 = vld [vmem:[%s28541_s9 + $0xfc8] ss:$28 sps:$4 sm:$0xff]  }
 0x77b   : > { %9147 = vmatpush1.bf16.msra.mxu1 %v21885_v23  ;;  %v21937_v23 = vld [vmem:[%s28541_s9 + $0xe38] ss:$28 sps:$4 sm:$0xff]  }
 0x77c   : > { %9148 = vmatprep.subr.bf16.mxu1 %v21890_v32  ;;  %v21990_v32 = vld [vmem:[%s28541_s9 + $0x1004] ss:$28 sps:$4 sm:$0xff]  }
 0x77f   : > { %18610 = vmatmul.mubr.msk.bf16.vlgmr.msra.gmra.mrb[64].mxu0 %vm7415_vm5, %v21891_v44  ;;  %9149 = vmatpush1.bf16.msra.mxu1 %v21888_v18  ;;  %v21988_v18 = vld [vmem:[%s28541_s9 + $0x1000] ss:$28 sps:$4 sm:$0xff]  }
 0x780   : > { %9337 = vmatpush1.bf16.msra.mxu0 %v25299_v11  ;;  %9150 = vmatprep.subr.bf16.mxu1 %v21894_v4  ;;  %v21934_v11 = vld [vmem:[%s28541_s9 + $0xe08] ss:$28 sps:$4 sm:$0xff]   ;;  %v21996_v4 = vld [vmem:[%s28541_s9 + $0x103c] ss:$28 sps:$4 sm:$0xff]  }
 0x781   : > { %9368 = vmatprep.mubr.bf16.mxu0 %v23387_v0  ;;  %10878 = vmatprep.subr.bf16.mxu0 %v21936_v9  ;;  %v21951_v9 = vld [vmem:[%s28541_s9 + $0xeac] ss:$28 sps:$4 sm:$0xff]  }
 0x783   : > { %9151 = vmatpush1.bf16.msra.mxu1 %v21892_v26  ;;  %v21994_v26 = vld [vmem:[%s28541_s9 + $0x1038] ss:$28 sps:$4 sm:$0xff]  }
 0x784   : > { %9152 = vmatprep.subr.bf16.mxu1 %v21897_v27  ;;  %v21949_v27 = vld [vmem:[%s28541_s9 + $0xea8] ss:$28 sps:$4 sm:$0xff]  }
 0x787   : > { %9153 = vmatpush1.bf16.msra.mxu1 %v21895_v20  ;;  %18612 = vmatmul.mubr.msk.bf16.vlgmr.msra.gmra.mrb[68].mxu0 %vm7415_vm5, %v21891_v44  ;;  %v21943_v44 = vld [vmem:[%s28541_s9 + $0xe70] ss:$28 sps:$4 sm:$0xff]  }
 0x788   : > { %9154 = vmatprep.subr.bf16.mxu1 %v21900_v29  ;;  %10879 = vmatpush1.bf16.msra.mxu0 %v21934_v11  ;;  %v22002_v20 = vld [vmem:[%s28541_s9 + $0x1074] ss:$28 sps:$4 sm:$0xff]   ;;  %v21957_v29 = vld [vmem:[%s28541_s9 + $0xee4] ss:$28 sps:$4 sm:$0xff]  }
 0x789   : > { %10880 = vmatprep.subr.bf16.mxu0 %v21942_v35  ;;  %v22000_v11 = vld [vmem:[%s28541_s9 + $0x1070] ss:$28 sps:$4 sm:$0xff]   ;;  %v21955_v35 = vld [vmem:[%s28541_s9 + $0xee0] ss:$28 sps:$4 sm:$0xff]  }
 0x78b   : > { %9155 = vmatpush1.bf16.msra.mxu1 %v21898_v13  ;;  %v22008_v13 = vld [vmem:[%s28541_s9 + $0x10ac] ss:$28 sps:$4 sm:$0xff]  }
 0x78c   : > { %9156 = vmatprep.subr.bf16.mxu1 %v21903_v52  ;;  %10881 = vmatpush1.bf16.msra.mxu0 %v21940_v53  ;;  %v21963_v52 = vld [vmem:[%s28541_s9 + $0xf1c] ss:$28 sps:$4 sm:$0xff]   ;;  %v22006_v53 = vld [vmem:[%s28541_s9 + $0x10a8] ss:$28 sps:$4 sm:$0xff]  }
 0x78d   : > { %10882 = vmatprep.subr.bf16.mxu0 %v21948_v56  ;;  %v21961_v56 = vld [vmem:[%s28541_s9 + $0xf18] ss:$28 sps:$4 sm:$0xff]  }
 0x78f   : > { %9157 = vmatpush1.bf16.msra.mxu1 %v21901_v37  ;;  %v21969_v37 = vld [vmem:[%s28541_s9 + $0xf54] ss:$28 sps:$4 sm:$0xff]  }
 0x790   : > { %9158 = vmatprep.subr.bf16.mxu1 %v21906_v38  ;;  %10883 = vmatpush1.bf16.msra.mxu0 %v21946_v41  ;;  %v21967_v38 = vld [vmem:[%s28541_s9 + $0xf50] ss:$28 sps:$4 sm:$0xff]   ;;  %v22014_v41 = vld [vmem:[%s28541_s9 + $0x10e4] ss:$28 sps:$4 sm:$0xff]  }
 0x791   : > { %10884 = vmatprep.subr.bf16.mxu0 %v21954_v42  ;;  %v21975_v42 = vld [vmem:[%s28541_s9 + $0xf8c] ss:$28 sps:$4 sm:$0xff]  }
 0x793   : > { %9159 = vmatpush1.bf16.msra.mxu1 %v21904_v43  ;;  %v22012_v43 = vld [vmem:[%s28541_s9 + $0x10e0] ss:$28 sps:$4 sm:$0xff]  }
 0x794   : > { %9160 = vmatprep.subr.bf16.mxu1 %v21909_v45  ;;  %10885 = vmatpush1.bf16.msra.mxu0 %v21952_v46  ;;  %v21973_v45 = vld [vmem:[%s28541_s9 + $0xf88] ss:$28 sps:$4 sm:$0xff]   ;;  %v22020_v46 = vld [vmem:[%s28541_s9 + $0x111c] ss:$28 sps:$4 sm:$0xff]  }
 0x795   : > { %10886 = vmatprep.subr.bf16.mxu0 %v21960_v34  ;;  %v21981_v34 = vld [vmem:[%s28541_s9 + $0xfc4] ss:$28 sps:$4 sm:$0xff]  }
 0x797   : > { %9161 = vmatpush1.bf16.msra.mxu1 %v21907_v54  ;;  %v22018_v54 = vld [vmem:[%s28541_s9 + $0x1118] ss:$28 sps:$4 sm:$0xff]  }
 0x798   : > { %9162 = vmatprep.subr.bf16.mxu1 %v21912_v47  ;;  %10887 = vmatpush1.bf16.msra.mxu0 %v21958_v48  ;;  %v21979_v47 = vld [vmem:[%s28541_s9 + $0xfc0] ss:$28 sps:$4 sm:$0xff]   ;;  %v22026_v48 = vld [vmem:[%s28541_s9 + $0x1154] ss:$28 sps:$4 sm:$0xff]  }
 0x799   : > { %10888 = vmatprep.subr.bf16.mxu0 %v21966_v5  ;;  %v22009_v5 = vld [vmem:[%s28541_s9 + $0x10d8] ss:$28 sps:$4 sm:$0xff]  }
 0x79b   : > { %9163 = vmatpush1.bf16.msra.mxu1 %v21910_v62  ;;  %v21987_v62 = vld [vmem:[%s28541_s9 + $0xffc] ss:$28 sps:$4 sm:$0xff]  }
 0x79c   : > { %9164 = vmatprep.subr.bf16.mxu1 %v21915_v49  ;;  %10889 = vmatpush1.bf16.msra.mxu0 %v21964_v24  ;;  %v22024_v49 = vld [vmem:[%s28541_s9 + $0x1150] ss:$28 sps:$4 sm:$0xff]  }
 0x79d   : > { %10890 = vmatprep.subr.bf16.mxu0 %v21972_v8  ;;  %v22015_v24 = vld [vmem:[%s28541_s9 + $0x1110] ss:$28 sps:$4 sm:$0xff]   ;;  %v22029_v8 = vld [vmem:[%s28541_s9 + $0x1184] ss:$28 sps:$4 sm:$0xff]  }
 0x79f   : > { %9165 = vmatpush1.bf16.msra.mxu1 %v21913_v55  ;;  %v21985_v55 = vld [vmem:[%s28541_s9 + $0xff8] ss:$28 sps:$4 sm:$0xff]  }
 0x7a0   : > { %9166 = vmatprep.subr.bf16.mxu1 %v21918_v57  ;;  %10891 = vmatpush1.bf16.msra.mxu0 %v21970_v30  ;;  %v22032_v57 = vld [vmem:[%s28541_s9 + $0x118c] ss:$28 sps:$4 sm:$0xff]  }
 0x7a1   : > { %10892 = vmatprep.subr.bf16.mxu0 %v21978_v7  ;;  %v22023_v30 = vld [vmem:[%s28541_s9 + $0x114c] ss:$28 sps:$4 sm:$0xff]  }
 0x7a3   : > { %9167 = vmatpush1.bf16.msra.mxu1 %v21916_v59  ;;  %v21993_v59 = vld [vmem:[%s28541_s9 + $0x1034] ss:$28 sps:$4 sm:$0xff]  }
 0x7a4   : > { %9168 = vmatprep.subr.bf16.mxu1 %v21921_v61  ;;  %10893 = vmatpush1.bf16.msra.mxu0 %v21976_v17  ;;  %v21991_v61 = vld [vmem:[%s28541_s9 + $0x1030] ss:$28 sps:$4 sm:$0xff]  }
 0x7a5   : > { %10894 = vmatprep.subr.bf16.mxu0 %v21984_v21 }
 0x7a7   : > { %9169 = vmatpush1.bf16.msra.mxu1 %v21919_v63  ;;  %v21999_v63 = vld [vmem:[%s28541_s9 + $0x106c] ss:$28 sps:$4 sm:$0xff]  }
 0x7a8   : > { %9170 = vmatprep.subr.bf16.mxu1 %v21924_v1  ;;  %10895 = vmatpush1.bf16.msra.mxu0 %v21982_v22  ;;  %v21997_v1 = vld [vmem:[%s28541_s9 + $0x1068] ss:$28 sps:$4 sm:$0xff]   ;;  %v26288_v22 = vld [vmem:[#allocation7] sm:$0xff] }
 0x7a9   : > { %10896 = vmatprep.subr.bf16.mxu0 %v21990_v32 }
 0x7ab   : > { %9171 = vmatpush1.bf16.msra.mxu1 %v21922_v2  ;;  %v22005_v2 = vld [vmem:[%s28541_s9 + $0x10a4] ss:$28 sps:$4 sm:$0xff]  }
 0x7ac   : > { %9172 = vmatprep.subr.bf16.mxu1 %v21927_v50  ;;  %10897 = vmatpush1.bf16.msra.mxu0 %v21988_v18  ;;  %v22003_v50 = vld [vmem:[%s28541_s9 + $0x10a0] ss:$28 sps:$4 sm:$0xff]  }
 0x7ad   : > { %10898 = vmatprep.subr.bf16.mxu0 %v21996_v4 }
 0x7af   : > { %9173 = vmatpush1.bf16.msra.mxu1 %v21925_v3  ;;  %v22011_v3 = vld [vmem:[%s28541_s9 + $0x10dc] ss:$28 sps:$4 sm:$0xff]  }
 0x7b0   : > { %9174 = vmatprep.subr.bf16.mxu1 %v21930_v6  ;;  %10899 = vmatpush1.bf16.msra.mxu0 %v21994_v26  ;;  %v22017_v6 = vld [vmem:[%s28541_s9 + $0x1114] ss:$28 sps:$4 sm:$0xff]  }
 0x7b1   : > { %10900 = vmatprep.subr.bf16.mxu0 %v22002_v20 }
 0x7b3   : > { %9175 = vmatpush1.bf16.msra.mxu1 %v21928_v16  ;;  %v22021_v16 = vld [vmem:[%s28541_s9 + $0x1148] ss:$28 sps:$4 sm:$0xff]  }
 0x7b4   : > { %10792 = vmatprep.subr.bf16.mxu1 %v21933_v51  ;;  %10901 = vmatpush1.bf16.msra.mxu0 %v22000_v11 }
 0x7b5   : > { %10902 = vmatprep.subr.bf16.mxu0 %v22008_v13 }
 0x7b6   : > { %9177 = vmatmul.mubr.bf16.vlgmr.msra.gmra.mrb[48].mxu1 %v25611_v40  ;;  %v21945_v40 = vld [vmem:[%s28541_s9 + $0xe74] ss:$28 sps:$4 sm:$0xff]  }
 0x7b7   : > { %10793 = vmatpush1.bf16.msra.mxu1 %v21931_v58 }
 0x7b8   : > { %10794 = vmatprep.subr.bf16.mxu1 %v21939_v31  ;;  %10903 = vmatpush1.bf16.msra.mxu0 %v22006_v53 }
 0x7b9   : > { %10904 = vmatprep.subr.bf16.mxu0 %v22014_v41  ;;  %v22038_v41 = vld [vmem:[%s28541_s9 + $0x11c4] ss:$28 sps:$4 sm:$0xff]  }
 0x7bb   : > { %10795 = vmatpush1.bf16.msra.mxu1 %v21937_v23  ;;  %v5637_v23 = vrot.slane %v26288_v22, %v711_v36 }
 0x7bc   : > { %10796 = vmatprep.subr.bf16.mxu1 %v21945_v40  ;;  %10905 = vmatpush1.bf16.msra.mxu0 %v22012_v43  ;;  %v22036_v43 = vld [vmem:[%s28541_s9 + $0x11c0] ss:$28 sps:$4 sm:$0xff]  }
 0x7bd   : > { %10906 = vmatprep.subr.bf16.mxu0 %v22020_v46  ;;  %v7407_v20 = vadd.f32 %v25577_v60, %v5637_v23  ;;  %v22030_v60 = vld [vmem:[%s28541_s9 + $0x1188] ss:$28 sps:$4 sm:$0xff]   ;;  %v22041_v46 = vld [vmem:[%s28541_s9 + $0x11f4] ss:$28 sps:$4 sm:$0xff]  }
 0x7bf   : > { %10797 = vmatpush1.bf16.msra.mxu1 %v21943_v44 }
 0x7c0   : > { %10798 = vmatprep.subr.bf16.mxu1 %v21951_v9  ;;  %10907 = vmatpush1.bf16.msra.mxu0 %v22018_v54  ;;  %v7400_v9 = vadd.f32 %v25575_v19, %v5637_v23  ;;  %v22027_v19 = vld [vmem:[%s28541_s9 + $0x1180] ss:$28 sps:$4 sm:$0xff]   ;;  %v22072_v23 = vld [vmem:[%s28541_s9 + $0x1310] ss:$28 sps:$4 sm:$0xff]  }
 0x7c1   : > { %10908 = vmatprep.subr.bf16.mxu0 %v22026_v48 }
 0x7c3   : > { %10799 = vmatpush1.bf16.msra.mxu1 %v21949_v27 }
 0x7c4   : > { %10800 = vmatprep.subr.bf16.mxu1 %v21957_v29  ;;  %10909 = vmatpush1.bf16.msra.mxu0 %v22024_v49  ;;  %v22039_v49 = vld [vmem:[%s28541_s9 + $0x11f0] ss:$28 sps:$4 sm:$0xff]  }
 0x7c5   : > { %10921 = vmatprep.subr.bf16.mxu0 %v22032_v57 }
 0x7c7   : > { %10801 = vmatpush1.bf16.msra.mxu1 %v21955_v35 }
 0x7c8   : > { %10802 = vmatprep.subr.bf16.mxu1 %v21963_v52 }
 0x7cb   : > { %10803 = vmatpush1.bf16.msra.mxu1 %v21961_v56 }
 0x7cc   : > { %10804 = vmatprep.subr.bf16.mxu1 %v21969_v37 }
 0x7cf   : > { %10805 = vmatpush1.bf16.msra.mxu1 %v21967_v38  ;;  %v22035_v38 = vld [vmem:[%s28541_s9 + $0x11bc] ss:$28 sps:$4 sm:$0xff]  }
 0x7d0   : > { %10806 = vmatprep.subr.bf16.mxu1 %v21975_v42  ;;  %v22033_v42 = vld [vmem:[%s28541_s9 + $0x11b8] ss:$28 sps:$4 sm:$0xff]  }
 0x7d3   : > { %10807 = vmatpush1.bf16.msra.mxu1 %v21973_v45 }
 0x7d4   : > { %10808 = vmatprep.subr.bf16.mxu1 %v21981_v34  ;;  %v22044_v34 = vld [vmem:[%s28541_s9 + $0x11fc] ss:$28 sps:$4 sm:$0xff]  }
 0x7d7   : > { %10809 = vmatpush1.bf16.msra.mxu1 %v21979_v47 }
 0x7d8   : > { %10810 = vmatprep.subr.bf16.mxu1 %v21987_v62 }
 0x7db   : > { %10811 = vmatpush1.bf16.msra.mxu1 %v21985_v55  ;;  %v22042_v55 = vld [vmem:[%s28541_s9 + $0x11f8] ss:$28 sps:$4 sm:$0xff]  }
 0x7dc   : > { %10812 = vmatprep.subr.bf16.mxu1 %v21993_v59  ;;  %v22047_v59 = vld [vmem:[%s28541_s9 + $0x122c] ss:$28 sps:$4 sm:$0xff]  }
 0x7df   : > { %10813 = vmatpush1.bf16.msra.mxu1 %v21991_v61  ;;  %v22050_v61 = vld [vmem:[%s28541_s9 + $0x1234] ss:$28 sps:$4 sm:$0xff]  }
 0x7e0   : > { %10814 = vmatprep.subr.bf16.mxu1 %v21999_v63  ;;  %v22045_v63 = vld [vmem:[%s28541_s9 + $0x1228] ss:$28 sps:$4 sm:$0xff]  }
 0x7e3   : > { %10815 = vmatpush1.bf16.msra.mxu1 %v21997_v1  ;;  %v22048_v1 = vld [vmem:[%s28541_s9 + $0x1230] ss:$28 sps:$4 sm:$0xff]  }
 0x7e4   : > { %10816 = vmatprep.subr.bf16.mxu1 %v22005_v2  ;;  %v22053_v2 = vld [vmem:[%s28541_s9 + $0x1264] ss:$28 sps:$4 sm:$0xff]  }
 0x7e7   : > { %10817 = vmatpush1.bf16.msra.mxu1 %v22003_v50  ;;  %v22056_v50 = vld [vmem:[%s28541_s9 + $0x126c] ss:$28 sps:$4 sm:$0xff]  }
 0x7e8   : > { %10818 = vmatprep.subr.bf16.mxu1 %v22011_v3  ;;  %v22051_v3 = vld [vmem:[%s28541_s9 + $0x1260] ss:$28 sps:$4 sm:$0xff]  }
 0x7eb   : > { %10819 = vmatpush1.bf16.msra.mxu1 %v22009_v5  ;;  %v22054_v5 = vld [vmem:[%s28541_s9 + $0x1268] ss:$28 sps:$4 sm:$0xff]  }
 0x7ec   : > { %10820 = vmatprep.subr.bf16.mxu1 %v22017_v6  ;;  %v22059_v6 = vld [vmem:[%s28541_s9 + $0x129c] ss:$28 sps:$4 sm:$0xff]  }
 0x7ef   : > { %10821 = vmatpush1.bf16.msra.mxu1 %v22015_v24  ;;  %v22062_v24 = vld [vmem:[%s28541_s9 + $0x12a4] ss:$28 sps:$4 sm:$0xff]  }
 0x7f0   : > { %10822 = vmatprep.subr.bf16.mxu1 %v22023_v30  ;;  %v22057_v30 = vld [vmem:[%s28541_s9 + $0x1298] ss:$28 sps:$4 sm:$0xff]  }
 0x7f3   : > { %10823 = vmatpush1.bf16.msra.mxu1 %v22021_v16  ;;  %v22060_v16 = vld [vmem:[%s28541_s9 + $0x12a0] ss:$28 sps:$4 sm:$0xff]  }
 0x7f4   : > { %10835 = vmatprep.subr.bf16.mxu1 %v22029_v8  ;;  %v22065_v8 = vld [vmem:[%s28541_s9 + $0x12d4] ss:$28 sps:$4 sm:$0xff]  }
 0x82a   : > { %v19848_v51 = vpop.f32.mrb[56].mxu0 }
 0x82b   : > { %v19849_v7 = vpop.f32.mrb[57].mxu0 }
 0x82c   : > { %v19850_v17 = vadd.f32 %v19849_v7, %v19848_v51  ;;  %v19851_v58 = vpop.f32.mrb[58].mxu0  ;;  %v22068_v51 = vld [vmem:[%s28541_s9 + $0x12dc] ss:$28 sps:$4 sm:$0xff]   ;;  %v22063_v7 = vld [vmem:[%s28541_s9 + $0x12d0] ss:$28 sps:$4 sm:$0xff]  }
 0x82d   : > { %v19852_v21 = vpop.f32.mrb[59].mxu0 }
 0x82e   : > { %v19853_v31 = vadd.f32 %v19852_v21, %v19851_v58  ;;  %v22071_v58 = vld [vmem:[%s28541_s9 + $0x130c] ss:$28 sps:$4 sm:$0xff]   ;;  %v22074_v21 = vld [vmem:[%s28541_s9 + $0x1314] ss:$28 sps:$4 sm:$0xff]  }
 0x84a   : > { %v19870_v32 = vpop.f32.mrb[60].mxu0 }
 0x84b   : > { %v19871_v40 = vpop.f32.mrb[61].mxu0 }
 0x84c   : > { %v19872_v18 = vadd.f32 %v19871_v40, %v19870_v32  ;;  %v19873_v44 = vpop.f32.mrb[62].mxu0  ;;  %v22077_v32 = vld [vmem:[%s28541_s9 + $0x1344] ss:$28 sps:$4 sm:$0xff]   ;;  %v22080_v40 = vld [vmem:[%s28541_s9 + $0x134c] ss:$28 sps:$4 sm:$0xff]  }
 0x84d   : > { %v19874_v4 = vpop.f32.mrb[63].mxu0 }
 0x84e   : > { %v9263_v26 = vadd.f32 %v19872_v18, %v19850_v17  ;;  %v19875_v27 = vadd.f32 %v19874_v4, %v19873_v44  ;;  %v22066_v17 = vld [vmem:[%s28541_s9 + $0x12d8] ss:$28 sps:$4 sm:$0xff]   ;;  %v22075_v18 = vld [vmem:[%s28541_s9 + $0x1340] ss:$28 sps:$4 sm:$0xff]   ;;  %v22078_v44 = vld [vmem:[%s28541_s9 + $0x1348] ss:$28 sps:$4 sm:$0xff]  }
 0x84f   : > { %v22083_v4 = vld [vmem:[%s28541_s9 + $0x137c] ss:$28 sps:$4 sm:$0xff]  }
 0x850   : > { %v26295_v29 = vadd.f32 %v9263_v26, %v7400_v9  ;;  %v9266_v11 = vadd.f32 %v19875_v27, %v19853_v31  ;;  %v22069_v31 = vld [vmem:[%s28541_s9 + $0x1308] ss:$28 sps:$4 sm:$0xff]   ;;  %v22081_v26 = vld [vmem:[%s28541_s9 + $0x1378] ss:$28 sps:$4 sm:$0xff]   ;;  %v22084_v27 = vld [vmem:[%s28541_s9 + $0x1380] ss:$28 sps:$4 sm:$0xff]  }
 0x851   : > { %v22086_v9 = vld [vmem:[%s28541_s9 + $0x1384] ss:$28 sps:$4 sm:$0xff]  }
 0x852   : > { %v26297_v35 = vadd.f32 %v9266_v11, %v7407_v20  ;;  %v9327_v13 = vpop.f32.mrb[64].mxu0  ;;  %v22089_v20 = vld [vmem:[%s28541_s9 + $0x13b4] ss:$28 sps:$4 sm:$0xff]   ;;  %v22092_v11 = vld [vmem:[%s28541_s9 + $0x13bc] ss:$28 sps:$4 sm:$0xff]  }
 0x853   : > { %v9329_v52 = vpop.f32.mrb[65].mxu0 }
 0x854   : > { %v9331_v53 = vpop.f32.mrb[66].mxu0 }
 0x855   : > { %v26299_v36 = vpack.c.bf16 %v9331_v53, %v9327_v13  ;;  %v9333_v56 = vpop.f32.mrb[67].mxu0  ;;  %v22087_v13 = vld [vmem:[%s28541_s9 + $0x13b0] ss:$28 sps:$4 sm:$0xff]  }
 0x856   : > { %v26301_v37 = vpack.c.bf16 %v9333_v56, %v9329_v52  ;;  %v22090_v52 = vld [vmem:[%s28541_s9 + $0x13b8] ss:$28 sps:$4 sm:$0xff]   ;;  %v22095_v53 = vld [vmem:[%s28541_s9 + $0x13ec] ss:$28 sps:$4 sm:$0xff]  }
 0x857   : > { %v22098_v56 = vld [vmem:[%s28541_s9 + $0x13f4] ss:$28 sps:$4 sm:$0xff]  }
 0x858   : > { %10824 = vmatprep.mubr.bf16.mxu1 %v26301_v37  ;;  %10910 = vmatprep.mubr.bf16.mxu0 %v26301_v37 }
 0x859   : > { %10825 = vmatmul.mubr.bf16.vlgmr.msra.gmra.mrb[44].mxu1 %v26299_v36  ;;  %10911 = vmatmul.mubr.bf16.vlgmr.msra.gmra.mrb[36].mxu0 %v26299_v36 }
 0x85a   : > { %10836 = vmatpush1.bf16.msra.mxu1 %v22027_v19  ;;  %10922 = vmatpush1.bf16.msra.mxu0 %v22030_v60  ;;  %v9370_v45 = vpop.f32.mrb[68].mxu0  ;;  %v22093_v19 = vld [vmem:[%s28541_s9 + $0x13e8] ss:$28 sps:$4 sm:$0xff]   ;;  %v22096_v60 = vld [vmem:[%s28541_s9 + $0x13f0] ss:$28 sps:$4 sm:$0xff]  }
 0x85b   : > { %10837 = vmatprep.subr.bf16.mxu1 %v22035_v38  ;;  %10923 = vmatprep.subr.bf16.mxu0 %v22038_v41  ;;  %v9372_v54 = vpop.f32.mrb[69].mxu0  ;;  %v22101_v38 = vld [vmem:[%s28541_s9 + $0x1424] ss:$28 sps:$4 sm:$0xff]   ;;  %v22104_v41 = vld [vmem:[%s28541_s9 + $0x142c] ss:$28 sps:$4 sm:$0xff]  }
 0x85c   : > { %v9374_v47 = vpop.f32.mrb[70].mxu0 }
 0x85d   : > { %v26331_v48 = vpack.c.bf16 %v9374_v47, %v9370_v45  ;;  %v9376_v62 = vpop.f32.mrb[71].mxu0  ;;  %v22107_v45 = vld [vmem:[%s28541_s9 + $0x145c] ss:$28 sps:$4 sm:$0xff]   ;;  %v22113_v47 = vld [vmem:[%s28541_s9 + $0x1494] ss:$28 sps:$4 sm:$0xff]  }
 0x85e   : > { %10838 = vmatpush1.bf16.msra.mxu1 %v22033_v42  ;;  %10924 = vmatpush1.bf16.msra.mxu0 %v22036_v43  ;;  %v26339_v57 = vpack.c.bf16 %v9376_v62, %v9372_v54  ;;  %v22099_v42 = vld [vmem:[%s28541_s9 + $0x1420] ss:$28 sps:$4 sm:$0xff]   ;;  %v22102_v43 = vld [vmem:[%s28541_s9 + $0x1428] ss:$28 sps:$4 sm:$0xff]  }
 0x85f   : > { %10839 = vmatprep.subr.bf16.mxu1 %v22041_v46  ;;  %10925 = vmatprep.subr.bf16.mxu0 %v22044_v34  ;;  %v22110_v46 = vld [vmem:[%s28541_s9 + $0x1464] ss:$28 sps:$4 sm:$0xff]   ;;  %v22105_v34 = vld [vmem:[%s28541_s9 + $0x1458] ss:$28 sps:$4 sm:$0xff]  }
 0x860   : > { %10867 = vmatprep.mubr.bf16.mxu1 %v26339_v57  ;;  %10953 = vmatprep.mubr.bf16.mxu0 %v26339_v57  ;;  %v22108_v54 = vld [vmem:[%s28541_s9 + $0x1460] ss:$28 sps:$4 sm:$0xff]  }
 0x861   : > { %v22116_v62 = vld [vmem:[%s28541_s9 + $0x149c] ss:$28 sps:$4 sm:$0xff]  }
 0x862   : > { %10840 = vmatpush1.bf16.msra.mxu1 %v22039_v49  ;;  %10926 = vmatpush1.bf16.msra.mxu0 %v22042_v55  ;;  %v22111_v49 = vld [vmem:[%s28541_s9 + $0x1490] ss:$28 sps:$4 sm:$0xff]   ;;  %v22114_v55 = vld [vmem:[%s28541_s9 + $0x1498] ss:$28 sps:$4 sm:$0xff]  }
 0x863   : > { %10841 = vmatprep.subr.bf16.mxu1 %v22047_v59  ;;  %10927 = vmatprep.subr.bf16.mxu0 %v22050_v61  ;;  %v22119_v59 = vld [vmem:[%s28541_s9 + $0x14cc] ss:$28 sps:$4 sm:$0xff]   ;;  %v22122_v61 = vld [vmem:[%s28541_s9 + $0x14d4] ss:$28 sps:$4 sm:$0xff]  }
 0x866   : > { %10842 = vmatpush1.bf16.msra.mxu1 %v22045_v63  ;;  %10928 = vmatpush1.bf16.msra.mxu0 %v22048_v1  ;;  %v22117_v63 = vld [vmem:[%s28541_s9 + $0x14c8] ss:$28 sps:$4 sm:$0xff]   ;;  %v22120_v1 = vld [vmem:[%s28541_s9 + $0x14d0] ss:$28 sps:$4 sm:$0xff]  }
 0x867   : > { %10843 = vmatprep.subr.bf16.mxu1 %v22053_v2  ;;  %10929 = vmatprep.subr.bf16.mxu0 %v22056_v50  ;;  %v22125_v2 = vld [vmem:[%s28541_s9 + $0xe14] ss:$28 sps:$4 sm:$0xff]  }
 0x868   : > { %v22126_v50 = vld [vmem:[%s28541_s9 + $0xfd8] ss:$28 sps:$4 sm:$0xff]  }
 0x86a   : > { %10844 = vmatpush1.bf16.msra.mxu1 %v22051_v3  ;;  %10930 = vmatpush1.bf16.msra.mxu0 %v22054_v5  ;;  %v22123_v3 = vld [vmem:[%s28541_s9 + $0xe10] ss:$28 sps:$4 sm:$0xff]   ;;  %v22127_v5 = vld [vmem:[%s28541_s9 + $0xe18] ss:$28 sps:$4 sm:$0xff]  }
 0x86b   : > { %10845 = vmatprep.subr.bf16.mxu1 %v22059_v6  ;;  %10931 = vmatprep.subr.bf16.mxu0 %v22062_v24  ;;  %v22130_v6 = vld [vmem:[%s28541_s9 + $0xe4c] ss:$28 sps:$4 sm:$0xff]  }
 0x86c   : > { %v22131_v24 = vld [vmem:[%s28541_s9 + $0x1010] ss:$28 sps:$4 sm:$0xff]  }
 0x86e   : > { %10846 = vmatpush1.bf16.msra.mxu1 %v22057_v30  ;;  %10932 = vmatpush1.bf16.msra.mxu0 %v22060_v16  ;;  %v22128_v30 = vld [vmem:[%s28541_s9 + $0xe48] ss:$28 sps:$4 sm:$0xff]   ;;  %v22132_v16 = vld [vmem:[%s28541_s9 + $0xe50] ss:$28 sps:$4 sm:$0xff]  }
 0x86f   : > { %10847 = vmatprep.subr.bf16.mxu1 %v22065_v8  ;;  %10933 = vmatprep.subr.bf16.mxu0 %v22068_v51  ;;  %v22135_v8 = vld [vmem:[%s28541_s9 + $0xe84] ss:$28 sps:$4 sm:$0xff]  }
 0x870   : > { %v22136_v51 = vld [vmem:[%s28541_s9 + $0x1048] ss:$28 sps:$4 sm:$0xff]  }
 0x872   : > { %10848 = vmatpush1.bf16.msra.mxu1 %v22063_v7  ;;  %10934 = vmatpush1.bf16.msra.mxu0 %v22066_v17  ;;  %v22133_v7 = vld [vmem:[%s28541_s9 + $0xe80] ss:$28 sps:$4 sm:$0xff]  }
 0x873   : > { %10849 = vmatprep.subr.bf16.mxu1 %v22071_v58  ;;  %10935 = vmatprep.subr.bf16.mxu0 %v22074_v21  ;;  %v22140_v17 = vld [vmem:[%s28541_s9 + $0xebc] ss:$28 sps:$4 sm:$0xff]  }
 0x874   : > { %v22141_v58 = vld [vmem:[%s28541_s9 + $0x1080] ss:$28 sps:$4 sm:$0xff]   ;;  %v22138_v21 = vld [vmem:[%s28541_s9 + $0xeb8] ss:$28 sps:$4 sm:$0xff]  }
 0x876   : > { %10850 = vmatpush1.bf16.msra.mxu1 %v22069_v31  ;;  %10936 = vmatpush1.bf16.msra.mxu0 %v22072_v23  ;;  %v22142_v31 = vld [vmem:[%s28541_s9 + $0xec0] ss:$28 sps:$4 sm:$0xff]   ;;  %v22145_v23 = vld [vmem:[%s28541_s9 + $0xef4] ss:$28 sps:$4 sm:$0xff]  }
 0x877   : > { %10851 = vmatprep.subr.bf16.mxu1 %v22077_v32  ;;  %10937 = vmatprep.subr.bf16.mxu0 %v22080_v40  ;;  %v22146_v32 = vld [vmem:[%s28541_s9 + $0x10b8] ss:$28 sps:$4 sm:$0xff]   ;;  %v22143_v40 = vld [vmem:[%s28541_s9 + $0xef0] ss:$28 sps:$4 sm:$0xff]  }
 0x87a   : > { %10852 = vmatpush1.bf16.msra.mxu1 %v22075_v18  ;;  %10938 = vmatpush1.bf16.msra.mxu0 %v22078_v44  ;;  %v22147_v18 = vld [vmem:[%s28541_s9 + $0xef8] ss:$28 sps:$4 sm:$0xff]   ;;  %v22150_v44 = vld [vmem:[%s28541_s9 + $0xf2c] ss:$28 sps:$4 sm:$0xff]  }
 0x87b   : > { %10853 = vmatprep.subr.bf16.mxu1 %v22083_v4  ;;  %10939 = vmatprep.subr.bf16.mxu0 %v22086_v9  ;;  %v22151_v4 = vld [vmem:[%s28541_s9 + $0x10f0] ss:$28 sps:$4 sm:$0xff]   ;;  %v22148_v9 = vld [vmem:[%s28541_s9 + $0xf28] ss:$28 sps:$4 sm:$0xff]  }
 0x87e   : > { %10854 = vmatpush1.bf16.msra.mxu1 %v22081_v26  ;;  %10940 = vmatpush1.bf16.msra.mxu0 %v22084_v27  ;;  %v22152_v26 = vld [vmem:[%s28541_s9 + $0xf30] ss:$28 sps:$4 sm:$0xff]   ;;  %v22155_v27 = vld [vmem:[%s28541_s9 + $0xf64] ss:$28 sps:$4 sm:$0xff]  }
 0x87f   : > { %10855 = vmatprep.subr.bf16.mxu1 %v22089_v20  ;;  %10941 = vmatprep.subr.bf16.mxu0 %v22092_v11  ;;  %v22156_v20 = vld [vmem:[%s28541_s9 + $0x1128] ss:$28 sps:$4 sm:$0xff]   ;;  %v22153_v11 = vld [vmem:[%s28541_s9 + $0xf60] ss:$28 sps:$4 sm:$0xff]  }
 0x882   : > { %10856 = vmatpush1.bf16.msra.mxu1 %v22087_v13  ;;  %10942 = vmatpush1.bf16.msra.mxu0 %v22090_v52  ;;  %v22157_v13 = vld [vmem:[%s28541_s9 + $0xf68] ss:$28 sps:$4 sm:$0xff]   ;;  %v22160_v52 = vld [vmem:[%s28541_s9 + $0xf9c] ss:$28 sps:$4 sm:$0xff]  }
 0x883   : > { %10857 = vmatprep.subr.bf16.mxu1 %v22095_v53  ;;  %10943 = vmatprep.subr.bf16.mxu0 %v22098_v56  ;;  %v22161_v53 = vld [vmem:[%s28541_s9 + $0x1160] ss:$28 sps:$4 sm:$0xff]   ;;  %v22158_v56 = vld [vmem:[%s28541_s9 + $0xf98] ss:$28 sps:$4 sm:$0xff]  }
 0x886   : > { %10858 = vmatpush1.bf16.msra.mxu1 %v22093_v19  ;;  %10944 = vmatpush1.bf16.msra.mxu0 %v22096_v60  ;;  %v22162_v19 = vld [vmem:[%s28541_s9 + $0xfa0] ss:$28 sps:$4 sm:$0xff]   ;;  %v22165_v60 = vld [vmem:[%s28541_s9 + $0xfd4] ss:$28 sps:$4 sm:$0xff]  }
 0x887   : > { %10859 = vmatprep.subr.bf16.mxu1 %v22101_v38  ;;  %10945 = vmatprep.subr.bf16.mxu0 %v22104_v41  ;;  %v22166_v38 = vld [vmem:[%s28541_s9 + $0x1358] ss:$28 sps:$4 sm:$0xff]   ;;  %v22163_v41 = vld [vmem:[%s28541_s9 + $0xfd0] ss:$28 sps:$4 sm:$0xff]  }
 0x88a   : > { %10860 = vmatpush1.bf16.msra.mxu1 %v22099_v42  ;;  %10946 = vmatpush1.bf16.msra.mxu0 %v22102_v43  ;;  %v22167_v42 = vld [vmem:[%s28541_s9 + $0x1198] ss:$28 sps:$4 sm:$0xff]   ;;  %v22170_v43 = vld [vmem:[%s28541_s9 + $0x100c] ss:$28 sps:$4 sm:$0xff]  }
 0x88b   : > { %10861 = vmatprep.subr.bf16.mxu1 %v22107_v45  ;;  %10947 = vmatprep.subr.bf16.mxu0 %v22110_v46  ;;  %v22171_v45 = vld [vmem:[%s28541_s9 + $0x1390] ss:$28 sps:$4 sm:$0xff]   ;;  %v22168_v46 = vld [vmem:[%s28541_s9 + $0x1008] ss:$28 sps:$4 sm:$0xff]  }
 0x88e   : > { %10862 = vmatpush1.bf16.msra.mxu1 %v22105_v34  ;;  %10948 = vmatpush1.bf16.msra.mxu0 %v22108_v54  ;;  %v22172_v34 = vld [vmem:[%s28541_s9 + $0x11d0] ss:$28 sps:$4 sm:$0xff]   ;;  %v22175_v54 = vld [vmem:[%s28541_s9 + $0x1044] ss:$28 sps:$4 sm:$0xff]  }
 0x88f   : > { %10863 = vmatprep.subr.bf16.mxu1 %v22113_v47  ;;  %10949 = vmatprep.subr.bf16.mxu0 %v22116_v62  ;;  %v22176_v47 = vld [vmem:[%s28541_s9 + $0x13c8] ss:$28 sps:$4 sm:$0xff]   ;;  %v22173_v62 = vld [vmem:[%s28541_s9 + $0x1040] ss:$28 sps:$4 sm:$0xff]  }
 0x892   : > { %10864 = vmatpush1.bf16.msra.mxu1 %v22111_v49  ;;  %10950 = vmatpush1.bf16.msra.mxu0 %v22114_v55  ;;  %v22177_v49 = vld [vmem:[%s28541_s9 + $0x1208] ss:$28 sps:$4 sm:$0xff]   ;;  %v22180_v55 = vld [vmem:[%s28541_s9 + $0x107c] ss:$28 sps:$4 sm:$0xff]  }
 0x893   : > { %10865 = vmatprep.subr.bf16.mxu1 %v22119_v59  ;;  %10951 = vmatprep.subr.bf16.mxu0 %v22122_v61  ;;  %v22181_v59 = vld [vmem:[%s28541_s9 + $0x1400] ss:$28 sps:$4 sm:$0xff]   ;;  %v22178_v61 = vld [vmem:[%s28541_s9 + $0x1078] ss:$28 sps:$4 sm:$0xff]  }
 0x896   : > { %10866 = vmatpush1.bf16.msra.mxu1 %v22117_v63  ;;  %10952 = vmatpush1.bf16.msra.mxu0 %v22120_v1  ;;  %v22182_v63 = vld [vmem:[%s28541_s9 + $0x1240] ss:$28 sps:$4 sm:$0xff]   ;;  %v22185_v1 = vld [vmem:[%s28541_s9 + $0x10b4] ss:$28 sps:$4 sm:$0xff]  }
 0x897   : > { %10964 = vmatprep.subr.bf16.mxu1 %v22125_v2  ;;  %19876 = vmatprep.subr.bf16.mxu0 %v22126_v50  ;;  %v22186_v2 = vld [vmem:[%s28541_s9 + $0x1438] ss:$28 sps:$4 sm:$0xff]   ;;  %v22183_v50 = vld [vmem:[%s28541_s9 + $0x10b0] ss:$28 sps:$4 sm:$0xff]  }
 0x899   : > { %10868 = vmatmul.mubr.bf16.vlgmr.msra.gmra.mrb[44].mxu1 %v26331_v48  ;;  %10954 = vmatmul.mubr.bf16.vlgmr.msra.gmra.mrb[36].mxu0 %v26331_v48 }
 0x89a   : > { %10965 = vmatpush1.bf16.msra.mxu1 %v22123_v3  ;;  %10996 = vmatprep.mubr.bf16.mxu1 %v26301_v37  ;;  %v22187_v3 = vld [vmem:[%s28541_s9 + $0x1278] ss:$28 sps:$4 sm:$0xff]  }
 0x89b   : > { %19877 = vmatpush3.bf16.msra.mxu0 %v22127_v5  ;;  %11082 = vmatprep.mubr.bf16.mxu0 %v26301_v37  ;;  %v22137_v37 = vld [vmem:[%s28541_s9 + $0xe88] ss:$28 sps:$4 sm:$0xff]  }
 0x89c   : > { %10966 = vmatprep.subr.bf16.mxu1 %v22130_v6  ;;  %19878 = vmatprep.subr.bf16.mxu0 %v22131_v24  ;;  %v22190_v5 = vld [vmem:[%s28541_s9 + $0x10ec] ss:$28 sps:$4 sm:$0xff]  }
 0x89d   : > { %v22191_v6 = vld [vmem:[%s28541_s9 + $0x1470] ss:$28 sps:$4 sm:$0xff]   ;;  %v22188_v24 = vld [vmem:[%s28541_s9 + $0x10e8] ss:$28 sps:$4 sm:$0xff]  }
 0x89e   : > { %10967 = vmatpush1.bf16.msra.mxu1 %v22128_v30  ;;  %v22192_v30 = vld [vmem:[%s28541_s9 + $0x12b0] ss:$28 sps:$4 sm:$0xff]  }
 0x89f   : > { %19879 = vmatpush3.bf16.msra.mxu0 %v22132_v16  ;;  %10968 = vmatprep.subr.bf16.mxu1 %v22135_v8  ;;  %v22195_v16 = vld [vmem:[%s28541_s9 + $0x1124] ss:$28 sps:$4 sm:$0xff]  }
 0x8a0   : > { %19880 = vmatprep.subr.bf16.mxu0 %v22136_v51  ;;  %v22196_v8 = vld [vmem:[%s28541_s9 + $0x14a8] ss:$28 sps:$4 sm:$0xff]   ;;  %v22193_v51 = vld [vmem:[%s28541_s9 + $0x1120] ss:$28 sps:$4 sm:$0xff]  }
 0x8a2   : > { %10969 = vmatpush1.bf16.msra.mxu1 %v22133_v7  ;;  %v22197_v7 = vld [vmem:[%s28541_s9 + $0x12e8] ss:$28 sps:$4 sm:$0xff]  }
 0x8a3   : > { %19881 = vmatpush3.bf16.msra.mxu0 %v22137_v37  ;;  %10970 = vmatprep.subr.bf16.mxu1 %v22140_v17  ;;  %v22200_v37 = vld [vmem:[%s28541_s9 + $0x115c] ss:$28 sps:$4 sm:$0xff]  }
 0x8a4   : > { %19882 = vmatprep.subr.bf16.mxu0 %v22141_v58  ;;  %v22201_v17 = vld [vmem:[%s28541_s9 + $0x14e0] ss:$28 sps:$4 sm:$0xff]   ;;  %v22198_v58 = vld [vmem:[%s28541_s9 + $0x1158] ss:$28 sps:$4 sm:$0xff]  }
 0x8a6   : > { %10971 = vmatpush1.bf16.msra.mxu1 %v22138_v21  ;;  %v22202_v21 = vld [vmem:[%s28541_s9 + $0x1320] ss:$28 sps:$4 sm:$0xff]  }
 0x8a7   : > { %19883 = vmatpush3.bf16.msra.mxu0 %v22142_v31  ;;  %10972 = vmatprep.subr.bf16.mxu1 %v22145_v23  ;;  %v22205_v31 = vld [vmem:[%s28541_s9 + $0x1194] ss:$28 sps:$4 sm:$0xff]  }
 0x8a8   : > { %19884 = vmatprep.subr.bf16.mxu0 %v22146_v32  ;;  %v22203_v23 = vld [vmem:[%s28541_s9 + $0x1190] ss:$28 sps:$4 sm:$0xff]  }
 0x8a9   : > { %v22208_v32 = vld [vmem:[%s28541_s9 + $0x11cc] ss:$28 sps:$4 sm:$0xff]  }
 0x8aa   : > { %10973 = vmatpush1.bf16.msra.mxu1 %v22143_v40  ;;  %v22206_v40 = vld [vmem:[%s28541_s9 + $0x11c8] ss:$28 sps:$4 sm:$0xff]  }
 0x8ab   : > { %19885 = vmatpush3.bf16.msra.mxu0 %v22147_v18  ;;  %10974 = vmatprep.subr.bf16.mxu1 %v22150_v44  ;;  %v22211_v18 = vld [vmem:[%s28541_s9 + $0x1204] ss:$28 sps:$4 sm:$0xff]   ;;  %v22214_v44 = vld [vmem:[%s28541_s9 + $0x123c] ss:$28 sps:$4 sm:$0xff]  }
 0x8ac   : > { %19886 = vmatprep.subr.bf16.mxu0 %v22151_v4  ;;  %v22217_v4 = vld [vmem:[%s28541_s9 + $0x1274] ss:$28 sps:$4 sm:$0xff]  }
 0x8ae   : > { %10975 = vmatpush1.bf16.msra.mxu1 %v22148_v9  ;;  %v22215_v9 = vld [vmem:[%s28541_s9 + $0x1270] ss:$28 sps:$4 sm:$0xff]  }
 0x8af   : > { %19887 = vmatpush3.bf16.msra.mxu0 %v22152_v26  ;;  %10976 = vmatprep.subr.bf16.mxu1 %v22155_v27  ;;  %v22220_v26 = vld [vmem:[%s28541_s9 + $0x12ac] ss:$28 sps:$4 sm:$0xff]  }
 0x8b0   : > { %19888 = vmatprep.subr.bf16.mxu0 %v22156_v20  ;;  %v22218_v27 = vld [vmem:[%s28541_s9 + $0x12a8] ss:$28 sps:$4 sm:$0xff]  }
 0x8b1   : > { %v22223_v20 = vld [vmem:[%s28541_s9 + $0x12e4] ss:$28 sps:$4 sm:$0xff]  }
 0x8b2   : > { %10977 = vmatpush1.bf16.msra.mxu1 %v22153_v11  ;;  %v22221_v11 = vld [vmem:[%s28541_s9 + $0x12e0] ss:$28 sps:$4 sm:$0xff]  }
 0x8b3   : > { %19889 = vmatpush3.bf16.msra.mxu0 %v22157_v13  ;;  %10978 = vmatprep.subr.bf16.mxu1 %v22160_v52  ;;  %v22226_v13 = vld [vmem:[%s28541_s9 + $0x131c] ss:$28 sps:$4 sm:$0xff]  }
 0x8b4   : > { %19890 = vmatprep.subr.bf16.mxu0 %v22161_v53  ;;  %v22224_v52 = vld [vmem:[%s28541_s9 + $0x1318] ss:$28 sps:$4 sm:$0xff]  }
 0x8b5   : > { %v22229_v53 = vld [vmem:[%s28541_s9 + $0x1354] ss:$28 sps:$4 sm:$0xff]  }
 0x8b6   : > { %10979 = vmatpush1.bf16.msra.mxu1 %v22158_v56  ;;  %v22227_v56 = vld [vmem:[%s28541_s9 + $0x1350] ss:$28 sps:$4 sm:$0xff]  }
 0x8b7   : > { %19891 = vmatpush3.bf16.msra.mxu0 %v22162_v19  ;;  %10980 = vmatprep.subr.bf16.mxu1 %v22165_v60  ;;  %v22232_v19 = vld [vmem:[%s28541_s9 + $0x138c] ss:$28 sps:$4 sm:$0xff]  }
 0x8b8   : > { %19898 = vmatprep.subr.bf16.mxu0 %v22166_v38  ;;  %v22230_v60 = vld [vmem:[%s28541_s9 + $0x1388] ss:$28 sps:$4 sm:$0xff]  }
 0x8b9   : > { %v22235_v38 = vld [vmem:[%s28541_s9 + $0x13c4] ss:$28 sps:$4 sm:$0xff]  }
 0x8ba   : > { %11083 = vmatmul.mubr.bf16.vlgmr.msra.gmra.mrb[72].mxu0 %v26299_v36  ;;  %10981 = vmatpush1.bf16.msra.mxu1 %v22163_v41  ;;  %v22233_v41 = vld [vmem:[%s28541_s9 + $0x13c0] ss:$28 sps:$4 sm:$0xff]  }
 0x8bb   : > { %19899 = vmatpush3.bf16.msra.mxu0 %v22167_v42  ;;  %11123 = vmatprep.mubr.bf16.mxu0 %v26339_v57  ;;  %v22238_v42 = vld [vmem:[%s28541_s9 + $0x13fc] ss:$28 sps:$4 sm:$0xff]  }
 0x8bc   : > { %10982 = vmatprep.subr.bf16.mxu1 %v22170_v43  ;;  %19900 = vmatprep.subr.bf16.mxu0 %v22171_v45  ;;  %v22236_v43 = vld [vmem:[%s28541_s9 + $0x13f8] ss:$28 sps:$4 sm:$0xff]  }
 0x8bd   : > { %v22241_v45 = vld [vmem:[%s28541_s9 + $0x1434] ss:$28 sps:$4 sm:$0xff]  }
 0x8be   : > { %10983 = vmatpush1.bf16.msra.mxu1 %v22168_v46  ;;  %v22239_v46 = vld [vmem:[%s28541_s9 + $0x1430] ss:$28 sps:$4 sm:$0xff]  }
 0x8bf   : > { %19901 = vmatpush3.bf16.msra.mxu0 %v22172_v34  ;;  %10984 = vmatprep.subr.bf16.mxu1 %v22175_v54  ;;  %v22244_v34 = vld [vmem:[%s28541_s9 + $0x146c] ss:$28 sps:$4 sm:$0xff]  }
 0x8c0   : > { %19902 = vmatprep.subr.bf16.mxu0 %v22176_v47  ;;  %v22242_v54 = vld [vmem:[%s28541_s9 + $0x1468] ss:$28 sps:$4 sm:$0xff]  }
 0x8c1   : > { %v22247_v47 = vld [vmem:[%s28541_s9 + $0x14a4] ss:$28 sps:$4 sm:$0xff]  }
 0x8c2   : > { %10985 = vmatpush1.bf16.msra.mxu1 %v22173_v62  ;;  %v22245_v62 = vld [vmem:[%s28541_s9 + $0x14a0] ss:$28 sps:$4 sm:$0xff]  }
 0x8c3   : > { %19903 = vmatpush3.bf16.msra.mxu0 %v22177_v49  ;;  %10986 = vmatprep.subr.bf16.mxu1 %v22180_v55  ;;  %v22250_v49 = vld [vmem:[%s28541_s9 + $0x14dc] ss:$28 sps:$4 sm:$0xff]  }
 0x8c4   : > { %19904 = vmatprep.subr.bf16.mxu0 %v22181_v59  ;;  %v22248_v55 = vld [vmem:[%s28541_s9 + $0x14d8] ss:$28 sps:$4 sm:$0xff]   ;;  %v5613_v59 = vrot.slane %v26288_v22, %v687_v33 }
 0x8c6   : > { %10987 = vmatpush1.bf16.msra.mxu1 %v22178_v61  ;;  %v5621_v61 = vrot.slane %v26288_v22, %v695_v14 }
 0x8c7   : > { %19905 = vmatpush3.bf16.msra.mxu0 %v22182_v63  ;;  %10988 = vmatprep.subr.bf16.mxu1 %v22185_v1  ;;  %v5617_v63 = vrot.slane %v26288_v22, %v691_v39  ;;  %v5625_v1 = vrot.slane %v26288_v22, %v699_v15 }
 0x8c8   : > { %19906 = vmatprep.subr.bf16.mxu0 %v22186_v2 }
 0x8ca   : > { %10989 = vmatpush1.bf16.msra.mxu1 %v22183_v50 }
 0x8cb   : > { %19907 = vmatpush3.bf16.msra.mxu0 %v22187_v3  ;;  %10990 = vmatprep.subr.bf16.mxu1 %v22190_v5 }
 0x8cc   : > { %19908 = vmatprep.subr.bf16.mxu0 %v22191_v6 }
 0x8ce   : > { %10991 = vmatpush1.bf16.msra.mxu1 %v22188_v24 }
 0x8cf   : > { %19909 = vmatpush3.bf16.msra.mxu0 %v22192_v30  ;;  %10992 = vmatprep.subr.bf16.mxu1 %v22195_v16 }
 0x8d0   : > { %19910 = vmatprep.subr.bf16.mxu0 %v22196_v8 }
 0x8d2   : > { %10993 = vmatpush1.bf16.msra.mxu1 %v22193_v51 }
 0x8d3   : > { %19911 = vmatpush3.bf16.msra.mxu0 %v22197_v7  ;;  %10994 = vmatprep.subr.bf16.mxu1 %v22200_v37 }
 0x8d4   : > { %19912 = vmatprep.subr.bf16.mxu0 %v22201_v17 }
 0x8d6   : > { %10995 = vmatpush1.bf16.msra.mxu1 %v22198_v58 }
 0x8d7   : > { %19913 = vmatpush3.bf16.msra.mxu0 %v22202_v21  ;;  %11007 = vmatprep.subr.bf16.mxu1 %v22205_v31 }
 0x8d9   : > { %10997 = vmatmul.mubr.bf16.vlgmr.msra.gmra.mrb[48].mxu1 %v26299_v36  ;;  %v22209_v36 = vld [vmem:[%s28541_s9 + $0x1200] ss:$28 sps:$4 sm:$0xff]  }
 0x8da   : > { %11124 = vmatmul.mubr.bf16.vlgmr.msra.gmra.mrb[76].mxu0 %v26331_v48  ;;  %11008 = vmatpush1.bf16.msra.mxu1 %v22203_v23 }
 0x8db   : > { %11039 = vmatprep.mubr.bf16.mxu1 %v26339_v57  ;;  %11009 = vmatprep.subr.bf16.mxu1 %v22208_v32  ;;  %v22212_v57 = vld [vmem:[%s28541_s9 + $0x1238] ss:$28 sps:$4 sm:$0xff]  }
 0x8dc   : > { %11224 = vmatprep.mubr.bf16.mxu0 %v23387_v0 }
 0x8de   : > { %11010 = vmatpush1.bf16.msra.mxu1 %v22206_v40 }
 0x8df   : > { %11011 = vmatprep.subr.bf16.mxu1 %v22211_v18 }
 0x8e2   : > { %11012 = vmatpush1.bf16.msra.mxu1 %v22209_v36 }
 0x8e3   : > { %11013 = vmatprep.subr.bf16.mxu1 %v22214_v44 }
 0x8e6   : > { %11014 = vmatpush1.bf16.msra.mxu1 %v22212_v57 }
 0x8e7   : > { %11015 = vmatprep.subr.bf16.mxu1 %v22217_v4 }
 0x8ea   : > { %11016 = vmatpush1.bf16.msra.mxu1 %v22215_v9  ;;  %v26820_v9 = vld [vmem:[#allocation8] sm:$0xf] }
 0x8eb   : > { %11017 = vmatprep.subr.bf16.mxu1 %v22220_v26 }
 0x8ee   : > { %11018 = vmatpush1.bf16.msra.mxu1 %v22218_v27 }
 0x8ef   : > { %11019 = vmatprep.subr.bf16.mxu1 %v22223_v20 }
 0x8f2   : > { %11020 = vmatpush1.bf16.msra.mxu1 %v22221_v11 }
 0x8f3   : > { %11021 = vmatprep.subr.bf16.mxu1 %v22226_v13 }
 0x8f6   : > { %11022 = vmatpush1.bf16.msra.mxu1 %v22224_v52 }
 0x8f7   : > { %11023 = vmatprep.subr.bf16.mxu1 %v22229_v53 }
 0x8fa   : > { %11024 = vmatpush1.bf16.msra.mxu1 %v22227_v56  ;;  %v22254_v56 = vld [vmem:[%s28545_s13 + $0x8] ss:$16 sps:$4 sm:$0xff]  }
 0x8fb   : > { %11025 = vmatprep.subr.bf16.mxu1 %v22232_v19  ;;  %v22256_v19 = vld [vmem:[%s28545_s13 + $0xc] ss:$16 sps:$4 sm:$0xff]  }
 0x8fe   : > { %11026 = vmatpush1.bf16.msra.mxu1 %v22230_v60  ;;  %v22262_v60 = vld [vmem:[%s28545_s13 + $0x2c] ss:$16 sps:$4 sm:$0xff]  }
 0x8ff   : > { %11027 = vmatprep.subr.bf16.mxu1 %v22235_v38  ;;  %v22260_v38 = vld [vmem:[%s28545_s13 + $0x28] ss:$16 sps:$4 sm:$0xff]  }
 0x902   : > { %11028 = vmatpush1.bf16.msra.mxu1 %v22233_v41  ;;  %v22268_v41 = vld [vmem:[%s28545_s13 + $0x4c] ss:$16 sps:$4 sm:$0xff]  }
 0x903   : > { %11029 = vmatprep.subr.bf16.mxu1 %v22238_v42  ;;  %v22266_v42 = vld [vmem:[%s28545_s13 + $0x48] ss:$16 sps:$4 sm:$0xff]  }
 0x906   : > { %11030 = vmatpush1.bf16.msra.mxu1 %v22236_v43  ;;  %v22274_v43 = vld [vmem:[%s28545_s13 + $0x6c] ss:$16 sps:$4 sm:$0xff]  }
 0x907   : > { %11031 = vmatprep.subr.bf16.mxu1 %v22241_v45 }
 0x90a   : > { %11032 = vmatpush1.bf16.msra.mxu1 %v22239_v46 }
 0x90b   : > { %11033 = vmatprep.subr.bf16.mxu1 %v22244_v34  ;;  %v22272_v34 = vld [vmem:[%s28545_s13 + $0x68] ss:$16 sps:$4 sm:$0xff]  }
 0x90e   : > { %11034 = vmatpush1.bf16.msra.mxu1 %v22242_v54 }
 0x90f   : > { %11035 = vmatprep.subr.bf16.mxu1 %v22247_v47 }
 0x912   : > { %11036 = vmatpush1.bf16.msra.mxu1 %v22245_v62 }
 0x913   : > { %11037 = vmatprep.subr.bf16.mxu1 %v22250_v49  ;;  %v22280_v49 = vld [vmem:[%s28545_s13 + $0x8c] ss:$16 sps:$4 sm:$0xff]  }
 0x916   : > { %11038 = vmatpush1.bf16.msra.mxu1 %v22248_v55 }
 0x917   : > { %13044 = vmatprep.subr.bf16.mxu1 %v22256_v19  ;;  %v22275_v19 = vld [vmem:[%s28545_s13 + $0x80] ss:$16 sps:$4 sm:$0xff]  }
 0x919   : > { %11040 = vmatmul.mubr.bf16.vlgmr.msra.gmra.mrb[48].mxu1 %v26331_v48 }
 0x91a   : > { %13045 = vmatpush1.bf16.msra.mxu1 %v22254_v56  ;;  %v22277_v56 = vld [vmem:[%s28545_s13 + $0x84] ss:$16 sps:$4 sm:$0xff]  }
 0x91b   : > { %13046 = vmatprep.subr.bf16.mxu1 %v22262_v60  ;;  %v22283_v60 = vld [vmem:[%s28545_s13 + $0xa4] ss:$16 sps:$4 sm:$0xff]  }
 0x91e   : > { %13047 = vmatpush1.bf16.msra.mxu1 %v22260_v38  ;;  %v22281_v38 = vld [vmem:[%s28545_s13 + $0xa0] ss:$16 sps:$4 sm:$0xff]  }
 0x91f   : > { %13048 = vmatprep.subr.bf16.mxu1 %v22268_v41  ;;  %v22289_v41 = vld [vmem:[%s28545_s13 + $0xc4] ss:$16 sps:$4 sm:$0xff]  }
 0x922   : > { %13049 = vmatpush1.bf16.msra.mxu1 %v22266_v42  ;;  %v22287_v42 = vld [vmem:[%s28545_s13 + $0xc0] ss:$16 sps:$4 sm:$0xff]  }
 0x923   : > { %13050 = vmatprep.subr.bf16.mxu1 %v22274_v43  ;;  %v22295_v43 = vld [vmem:[%s28545_s13 + $0xe4] ss:$16 sps:$4 sm:$0xff]  }
 0x926   : > { %13051 = vmatpush1.bf16.msra.mxu1 %v22272_v34  ;;  %v22299_v34 = vld [vmem:[%s28545_s13 + $0x100] ss:$16 sps:$4 sm:$0xff]  }
 0x927   : > { %13052 = vmatprep.subr.bf16.mxu1 %v22280_v49  ;;  %v22311_v49 = vld [vmem:[%s28545_s13 + $0x140] ss:$16 sps:$4 sm:$0xff]  }
 0x96c   : > { %v10869_v2 = vpop.f32.mrb[44].mxu1  ;;  %v10955_v50 = vpop.f32.mrb[36].mxu0 }
 0x96d   : > { %v20191_v3 = vadd.f32 %v10869_v2, %v5613_v59  ;;  %v20195_v48 = vadd.f32 %v10955_v50, %v5621_v61  ;;  %v10871_v5 = vpop.f32.mrb[45].mxu1  ;;  %v10957_v6 = vpop.f32.mrb[37].mxu0  ;;  %v22286_v2 = vld [vmem:[%s28545_s13 + $0xac] ss:$16 sps:$4 sm:$0xff]  }
 0x96e   : > { %v20192_v24 = vadd.f32 %v10871_v5, %v5617_v63  ;;  %v20196_v33 = vadd.f32 %v10957_v6, %v5625_v1  ;;  %v10873_v30 = vpop.f32.mrb[46].mxu1  ;;  %v10959_v16 = vpop.f32.mrb[38].mxu0 }
 0x96f   : > { %v20193_v8 = vadd.f32 %v10873_v30, %v5613_v59  ;;  %v20197_v14 = vadd.f32 %v10959_v16, %v5621_v61  ;;  %v10875_v51 = vpop.f32.mrb[47].mxu1  ;;  %v10961_v7 = vpop.f32.mrb[39].mxu0  ;;  %v11146_v17 = vmax.f32 %v20191_v3, 0.0  ;;  %v11148_v58 = vmax.f32 %v20195_v48, 0.0  ;;  %v22278_v61 = vld [vmem:[%s28545_s13 + $0x88] ss:$16 sps:$4 sm:$0xff]  }
 0x970   : > { %v20194_v37 = vadd.f32 %v10875_v51, %v5617_v63  ;;  %v20198_v39 = vadd.f32 %v10961_v7, %v5625_v1  ;;  %v11147_v31 = vmax.f32 %v20192_v24, 0.0  ;;  %v11149_v23 = vmax.f32 %v20196_v33, 0.0  ;;  %13053 = vmatpush1.bf16.msra.mxu1 %v22278_v61  ;;  %v22284_v3 = vld [vmem:[%s28545_s13 + $0xa8] ss:$16 sps:$4 sm:$0xff]   ;;  %v22298_v33 = vld [vmem:[%s28545_s13 + $0xec] ss:$16 sps:$4 sm:$0xff]  }
 0x971   : > { %v11153_v21 = vmax.f32 %v20193_v8, 0.0  ;;  %v11155_v15 = vmax.f32 %v20197_v14, 0.0  ;;  %13054 = vmatprep.subr.bf16.mxu1 %v22286_v2  ;;  %v22290_v24 = vld [vmem:[%s28545_s13 + $0xc8] ss:$16 sps:$4 sm:$0xff]   ;;  %v22304_v16 = vld [vmem:[%s28545_s13 + $0x10c] ss:$16 sps:$4 sm:$0xff]  }
 0x972   : > { %v11154_v32 = vmax.f32 %v20194_v37, 0.0  ;;  %v11156_v40 = vmax.f32 %v20198_v39, 0.0  ;;  %v22302_v30 = vld [vmem:[%s28545_s13 + $0x108] ss:$16 sps:$4 sm:$0xff]   ;;  %v22310_v14 = vld [vmem:[%s28545_s13 + $0x12c] ss:$16 sps:$4 sm:$0xff]   ;;  %v5629_v37 = vrot.slane %v26288_v22, %v703_v25  ;;  %v5633_v39 = vrot.slane %v26288_v22, %v707_v28 }
 0x973   : > { %v11160_v18 = vpack.c.bf16 %v11153_v21, %v11146_v17  ;;  %v11162_v36 = vpack.c.bf16 %v11155_v15, %v11148_v58  ;;  %v22308_v8 = vld [vmem:[%s28545_s13 + $0x128] ss:$16 sps:$4 sm:$0xff]   ;;  %v22316_v7 = vld [vmem:[%s28545_s13 + $0x14c] ss:$16 sps:$4 sm:$0xff]   ;;  %v22253_v22 = vld [vmem:[%s28545_s13 + $0x4] ss:$16 sps:$4 sm:$0xff]  }
 0x974   : > { %v26810_v44 = vpack.c.bf16 %v11154_v32, %v11147_v31  ;;  %v26812_v57 = vpack.c.bf16 %v11156_v40, %v11149_v23  ;;  %13055 = vmatpush1.bf16.msra.mxu1 %v22284_v3  ;;  %v22314_v51 = vld [vmem:[%s28545_s13 + $0x148] ss:$16 sps:$4 sm:$0xff]   ;;  %v11355_v28 = vld [vmem:[#allocation10] sm:$0xf]  ;;  %v22319_v61 = vld [vmem:[%s28545_s13 + $0x164] ss:$16 sps:$4 sm:$0xff]  }
 0x975   : > { %v26815_v4 = vsel %vm814_vm0, %v11160_v18, 0  ;;  %v26827_v26 = vsel %vm814_vm0, %v11162_v36, 0  ;;  %v22322_v2 = vld [vmem:[%s28545_s13 + $0x16c] ss:$16 sps:$4 sm:$0xff]  }
 0x976   : > { %19093 = vmatprep.subr.msk.bf16.mxu0 %vm814_vm0, %v26810_v44 }
 0x977   : > { %11193 = vmatpush1.bf16.msra.mxu0 %v26815_v4 }
 0x978   : > { %19095 = vmatprep.subr.msk.bf16.mxu0 %vm814_vm0, %v26812_v57 }
 0x97a   : > { %19094 = vmatmul.mubr.msk.bf16.vlgmr.msra.gmra.mrb[80].mxu0 %vm7415_vm5, %v26820_v9 }
 0x97b   : > { %11234 = vmatpush1.bf16.msra.mxu0 %v26827_v26  ;;  %11265 = vmatprep.mubr.bf16.mxu0 %v23387_v0 }
 0x982   : > { %19096 = vmatmul.mubr.msk.bf16.vlgmr.msra.gmra.mrb[84].mxu0 %vm7415_vm5, %v26820_v9 }
 0x983   : > { %11306 = vmatprep.mubr.bf16.mxu0 %v23387_v0 }
 0x98d   : > { %v19892_v27 = vpop.f32.mrb[72].mxu0 }
 0x98e   : > { %v19893_v20 = vpop.f32.mrb[73].mxu0 }
 0x98f   : > { %v19894_v11 = vadd.f32 %v19893_v20, %v19892_v27  ;;  %v19895_v13 = vpop.f32.mrb[74].mxu0 }
 0x990   : > { %v19896_v52 = vpop.f32.mrb[75].mxu0 }
 0x991   : > { %v19897_v53 = vadd.f32 %v19896_v52, %v19895_v13  ;;  %v22271_v52 = vld [vmem:[%s28545_s13 + $0x64] ss:$16 sps:$4 sm:$0xff]  }
 0x9ad   : > { %v19914_v45 = vpop.f32.mrb[76].mxu0 }
 0x9ae   : > { %v19915_v46 = vpop.f32.mrb[77].mxu0 }
 0x9af   : > { %v19916_v54 = vadd.f32 %v19915_v46, %v19914_v45  ;;  %v19917_v47 = vpop.f32.mrb[78].mxu0  ;;  %v22293_v45 = vld [vmem:[%s28545_s13 + $0xe0] ss:$16 sps:$4 sm:$0xff]   ;;  %v22301_v46 = vld [vmem:[%s28545_s13 + $0x104] ss:$16 sps:$4 sm:$0xff]  }
 0x9b0   : > { %v19918_v62 = vpop.f32.mrb[79].mxu0 }
 0x9b1   : > { %v11126_v55 = vadd.f32 %v19916_v54, %v19894_v11  ;;  %v19919_v59 = vadd.f32 %v19918_v62, %v19917_v47  ;;  %v22307_v54 = vld [vmem:[%s28545_s13 + $0x124] ss:$16 sps:$4 sm:$0xff]   ;;  %v22305_v47 = vld [vmem:[%s28545_s13 + $0x120] ss:$16 sps:$4 sm:$0xff]  }
 0x9b2   : > { %v22313_v62 = vld [vmem:[%s28545_s13 + $0x144] ss:$16 sps:$4 sm:$0xff]  }
 0x9b3   : > { %v11138_v63 = vadd.f32 %v11126_v55, %v26295_v29  ;;  %v11129_v1 = vadd.f32 %v19919_v59, %v19897_v53  ;;  %v22292_v29 = vld [vmem:[%s28545_s13 + $0xcc] ss:$16 sps:$4 sm:$0xff]   ;;  %v22269_v53 = vld [vmem:[%s28545_s13 + $0x60] ss:$16 sps:$4 sm:$0xff]  }
 0x9b4   : > { %13056 = vmatprep.subr.bf16.mxu1 %v22292_v29  ;;  %v22317_v59 = vld [vmem:[%s28545_s13 + $0x160] ss:$16 sps:$4 sm:$0xff]   ;;  %v22326_v29 = vld [vmem:[%s28545_s13 + $0x188] ss:$16 sps:$4 sm:$0xff]  }
 0x9b5   : > { %v11145_v50 = vadd.f32 %v11129_v1, %v26297_v35  ;;  %v11152_v48 = vmax.f32 %v11138_v63, 0.0  ;;  %13057 = vmatpush1.bf16.msra.mxu1 %v22290_v24  ;;  %v22296_v35 = vld [vmem:[%s28545_s13 + $0xe8] ss:$16 sps:$4 sm:$0xff]  }
 0x9b6   : > { %13058 = vmatprep.subr.bf16.mxu1 %v22298_v33  ;;  %v22320_v1 = vld [vmem:[%s28545_s13 + $0x168] ss:$16 sps:$4 sm:$0xff]   ;;  %v22331_v33 = vld [vmem:[%s28545_s13 + $0x1a4] ss:$16 sps:$4 sm:$0xff]  }
 0x9b7   : > { %v11159_v5 = vmax.f32 %v11145_v50, 0.0 }
 0x9b9   : > { %v11166_v6 = vpack.c.bf16 %v11159_v5, %v11152_v48  ;;  %13059 = vmatpush1.bf16.msra.mxu1 %v22296_v35  ;;  %v22323_v48 = vld [vmem:[%s28545_s13 + $0x180] ss:$16 sps:$4 sm:$0xff]   ;;  %v22325_v5 = vld [vmem:[%s28545_s13 + $0x184] ss:$16 sps:$4 sm:$0xff]  }
 0x9ba   : > { %13060 = vmatprep.subr.bf16.mxu1 %v22304_v16  ;;  %v22329_v35 = vld [vmem:[%s28545_s13 + $0x1a0] ss:$16 sps:$4 sm:$0xff]   ;;  %v22332_v16 = vld [vmem:[%s28545_s13 + $0x1a8] ss:$16 sps:$4 sm:$0xff]  }
 0x9bb   : > { %v11190_v12 = vsel %vm814_vm0, %v11166_v6, 0  ;;  %v22328_v6 = vld [vmem:[%s28545_s13 + $0x18c] ss:$16 sps:$4 sm:$0xff]  }
 0x9bd   : > { %13061 = vmatpush1.bf16.msra.mxu1 %v22302_v30 }
 0x9be   : > { %13062 = vmatprep.subr.bf16.mxu1 %v22310_v14 }
 0x9c1   : > { %13063 = vmatpush1.bf16.msra.mxu1 %v22308_v8  ;;  %v22334_v8 = vld [vmem:[%s28545_s13 + $0x1ac] ss:$16 sps:$4 sm:$0xff]  }
 0x9c2   : > { %13064 = vmatprep.subr.bf16.mxu1 %v22316_v7  ;;  %v22335_v7 = vld [vmem:[%s28545_s13 + $0x1c0] ss:$16 sps:$4 sm:$0xff]  }
 0x9c5   : > { %13065 = vmatpush1.bf16.msra.mxu1 %v22314_v51 }
 0x9c6   : > { %13066 = vmatprep.subr.bf16.mxu1 %v22322_v2  ;;  %v22368_v2 = vld [vmem:[%s28545_s13 + $0x268] ss:$16 sps:$4 sm:$0xff]  }
 0x9c9   : > { %13067 = vmatpush1.bf16.msra.mxu1 %v22320_v1  ;;  %v22365_v1 = vld [vmem:[%s28545_s13 + $0x260] ss:$16 sps:$4 sm:$0xff]  }
 0x9ca   : > { %13068 = vmatprep.subr.bf16.mxu1 %v22328_v6 }
 0x9cd   : > { %13069 = vmatpush1.bf16.msra.mxu1 %v22326_v29 }
 0x9ce   : > { %13070 = vmatprep.subr.bf16.mxu1 %v22334_v8 }
 0x9d1   : > { %13071 = vmatpush1.bf16.msra.mxu1 %v22332_v16  ;;  %v22382_v16 = vld [vmem:[%s28545_s13 + $0x2ac] ss:$16 sps:$4 sm:$0xff]  }
 0x9ec   : > { %v11041_v17 = vpop.f32.mrb[48].mxu1 }
 0x9ed   : > { %v20199_v58 = vadd.f32 %v11041_v17, %v5629_v37  ;;  %v11043_v21 = vpop.f32.mrb[49].mxu1  ;;  %v22340_v17 = vld [vmem:[%s28545_s13 + $0x1cc] ss:$16 sps:$4 sm:$0xff]  }
 0x9ee   : > { %v20200_v15 = vadd.f32 %v11043_v21, %v5633_v39  ;;  %v11045_v31 = vpop.f32.mrb[50].mxu1  ;;  %13072 = vmatprep.subr.bf16.mxu1 %v22340_v17  ;;  %v22346_v21 = vld [vmem:[%s28545_s13 + $0x1ec] ss:$16 sps:$4 sm:$0xff]  }
 0x9ef   : > { %v20201_v23 = vadd.f32 %v11045_v31, %v5629_v37  ;;  %v11047_v32 = vpop.f32.mrb[51].mxu1  ;;  %v11150_v18 = vmax.f32 %v20199_v58, 0.0  ;;  %v22337_v37 = vld [vmem:[%s28545_s13 + $0x1c4] ss:$16 sps:$4 sm:$0xff]   ;;  %v22344_v31 = vld [vmem:[%s28545_s13 + $0x1e8] ss:$16 sps:$4 sm:$0xff]  }
 0x9f0   : > { %v20202_v40 = vadd.f32 %v11047_v32, %v5633_v39  ;;  %v11151_v27 = vmax.f32 %v20200_v15, 0.0  ;;  %v22338_v39 = vld [vmem:[%s28545_s13 + $0x1c8] ss:$16 sps:$4 sm:$0xff]   ;;  %v22343_v58 = vld [vmem:[%s28545_s13 + $0x1e4] ss:$16 sps:$4 sm:$0xff]  }
 0x9f1   : > { %v11157_v36 = vmax.f32 %v20201_v23, 0.0  ;;  %13073 = vmatpush1.bf16.msra.mxu1 %v22338_v39  ;;  %v22341_v15 = vld [vmem:[%s28545_s13 + $0x1e0] ss:$16 sps:$4 sm:$0xff]   ;;  %v22349_v23 = vld [vmem:[%s28545_s13 + $0x204] ss:$16 sps:$4 sm:$0xff]  }
 0x9f2   : > { %v11158_v20 = vmax.f32 %v20202_v40, 0.0  ;;  %13074 = vmatprep.subr.bf16.mxu1 %v22346_v21  ;;  %v22352_v32 = vld [vmem:[%s28545_s13 + $0x20c] ss:$16 sps:$4 sm:$0xff]   ;;  %v22383_v21 = vld [vmem:[%s28545_s13 + $0x2c0] ss:$16 sps:$4 sm:$0xff]  }
 0x9f3   : > { %v11164_v11 = vpack.c.bf16 %v11157_v36, %v11150_v18  ;;  %v22388_v39 = vld [vmem:[%s28545_s13 + $0x2cc] ss:$16 sps:$4 sm:$0xff]  }
 0x9f4   : > { %v11165_v13 = vpack.c.bf16 %v11158_v20, %v11151_v27 }
 0x9f5   : > { %v11184_v25 = vsel %vm814_vm0, %v11164_v11, 0  ;;  %13075 = vmatpush1.bf16.msra.mxu1 %v22344_v31 }
 0x9f6   : > { %19097 = vmatprep.subr.msk.bf16.mxu0 %vm814_vm0, %v11165_v13  ;;  %13085 = vmatprep.subr.bf16.mxu1 %v22352_v32  ;;  %v22394_v32 = vld [vmem:[%s28545_s13 + $0x2ec] ss:$16 sps:$4 sm:$0xff]  }
 0x9f7   : > { %11275 = vmatpush1.bf16.msra.mxu0 %v11184_v25 }
 0x9f8   : > { %20127 = vmatprep.subr.bf16.mxu0 %v23388_v10 }
 0x9fa   : > { %19098 = vmatmul.mubr.msk.bf16.vlgmr.msra.gmra.mrb[88].mxu0 %vm7415_vm5, %v26820_v9 }
 0x9fb   : > { %20128 = vmatpush3.bf16.msra.mxu0 %v11190_v12  ;;  %20129 = vmatprep.mubr.msk.bf16.mxu0 %vm23389_vm2, %v23388_v10 }
 0x9fc   : > { %19100 = vmatprep.subr.msk.bf16.mxu0 %vm814_vm0, %v26810_v44  ;;  %v22251_v44 = vld [vmem:[%s28545_s13] ss:$16 sps:$4 sm:$0xff]  }
 0xa02   : > { %20130 = vmatmul.mubr.msk.bf16.vlgmr.msra.gmra.mrb[92].mxu0 %vm7415_vm5, %v26820_v9  ;;  %v22265_v9 = vld [vmem:[%s28545_s13 + $0x44] ss:$16 sps:$4 sm:$0xff]  }
 0xa03   : > { %11360 = vmatpush1.bf16.msra.mxu0 %v26815_v4  ;;  %11391 = vmatprep.mubr.bf16.mxu0 %v23387_v0  ;;  %v22257_v4 = vld [vmem:[%s28545_s13 + $0x20] ss:$16 sps:$4 sm:$0xff]  }
 0xa04   : > { %19102 = vmatprep.subr.msk.bf16.mxu0 %vm814_vm0, %v26812_v57  ;;  %v22259_v57 = vld [vmem:[%s28545_s13 + $0x24] ss:$16 sps:$4 sm:$0xff]  }
 0xa0a   : > { %19101 = vmatmul.mubr.msk.bf16.vlgmr.msra.gmra.mrb[96].mxu0 %vm7415_vm5, %v11355_v28 }
 0xa0b   : > { %11401 = vmatpush1.bf16.msra.mxu0 %v26827_v26  ;;  %11432 = vmatprep.mubr.bf16.mxu0 %v23387_v0  ;;  %v22263_v26 = vld [vmem:[%s28545_s13 + $0x40] ss:$16 sps:$4 sm:$0xff]  }
 0xa0c   : > { %19104 = vmatprep.subr.msk.bf16.mxu0 %vm814_vm0, %v11165_v13 }
 0xa12   : > { %19103 = vmatmul.mubr.msk.bf16.vlgmr.msra.gmra.mrb[100].mxu0 %vm7415_vm5, %v11355_v28 }
 0xa13   : > { %11442 = vmatpush1.bf16.msra.mxu0 %v11184_v25  ;;  %11473 = vmatprep.mubr.bf16.mxu0 %v23387_v0 }
 0xa14   : > { %20133 = vmatprep.subr.bf16.mxu0 %v23388_v10 }
 0xa1a   : > { %19105 = vmatmul.mubr.msk.bf16.vlgmr.msra.gmra.mrb[104].mxu0 %vm7415_vm5, %v11355_v28 }
 0xa1b   : > { %20134 = vmatpush3.bf16.msra.mxu0 %v11190_v12  ;;  %20135 = vmatprep.mubr.msk.bf16.mxu0 %vm23389_vm2, %v23388_v10 }
 0xa1c   : > { %12880 = vmatprep.subr.bf16.mxu0 %v22253_v22 }
 0xa22   : > { %20136 = vmatmul.mubr.msk.bf16.vlgmr.msra.gmra.mrb[108].mxu0 %vm7415_vm5, %v11355_v28 }
 0xa23   : > { %12881 = vmatpush1.bf16.msra.mxu0 %v22251_v44 }
 0xa24   : > { %12882 = vmatprep.subr.bf16.mxu0 %v22259_v57 }
 0xa27   : > { %12883 = vmatpush1.bf16.msra.mxu0 %v22257_v4 }
 0xa28   : > { %12884 = vmatprep.subr.bf16.mxu0 %v22265_v9 }
 0xa2b   : > { %12885 = vmatpush1.bf16.msra.mxu0 %v22263_v26  ;;  %v22347_v26 = vld [vmem:[%s28545_s13 + $0x200] ss:$16 sps:$4 sm:$0xff]  }
 0xa2c   : > { %12886 = vmatprep.subr.bf16.mxu0 %v22271_v52  ;;  %v22350_v52 = vld [vmem:[%s28545_s13 + $0x208] ss:$16 sps:$4 sm:$0xff]  }
 0xa2f   : > { %12887 = vmatpush1.bf16.msra.mxu0 %v22269_v53 }
 0xa30   : > { %12888 = vmatprep.subr.bf16.mxu0 %v22277_v56  ;;  %v22355_v56 = vld [vmem:[%s28545_s13 + $0x224] ss:$16 sps:$4 sm:$0xff]  }
 0xa33   : > { %12889 = vmatpush1.bf16.msra.mxu0 %v22275_v19  ;;  %v22358_v19 = vld [vmem:[%s28545_s13 + $0x22c] ss:$16 sps:$4 sm:$0xff]  }
 0xa34   : > { %12890 = vmatprep.subr.bf16.mxu0 %v22283_v60 }
 0xa37   : > { %12891 = vmatpush1.bf16.msra.mxu0 %v22281_v38  ;;  %v22353_v38 = vld [vmem:[%s28545_s13 + $0x220] ss:$16 sps:$4 sm:$0xff]  }
 0xa38   : > { %12892 = vmatprep.subr.bf16.mxu0 %v22289_v41  ;;  %v22356_v41 = vld [vmem:[%s28545_s13 + $0x228] ss:$16 sps:$4 sm:$0xff]  }
 0xa3b   : > { %12893 = vmatpush1.bf16.msra.mxu0 %v22287_v42 }
 0xa3c   : > { %12894 = vmatprep.subr.bf16.mxu0 %v22295_v43 }
 0xa3f   : > { %12895 = vmatpush1.bf16.msra.mxu0 %v22293_v45  ;;  %v22361_v45 = vld [vmem:[%s28545_s13 + $0x244] ss:$16 sps:$4 sm:$0xff]  }
 0xa40   : > { %12896 = vmatprep.subr.bf16.mxu0 %v22301_v46  ;;  %v22364_v46 = vld [vmem:[%s28545_s13 + $0x24c] ss:$16 sps:$4 sm:$0xff]  }
 0xa43   : > { %12897 = vmatpush1.bf16.msra.mxu0 %v22299_v34 }
 0xa44   : > { %12898 = vmatprep.subr.bf16.mxu0 %v22307_v54 }
 0xa47   : > { %12899 = vmatpush1.bf16.msra.mxu0 %v22305_v47 }
 0xa48   : > { %12900 = vmatprep.subr.bf16.mxu0 %v22313_v62 }
 0xa4b   : > { %12901 = vmatpush1.bf16.msra.mxu0 %v22311_v49  ;;  %v22359_v49 = vld [vmem:[%s28545_s13 + $0x240] ss:$16 sps:$4 sm:$0xff]  }
 0xa4c   : > { %12902 = vmatprep.subr.bf16.mxu0 %v22319_v61  ;;  %v22370_v61 = vld [vmem:[%s28545_s13 + $0x26c] ss:$16 sps:$4 sm:$0xff]  }
 0xa4d   : > { %v11226_v55 = vpop.f32.mrb[80].mxu0 }
 0xa4e   : > { %v11228_v63 = vpop.f32.mrb[81].mxu0 }
 0xa4f   : > { %v11230_v50 = vpop.f32.mrb[82].mxu0  ;;  %12903 = vmatpush1.bf16.msra.mxu0 %v22317_v59  ;;  %v22367_v59 = vld [vmem:[%s28545_s13 + $0x264] ss:$16 sps:$4 sm:$0xff]  }
 0xa50   : > { %v11231_v3 = vpop.f32.mrb[83].mxu0  ;;  %12904 = vmatprep.subr.bf16.mxu0 %v22325_v5  ;;  %v22376_v5 = vld [vmem:[%s28545_s13 + $0x28c] ss:$16 sps:$4 sm:$0xff]  }
 0xa53   : > { %12905 = vmatpush1.bf16.msra.mxu0 %v22323_v48  ;;  %v22373_v48 = vld [vmem:[%s28545_s13 + $0x284] ss:$16 sps:$4 sm:$0xff]  }
 0xa54   : > { %12906 = vmatprep.subr.bf16.mxu0 %v22331_v33  ;;  %v22374_v33 = vld [vmem:[%s28545_s13 + $0x288] ss:$16 sps:$4 sm:$0xff]  }
 0xa55   : > { %v11267_v24 = vpop.f32.mrb[84].mxu0 }
 0xa56   : > { %v27031_v30 = vpop.f32.mrb[85].mxu0 }
 0xa57   : > { %v11271_v14 = vpop.f32.mrb[86].mxu0  ;;  %12907 = vmatpush1.bf16.msra.mxu0 %v22329_v35  ;;  %v22371_v35 = vld [vmem:[%s28545_s13 + $0x280] ss:$16 sps:$4 sm:$0xff]  }
 0xa58   : > { %v11272_v51 = vpop.f32.mrb[87].mxu0  ;;  %12908 = vmatprep.subr.bf16.mxu0 %v22337_v37  ;;  %v22377_v14 = vld [vmem:[%s28545_s13 + $0x2a0] ss:$16 sps:$4 sm:$0xff]   ;;  %v22385_v37 = vld [vmem:[%s28545_s13 + $0x2c4] ss:$16 sps:$4 sm:$0xff]  }
 0xa59   : > { %v22380_v51 = vld [vmem:[%s28545_s13 + $0x2a8] ss:$16 sps:$4 sm:$0xff]  }
 0xa5b   : > { %12909 = vmatpush1.bf16.msra.mxu0 %v22335_v7 }
 0xa5c   : > { %12910 = vmatprep.subr.bf16.mxu0 %v22343_v58 }
 0xa5f   : > { %12911 = vmatpush1.bf16.msra.mxu0 %v22341_v15  ;;  %v22386_v15 = vld [vmem:[%s28545_s13 + $0x2c8] ss:$16 sps:$4 sm:$0xff]  }
 0xa60   : > { %12921 = vmatprep.subr.bf16.mxu0 %v22349_v23  ;;  %v22391_v23 = vld [vmem:[%s28545_s13 + $0x2e4] ss:$16 sps:$4 sm:$0xff]  }
 0xacd   : > { %v11308_v40 = vpop.f32.mrb[88].mxu0 }
 0xace   : > { %v11310_v18 = vpop.f32.mrb[89].mxu0 }
 0xacf   : > { %v11312_v36 = vpop.f32.mrb[90].mxu0 }
 0xad0   : > { %v11313_v27 = vpop.f32.mrb[91].mxu0  ;;  %v22397_v36 = vld [vmem:[%s28545_s13 + $0x304] ss:$16 sps:$4 sm:$0xff]  }
 0xad1   : > { %v22400_v27 = vld [vmem:[%s28545_s13 + $0x30c] ss:$16 sps:$4 sm:$0xff]  }
 0xad5   : > { %v27069_v20 = vpop.f32.mrb[92].mxu0 }
 0xad6   : > { %v20131_v11 = vpop.f32.mrb[93].mxu0 }
 0xad7   : > { %v11352_v13 = vpop.f32.mrb[94].mxu0  ;;  %v22398_v11 = vld [vmem:[%s28545_s13 + $0x308] ss:$16 sps:$4 sm:$0xff]  }
 0xad8   : > { %v20132_v25 = vpop.f32.mrb[95].mxu0  ;;  %v22403_v13 = vld [vmem:[%s28545_s13 + $0x324] ss:$16 sps:$4 sm:$0xff]  }
 0xad9   : > { %v22406_v25 = vld [vmem:[%s28545_s13 + $0x32c] ss:$16 sps:$4 sm:$0xff]  }
 0xadd   : > { %v11393_v12 = vpop.f32.mrb[96].mxu0 }
 0xade   : > { %v11522_v28 = vmax.f32 %v11226_v55, %v11393_v12  ;;  %v11395_v22 = vpop.f32.mrb[97].mxu0  ;;  %v22362_v55 = vld [vmem:[%s28545_s13 + $0x248] ss:$16 sps:$4 sm:$0xff]   ;;  %v22401_v12 = vld [vmem:[%s28545_s13 + $0x320] ss:$16 sps:$4 sm:$0xff]  }
 0xadf   : > { %v11523_v44 = vmax.f32 %v11228_v63, %v11395_v22  ;;  %v11397_v57 = vpop.f32.mrb[98].mxu0  ;;  %v22409_v22 = vld [vmem:[%s28545_s13 + $0x344] ss:$16 sps:$4 sm:$0xff]  }
 0xae0   : > { %v11398_v4 = vpop.f32.mrb[99].mxu0  ;;  %v27079_v53 = vpack.c.bf16 %v11522_v28, %v11522_v28  ;;  %v22404_v28 = vld [vmem:[%s28545_s13 + $0x328] ss:$16 sps:$4 sm:$0xff]   ;;  %v22407_v57 = vld [vmem:[%s28545_s13 + $0x340] ss:$16 sps:$4 sm:$0xff]  }
 0xae1   : > { %v27071_v9 = vpack.c.bf16 %v11523_v44, %v11523_v44  ;;  %v22412_v44 = vld [vmem:[%s28545_s13 + $0x34c] ss:$16 sps:$4 sm:$0xff]   ;;  %v22410_v4 = vld [vmem:[%s28545_s13 + $0x348] ss:$16 sps:$4 sm:$0xff]  }
 0xae3   : > { %12912 = vmatprep.mubr.bf16.mxu0 %v27071_v9  ;;  %13076 = vmatprep.mubr.bf16.mxu1 %v27071_v9 }
 0xae4   : > { %12913 = vmatmul.mubr.bf16.vlgmr.msra.gmra.mrb[112].mxu0 %v27079_v53  ;;  %13077 = vmatmul.mubr.bf16.vlgmr.msra.gmra.mrb[52].mxu1 %v27079_v53 }
 0xae5   : > { %12922 = vmatpush1.bf16.msra.mxu0 %v22347_v26  ;;  %13086 = vmatpush1.bf16.msra.mxu1 %v22350_v52  ;;  %v11434_v60 = vpop.f32.mrb[100].mxu0  ;;  %v22415_v26 = vld [vmem:[%s28545_s13 + $0x364] ss:$16 sps:$4 sm:$0xff]   ;;  %v22418_v52 = vld [vmem:[%s28545_s13 + $0x36c] ss:$16 sps:$4 sm:$0xff]  }
 0xae6   : > { %v27097_v42 = vmax.f32 %v11267_v24, %v11434_v60  ;;  %v11436_v43 = vpop.f32.mrb[101].mxu0  ;;  %12923 = vmatprep.subr.bf16.mxu0 %v22355_v56  ;;  %13087 = vmatprep.subr.bf16.mxu1 %v22358_v19  ;;  %v22413_v56 = vld [vmem:[%s28545_s13 + $0x360] ss:$16 sps:$4 sm:$0xff]   ;;  %v22416_v19 = vld [vmem:[%s28545_s13 + $0x368] ss:$16 sps:$4 sm:$0xff]  }
 0xae7   : > { %v11525_v34 = vmax.f32 %v27031_v30, %v11436_v43  ;;  %v11438_v54 = vpop.f32.mrb[102].mxu0  ;;  %v22379_v30 = vld [vmem:[%s28545_s13 + $0x2a4] ss:$16 sps:$4 sm:$0xff]   ;;  %v22422_v43 = vld [vmem:[%s28545_s13 + $0x388] ss:$16 sps:$4 sm:$0xff]  }
 0xae8   : > { %v11439_v47 = vpop.f32.mrb[103].mxu0  ;;  %v22421_v60 = vld [vmem:[%s28545_s13 + $0x384] ss:$16 sps:$4 sm:$0xff]   ;;  %v22428_v54 = vld [vmem:[%s28545_s13 + $0x3a8] ss:$16 sps:$4 sm:$0xff]  }
 0xae9   : > { %v27106_v62 = vpack.c.bf16 %v11525_v34, %v11525_v34  ;;  %12924 = vmatpush1.bf16.msra.mxu0 %v22353_v38  ;;  %13088 = vmatpush1.bf16.msra.mxu1 %v22356_v41  ;;  %v22424_v38 = vld [vmem:[%s28545_s13 + $0x38c] ss:$16 sps:$4 sm:$0xff]   ;;  %v22419_v41 = vld [vmem:[%s28545_s13 + $0x380] ss:$16 sps:$4 sm:$0xff]   ;;  %v22433_v47 = vld [vmem:[%s28545_s13 + $0x3c4] ss:$16 sps:$4 sm:$0xff]  }
 0xaea   : > { %12925 = vmatprep.subr.bf16.mxu0 %v22361_v45  ;;  %13089 = vmatprep.subr.bf16.mxu1 %v22364_v46  ;;  %v22427_v45 = vld [vmem:[%s28545_s13 + $0x3a4] ss:$16 sps:$4 sm:$0xff]   ;;  %v22430_v46 = vld [vmem:[%s28545_s13 + $0x3ac] ss:$16 sps:$4 sm:$0xff]   ;;  %v22425_v34 = vld [vmem:[%s28545_s13 + $0x3a0] ss:$16 sps:$4 sm:$0xff]  }
 0xaeb   : > { %12953 = vmatprep.mubr.bf16.mxu0 %v27106_v62  ;;  %13117 = vmatprep.mubr.bf16.mxu1 %v27106_v62 }
 0xaed   : > { %12926 = vmatpush1.bf16.msra.mxu0 %v22359_v49  ;;  %13090 = vmatpush1.bf16.msra.mxu1 %v22362_v55  ;;  %v11475_v63 = vpop.f32.mrb[104].mxu0  ;;  %v22436_v49 = vld [vmem:[%s28545_s13 + $0x3cc] ss:$16 sps:$4 sm:$0xff]   ;;  %v22431_v55 = vld [vmem:[%s28545_s13 + $0x3c0] ss:$16 sps:$4 sm:$0xff]  }
 0xaee   : > { %v27128_v50 = vmax.f32 %v11308_v40, %v11475_v63  ;;  %v11477_v3 = vpop.f32.mrb[105].mxu0  ;;  %12927 = vmatprep.subr.bf16.mxu0 %v22367_v59  ;;  %13091 = vmatprep.subr.bf16.mxu1 %v22370_v61  ;;  %v22389_v40 = vld [vmem:[%s28545_s13 + $0x2e0] ss:$16 sps:$4 sm:$0xff]   ;;  %v22434_v59 = vld [vmem:[%s28545_s13 + $0x3c8] ss:$16 sps:$4 sm:$0xff]  }
 0xaef   : > { %v27136_v29 = vmax.f32 %v11310_v18, %v11477_v3  ;;  %v11479_v6 = vpop.f32.mrb[106].mxu0  ;;  %v22392_v18 = vld [vmem:[%s28545_s13 + $0x2e8] ss:$16 sps:$4 sm:$0xff]   ;;  %v22439_v61 = vld [vmem:[%s28545_s13 + $0x3e4] ss:$16 sps:$4 sm:$0xff]  }
 0xaf0   : > { %v11480_v24 = vpop.f32.mrb[107].mxu0  ;;  %v22442_v63 = vld [vmem:[%s28545_s13 + $0x3ec] ss:$16 sps:$4 sm:$0xff]   ;;  %v22445_v3 = vld [vmem:[%s28545_s13 + $0x404] ss:$16 sps:$4 sm:$0xff]   ;;  %v27290_v6 = vpack.c.bf16 %v27097_v42, %v27097_v42 }
 0xaf1   : > { %12928 = vmatpush1.bf16.msra.mxu0 %v22365_v1  ;;  %13092 = vmatpush1.bf16.msra.mxu1 %v22368_v2  ;;  %v22437_v1 = vld [vmem:[%s28545_s13 + $0x3e0] ss:$16 sps:$4 sm:$0xff]   ;;  %v22440_v2 = vld [vmem:[%s28545_s13 + $0x3e8] ss:$16 sps:$4 sm:$0xff]  }
 0xaf2   : > { %12929 = vmatprep.subr.bf16.mxu0 %v22373_v48  ;;  %13093 = vmatprep.subr.bf16.mxu1 %v22376_v5  ;;  %v22448_v48 = vld [vmem:[%s28545_s13 + $0x40c] ss:$16 sps:$4 sm:$0xff]   ;;  %v22443_v5 = vld [vmem:[%s28545_s13 + $0x400] ss:$16 sps:$4 sm:$0xff]   ;;  %v22446_v24 = vld [vmem:[%s28545_s13 + $0x408] ss:$16 sps:$4 sm:$0xff]  }
 0xaf3   : > { %v22449_v42 = vld [vmem:[%s28545_s13 + $0x420] ss:$16 sps:$4 sm:$0xff]  }
 0xaf5   : > { %12930 = vmatpush1.bf16.msra.mxu0 %v22371_v35  ;;  %13094 = vmatpush1.bf16.msra.mxu1 %v22374_v33  ;;  %v11516_v8 = vpop.f32.mrb[108].mxu0  ;;  %v27297_v35 = vpack.c.bf16 %v27136_v29, %v27136_v29  ;;  %v22451_v33 = vld [vmem:[%s28545_s13 + $0x424] ss:$16 sps:$4 sm:$0xff]   ;;  %v22452_v29 = vld [vmem:[%s28545_s13 + $0x428] ss:$16 sps:$4 sm:$0xff]  }
 0xaf6   : > { %v27157_v7 = vmax.f32 %v27069_v20, %v11516_v8  ;;  %12931 = vmatprep.subr.bf16.mxu0 %v22379_v30  ;;  %13095 = vmatprep.subr.bf16.mxu1 %v22382_v16  ;;  %v20137_v17 = vpop.f32.mrb[109].mxu0  ;;  %v22395_v20 = vld [vmem:[%s28545_s13 + $0x300] ss:$16 sps:$4 sm:$0xff]   ;;  %v22454_v30 = vld [vmem:[%s28545_s13 + $0x42c] ss:$16 sps:$4 sm:$0xff]  }
 0xaf7   : > { %v11519_v58 = vpop.f32.mrb[110].mxu0  ;;  %v22457_v16 = vld [vmem:[%s28545_s13 + $0x444] ss:$16 sps:$4 sm:$0xff]   ;;  %v22460_v8 = vld [vmem:[%s28545_s13 + $0x44c] ss:$16 sps:$4 sm:$0xff]  }
 0xaf8   : > { %v20138_v31 = vpop.f32.mrb[111].mxu0  ;;  %v22461_v17 = vld [vmem:[%s28545_s13 + $0x460] ss:$16 sps:$4 sm:$0xff]   ;;  %v22464_v58 = vld [vmem:[%s28545_s13 + $0x468] ss:$16 sps:$4 sm:$0xff]  }
 0xaf9   : > { %12932 = vmatpush1.bf16.msra.mxu0 %v22377_v14  ;;  %13096 = vmatpush1.bf16.msra.mxu1 %v22380_v51  ;;  %v22455_v14 = vld [vmem:[%s28545_s13 + $0x440] ss:$16 sps:$4 sm:$0xff]   ;;  %v22458_v51 = vld [vmem:[%s28545_s13 + $0x448] ss:$16 sps:$4 sm:$0xff]  }
 0xafa   : > { %12933 = vmatprep.subr.bf16.mxu0 %v22385_v37  ;;  %13097 = vmatprep.subr.bf16.mxu1 %v22388_v39  ;;  %v22463_v37 = vld [vmem:[%s28545_s13 + $0x464] ss:$16 sps:$4 sm:$0xff]   ;;  %v22466_v39 = vld [vmem:[%s28545_s13 + $0x46c] ss:$16 sps:$4 sm:$0xff]   ;;  %v22467_v31 = vld [vmem:[%s28545_s13 + $0x480] ss:$16 sps:$4 sm:$0xff]  }
 0xafd   : > { %12934 = vmatpush1.bf16.msra.mxu0 %v22383_v21  ;;  %13098 = vmatpush1.bf16.msra.mxu1 %v22386_v15  ;;  %v22469_v21 = vld [vmem:[%s28545_s13 + $0x484] ss:$16 sps:$4 sm:$0xff]   ;;  %v22472_v15 = vld [vmem:[%s28545_s13 + $0x48c] ss:$16 sps:$4 sm:$0xff]  }
 0xafe   : > { %12935 = vmatprep.subr.bf16.mxu0 %v22391_v23  ;;  %13099 = vmatprep.subr.bf16.mxu1 %v22394_v32  ;;  %v22470_v23 = vld [vmem:[%s28545_s13 + $0x488] ss:$16 sps:$4 sm:$0xff]   ;;  %v22475_v32 = vld [vmem:[%s28545_s13 + $0x4a4] ss:$16 sps:$4 sm:$0xff]  }
 0xb01   : > { %12936 = vmatpush1.bf16.msra.mxu0 %v22389_v40  ;;  %13100 = vmatpush1.bf16.msra.mxu1 %v22392_v18  ;;  %v22478_v40 = vld [vmem:[%s28545_s13 + $0x4ac] ss:$16 sps:$4 sm:$0xff]   ;;  %v22473_v18 = vld [vmem:[%s28545_s13 + $0x4a0] ss:$16 sps:$4 sm:$0xff]  }
 0xb02   : > { %12937 = vmatprep.subr.bf16.mxu0 %v22397_v36  ;;  %13101 = vmatprep.subr.bf16.mxu1 %v22400_v27  ;;  %v22476_v36 = vld [vmem:[%s28545_s13 + $0x4a8] ss:$16 sps:$4 sm:$0xff]   ;;  %v22481_v27 = vld [vmem:[%s28545_s13 + $0x4c4] ss:$16 sps:$4 sm:$0xff]  }
 0xb05   : > { %12938 = vmatpush1.bf16.msra.mxu0 %v22395_v20  ;;  %13102 = vmatpush1.bf16.msra.mxu1 %v22398_v11  ;;  %v22484_v20 = vld [vmem:[%s28545_s13 + $0x4cc] ss:$16 sps:$4 sm:$0xff]   ;;  %v22479_v11 = vld [vmem:[%s28545_s13 + $0x4c0] ss:$16 sps:$4 sm:$0xff]  }
 0xb06   : > { %12939 = vmatprep.subr.bf16.mxu0 %v22403_v13  ;;  %13103 = vmatprep.subr.bf16.mxu1 %v22406_v25  ;;  %v22482_v13 = vld [vmem:[%s28545_s13 + $0x4c8] ss:$16 sps:$4 sm:$0xff]   ;;  %v22487_v25 = vld [vmem:[%s28545_s13 + $0x4e4] ss:$16 sps:$4 sm:$0xff]  }
 0xb09   : > { %12940 = vmatpush1.bf16.msra.mxu0 %v22401_v12  ;;  %13104 = vmatpush1.bf16.msra.mxu1 %v22404_v28  ;;  %v22490_v12 = vld [vmem:[%s28545_s13 + $0x4ec] ss:$16 sps:$4 sm:$0xff]   ;;  %v22485_v28 = vld [vmem:[%s28545_s13 + $0x4e0] ss:$16 sps:$4 sm:$0xff]  }
 0xb0a   : > { %12941 = vmatprep.subr.bf16.mxu0 %v22409_v22  ;;  %13105 = vmatprep.subr.bf16.mxu1 %v22412_v44  ;;  %v22488_v22 = vld [vmem:[%s28545_s13 + $0x4e8] ss:$16 sps:$4 sm:$0xff]   ;;  %v22493_v44 = vld [vmem:[%s28545_s13 + $0x504] ss:$16 sps:$4 sm:$0xff]  }
 0xb0d   : > { %12942 = vmatpush1.bf16.msra.mxu0 %v22407_v57  ;;  %13106 = vmatpush1.bf16.msra.mxu1 %v22410_v4  ;;  %v22496_v57 = vld [vmem:[%s28545_s13 + $0x50c] ss:$16 sps:$4 sm:$0xff]   ;;  %v22491_v4 = vld [vmem:[%s28545_s13 + $0x500] ss:$16 sps:$4 sm:$0xff]  }
 0xb0e   : > { %12943 = vmatprep.subr.bf16.mxu0 %v22415_v26  ;;  %13107 = vmatprep.subr.bf16.mxu1 %v22418_v52  ;;  %v22494_v26 = vld [vmem:[%s28545_s13 + $0x508] ss:$16 sps:$4 sm:$0xff]   ;;  %v22499_v52 = vld [vmem:[%s28545_s13 + $0x524] ss:$16 sps:$4 sm:$0xff]  }
 0xb11   : > { %12944 = vmatpush1.bf16.msra.mxu0 %v22413_v56  ;;  %13108 = vmatpush1.bf16.msra.mxu1 %v22416_v19  ;;  %v22502_v56 = vld [vmem:[%s28545_s13 + $0x52c] ss:$16 sps:$4 sm:$0xff]   ;;  %v22497_v19 = vld [vmem:[%s28545_s13 + $0x520] ss:$16 sps:$4 sm:$0xff]  }
 0xb12   : > { %12945 = vmatprep.subr.bf16.mxu0 %v22421_v60  ;;  %13109 = vmatprep.subr.bf16.mxu1 %v22424_v38  ;;  %v22500_v60 = vld [vmem:[%s28545_s13 + $0x528] ss:$16 sps:$4 sm:$0xff]   ;;  %v22505_v38 = vld [vmem:[%s28545_s13 + $0x544] ss:$16 sps:$4 sm:$0xff]  }
 0xb15   : > { %12946 = vmatpush1.bf16.msra.mxu0 %v22419_v41  ;;  %13110 = vmatpush1.bf16.msra.mxu1 %v22422_v43  ;;  %v22508_v41 = vld [vmem:[%s28545_s13 + $0x54c] ss:$16 sps:$4 sm:$0xff]   ;;  %v22503_v43 = vld [vmem:[%s28545_s13 + $0x540] ss:$16 sps:$4 sm:$0xff]  }
 0xb16   : > { %12947 = vmatprep.subr.bf16.mxu0 %v22427_v45  ;;  %13111 = vmatprep.subr.bf16.mxu1 %v22430_v46  ;;  %v22506_v45 = vld [vmem:[%s28545_s13 + $0x548] ss:$16 sps:$4 sm:$0xff]   ;;  %v22511_v46 = vld [vmem:[%s28545_s13 + $0x564] ss:$16 sps:$4 sm:$0xff]  }
 0xb19   : > { %12948 = vmatpush1.bf16.msra.mxu0 %v22425_v34  ;;  %13112 = vmatpush1.bf16.msra.mxu1 %v22428_v54  ;;  %v22514_v34 = vld [vmem:[%s28545_s13 + $0x56c] ss:$16 sps:$4 sm:$0xff]   ;;  %v22509_v54 = vld [vmem:[%s28545_s13 + $0x560] ss:$16 sps:$4 sm:$0xff]  }
 0xb1a   : > { %12949 = vmatprep.subr.bf16.mxu0 %v22433_v47  ;;  %13113 = vmatprep.subr.bf16.mxu1 %v22436_v49  ;;  %v22512_v47 = vld [vmem:[%s28545_s13 + $0x568] ss:$16 sps:$4 sm:$0xff]   ;;  %v22517_v49 = vld [vmem:[%s28545_s13 + $0x584] ss:$16 sps:$4 sm:$0xff]  }
 0xb1d   : > { %12950 = vmatpush1.bf16.msra.mxu0 %v22431_v55  ;;  %13114 = vmatpush1.bf16.msra.mxu1 %v22434_v59  ;;  %v22520_v55 = vld [vmem:[%s28545_s13 + $0x58c] ss:$16 sps:$4 sm:$0xff]   ;;  %v22515_v59 = vld [vmem:[%s28545_s13 + $0x580] ss:$16 sps:$4 sm:$0xff]  }
 0xb1e   : > { %12951 = vmatprep.subr.bf16.mxu0 %v22439_v61  ;;  %13115 = vmatprep.subr.bf16.mxu1 %v22442_v63  ;;  %v22518_v61 = vld [vmem:[%s28545_s13 + $0x588] ss:$16 sps:$4 sm:$0xff]   ;;  %v22523_v63 = vld [vmem:[%s28545_s13 + $0x5a4] ss:$16 sps:$4 sm:$0xff]  }
 0xb21   : > { %12952 = vmatpush1.bf16.msra.mxu0 %v22437_v1  ;;  %13116 = vmatpush1.bf16.msra.mxu1 %v22440_v2  ;;  %v22526_v1 = vld [vmem:[%s28545_s13 + $0x5ac] ss:$16 sps:$4 sm:$0xff]   ;;  %v22521_v2 = vld [vmem:[%s28545_s13 + $0x5a0] ss:$16 sps:$4 sm:$0xff]  }
 0xb22   : > { %12962 = vmatprep.subr.bf16.mxu0 %v22445_v3  ;;  %13126 = vmatprep.subr.bf16.mxu1 %v22448_v48  ;;  %v22524_v3 = vld [vmem:[%s28545_s13 + $0x5a8] ss:$16 sps:$4 sm:$0xff]   ;;  %v22529_v48 = vld [vmem:[%s28545_s13 + $0x5c4] ss:$16 sps:$4 sm:$0xff]  }
 0xb24   : > { %12954 = vmatmul.mubr.bf16.vlgmr.msra.gmra.mrb[112].mxu0 %v27290_v6  ;;  %13118 = vmatmul.mubr.bf16.vlgmr.msra.gmra.mrb[52].mxu1 %v27290_v6 }
 0xb25   : > { %12963 = vmatpush1.bf16.msra.mxu0 %v22443_v5  ;;  %12994 = vmatprep.mubr.bf16.mxu0 %v27297_v35  ;;  %v22532_v5 = vld [vmem:[%s28545_s13 + $0x5cc] ss:$16 sps:$4 sm:$0xff]  }
 0xb26   : > { %13127 = vmatpush1.bf16.msra.mxu1 %v22446_v24  ;;  %13158 = vmatprep.mubr.bf16.mxu1 %v27297_v35  ;;  %v22527_v24 = vld [vmem:[%s28545_s13 + $0x5c0] ss:$16 sps:$4 sm:$0xff]  }
 0xb27   : > { %12964 = vmatprep.subr.bf16.mxu0 %v22451_v33  ;;  %13128 = vmatprep.subr.bf16.mxu1 %v22454_v30  ;;  %v22530_v33 = vld [vmem:[%s28545_s13 + $0x5c8] ss:$16 sps:$4 sm:$0xff]   ;;  %v22535_v30 = vld [vmem:[%s28545_s13 + $0x5e4] ss:$16 sps:$4 sm:$0xff]  }
 0xb29   : > { %12965 = vmatpush1.bf16.msra.mxu0 %v22449_v42  ;;  %v22538_v42 = vld [vmem:[%s28545_s13 + $0x5ec] ss:$16 sps:$4 sm:$0xff]  }
 0xb2a   : > { %13129 = vmatpush1.bf16.msra.mxu1 %v22452_v29  ;;  %12966 = vmatprep.subr.bf16.mxu0 %v22457_v16  ;;  %v22533_v29 = vld [vmem:[%s28545_s13 + $0x5e0] ss:$16 sps:$4 sm:$0xff]   ;;  %v22536_v16 = vld [vmem:[%s28545_s13 + $0x5e8] ss:$16 sps:$4 sm:$0xff]  }
 0xb2b   : > { %13130 = vmatprep.subr.bf16.mxu1 %v22460_v8  ;;  %v22541_v8 = vld [vmem:[%s28545_s13 + $0x604] ss:$16 sps:$4 sm:$0xff]  }
 0xb2d   : > { %12967 = vmatpush1.bf16.msra.mxu0 %v22455_v14  ;;  %v22544_v14 = vld [vmem:[%s28545_s13 + $0x60c] ss:$16 sps:$4 sm:$0xff]  }
 0xb2e   : > { %13131 = vmatpush1.bf16.msra.mxu1 %v22458_v51  ;;  %12968 = vmatprep.subr.bf16.mxu0 %v22463_v37  ;;  %v22539_v51 = vld [vmem:[%s28545_s13 + $0x600] ss:$16 sps:$4 sm:$0xff]   ;;  %v27494_v37 = vpack.c.bf16 %v27128_v50, %v27128_v50 }
 0xb2f   : > { %13132 = vmatprep.subr.bf16.mxu1 %v22466_v39  ;;  %v22542_v39 = vld [vmem:[%s28545_s13 + $0x608] ss:$16 sps:$4 sm:$0xff]   ;;  %v22545_v50 = vld [vmem:[%s28545_s13 + $0x620] ss:$16 sps:$4 sm:$0xff]  }
 0xb31   : > { %12969 = vmatpush1.bf16.msra.mxu0 %v22461_v17  ;;  %v22547_v17 = vld [vmem:[%s28545_s13 + $0x624] ss:$16 sps:$4 sm:$0xff]  }
 0xb32   : > { %13133 = vmatpush1.bf16.msra.mxu1 %v22464_v58  ;;  %12970 = vmatprep.subr.bf16.mxu0 %v22469_v21  ;;  %v22550_v58 = vld [vmem:[%s28545_s13 + $0x62c] ss:$16 sps:$4 sm:$0xff]   ;;  %v22548_v21 = vld [vmem:[%s28545_s13 + $0x628] ss:$16 sps:$4 sm:$0xff]  }
 0xb33   : > { %13134 = vmatprep.subr.bf16.mxu1 %v22472_v15  ;;  %v22553_v15 = vld [vmem:[%s28545_s13 + $0x644] ss:$16 sps:$4 sm:$0xff]  }
 0xb35   : > { %12971 = vmatpush1.bf16.msra.mxu0 %v22467_v31  ;;  %v22556_v31 = vld [vmem:[%s28545_s13 + $0x64c] ss:$16 sps:$4 sm:$0xff]  }
 0xb36   : > { %13135 = vmatpush1.bf16.msra.mxu1 %v22470_v23  ;;  %12972 = vmatprep.subr.bf16.mxu0 %v22475_v32  ;;  %v22551_v23 = vld [vmem:[%s28545_s13 + $0x640] ss:$16 sps:$4 sm:$0xff]   ;;  %v22554_v32 = vld [vmem:[%s28545_s13 + $0x648] ss:$16 sps:$4 sm:$0xff]  }
 0xb37   : > { %13136 = vmatprep.subr.bf16.mxu1 %v22478_v40  ;;  %v22559_v40 = vld [vmem:[%s28545_s13 + $0x664] ss:$16 sps:$4 sm:$0xff]  }
 0xb39   : > { %12973 = vmatpush1.bf16.msra.mxu0 %v22473_v18  ;;  %v22562_v18 = vld [vmem:[%s28545_s13 + $0x66c] ss:$16 sps:$4 sm:$0xff]  }
 0xb3a   : > { %13137 = vmatpush1.bf16.msra.mxu1 %v22476_v36  ;;  %12974 = vmatprep.subr.bf16.mxu0 %v22481_v27  ;;  %v22557_v36 = vld [vmem:[%s28545_s13 + $0x660] ss:$16 sps:$4 sm:$0xff]   ;;  %v22560_v27 = vld [vmem:[%s28545_s13 + $0x668] ss:$16 sps:$4 sm:$0xff]  }
 0xb3b   : > { %13138 = vmatprep.subr.bf16.mxu1 %v22484_v20  ;;  %v22565_v20 = vld [vmem:[%s28545_s13 + $0x684] ss:$16 sps:$4 sm:$0xff]  }
 0xb3d   : > { %12975 = vmatpush1.bf16.msra.mxu0 %v22479_v11  ;;  %v22568_v11 = vld [vmem:[%s28545_s13 + $0x68c] ss:$16 sps:$4 sm:$0xff]  }
 0xb3e   : > { %13139 = vmatpush1.bf16.msra.mxu1 %v22482_v13  ;;  %12976 = vmatprep.subr.bf16.mxu0 %v22487_v25  ;;  %v22563_v13 = vld [vmem:[%s28545_s13 + $0x680] ss:$16 sps:$4 sm:$0xff]   ;;  %v22566_v25 = vld [vmem:[%s28545_s13 + $0x688] ss:$16 sps:$4 sm:$0xff]  }
 0xb3f   : > { %13140 = vmatprep.subr.bf16.mxu1 %v22490_v12  ;;  %v22571_v12 = vld [vmem:[%s28545_s13 + $0x6a4] ss:$16 sps:$4 sm:$0xff]  }
 0xb41   : > { %12977 = vmatpush1.bf16.msra.mxu0 %v22485_v28  ;;  %v22574_v28 = vld [vmem:[%s28545_s13 + $0x6ac] ss:$16 sps:$4 sm:$0xff]  }
 0xb42   : > { %13141 = vmatpush1.bf16.msra.mxu1 %v22488_v22  ;;  %12978 = vmatprep.subr.bf16.mxu0 %v22493_v44  ;;  %v22569_v22 = vld [vmem:[%s28545_s13 + $0x6a0] ss:$16 sps:$4 sm:$0xff]   ;;  %v22572_v44 = vld [vmem:[%s28545_s13 + $0x6a8] ss:$16 sps:$4 sm:$0xff]  }
 0xb43   : > { %13142 = vmatprep.subr.bf16.mxu1 %v22496_v57  ;;  %v22577_v57 = vld [vmem:[%s28545_s13 + $0x6c4] ss:$16 sps:$4 sm:$0xff]  }
 0xb45   : > { %12979 = vmatpush1.bf16.msra.mxu0 %v22491_v4  ;;  %v22580_v4 = vld [vmem:[%s28545_s13 + $0x6cc] ss:$16 sps:$4 sm:$0xff]  }
 0xb46   : > { %13143 = vmatpush1.bf16.msra.mxu1 %v22494_v26  ;;  %12980 = vmatprep.subr.bf16.mxu0 %v22499_v52  ;;  %v22575_v26 = vld [vmem:[%s28545_s13 + $0x6c0] ss:$16 sps:$4 sm:$0xff]   ;;  %v22578_v52 = vld [vmem:[%s28545_s13 + $0x6c8] ss:$16 sps:$4 sm:$0xff]  }
 0xb47   : > { %13144 = vmatprep.subr.bf16.mxu1 %v22502_v56  ;;  %v22583_v56 = vld [vmem:[%s28545_s13 + $0x6e4] ss:$16 sps:$4 sm:$0xff]  }
 0xb49   : > { %12981 = vmatpush1.bf16.msra.mxu0 %v22497_v19  ;;  %v22586_v19 = vld [vmem:[%s28545_s13 + $0x6ec] ss:$16 sps:$4 sm:$0xff]  }
 0xb4a   : > { %13145 = vmatpush1.bf16.msra.mxu1 %v22500_v60  ;;  %12982 = vmatprep.subr.bf16.mxu0 %v22505_v38  ;;  %v22581_v60 = vld [vmem:[%s28545_s13 + $0x6e0] ss:$16 sps:$4 sm:$0xff]   ;;  %v22584_v38 = vld [vmem:[%s28545_s13 + $0x6e8] ss:$16 sps:$4 sm:$0xff]  }
 0xb4b   : > { %13146 = vmatprep.subr.bf16.mxu1 %v22508_v41  ;;  %v22589_v41 = vld [vmem:[%s28546_s14 + $0x4] ss:$16 sps:$4 sm:$0xff]  }
 0xb4d   : > { %12983 = vmatpush1.bf16.msra.mxu0 %v22503_v43  ;;  %v22592_v43 = vld [vmem:[%s28546_s14 + $0xc] ss:$16 sps:$4 sm:$0xff]  }
 0xb4e   : > { %13147 = vmatpush1.bf16.msra.mxu1 %v22506_v45  ;;  %12984 = vmatprep.subr.bf16.mxu0 %v22511_v46  ;;  %v22587_v45 = vld [vmem:[%s28546_s14] ss:$16 sps:$4 sm:$0xff]   ;;  %v27598_v46 = vpack.c.bf16 %v27157_v7, %v27157_v7 }
 0xb4f   : > { %13148 = vmatprep.subr.bf16.mxu1 %v22514_v34  ;;  %v22590_v34 = vld [vmem:[%s28546_s14 + $0x8] ss:$16 sps:$4 sm:$0xff]   ;;  %v22593_v7 = vld [vmem:[%s28546_s14 + $0x20] ss:$16 sps:$4 sm:$0xff]  }
 0xb51   : > { %12985 = vmatpush1.bf16.msra.mxu0 %v22509_v54  ;;  %v22595_v54 = vld [vmem:[%s28546_s14 + $0x24] ss:$16 sps:$4 sm:$0xff]  }
 0xb52   : > { %13149 = vmatpush1.bf16.msra.mxu1 %v22512_v47  ;;  %12986 = vmatprep.subr.bf16.mxu0 %v22517_v49  ;;  %v22598_v47 = vld [vmem:[%s28546_s14 + $0x2c] ss:$16 sps:$4 sm:$0xff]   ;;  %v22596_v49 = vld [vmem:[%s28546_s14 + $0x28] ss:$16 sps:$4 sm:$0xff]  }
 0xb53   : > { %13150 = vmatprep.subr.bf16.mxu1 %v22520_v55  ;;  %v22601_v55 = vld [vmem:[%s28546_s14 + $0x44] ss:$16 sps:$4 sm:$0xff]  }
 0xb55   : > { %12987 = vmatpush1.bf16.msra.mxu0 %v22515_v59  ;;  %v22604_v59 = vld [vmem:[%s28546_s14 + $0x4c] ss:$16 sps:$4 sm:$0xff]  }
 0xb56   : > { %13151 = vmatpush1.bf16.msra.mxu1 %v22518_v61  ;;  %12988 = vmatprep.subr.bf16.mxu0 %v22523_v63  ;;  %v22599_v61 = vld [vmem:[%s28546_s14 + $0x40] ss:$16 sps:$4 sm:$0xff]   ;;  %v22602_v63 = vld [vmem:[%s28546_s14 + $0x48] ss:$16 sps:$4 sm:$0xff]  }
 0xb57   : > { %13152 = vmatprep.subr.bf16.mxu1 %v22526_v1  ;;  %v22610_v1 = vld [vmem:[%s28546_s14 + $0x6c] ss:$16 sps:$4 sm:$0xff]  }
 0xb59   : > { %12989 = vmatpush1.bf16.msra.mxu0 %v22521_v2  ;;  %v22605_v2 = vld [vmem:[%s28546_s14 + $0x60] ss:$16 sps:$4 sm:$0xff]  }
 0xb5a   : > { %13153 = vmatpush1.bf16.msra.mxu1 %v22524_v3  ;;  %12990 = vmatprep.subr.bf16.mxu0 %v22529_v48  ;;  %v22608_v3 = vld [vmem:[%s28546_s14 + $0x68] ss:$16 sps:$4 sm:$0xff]   ;;  %v22613_v48 = vld [vmem:[%s28546_s14 + $0x84] ss:$16 sps:$4 sm:$0xff]  }
 0xb5b   : > { %13154 = vmatprep.subr.bf16.mxu1 %v22532_v5  ;;  %v22616_v5 = vld [vmem:[%s28546_s14 + $0x8c] ss:$16 sps:$4 sm:$0xff]  }
 0xb5d   : > { %12991 = vmatpush1.bf16.msra.mxu0 %v22527_v24  ;;  %v22611_v24 = vld [vmem:[%s28546_s14 + $0x80] ss:$16 sps:$4 sm:$0xff]  }
 0xb5e   : > { %13155 = vmatpush1.bf16.msra.mxu1 %v22530_v33  ;;  %12992 = vmatprep.subr.bf16.mxu0 %v22535_v30  ;;  %v22614_v33 = vld [vmem:[%s28546_s14 + $0x88] ss:$16 sps:$4 sm:$0xff]   ;;  %v22619_v30 = vld [vmem:[%s28546_s14 + $0xa4] ss:$16 sps:$4 sm:$0xff]  }
 0xb5f   : > { %13156 = vmatprep.subr.bf16.mxu1 %v22538_v42  ;;  %v22622_v42 = vld [vmem:[%s28546_s14 + $0xac] ss:$16 sps:$4 sm:$0xff]  }
 0xb61   : > { %12993 = vmatpush1.bf16.msra.mxu0 %v22533_v29  ;;  %v22617_v29 = vld [vmem:[%s28546_s14 + $0xa0] ss:$16 sps:$4 sm:$0xff]  }
 0xb62   : > { %13157 = vmatpush1.bf16.msra.mxu1 %v22536_v16  ;;  %13003 = vmatprep.subr.bf16.mxu0 %v22541_v8  ;;  %v22620_v16 = vld [vmem:[%s28546_s14 + $0xa8] ss:$16 sps:$4 sm:$0xff]   ;;  %v22625_v8 = vld [vmem:[%s28546_s14 + $0xc4] ss:$16 sps:$4 sm:$0xff]  }
 0xb63   : > { %13167 = vmatprep.subr.bf16.mxu1 %v22544_v14  ;;  %v22628_v14 = vld [vmem:[%s28546_s14 + $0xcc] ss:$16 sps:$4 sm:$0xff]  }
 0xb64   : > { %12995 = vmatmul.mubr.bf16.vlgmr.msra.gmra.mrb[112].mxu0 %v27494_v37 }
 0xb65   : > { %13159 = vmatmul.mubr.bf16.vlgmr.msra.gmra.mrb[52].mxu1 %v27494_v37  ;;  %13004 = vmatpush1.bf16.msra.mxu0 %v22539_v51  ;;  %v22623_v51 = vld [vmem:[%s28546_s14 + $0xc0] ss:$16 sps:$4 sm:$0xff]  }
 0xb66   : > { %13168 = vmatpush1.bf16.msra.mxu1 %v22542_v39  ;;  %13005 = vmatprep.subr.bf16.mxu0 %v22547_v17  ;;  %v22626_v39 = vld [vmem:[%s28546_s14 + $0xc8] ss:$16 sps:$4 sm:$0xff]   ;;  %v22631_v17 = vld [vmem:[%s28546_s14 + $0xe4] ss:$16 sps:$4 sm:$0xff]  }
 0xb67   : > { %13169 = vmatprep.subr.bf16.mxu1 %v22550_v58  ;;  %13035 = vmatprep.mubr.bf16.mxu0 %v23387_v0  ;;  %v22634_v58 = vld [vmem:[%s28546_s14 + $0xec] ss:$16 sps:$4 sm:$0xff]  }
 0xb68   : > { %13199 = vmatprep.mubr.bf16.mxu1 %v23387_v0 }
 0xb69   : > { %13006 = vmatpush1.bf16.msra.mxu0 %v22545_v50  ;;  %v22629_v50 = vld [vmem:[%s28546_s14 + $0xe0] ss:$16 sps:$4 sm:$0xff]  }
 0xb6a   : > { %13170 = vmatpush1.bf16.msra.mxu1 %v22548_v21  ;;  %13007 = vmatprep.subr.bf16.mxu0 %v22553_v15  ;;  %v22632_v21 = vld [vmem:[%s28546_s14 + $0xe8] ss:$16 sps:$4 sm:$0xff]   ;;  %v22637_v15 = vld [vmem:[%s28546_s14 + $0x104] ss:$16 sps:$4 sm:$0xff]  }
 0xb6b   : > { %13171 = vmatprep.subr.bf16.mxu1 %v22556_v31  ;;  %v22640_v31 = vld [vmem:[%s28546_s14 + $0x10c] ss:$16 sps:$4 sm:$0xff]  }
 0xb6d   : > { %13008 = vmatpush1.bf16.msra.mxu0 %v22551_v23  ;;  %v22635_v23 = vld [vmem:[%s28546_s14 + $0x100] ss:$16 sps:$4 sm:$0xff]  }
 0xb6e   : > { %13172 = vmatpush1.bf16.msra.mxu1 %v22554_v32  ;;  %13009 = vmatprep.subr.bf16.mxu0 %v22559_v40  ;;  %v22638_v32 = vld [vmem:[%s28546_s14 + $0x108] ss:$16 sps:$4 sm:$0xff]   ;;  %v22643_v40 = vld [vmem:[%s28546_s14 + $0x124] ss:$16 sps:$4 sm:$0xff]  }
 0xb6f   : > { %13173 = vmatprep.subr.bf16.mxu1 %v22562_v18  ;;  %v22646_v18 = vld [vmem:[%s28546_s14 + $0x12c] ss:$16 sps:$4 sm:$0xff]  }
 0xb71   : > { %13010 = vmatpush1.bf16.msra.mxu0 %v22557_v36  ;;  %v22641_v36 = vld [vmem:[%s28546_s14 + $0x120] ss:$16 sps:$4 sm:$0xff]  }
 0xb72   : > { %13174 = vmatpush1.bf16.msra.mxu1 %v22560_v27  ;;  %13011 = vmatprep.subr.bf16.mxu0 %v22565_v20  ;;  %v22644_v27 = vld [vmem:[%s28546_s14 + $0x128] ss:$16 sps:$4 sm:$0xff]   ;;  %v22649_v20 = vld [vmem:[%s28546_s14 + $0x144] ss:$16 sps:$4 sm:$0xff]  }
 0xb73   : > { %13175 = vmatprep.subr.bf16.mxu1 %v22568_v11  ;;  %v22652_v11 = vld [vmem:[%s28546_s14 + $0x14c] ss:$16 sps:$4 sm:$0xff]  }
 0xb75   : > { %13012 = vmatpush1.bf16.msra.mxu0 %v22563_v13  ;;  %v22647_v13 = vld [vmem:[%s28546_s14 + $0x140] ss:$16 sps:$4 sm:$0xff]  }
 0xb76   : > { %13176 = vmatpush1.bf16.msra.mxu1 %v22566_v25  ;;  %13013 = vmatprep.subr.bf16.mxu0 %v22571_v12  ;;  %v22650_v25 = vld [vmem:[%s28546_s14 + $0x148] ss:$16 sps:$4 sm:$0xff]   ;;  %v22655_v12 = vld [vmem:[%s28546_s14 + $0x164] ss:$16 sps:$4 sm:$0xff]  }
 0xb77   : > { %13177 = vmatprep.subr.bf16.mxu1 %v22574_v28  ;;  %v22658_v28 = vld [vmem:[%s28546_s14 + $0x16c] ss:$16 sps:$4 sm:$0xff]  }
 0xb79   : > { %13014 = vmatpush1.bf16.msra.mxu0 %v22569_v22  ;;  %v22653_v22 = vld [vmem:[%s28546_s14 + $0x160] ss:$16 sps:$4 sm:$0xff]  }
 0xb7a   : > { %13178 = vmatpush1.bf16.msra.mxu1 %v22572_v44  ;;  %13015 = vmatprep.subr.bf16.mxu0 %v22577_v57  ;;  %v22656_v44 = vld [vmem:[%s28546_s14 + $0x168] ss:$16 sps:$4 sm:$0xff]   ;;  %v22661_v57 = vld [vmem:[%s28546_s14 + $0x184] ss:$16 sps:$4 sm:$0xff]  }
 0xb7b   : > { %13179 = vmatprep.subr.bf16.mxu1 %v22580_v4  ;;  %v22664_v4 = vld [vmem:[%s28546_s14 + $0x18c] ss:$16 sps:$4 sm:$0xff]  }
 0xb7d   : > { %13016 = vmatpush1.bf16.msra.mxu0 %v22575_v26  ;;  %v22659_v26 = vld [vmem:[%s28546_s14 + $0x180] ss:$16 sps:$4 sm:$0xff]  }
 0xb7e   : > { %13180 = vmatpush1.bf16.msra.mxu1 %v22578_v52  ;;  %13017 = vmatprep.subr.bf16.mxu0 %v22583_v56  ;;  %v22662_v52 = vld [vmem:[%s28546_s14 + $0x188] ss:$16 sps:$4 sm:$0xff]   ;;  %v22667_v56 = vld [vmem:[%s28546_s14 + $0x1a4] ss:$16 sps:$4 sm:$0xff]  }
 0xb7f   : > { %13181 = vmatprep.subr.bf16.mxu1 %v22586_v19  ;;  %v22670_v19 = vld [vmem:[%s28546_s14 + $0x1ac] ss:$16 sps:$4 sm:$0xff]  }
 0xb81   : > { %13018 = vmatpush1.bf16.msra.mxu0 %v22581_v60  ;;  %v22665_v60 = vld [vmem:[%s28546_s14 + $0x1a0] ss:$16 sps:$4 sm:$0xff]  }
 0xb82   : > { %13182 = vmatpush1.bf16.msra.mxu1 %v22584_v38  ;;  %14552 = vmatprep.subr.bf16.mxu0 %v22589_v41  ;;  %v22668_v38 = vld [vmem:[%s28546_s14 + $0x1a8] ss:$16 sps:$4 sm:$0xff]   ;;  %v22673_v41 = vld [vmem:[%s28546_s14 + $0x1c4] ss:$16 sps:$4 sm:$0xff]  }
 0xb83   : > { %14716 = vmatprep.subr.bf16.mxu1 %v22592_v43  ;;  %v22676_v43 = vld [vmem:[%s28546_s14 + $0x1cc] ss:$16 sps:$4 sm:$0xff]  }
 0xb84   : > { %13036 = vmatmul.mubr.bf16.vlgmr.msra.gmra.mrb[112].mxu0 %v27598_v46 }
 0xb85   : > { %13200 = vmatmul.mubr.bf16.vlgmr.msra.gmra.mrb[52].mxu1 %v27598_v46  ;;  %14553 = vmatpush1.bf16.msra.mxu0 %v22587_v45  ;;  %v22671_v45 = vld [vmem:[%s28546_s14 + $0x1c0] ss:$16 sps:$4 sm:$0xff]  }
 0xb86   : > { %14584 = vmatprep.mubr.bf16.mxu0 %v27071_v9  ;;  %14717 = vmatpush1.bf16.msra.mxu1 %v22590_v34  ;;  %v22674_v34 = vld [vmem:[%s28546_s14 + $0x1c8] ss:$16 sps:$4 sm:$0xff]  }
 0xb87   : > { %14748 = vmatprep.mubr.bf16.mxu1 %v27071_v9  ;;  %14554 = vmatprep.subr.bf16.mxu0 %v22595_v54  ;;  %v22607_v9 = vld [vmem:[%s28546_s14 + $0x64] ss:$16 sps:$4 sm:$0xff]  }
 0xb88   : > { %14718 = vmatprep.subr.bf16.mxu1 %v22598_v47  ;;  %v22679_v54 = vld [vmem:[%s28546_s14 + $0x1e4] ss:$16 sps:$4 sm:$0xff]   ;;  %v22682_v47 = vld [vmem:[%s28546_s14 + $0x1ec] ss:$16 sps:$4 sm:$0xff]  }
 0xb89   : > { %14555 = vmatpush1.bf16.msra.mxu0 %v22593_v7  ;;  %v22677_v7 = vld [vmem:[%s28546_s14 + $0x1e0] ss:$16 sps:$4 sm:$0xff]  }
 0xb8a   : > { %14719 = vmatpush1.bf16.msra.mxu1 %v22596_v49  ;;  %14556 = vmatprep.subr.bf16.mxu0 %v22601_v55  ;;  %v22680_v49 = vld [vmem:[%s28546_s14 + $0x1e8] ss:$16 sps:$4 sm:$0xff]   ;;  %v22685_v55 = vld [vmem:[%s28546_s14 + $0x204] ss:$16 sps:$4 sm:$0xff]  }
 0xb8b   : > { %14720 = vmatprep.subr.bf16.mxu1 %v22604_v59  ;;  %v22688_v59 = vld [vmem:[%s28546_s14 + $0x20c] ss:$16 sps:$4 sm:$0xff]  }
 0xb8d   : > { %14557 = vmatpush1.bf16.msra.mxu0 %v22599_v61  ;;  %v22683_v61 = vld [vmem:[%s28546_s14 + $0x200] ss:$16 sps:$4 sm:$0xff]  }
 0xb8e   : > { %14721 = vmatpush1.bf16.msra.mxu1 %v22602_v63  ;;  %14558 = vmatprep.subr.bf16.mxu0 %v22607_v9  ;;  %v22686_v63 = vld [vmem:[%s28546_s14 + $0x208] ss:$16 sps:$4 sm:$0xff]   ;;  %v22691_v9 = vld [vmem:[%s28546_s14 + $0x224] ss:$16 sps:$4 sm:$0xff]  }
 0xb8f   : > { %14722 = vmatprep.subr.bf16.mxu1 %v22610_v1  ;;  %v22694_v1 = vld [vmem:[%s28546_s14 + $0x22c] ss:$16 sps:$4 sm:$0xff]  }
 0xb91   : > { %14559 = vmatpush1.bf16.msra.mxu0 %v22605_v2  ;;  %v22689_v2 = vld [vmem:[%s28546_s14 + $0x220] ss:$16 sps:$4 sm:$0xff]  }
 0xb92   : > { %14723 = vmatpush1.bf16.msra.mxu1 %v22608_v3  ;;  %14560 = vmatprep.subr.bf16.mxu0 %v22613_v48  ;;  %v22692_v3 = vld [vmem:[%s28546_s14 + $0x228] ss:$16 sps:$4 sm:$0xff]   ;;  %v22697_v48 = vld [vmem:[%s28546_s14 + $0x244] ss:$16 sps:$4 sm:$0xff]  }
 0xb93   : > { %14724 = vmatprep.subr.bf16.mxu1 %v22616_v5  ;;  %v22695_v5 = vld [vmem:[%s28546_s14 + $0x240] ss:$16 sps:$4 sm:$0xff]  }
 0xb95   : > { %14561 = vmatpush1.bf16.msra.mxu0 %v22611_v24  ;;  %v22698_v24 = vld [vmem:[%s28546_s14 + $0x248] ss:$16 sps:$4 sm:$0xff]  }
 0xb96   : > { %14725 = vmatpush1.bf16.msra.mxu1 %v22614_v33  ;;  %14562 = vmatprep.subr.bf16.mxu0 %v22619_v30  ;;  %v22706_v33 = vld [vmem:[%s28546_s14 + $0x26c] ss:$16 sps:$4 sm:$0xff]   ;;  %v22701_v30 = vld [vmem:[%s28546_s14 + $0x260] ss:$16 sps:$4 sm:$0xff]  }
 0xb97   : > { %14726 = vmatprep.subr.bf16.mxu1 %v22622_v42  ;;  %v22704_v42 = vld [vmem:[%s28546_s14 + $0x268] ss:$16 sps:$4 sm:$0xff]  }
 0xb99   : > { %14563 = vmatpush1.bf16.msra.mxu0 %v22617_v29  ;;  %v22709_v29 = vld [vmem:[%s28546_s14 + $0x284] ss:$16 sps:$4 sm:$0xff]  }
 0xb9a   : > { %14727 = vmatpush1.bf16.msra.mxu1 %v22620_v16  ;;  %14564 = vmatprep.subr.bf16.mxu0 %v22625_v8  ;;  %v22712_v16 = vld [vmem:[%s28546_s14 + $0x28c] ss:$16 sps:$4 sm:$0xff]   ;;  %v22707_v8 = vld [vmem:[%s28546_s14 + $0x280] ss:$16 sps:$4 sm:$0xff]  }
 0xb9b   : > { %14728 = vmatprep.subr.bf16.mxu1 %v22628_v14  ;;  %v22710_v14 = vld [vmem:[%s28546_s14 + $0x288] ss:$16 sps:$4 sm:$0xff]  }
 0xb9d   : > { %14565 = vmatpush1.bf16.msra.mxu0 %v22623_v51  ;;  %v22715_v51 = vld [vmem:[%s28546_s14 + $0x2a4] ss:$16 sps:$4 sm:$0xff]  }
 0xb9e   : > { %14729 = vmatpush1.bf16.msra.mxu1 %v22626_v39  ;;  %14566 = vmatprep.subr.bf16.mxu0 %v22631_v17  ;;  %v22718_v39 = vld [vmem:[%s28546_s14 + $0x2ac] ss:$16 sps:$4 sm:$0xff]   ;;  %v22713_v17 = vld [vmem:[%s28546_s14 + $0x2a0] ss:$16 sps:$4 sm:$0xff]  }
 0xb9f   : > { %14730 = vmatprep.subr.bf16.mxu1 %v22634_v58  ;;  %v22716_v58 = vld [vmem:[%s28546_s14 + $0x2a8] ss:$16 sps:$4 sm:$0xff]  }
 0xba1   : > { %14567 = vmatpush1.bf16.msra.mxu0 %v22629_v50  ;;  %v22721_v50 = vld [vmem:[%s28546_s14 + $0x2c4] ss:$16 sps:$4 sm:$0xff]  }
 0xba2   : > { %14731 = vmatpush1.bf16.msra.mxu1 %v22632_v21  ;;  %14568 = vmatprep.subr.bf16.mxu0 %v22637_v15  ;;  %v22724_v21 = vld [vmem:[%s28546_s14 + $0x2cc] ss:$16 sps:$4 sm:$0xff]   ;;  %v22719_v15 = vld [vmem:[%s28546_s14 + $0x2c0] ss:$16 sps:$4 sm:$0xff]  }
 0xba3   : > { %14732 = vmatprep.subr.bf16.mxu1 %v22640_v31  ;;  %v22722_v31 = vld [vmem:[%s28546_s14 + $0x2c8] ss:$16 sps:$4 sm:$0xff]  }
 0xba5   : > { %14569 = vmatpush1.bf16.msra.mxu0 %v22635_v23  ;;  %v22727_v23 = vld [vmem:[%s28546_s14 + $0x2e4] ss:$16 sps:$4 sm:$0xff]  }
 0xba6   : > { %14733 = vmatpush1.bf16.msra.mxu1 %v22638_v32  ;;  %14570 = vmatprep.subr.bf16.mxu0 %v22643_v40  ;;  %v22730_v32 = vld [vmem:[%s28546_s14 + $0x2ec] ss:$16 sps:$4 sm:$0xff]   ;;  %v22725_v40 = vld [vmem:[%s28546_s14 + $0x2e0] ss:$16 sps:$4 sm:$0xff]  }
 0xba7   : > { %14734 = vmatprep.subr.bf16.mxu1 %v22646_v18  ;;  %v22728_v18 = vld [vmem:[%s28546_s14 + $0x2e8] ss:$16 sps:$4 sm:$0xff]  }
 0xba9   : > { %14571 = vmatpush1.bf16.msra.mxu0 %v22641_v36  ;;  %v22733_v36 = vld [vmem:[%s28546_s14 + $0x304] ss:$16 sps:$4 sm:$0xff]  }
 0xbaa   : > { %14735 = vmatpush1.bf16.msra.mxu1 %v22644_v27  ;;  %14572 = vmatprep.subr.bf16.mxu0 %v22649_v20  ;;  %v22736_v27 = vld [vmem:[%s28546_s14 + $0x30c] ss:$16 sps:$4 sm:$0xff]   ;;  %v22731_v20 = vld [vmem:[%s28546_s14 + $0x300] ss:$16 sps:$4 sm:$0xff]  }
 0xbab   : > { %14736 = vmatprep.subr.bf16.mxu1 %v22652_v11  ;;  %v22734_v11 = vld [vmem:[%s28546_s14 + $0x308] ss:$16 sps:$4 sm:$0xff]  }
 0xbad   : > { %14573 = vmatpush1.bf16.msra.mxu0 %v22647_v13  ;;  %v22739_v13 = vld [vmem:[%s28546_s14 + $0x324] ss:$16 sps:$4 sm:$0xff]  }
 0xbae   : > { %14737 = vmatpush1.bf16.msra.mxu1 %v22650_v25  ;;  %14574 = vmatprep.subr.bf16.mxu0 %v22655_v12  ;;  %v22742_v25 = vld [vmem:[%s28546_s14 + $0x32c] ss:$16 sps:$4 sm:$0xff]   ;;  %v22737_v12 = vld [vmem:[%s28546_s14 + $0x320] ss:$16 sps:$4 sm:$0xff]  }
 0xbaf   : > { %14738 = vmatprep.subr.bf16.mxu1 %v22658_v28  ;;  %v22740_v28 = vld [vmem:[%s28546_s14 + $0x328] ss:$16 sps:$4 sm:$0xff]  }
 0xbb1   : > { %14575 = vmatpush1.bf16.msra.mxu0 %v22653_v22  ;;  %v22745_v22 = vld [vmem:[%s28546_s14 + $0x344] ss:$16 sps:$4 sm:$0xff]  }
 0xbb2   : > { %14739 = vmatpush1.bf16.msra.mxu1 %v22656_v44  ;;  %14576 = vmatprep.subr.bf16.mxu0 %v22661_v57  ;;  %v22748_v44 = vld [vmem:[%s28546_s14 + $0x34c] ss:$16 sps:$4 sm:$0xff]   ;;  %v22743_v57 = vld [vmem:[%s28546_s14 + $0x340] ss:$16 sps:$4 sm:$0xff]  }
 0xbb3   : > { %14740 = vmatprep.subr.bf16.mxu1 %v22664_v4  ;;  %v22746_v4 = vld [vmem:[%s28546_s14 + $0x348] ss:$16 sps:$4 sm:$0xff]  }
 0xbb5   : > { %14577 = vmatpush1.bf16.msra.mxu0 %v22659_v26  ;;  %v22751_v26 = vld [vmem:[%s28546_s14 + $0x364] ss:$16 sps:$4 sm:$0xff]  }
 0xbb6   : > { %14741 = vmatpush1.bf16.msra.mxu1 %v22662_v52  ;;  %14578 = vmatprep.subr.bf16.mxu0 %v22667_v56  ;;  %v22754_v52 = vld [vmem:[%s28546_s14 + $0x36c] ss:$16 sps:$4 sm:$0xff]   ;;  %v22749_v56 = vld [vmem:[%s28546_s14 + $0x360] ss:$16 sps:$4 sm:$0xff]  }
 0xbb7   : > { %14742 = vmatprep.subr.bf16.mxu1 %v22670_v19  ;;  %v22752_v19 = vld [vmem:[%s28546_s14 + $0x368] ss:$16 sps:$4 sm:$0xff]  }
 0xbb9   : > { %14579 = vmatpush1.bf16.msra.mxu0 %v22665_v60  ;;  %v22757_v60 = vld [vmem:[%s28546_s14 + $0x384] ss:$16 sps:$4 sm:$0xff]  }
 0xbba   : > { %14743 = vmatpush1.bf16.msra.mxu1 %v22668_v38  ;;  %14580 = vmatprep.subr.bf16.mxu0 %v22673_v41  ;;  %v22760_v38 = vld [vmem:[%s28546_s14 + $0x38c] ss:$16 sps:$4 sm:$0xff]   ;;  %v22755_v41 = vld [vmem:[%s28546_s14 + $0x380] ss:$16 sps:$4 sm:$0xff]  }
 0xbbb   : > { %14744 = vmatprep.subr.bf16.mxu1 %v22676_v43  ;;  %v22758_v43 = vld [vmem:[%s28546_s14 + $0x388] ss:$16 sps:$4 sm:$0xff]  }
 0xbbd   : > { %14581 = vmatpush1.bf16.msra.mxu0 %v22671_v45  ;;  %v22763_v45 = vld [vmem:[%s28546_s14 + $0x3a4] ss:$16 sps:$4 sm:$0xff]  }
 0xbbe   : > { %14745 = vmatpush1.bf16.msra.mxu1 %v22674_v34  ;;  %14582 = vmatprep.subr.bf16.mxu0 %v22679_v54  ;;  %v22766_v34 = vld [vmem:[%s28546_s14 + $0x3ac] ss:$16 sps:$4 sm:$0xff]   ;;  %v22761_v54 = vld [vmem:[%s28546_s14 + $0x3a0] ss:$16 sps:$4 sm:$0xff]  }
 0xbbf   : > { %14746 = vmatprep.subr.bf16.mxu1 %v22682_v47  ;;  %v22764_v47 = vld [vmem:[%s28546_s14 + $0x3a8] ss:$16 sps:$4 sm:$0xff]  }
 0xbc1   : > { %14583 = vmatpush1.bf16.msra.mxu0 %v22677_v7  ;;  %v22769_v7 = vld [vmem:[%s28546_s14 + $0x3c4] ss:$16 sps:$4 sm:$0xff]  }
 0xbc2   : > { %14747 = vmatpush1.bf16.msra.mxu1 %v22680_v49  ;;  %14593 = vmatprep.subr.bf16.mxu0 %v22685_v55  ;;  %v22772_v49 = vld [vmem:[%s28546_s14 + $0x3cc] ss:$16 sps:$4 sm:$0xff]   ;;  %v22767_v55 = vld [vmem:[%s28546_s14 + $0x3c0] ss:$16 sps:$4 sm:$0xff]  }
 0xbc3   : > { %14757 = vmatprep.subr.bf16.mxu1 %v22688_v59  ;;  %v22770_v59 = vld [vmem:[%s28546_s14 + $0x3c8] ss:$16 sps:$4 sm:$0xff]  }
 0xbc4   : > { %14585 = vmatmul.mubr.bf16.vlgmr.msra.gmra.mrb[116].mxu0 %v27079_v53 }
 0xbc5   : > { %14749 = vmatmul.mubr.bf16.vlgmr.msra.gmra.mrb[56].mxu1 %v27079_v53  ;;  %14594 = vmatpush1.bf16.msra.mxu0 %v22683_v61  ;;  %v22700_v53 = vld [vmem:[%s28546_s14 + $0x24c] ss:$16 sps:$4 sm:$0xff]   ;;  %v22775_v61 = vld [vmem:[%s28546_s14 + $0x3e4] ss:$16 sps:$4 sm:$0xff]  }
 0xbc6   : > { %14625 = vmatprep.mubr.bf16.mxu0 %v27106_v62  ;;  %14758 = vmatpush1.bf16.msra.mxu1 %v22686_v63  ;;  %v22778_v63 = vld [vmem:[%s28546_s14 + $0x3ec] ss:$16 sps:$4 sm:$0xff]  }
 0xbc7   : > { %14789 = vmatprep.mubr.bf16.mxu1 %v27106_v62  ;;  %14595 = vmatprep.subr.bf16.mxu0 %v22691_v9  ;;  %v22703_v62 = vld [vmem:[%s28546_s14 + $0x264] ss:$16 sps:$4 sm:$0xff]   ;;  %v22773_v9 = vld [vmem:[%s28546_s14 + $0x3e0] ss:$16 sps:$4 sm:$0xff]  }
 0xbc8   : > { %14759 = vmatprep.subr.bf16.mxu1 %v22694_v1  ;;  %v22776_v1 = vld [vmem:[%s28546_s14 + $0x3e8] ss:$16 sps:$4 sm:$0xff]  }
 0xbc9   : > { %14596 = vmatpush1.bf16.msra.mxu0 %v22689_v2  ;;  %v22781_v2 = vld [vmem:[%s28546_s14 + $0x404] ss:$16 sps:$4 sm:$0xff]  }
 0xbca   : > { %14760 = vmatpush1.bf16.msra.mxu1 %v22692_v3  ;;  %14597 = vmatprep.subr.bf16.mxu0 %v22697_v48  ;;  %v22784_v3 = vld [vmem:[%s28546_s14 + $0x40c] ss:$16 sps:$4 sm:$0xff]   ;;  %v22779_v48 = vld [vmem:[%s28546_s14 + $0x400] ss:$16 sps:$4 sm:$0xff]  }
 0xbcb   : > { %14761 = vmatprep.subr.bf16.mxu1 %v22700_v53  ;;  %v22782_v53 = vld [vmem:[%s28546_s14 + $0x408] ss:$16 sps:$4 sm:$0xff]  }
 0xbcd   : > { %14598 = vmatpush1.bf16.msra.mxu0 %v22695_v5  ;;  %v22787_v5 = vld [vmem:[%s28546_s14 + $0x424] ss:$16 sps:$4 sm:$0xff]  }
 0xbce   : > { %14762 = vmatpush1.bf16.msra.mxu1 %v22698_v24  ;;  %14599 = vmatprep.subr.bf16.mxu0 %v22703_v62  ;;  %v22790_v24 = vld [vmem:[%s28546_s14 + $0x42c] ss:$16 sps:$4 sm:$0xff]   ;;  %v22785_v62 = vld [vmem:[%s28546_s14 + $0x420] ss:$16 sps:$4 sm:$0xff]  }
 0xbcf   : > { %14763 = vmatprep.subr.bf16.mxu1 %v22706_v33  ;;  %v22788_v33 = vld [vmem:[%s28546_s14 + $0x428] ss:$16 sps:$4 sm:$0xff]  }
 0xbd1   : > { %14600 = vmatpush1.bf16.msra.mxu0 %v22701_v30  ;;  %v22793_v30 = vld [vmem:[%s28546_s14 + $0x444] ss:$16 sps:$4 sm:$0xff]  }
 0xbd2   : > { %14764 = vmatpush1.bf16.msra.mxu1 %v22704_v42  ;;  %14601 = vmatprep.subr.bf16.mxu0 %v22709_v29  ;;  %v22791_v42 = vld [vmem:[%s28546_s14 + $0x440] ss:$16 sps:$4 sm:$0xff]   ;;  %v22794_v29 = vld [vmem:[%s28546_s14 + $0x448] ss:$16 sps:$4 sm:$0xff]  }
 0xbd3   : > { %14765 = vmatprep.subr.bf16.mxu1 %v22712_v16  ;;  %v22802_v16 = vld [vmem:[%s28546_s14 + $0x46c] ss:$16 sps:$4 sm:$0xff]  }
 0xbd5   : > { %14602 = vmatpush1.bf16.msra.mxu0 %v22707_v8  ;;  %v22797_v8 = vld [vmem:[%s28546_s14 + $0x460] ss:$16 sps:$4 sm:$0xff]  }
 0xbd6   : > { %14766 = vmatpush1.bf16.msra.mxu1 %v22710_v14  ;;  %14603 = vmatprep.subr.bf16.mxu0 %v22715_v51  ;;  %v22800_v14 = vld [vmem:[%s28546_s14 + $0x468] ss:$16 sps:$4 sm:$0xff]   ;;  %v22805_v51 = vld [vmem:[%s28546_s14 + $0x484] ss:$16 sps:$4 sm:$0xff]  }
 0xbd7   : > { %14767 = vmatprep.subr.bf16.mxu1 %v22718_v39  ;;  %v22808_v39 = vld [vmem:[%s28546_s14 + $0x48c] ss:$16 sps:$4 sm:$0xff]  }
 0xbd9   : > { %14604 = vmatpush1.bf16.msra.mxu0 %v22713_v17  ;;  %v22803_v17 = vld [vmem:[%s28546_s14 + $0x480] ss:$16 sps:$4 sm:$0xff]  }
 0xbda   : > { %14768 = vmatpush1.bf16.msra.mxu1 %v22716_v58  ;;  %14605 = vmatprep.subr.bf16.mxu0 %v22721_v50  ;;  %v22806_v58 = vld [vmem:[%s28546_s14 + $0x488] ss:$16 sps:$4 sm:$0xff]   ;;  %v22811_v50 = vld [vmem:[%s28546_s14 + $0x4a4] ss:$16 sps:$4 sm:$0xff]  }
 0xbdb   : > { %14769 = vmatprep.subr.bf16.mxu1 %v22724_v21  ;;  %v22814_v21 = vld [vmem:[%s28546_s14 + $0x4ac] ss:$16 sps:$4 sm:$0xff]  }
 0xbdd   : > { %14606 = vmatpush1.bf16.msra.mxu0 %v22719_v15  ;;  %v22809_v15 = vld [vmem:[%s28546_s14 + $0x4a0] ss:$16 sps:$4 sm:$0xff]  }
 0xbde   : > { %14770 = vmatpush1.bf16.msra.mxu1 %v22722_v31  ;;  %14607 = vmatprep.subr.bf16.mxu0 %v22727_v23  ;;  %v22812_v31 = vld [vmem:[%s28546_s14 + $0x4a8] ss:$16 sps:$4 sm:$0xff]   ;;  %v22817_v23 = vld [vmem:[%s28546_s14 + $0x4c4] ss:$16 sps:$4 sm:$0xff]  }
 0xbdf   : > { %14771 = vmatprep.subr.bf16.mxu1 %v22730_v32  ;;  %v22820_v32 = vld [vmem:[%s28546_s14 + $0x4cc] ss:$16 sps:$4 sm:$0xff]  }
 0xbe1   : > { %14608 = vmatpush1.bf16.msra.mxu0 %v22725_v40  ;;  %v22815_v40 = vld [vmem:[%s28546_s14 + $0x4c0] ss:$16 sps:$4 sm:$0xff]  }
 0xbe2   : > { %14772 = vmatpush1.bf16.msra.mxu1 %v22728_v18  ;;  %14609 = vmatprep.subr.bf16.mxu0 %v22733_v36  ;;  %v22818_v18 = vld [vmem:[%s28546_s14 + $0x4c8] ss:$16 sps:$4 sm:$0xff]   ;;  %v22823_v36 = vld [vmem:[%s28546_s14 + $0x4e4] ss:$16 sps:$4 sm:$0xff]  }
 0xbe3   : > { %14773 = vmatprep.subr.bf16.mxu1 %v22736_v27  ;;  %v22826_v27 = vld [vmem:[%s28546_s14 + $0x4ec] ss:$16 sps:$4 sm:$0xff]  }
 0xbe5   : > { %14610 = vmatpush1.bf16.msra.mxu0 %v22731_v20  ;;  %v22821_v20 = vld [vmem:[%s28546_s14 + $0x4e0] ss:$16 sps:$4 sm:$0xff]  }
 0xbe6   : > { %14774 = vmatpush1.bf16.msra.mxu1 %v22734_v11  ;;  %14611 = vmatprep.subr.bf16.mxu0 %v22739_v13  ;;  %v22824_v11 = vld [vmem:[%s28546_s14 + $0x4e8] ss:$16 sps:$4 sm:$0xff]   ;;  %v22829_v13 = vld [vmem:[%s28546_s14 + $0x504] ss:$16 sps:$4 sm:$0xff]  }
 0xbe7   : > { %14775 = vmatprep.subr.bf16.mxu1 %v22742_v25  ;;  %v22832_v25 = vld [vmem:[%s28546_s14 + $0x50c] ss:$16 sps:$4 sm:$0xff]  }
 0xbe9   : > { %14612 = vmatpush1.bf16.msra.mxu0 %v22737_v12  ;;  %v22827_v12 = vld [vmem:[%s28546_s14 + $0x500] ss:$16 sps:$4 sm:$0xff]  }
 0xbea   : > { %14776 = vmatpush1.bf16.msra.mxu1 %v22740_v28  ;;  %14613 = vmatprep.subr.bf16.mxu0 %v22745_v22  ;;  %v22830_v28 = vld [vmem:[%s28546_s14 + $0x508] ss:$16 sps:$4 sm:$0xff]   ;;  %v22835_v22 = vld [vmem:[%s28546_s14 + $0x524] ss:$16 sps:$4 sm:$0xff]  }
 0xbeb   : > { %14777 = vmatprep.subr.bf16.mxu1 %v22748_v44  ;;  %v22838_v44 = vld [vmem:[%s28546_s14 + $0x52c] ss:$16 sps:$4 sm:$0xff]  }
 0xbed   : > { %14614 = vmatpush1.bf16.msra.mxu0 %v22743_v57  ;;  %v22833_v57 = vld [vmem:[%s28546_s14 + $0x520] ss:$16 sps:$4 sm:$0xff]  }
 0xbee   : > { %14778 = vmatpush1.bf16.msra.mxu1 %v22746_v4  ;;  %14615 = vmatprep.subr.bf16.mxu0 %v22751_v26  ;;  %v22836_v4 = vld [vmem:[%s28546_s14 + $0x528] ss:$16 sps:$4 sm:$0xff]   ;;  %v22841_v26 = vld [vmem:[%s28546_s14 + $0x544] ss:$16 sps:$4 sm:$0xff]  }
 0xbef   : > { %14779 = vmatprep.subr.bf16.mxu1 %v22754_v52  ;;  %v22844_v52 = vld [vmem:[%s28546_s14 + $0x54c] ss:$16 sps:$4 sm:$0xff]  }
 0xbf1   : > { %14616 = vmatpush1.bf16.msra.mxu0 %v22749_v56  ;;  %v22839_v56 = vld [vmem:[%s28546_s14 + $0x540] ss:$16 sps:$4 sm:$0xff]  }
 0xbf2   : > { %14780 = vmatpush1.bf16.msra.mxu1 %v22752_v19  ;;  %14617 = vmatprep.subr.bf16.mxu0 %v22757_v60  ;;  %v22842_v19 = vld [vmem:[%s28546_s14 + $0x548] ss:$16 sps:$4 sm:$0xff]   ;;  %v22847_v60 = vld [vmem:[%s28546_s14 + $0x564] ss:$16 sps:$4 sm:$0xff]  }
 0xbf3   : > { %14781 = vmatprep.subr.bf16.mxu1 %v22760_v38  ;;  %v22850_v38 = vld [vmem:[%s28546_s14 + $0x56c] ss:$16 sps:$4 sm:$0xff]  }
 0xbf5   : > { %14618 = vmatpush1.bf16.msra.mxu0 %v22755_v41  ;;  %v22845_v41 = vld [vmem:[%s28546_s14 + $0x560] ss:$16 sps:$4 sm:$0xff]  }
 0xbf6   : > { %14782 = vmatpush1.bf16.msra.mxu1 %v22758_v43  ;;  %14619 = vmatprep.subr.bf16.mxu0 %v22763_v45  ;;  %v22848_v43 = vld [vmem:[%s28546_s14 + $0x568] ss:$16 sps:$4 sm:$0xff]   ;;  %v22853_v45 = vld [vmem:[%s28546_s14 + $0x584] ss:$16 sps:$4 sm:$0xff]  }
 0xbf7   : > { %14783 = vmatprep.subr.bf16.mxu1 %v22766_v34  ;;  %v22856_v34 = vld [vmem:[%s28546_s14 + $0x58c] ss:$16 sps:$4 sm:$0xff]  }
 0xbf9   : > { %14620 = vmatpush1.bf16.msra.mxu0 %v22761_v54  ;;  %v22851_v54 = vld [vmem:[%s28546_s14 + $0x580] ss:$16 sps:$4 sm:$0xff]  }
 0xbfa   : > { %14784 = vmatpush1.bf16.msra.mxu1 %v22764_v47  ;;  %14621 = vmatprep.subr.bf16.mxu0 %v22769_v7  ;;  %v22854_v47 = vld [vmem:[%s28546_s14 + $0x588] ss:$16 sps:$4 sm:$0xff]   ;;  %v22859_v7 = vld [vmem:[%s28546_s14 + $0x5a4] ss:$16 sps:$4 sm:$0xff]  }
 0xbfb   : > { %14785 = vmatprep.subr.bf16.mxu1 %v22772_v49  ;;  %v22862_v49 = vld [vmem:[%s28546_s14 + $0x5ac] ss:$16 sps:$4 sm:$0xff]  }
 0xbfd   : > { %14622 = vmatpush1.bf16.msra.mxu0 %v22767_v55  ;;  %v22857_v55 = vld [vmem:[%s28546_s14 + $0x5a0] ss:$16 sps:$4 sm:$0xff]  }
 0xbfe   : > { %14786 = vmatpush1.bf16.msra.mxu1 %v22770_v59  ;;  %14623 = vmatprep.subr.bf16.mxu0 %v22775_v61  ;;  %v22860_v59 = vld [vmem:[%s28546_s14 + $0x5a8] ss:$16 sps:$4 sm:$0xff]   ;;  %v22865_v61 = vld [vmem:[%s28546_s14 + $0x5c4] ss:$16 sps:$4 sm:$0xff]  }
 0xbff   : > { %14787 = vmatprep.subr.bf16.mxu1 %v22778_v63  ;;  %v22868_v63 = vld [vmem:[%s28546_s14 + $0x5cc] ss:$16 sps:$4 sm:$0xff]  }
 0xc01   : > { %14624 = vmatpush1.bf16.msra.mxu0 %v22773_v9  ;;  %v22863_v9 = vld [vmem:[%s28546_s14 + $0x5c0] ss:$16 sps:$4 sm:$0xff]  }
 0xc02   : > { %14788 = vmatpush1.bf16.msra.mxu1 %v22776_v1  ;;  %14634 = vmatprep.subr.bf16.mxu0 %v22781_v2  ;;  %v22866_v1 = vld [vmem:[%s28546_s14 + $0x5c8] ss:$16 sps:$4 sm:$0xff]   ;;  %v22871_v2 = vld [vmem:[%s28546_s14 + $0x5e4] ss:$16 sps:$4 sm:$0xff]  }
 0xc03   : > { %14798 = vmatprep.subr.bf16.mxu1 %v22784_v3  ;;  %v22874_v3 = vld [vmem:[%s28546_s14 + $0x5ec] ss:$16 sps:$4 sm:$0xff]  }
 0xc04   : > { %14626 = vmatmul.mubr.bf16.vlgmr.msra.gmra.mrb[116].mxu0 %v27290_v6 }
 0xc05   : > { %14790 = vmatmul.mubr.bf16.vlgmr.msra.gmra.mrb[56].mxu1 %v27290_v6  ;;  %14635 = vmatpush1.bf16.msra.mxu0 %v22779_v48  ;;  %v22796_v6 = vld [vmem:[%s28546_s14 + $0x44c] ss:$16 sps:$4 sm:$0xff]   ;;  %v22869_v48 = vld [vmem:[%s28546_s14 + $0x5e0] ss:$16 sps:$4 sm:$0xff]  }
 0xc06   : > { %14666 = vmatprep.mubr.bf16.mxu0 %v27297_v35  ;;  %14799 = vmatpush1.bf16.msra.mxu1 %v22782_v53  ;;  %v22872_v53 = vld [vmem:[%s28546_s14 + $0x5e8] ss:$16 sps:$4 sm:$0xff]  }
 0xc07   : > { %14830 = vmatprep.mubr.bf16.mxu1 %v27297_v35  ;;  %14636 = vmatprep.subr.bf16.mxu0 %v22787_v5  ;;  %v22799_v35 = vld [vmem:[%s28546_s14 + $0x464] ss:$16 sps:$4 sm:$0xff]  }
 0xc08   : > { %14800 = vmatprep.subr.bf16.mxu1 %v22790_v24  ;;  %v22877_v5 = vld [vmem:[%s28546_s14 + $0x604] ss:$16 sps:$4 sm:$0xff]   ;;  %v22880_v24 = vld [vmem:[%s28546_s14 + $0x60c] ss:$16 sps:$4 sm:$0xff]  }
 0xc09   : > { %14637 = vmatpush1.bf16.msra.mxu0 %v22785_v62  ;;  %v22875_v62 = vld [vmem:[%s28546_s14 + $0x600] ss:$16 sps:$4 sm:$0xff]  }
 0xc0a   : > { %14801 = vmatpush1.bf16.msra.mxu1 %v22788_v33  ;;  %14638 = vmatprep.subr.bf16.mxu0 %v22793_v30  ;;  %v22878_v33 = vld [vmem:[%s28546_s14 + $0x608] ss:$16 sps:$4 sm:$0xff]   ;;  %v22883_v30 = vld [vmem:[%s28546_s14 + $0x624] ss:$16 sps:$4 sm:$0xff]  }
 0xc0b   : > { %14802 = vmatprep.subr.bf16.mxu1 %v22796_v6  ;;  %v22886_v6 = vld [vmem:[%s28546_s14 + $0x62c] ss:$16 sps:$4 sm:$0xff]  }
 0xc0d   : > { %14639 = vmatpush1.bf16.msra.mxu0 %v22791_v42  ;;  %v22881_v42 = vld [vmem:[%s28546_s14 + $0x620] ss:$16 sps:$4 sm:$0xff]  }
 0xc0e   : > { %14803 = vmatpush1.bf16.msra.mxu1 %v22794_v29  ;;  %14640 = vmatprep.subr.bf16.mxu0 %v22799_v35  ;;  %v22884_v29 = vld [vmem:[%s28546_s14 + $0x628] ss:$16 sps:$4 sm:$0xff]   ;;  %v22889_v35 = vld [vmem:[%s28546_s14 + $0x644] ss:$16 sps:$4 sm:$0xff]  }
 0xc0f   : > { %14804 = vmatprep.subr.bf16.mxu1 %v22802_v16  ;;  %v22887_v16 = vld [vmem:[%s28546_s14 + $0x640] ss:$16 sps:$4 sm:$0xff]  }
 0xc11   : > { %14641 = vmatpush1.bf16.msra.mxu0 %v22797_v8  ;;  %v22890_v8 = vld [vmem:[%s28546_s14 + $0x648] ss:$16 sps:$4 sm:$0xff]  }
 0xc12   : > { %14805 = vmatpush1.bf16.msra.mxu1 %v22800_v14  ;;  %14642 = vmatprep.subr.bf16.mxu0 %v22805_v51  ;;  %v22895_v14 = vld [vmem:[%s28546_s14 + $0x664] ss:$16 sps:$4 sm:$0xff]   ;;  %v22898_v51 = vld [vmem:[%s28546_s14 + $0x66c] ss:$16 sps:$4 sm:$0xff]  }
 0xc13   : > { %14806 = vmatprep.subr.bf16.mxu1 %v22808_v39  ;;  %v22893_v39 = vld [vmem:[%s28546_s14 + $0x660] ss:$16 sps:$4 sm:$0xff]  }
 0xc15   : > { %14643 = vmatpush1.bf16.msra.mxu0 %v22803_v17  ;;  %v22896_v17 = vld [vmem:[%s28546_s14 + $0x668] ss:$16 sps:$4 sm:$0xff]  }
 0xc16   : > { %14807 = vmatpush1.bf16.msra.mxu1 %v22806_v58  ;;  %14644 = vmatprep.subr.bf16.mxu0 %v22811_v50  ;;  %v22901_v58 = vld [vmem:[%s28546_s14 + $0x684] ss:$16 sps:$4 sm:$0xff]   ;;  %v22904_v50 = vld [vmem:[%s28546_s14 + $0x68c] ss:$16 sps:$4 sm:$0xff]  }
 0xc17   : > { %14808 = vmatprep.subr.bf16.mxu1 %v22814_v21  ;;  %v22899_v21 = vld [vmem:[%s28546_s14 + $0x680] ss:$16 sps:$4 sm:$0xff]  }
 0xc19   : > { %14645 = vmatpush1.bf16.msra.mxu0 %v22809_v15  ;;  %v22902_v15 = vld [vmem:[%s28546_s14 + $0x688] ss:$16 sps:$4 sm:$0xff]  }
 0xc1a   : > { %14809 = vmatpush1.bf16.msra.mxu1 %v22812_v31  ;;  %14646 = vmatprep.subr.bf16.mxu0 %v22817_v23  ;;  %v22907_v31 = vld [vmem:[%s28546_s14 + $0x6a4] ss:$16 sps:$4 sm:$0xff]   ;;  %v22910_v23 = vld [vmem:[%s28546_s14 + $0x6ac] ss:$16 sps:$4 sm:$0xff]  }
 0xc1b   : > { %14810 = vmatprep.subr.bf16.mxu1 %v22820_v32  ;;  %v22905_v32 = vld [vmem:[%s28546_s14 + $0x6a0] ss:$16 sps:$4 sm:$0xff]  }
 0xc1d   : > { %14647 = vmatpush1.bf16.msra.mxu0 %v22815_v40  ;;  %v22908_v40 = vld [vmem:[%s28546_s14 + $0x6a8] ss:$16 sps:$4 sm:$0xff]  }
 0xc1e   : > { %14811 = vmatpush1.bf16.msra.mxu1 %v22818_v18  ;;  %14648 = vmatprep.subr.bf16.mxu0 %v22823_v36  ;;  %v22913_v18 = vld [vmem:[%s28546_s14 + $0x6c4] ss:$16 sps:$4 sm:$0xff]  }
 0xc1f   : > { %14812 = vmatprep.subr.bf16.mxu1 %v22826_v27  ;;  %v22916_v27 = vld [vmem:[%s28546_s14 + $0x6cc] ss:$16 sps:$4 sm:$0xff]  }
 0xc21   : > { %14649 = vmatpush1.bf16.msra.mxu0 %v22821_v20 }
 0xc22   : > { %14813 = vmatpush1.bf16.msra.mxu1 %v22824_v11  ;;  %14650 = vmatprep.subr.bf16.mxu0 %v22829_v13 }
 0xc23   : > { %14814 = vmatprep.subr.bf16.mxu1 %v22832_v25 }
 0xc25   : > { %14651 = vmatpush1.bf16.msra.mxu0 %v22827_v12  ;;  %v22911_v12 = vld [vmem:[%s28546_s14 + $0x6c0] ss:$16 sps:$4 sm:$0xff]  }
 0xc26   : > { %14815 = vmatpush1.bf16.msra.mxu1 %v22830_v28  ;;  %14652 = vmatprep.subr.bf16.mxu0 %v22835_v22 }
 0xc27   : > { %14816 = vmatprep.subr.bf16.mxu1 %v22838_v44  ;;  %v22914_v44 = vld [vmem:[%s28546_s14 + $0x6c8] ss:$16 sps:$4 sm:$0xff]  }
 0xc29   : > { %14653 = vmatpush1.bf16.msra.mxu0 %v22833_v57  ;;  %v22919_v57 = vld [vmem:[%s28546_s14 + $0x6e4] ss:$16 sps:$4 sm:$0xff]  }
 0xc2a   : > { %14817 = vmatpush1.bf16.msra.mxu1 %v22836_v4  ;;  %14654 = vmatprep.subr.bf16.mxu0 %v22841_v26  ;;  %v22922_v26 = vld [vmem:[%s28546_s14 + $0x6ec] ss:$16 sps:$4 sm:$0xff]  }
 0xc2b   : > { %14818 = vmatprep.subr.bf16.mxu1 %v22844_v52  ;;  %v22917_v52 = vld [vmem:[%s28546_s14 + $0x6e0] ss:$16 sps:$4 sm:$0xff]  }
 0xc2d   : > { %14655 = vmatpush1.bf16.msra.mxu0 %v22839_v56  ;;  %v22920_v56 = vld [vmem:[%s28546_s14 + $0x6e8] ss:$16 sps:$4 sm:$0xff]  }
 0xc2e   : > { %14819 = vmatpush1.bf16.msra.mxu1 %v22842_v19  ;;  %14656 = vmatprep.subr.bf16.mxu0 %v22847_v60  ;;  %v22923_v19 = vld [vmem:[#allocation11 + $0x40] sm:$0xff]  }
 0xc2f   : > { %14820 = vmatprep.subr.bf16.mxu1 %v22850_v38  ;;  %v22925_v60 = vld [vmem:[#allocation11 + $0x200] sm:$0xff]  }
 0xc30   : > { %v22924_v38 = vld [vmem:[#allocation11] sm:$0xff]  }
 0xc31   : > { %14657 = vmatpush1.bf16.msra.mxu0 %v22845_v41  ;;  %v22926_v41 = vld [vmem:[#allocation11 + $0x1c0] sm:$0xff]  }
 0xc32   : > { %14821 = vmatpush1.bf16.msra.mxu1 %v22848_v43  ;;  %14658 = vmatprep.subr.bf16.mxu0 %v22853_v45  ;;  %v22927_v43 = vld [vmem:[#allocation11 + $0x48] sm:$0xff]  }
 0xc33   : > { %14822 = vmatprep.subr.bf16.mxu1 %v22856_v34  ;;  %v22929_v45 = vld [vmem:[#allocation11 + $0x208] sm:$0xff]  }
 0xc34   : > { %v22928_v34 = vld [vmem:[#allocation11 + $0x8] sm:$0xff]  }
 0xc35   : > { %14659 = vmatpush1.bf16.msra.mxu0 %v22851_v54  ;;  %v22930_v54 = vld [vmem:[#allocation11 + $0x1c8] sm:$0xff]  }
 0xc36   : > { %14823 = vmatpush1.bf16.msra.mxu1 %v22854_v47  ;;  %14660 = vmatprep.subr.bf16.mxu0 %v22859_v7  ;;  %v22931_v47 = vld [vmem:[#allocation11 + $0x50] sm:$0xff]  }
 0xc37   : > { %14824 = vmatprep.subr.bf16.mxu1 %v22862_v49  ;;  %v22933_v7 = vld [vmem:[#allocation11 + $0x210] sm:$0xff]  }
 0xc38   : > { %v22932_v49 = vld [vmem:[#allocation11 + $0x10] sm:$0xff]  }
 0xc39   : > { %14661 = vmatpush1.bf16.msra.mxu0 %v22857_v55  ;;  %v22934_v55 = vld [vmem:[#allocation11 + $0x1d0] sm:$0xff]  }
 0xc3a   : > { %14825 = vmatpush1.bf16.msra.mxu1 %v22860_v59  ;;  %14662 = vmatprep.subr.bf16.mxu0 %v22865_v61  ;;  %v22935_v59 = vld [vmem:[#allocation11 + $0x58] sm:$0xff]  }
 0xc3b   : > { %14826 = vmatprep.subr.bf16.mxu1 %v22868_v63  ;;  %v22937_v61 = vld [vmem:[#allocation11 + $0x218] sm:$0xff]  }
 0xc3c   : > { %v22936_v63 = vld [vmem:[#allocation11 + $0x18] sm:$0xff]  }
 0xc3d   : > { %14663 = vmatpush1.bf16.msra.mxu0 %v22863_v9  ;;  %v22939_v9 = vld [vmem:[#allocation11 + $0x60] sm:$0xff]  }
 0xc3e   : > { %14827 = vmatpush1.bf16.msra.mxu1 %v22866_v1  ;;  %14664 = vmatprep.subr.bf16.mxu0 %v22871_v2  ;;  %v22941_v1 = vld [vmem:[#allocation11 + $0x220] sm:$0xff]  }
 0xc3f   : > { %14828 = vmatprep.subr.bf16.mxu1 %v22874_v3  ;;  %v22940_v2 = vld [vmem:[#allocation11 + $0x20] sm:$0xff]  }
 0xc40   : > { %v22942_v3 = vld [vmem:[#allocation11 + $0x1e0] sm:$0xff]  }
 0xc41   : > { %14665 = vmatpush1.bf16.msra.mxu0 %v22869_v48  ;;  %v22943_v48 = vld [vmem:[#allocation11 + $0x68] sm:$0xff]  }
 0xc42   : > { %14829 = vmatpush1.bf16.msra.mxu1 %v22872_v53  ;;  %14675 = vmatprep.subr.bf16.mxu0 %v22877_v5  ;;  %v22945_v53 = vld [vmem:[#allocation11 + $0x228] sm:$0xff]  }
 0xc43   : > { %14839 = vmatprep.subr.bf16.mxu1 %v22880_v24  ;;  %v22944_v5 = vld [vmem:[#allocation11 + $0x28] sm:$0xff]  }
 0xc44   : > { %14667 = vmatmul.mubr.bf16.vlgmr.msra.gmra.mrb[116].mxu0 %v27494_v37  ;;  %v22946_v24 = vld [vmem:[#allocation11 + $0x1e8] sm:$0xff]  }
 0xc45   : > { %14831 = vmatmul.mubr.bf16.vlgmr.msra.gmra.mrb[56].mxu1 %v27494_v37  ;;  %14676 = vmatpush1.bf16.msra.mxu0 %v22875_v62  ;;  %v22892_v37 = vld [vmem:[%s28546_s14 + $0x64c] ss:$16 sps:$4 sm:$0xff]   ;;  %v22947_v62 = vld [vmem:[#allocation11 + $0x70] sm:$0xff]  }
 0xc46   : > { %14840 = vmatpush1.bf16.msra.mxu1 %v22878_v33  ;;  %14677 = vmatprep.subr.bf16.mxu0 %v22883_v30  ;;  %v22948_v33 = vld [vmem:[#allocation11 + $0x30] sm:$0xff]  }
 0xc47   : > { %14841 = vmatprep.subr.bf16.mxu1 %v22886_v6  ;;  %14707 = vmatprep.mubr.bf16.mxu0 %v23387_v0  ;;  %v22949_v30 = vld [vmem:[#allocation11 + $0x230] sm:$0xff]  }
 0xc48   : > { %14871 = vmatprep.mubr.bf16.mxu1 %v23387_v0  ;;  %v22950_v6 = vld [vmem:[#allocation11 + $0x1f0] sm:$0xff]  }
 0xc49   : > { %14678 = vmatpush1.bf16.msra.mxu0 %v22881_v42  ;;  %v22951_v42 = vld [vmem:[#allocation11 + $0x78] sm:$0xff]  }
 0xc4a   : > { %14842 = vmatpush1.bf16.msra.mxu1 %v22884_v29  ;;  %14679 = vmatprep.subr.bf16.mxu0 %v22889_v35  ;;  %v22952_v29 = vld [vmem:[#allocation11 + $0x38] sm:$0xff]  }
 0xc4b   : > { %14843 = vmatprep.subr.bf16.mxu1 %v22892_v37  ;;  %v22953_v35 = vld [vmem:[#allocation11 + $0x238] sm:$0xff]  }
 0xc4c   : > { %v22954_v37 = vld [vmem:[#allocation11 + $0x1f8] sm:$0xff]  }
 0xc4d   : > { %14680 = vmatpush1.bf16.msra.mxu0 %v22887_v16  ;;  %v22956_v16 = vld [vmem:[#allocation11 + $0x2e0] sm:$0xff]  }
 0xc4e   : > { %14844 = vmatpush1.bf16.msra.mxu1 %v22890_v8  ;;  %14681 = vmatprep.subr.bf16.mxu0 %v22895_v14 }
 0xc4f   : > { %14845 = vmatprep.subr.bf16.mxu1 %v22898_v51 }
 0xc51   : > { %14682 = vmatpush1.bf16.msra.mxu0 %v22893_v39 }
 0xc52   : > { %14846 = vmatpush1.bf16.msra.mxu1 %v22896_v17  ;;  %14683 = vmatprep.subr.bf16.mxu0 %v22901_v58 }
 0xc53   : > { %14847 = vmatprep.subr.bf16.mxu1 %v22904_v50 }
 0xc55   : > { %14684 = vmatpush1.bf16.msra.mxu0 %v22899_v21 }
 0xc56   : > { %14848 = vmatpush1.bf16.msra.mxu1 %v22902_v15  ;;  %14685 = vmatprep.subr.bf16.mxu0 %v22907_v31 }
 0xc57   : > { %v28258_v36 = vpop.f32.mrb[112].mxu0  ;;  %14849 = vmatprep.subr.bf16.mxu1 %v22910_v23 }
 0xc58   : > { %v28263_v20 = vpop.f32.mrb[52].mxu1  ;;  %v28265_v11 = vpop.f32.mrb[113].mxu0 }
 0xc59   : > { %v28267_v13 = vpop.f32.mrb[53].mxu1  ;;  %v13041_v25 = vpop.f32.mrb[114].mxu0  ;;  %14686 = vmatpush1.bf16.msra.mxu0 %v22905_v32 }
 0xc5a   : > { %v13205_v28 = vpop.f32.mrb[54].mxu1  ;;  %14850 = vmatpush1.bf16.msra.mxu1 %v22908_v40  ;;  %v13042_v22 = vpop.f32.mrb[115].mxu0  ;;  %14687 = vmatprep.subr.bf16.mxu0 %v22913_v18 }
 0xc5b   : > { %v13206_v4 = vpop.f32.mrb[55].mxu1  ;;  %14851 = vmatprep.subr.bf16.mxu1 %v22916_v27  ;;  %v22955_v27 = vld [vmem:[#allocation11 + $0x80] sm:$0xff]   ;;  %v22958_v28 = vld [vmem:[#allocation11 + $0x88] sm:$0xff]  }
 0xc5c   : > { %v22959_v22 = vld [vmem:[#allocation11 + $0x2e8] sm:$0xff]   ;;  %v22962_v4 = vld [vmem:[#allocation11 + $0x2f0] sm:$0xff]  }
 0xc5d   : > { %14688 = vmatpush1.bf16.msra.mxu0 %v22911_v12 }
 0xc5e   : > { %14852 = vmatpush1.bf16.msra.mxu1 %v22914_v44  ;;  %14689 = vmatprep.subr.bf16.mxu0 %v22919_v57  ;;  %v22960_v44 = vld [vmem:[#allocation11 + $0x2a8] sm:$0xff]   ;;  %v22961_v57 = vld [vmem:[#allocation11 + $0x90] sm:$0xff]  }
 0xc5f   : > { %14853 = vmatprep.subr.bf16.mxu1 %v22922_v26  ;;  %v22963_v26 = vld [vmem:[#allocation11 + $0x2b0] sm:$0xff]  }
 0xc61   : > { %14690 = vmatpush1.bf16.msra.mxu0 %v22917_v52  ;;  %v22964_v52 = vld [vmem:[#allocation11 + $0x98] sm:$0xff]  }
 0xc62   : > { %14854 = vmatpush1.bf16.msra.mxu1 %v22920_v56  ;;  %19924 = vmatprep.subr.bf16.mxu0 %v22923_v19  ;;  %v22965_v56 = vld [vmem:[#allocation11 + $0x2f8] sm:$0xff]  }
 0xc63   : > { %19968 = vmatprep.subr.bf16.mxu1 %v22925_v60  ;;  %v22966_v19 = vld [vmem:[#allocation11 + $0x2b8] sm:$0xff]   ;;  %v22967_v60 = vld [vmem:[#allocation11 + $0xa0] sm:$0xff]  }
 0xc64   : > { %14708 = vmatmul.mubr.bf16.vlgmr.msra.gmra.mrb[116].mxu0 %v27598_v46 }
 0xc65   : > { %14872 = vmatmul.mubr.bf16.vlgmr.msra.gmra.mrb[56].mxu1 %v27598_v46  ;;  %19925 = vmatpush3.bf16.msra.mxu0 %v22924_v38  ;;  %v22938_v46 = vld [vmem:[#allocation11 + $0x1d8] sm:$0xff]   ;;  %v22968_v38 = vld [vmem:[#allocation11 + $0x300] sm:$0xff]  }
 0xc66   : > { %19969 = vmatpush3.bf16.msra.mxu1 %v22926_v41  ;;  %19926 = vmatprep.subr.bf16.mxu0 %v22927_v43  ;;  %v22969_v41 = vld [vmem:[#allocation11 + $0x2c0] sm:$0xff]   ;;  %v22970_v43 = vld [vmem:[#allocation11 + $0xa8] sm:$0xff]  }
 0xc67   : > { %19970 = vmatprep.subr.bf16.mxu1 %v22929_v45  ;;  %v22971_v45 = vld [vmem:[#allocation11 + $0x308] sm:$0xff]  }
 0xc69   : > { %19927 = vmatpush3.bf16.msra.mxu0 %v22928_v34  ;;  %v22972_v34 = vld [vmem:[#allocation11 + $0x2c8] sm:$0xff]  }
 0xc6a   : > { %19971 = vmatpush3.bf16.msra.mxu1 %v22930_v54  ;;  %19928 = vmatprep.subr.bf16.mxu0 %v22931_v47  ;;  %v22973_v54 = vld [vmem:[#allocation11 + $0xb0] sm:$0xff]  }
 0xc6b   : > { %19972 = vmatprep.subr.bf16.mxu1 %v22933_v7  ;;  %v22974_v47 = vld [vmem:[#allocation11 + $0x310] sm:$0xff]  }
 0xc6c   : > { %v22975_v7 = vld [vmem:[#allocation11 + $0x2d0] sm:$0xff]  }
 0xc6d   : > { %19929 = vmatpush3.bf16.msra.mxu0 %v22932_v49  ;;  %v22976_v49 = vld [vmem:[#allocation11 + $0xb8] sm:$0xff]  }
 0xc6e   : > { %19973 = vmatpush3.bf16.msra.mxu1 %v22934_v55  ;;  %19930 = vmatprep.subr.bf16.mxu0 %v22935_v59  ;;  %v22977_v55 = vld [vmem:[#allocation11 + $0x318] sm:$0xff]  }
 0xc6f   : > { %19974 = vmatprep.subr.bf16.mxu1 %v22937_v61  ;;  %v22978_v59 = vld [vmem:[#allocation11 + $0x2d8] sm:$0xff]   ;;  %v22979_v61 = vld [vmem:[#allocation11 + $0xc0] sm:$0xff]  }
 0xc71   : > { %19931 = vmatpush3.bf16.msra.mxu0 %v22936_v63 }
 0xc72   : > { %19975 = vmatpush3.bf16.msra.mxu1 %v22938_v46  ;;  %19932 = vmatprep.subr.bf16.mxu0 %v22939_v9  ;;  %v22980_v46 = vld [vmem:[#allocation11 + $0x3c0] sm:$0xff]  }
 0xc73   : > { %19976 = vmatprep.subr.bf16.mxu1 %v22941_v1  ;;  %v22981_v9 = vld [vmem:[#allocation11 + $0x380] sm:$0xff]  }
 0xc75   : > { %19933 = vmatpush3.bf16.msra.mxu0 %v22940_v2  ;;  %v22982_v2 = vld [vmem:[#allocation11 + $0xc8] sm:$0xff]  }
 0xc76   : > { %19977 = vmatpush3.bf16.msra.mxu1 %v22942_v3  ;;  %19934 = vmatprep.subr.bf16.mxu0 %v22943_v48  ;;  %v22983_v3 = vld [vmem:[#allocation11 + $0x3c8] sm:$0xff]  }
 0xc77   : > { %19978 = vmatprep.subr.bf16.mxu1 %v22945_v53  ;;  %v22984_v53 = vld [vmem:[#allocation11 + $0x388] sm:$0xff]  }
 0xc79   : > { %19935 = vmatpush3.bf16.msra.mxu0 %v22944_v5  ;;  %v22985_v5 = vld [vmem:[#allocation11 + $0xd0] sm:$0xff]  }
 0xc7a   : > { %19979 = vmatpush3.bf16.msra.mxu1 %v22946_v24  ;;  %19936 = vmatprep.subr.bf16.mxu0 %v22947_v62  ;;  %v22986_v24 = vld [vmem:[#allocation11 + $0x3d0] sm:$0xff]  }
 0xc7b   : > { %19980 = vmatprep.subr.bf16.mxu1 %v22949_v30  ;;  %v22987_v62 = vld [vmem:[#allocation11 + $0x390] sm:$0xff]   ;;  %v22989_v30 = vld [vmem:[#allocation11 + $0x3d8] sm:$0xff]  }
 0xc7d   : > { %19937 = vmatpush3.bf16.msra.mxu0 %v22948_v33  ;;  %v22988_v33 = vld [vmem:[#allocation11 + $0xd8] sm:$0xff]  }
 0xc7e   : > { %19981 = vmatpush3.bf16.msra.mxu1 %v22950_v6  ;;  %19938 = vmatprep.subr.bf16.mxu0 %v22951_v42  ;;  %v22991_v6 = vld [vmem:[#allocation11 + $0x120] sm:$0xff]   ;;  %v22990_v42 = vld [vmem:[#allocation11 + $0x398] sm:$0xff]  }
 0xc7f   : > { %19982 = vmatprep.subr.bf16.mxu1 %v22953_v35 }
 0xc81   : > { %19939 = vmatpush3.bf16.msra.mxu0 %v22952_v29  ;;  %v22992_v29 = vld [vmem:[#allocation11 + $0xe0] sm:$0xff]  }
 0xc82   : > { %15157 = vmatprep.subr.bf16.mxu0 %v23387_v0  ;;  %19983 = vmatpush3.bf16.msra.mxu1 %v22954_v37  ;;  %v22993_v37 = vld [vmem:[#allocation11 + $0x3e0] sm:$0xff]  }
 0xc83   : > { %19990 = vmatprep.subr.bf16.mxu1 %v22956_v16  ;;  %v22995_v16 = vld [vmem:[#allocation11 + $0x128] sm:$0xff]  }
 0xd37   : > { %v14709_v8 = vpop.f32.mrb[116].mxu0 }
 0xd38   : > { %v14880_v14 = vmax.f32 %v28258_v36, %v14709_v8  ;;  %v14873_v51 = vpop.f32.mrb[56].mxu1  ;;  %v14711_v39 = vpop.f32.mrb[117].mxu0  ;;  %v22994_v8 = vld [vmem:[#allocation11 + $0x3a0] sm:$0xff]  }
 0xd39   : > { %v28292_v17 = vmax.f32 %v28263_v20, %v14873_v51  ;;  %v14881_v58 = vmax.f32 %v28265_v11, %v14711_v39  ;;  %v14875_v50 = vpop.f32.mrb[57].mxu1  ;;  %v14713_v21 = vpop.f32.mrb[118].mxu0  ;;  %v22997_v51 = vld [vmem:[#allocation11 + $0x3e8] sm:$0xff]   ;;  %v22999_v39 = vld [vmem:[#allocation11 + $0x130] sm:$0xff]  }
 0xd3a   : > { %v14883_v15 = vmax.f32 %v28267_v13, %v14875_v50  ;;  %v14877_v31 = vpop.f32.mrb[58].mxu1  ;;  %v14714_v23 = vpop.f32.mrb[119].mxu0  ;;  %v28296_v32 = vpack.c.bf16 %v14880_v14, %v14880_v14  ;;  %v22957_v13 = vld [vmem:[#allocation11 + $0x2a0] sm:$0xff]   ;;  %v22996_v14 = vld [vmem:[#allocation11 + $0xe8] sm:$0xff]   ;;  %v23001_v50 = vld [vmem:[#allocation11 + $0x3f0] sm:$0xff]  }
 0xd3b   : > { %v28298_v40 = vpack.c.bf16 %v14881_v58, %v14881_v58  ;;  %v14878_v18 = vpop.f32.mrb[59].mxu1  ;;  %v28330_v35 = vpack.c.bf16 %v28292_v17, %v28292_v17  ;;  %v22998_v58 = vld [vmem:[#allocation11 + $0x3a8] sm:$0xff]   ;;  %v23000_v17 = vld [vmem:[#allocation11 + $0xf0] sm:$0xff]   ;;  %v23003_v21 = vld [vmem:[#allocation11 + $0x138] sm:$0xff]  }
 0xd3c   : > { %v28300_v36 = vpack.c.bf16 %v14883_v15, %v14883_v15  ;;  %v15582_v25 = vrot.slane %v28296_v32, 1  ;;  %v28320_v63 = vshrl.u32 %v28296_v32, 16  ;;  %v23002_v15 = vld [vmem:[#allocation11 + $0x3b0] sm:$0xff]   ;;  %v23004_v31 = vld [vmem:[#allocation11 + $0xf8] sm:$0xff]   ;;  %v23007_v18 = vld [vmem:[#allocation11 + $0x140] sm:$0xff]  }
 0xd3d   : > { %15149 = vmatprep.mubr.bf16.mxu0 %v28298_v40  ;;  %v15583_v20 = vrot.slane %v28298_v40, 1  ;;  %v28305_v11 = vshrl.u32 %v28298_v40, 16  ;;  %v16215_v48 = vrot.slane %v28298_v40, 2  ;;  %v23005_v23 = vld [vmem:[#allocation11 + $0x3f8] sm:$0xff]  }
 0xd3e   : > { %15150 = vmatmul.mubr.bf16.vlgmr.msra.gmra.mrb[120].mxu0 %v28296_v32  ;;  %v15898_v1 = vrot.slane %v28320_v63, 1 }
 0xd3f   : > { %15158 = vmatpush1.bf16.msra.mxu0 %v22955_v27  ;;  %19583 = vmatprep.mubr.msk.bf16.mxu0 %vm15113_vm6, %v28300_v36  ;;  %v15899_v12 = vrot.slane %v28305_v11, 1  ;;  %v23006_v27 = vld [vmem:[#allocation11 + $0x3b8] sm:$0xff]  }
 0xd40   : > { %15792 = vmatprep.mubr.bf16.mxu1 %v15583_v20  ;;  %15159 = vmatprep.subr.bf16.mxu0 %v23387_v0  ;;  %v23008_v20 = vld [vmem:[#allocation11 + $0x100] sm:$0xff]  }
 0xd41   : > { %15793 = vmatmul.mubr.bf16.vlgmr.msra.gmra.mrb[60].mxu1 %v15582_v25  ;;  %v23011_v25 = vld [vmem:[#allocation11 + $0x148] sm:$0xff]  }
 0xd42   : > { %19991 = vmatpush3.bf16.msra.mxu1 %v22957_v13  ;;  %16108 = vmatprep.mubr.bf16.mxu1 %v15899_v12  ;;  %v23009_v13 = vld [vmem:[#allocation11 + $0x4a0] sm:$0xff]  }
 0xd43   : > { %15160 = vmatpush1.bf16.msra.mxu0 %v22958_v28  ;;  %19992 = vmatprep.subr.bf16.mxu1 %v22959_v22  ;;  %v23010_v12 = vld [vmem:[#allocation11 + $0x460] sm:$0xff]   ;;  %v16214_v28 = vrot.slane %v28296_v32, 2  ;;  %v23012_v22 = vld [vmem:[#allocation11 + $0x108] sm:$0xff]  }
 0xd44   : > { %15161 = vmatprep.subr.bf16.mxu0 %v23387_v0 }
 0xd46   : > { %19993 = vmatpush3.bf16.msra.mxu1 %v22960_v44  ;;  %v23013_v44 = vld [vmem:[#allocation11 + $0x4a8] sm:$0xff]  }
 0xd47   : > { %15162 = vmatpush1.bf16.msra.mxu0 %v22961_v57  ;;  %19994 = vmatprep.subr.bf16.mxu1 %v22962_v4  ;;  %v16531_v57 = vrot.slane %v28305_v11, 2  ;;  %v23015_v4 = vld [vmem:[#allocation11 + $0x150] sm:$0xff]  }
 0xd48   : > { %15163 = vmatprep.subr.bf16.mxu0 %v23387_v0 }
 0xd4a   : > { %19995 = vmatpush3.bf16.msra.mxu1 %v22963_v26  ;;  %v23014_v26 = vld [vmem:[#allocation11 + $0x468] sm:$0xff]  }
 0xd4b   : > { %15164 = vmatpush1.bf16.msra.mxu0 %v22964_v52  ;;  %19996 = vmatprep.subr.bf16.mxu1 %v22965_v56  ;;  %v23016_v52 = vld [vmem:[#allocation11 + $0x110] sm:$0xff]  }
 0xd4c   : > { %15165 = vmatprep.subr.bf16.mxu0 %v23387_v0  ;;  %v23017_v56 = vld [vmem:[#allocation11 + $0x4b0] sm:$0xff]  }
 0xd4e   : > { %19997 = vmatpush3.bf16.msra.mxu1 %v22966_v19  ;;  %v23019_v19 = vld [vmem:[#allocation11 + $0x158] sm:$0xff]  }
 0xd4f   : > { %15166 = vmatpush1.bf16.msra.mxu0 %v22967_v60  ;;  %19998 = vmatprep.subr.bf16.mxu1 %v22968_v38  ;;  %v23018_v60 = vld [vmem:[#allocation11 + $0x470] sm:$0xff]   ;;  %v23020_v38 = vld [vmem:[#allocation11 + $0x118] sm:$0xff]  }
 0xd50   : > { %15167 = vmatprep.subr.bf16.mxu0 %v23387_v0 }
 0xd52   : > { %19999 = vmatpush3.bf16.msra.mxu1 %v22969_v41  ;;  %v23021_v41 = vld [vmem:[#allocation11 + $0x4b8] sm:$0xff]  }
 0xd53   : > { %15168 = vmatpush1.bf16.msra.mxu0 %v22970_v43  ;;  %20000 = vmatprep.subr.bf16.mxu1 %v22971_v45  ;;  %v23023_v43 = vld [vmem:[#allocation11 + $0x160] sm:$0xff]  }
 0xd54   : > { %15169 = vmatprep.subr.bf16.mxu0 %v23387_v0  ;;  %v23024_v45 = vld [vmem:[#allocation11 + $0x4c0] sm:$0xff]  }
 0xd56   : > { %20001 = vmatpush3.bf16.msra.mxu1 %v22972_v34  ;;  %v28338_v34 = vshrl.u32 %v28300_v36, 16 }
 0xd57   : > { %15170 = vmatpush1.bf16.msra.mxu0 %v22973_v54  ;;  %20002 = vmatprep.subr.bf16.mxu1 %v22974_v47  ;;  %v23025_v54 = vld [vmem:[#allocation11 + $0x480] sm:$0xff]   ;;  %v23026_v47 = vld [vmem:[#allocation11 + $0x168] sm:$0xff]  }
 0xd58   : > { %15171 = vmatprep.subr.bf16.mxu0 %v23387_v0 }
 0xd5a   : > { %20003 = vmatpush3.bf16.msra.mxu1 %v22975_v7  ;;  %v23027_v7 = vld [vmem:[#allocation11 + $0x4c8] sm:$0xff]  }
 0xd5b   : > { %15172 = vmatpush1.bf16.msra.mxu0 %v22976_v49  ;;  %20004 = vmatprep.subr.bf16.mxu1 %v22977_v55  ;;  %v23028_v49 = vld [vmem:[#allocation11 + $0x488] sm:$0xff]   ;;  %v23029_v55 = vld [vmem:[#allocation11 + $0x170] sm:$0xff]  }
 0xd5c   : > { %15173 = vmatprep.subr.bf16.mxu0 %v23387_v0 }
 0xd5e   : > { %20005 = vmatpush3.bf16.msra.mxu1 %v22978_v59  ;;  %v23030_v59 = vld [vmem:[#allocation11 + $0x4d0] sm:$0xff]  }
 0xd5f   : > { %15174 = vmatpush1.bf16.msra.mxu0 %v22979_v61  ;;  %20012 = vmatprep.subr.bf16.mxu1 %v22980_v46  ;;  %v23031_v61 = vld [vmem:[#allocation11 + $0x490] sm:$0xff]   ;;  %v23032_v46 = vld [vmem:[#allocation11 + $0x178] sm:$0xff]  }
 0xd60   : > { %15175 = vmatprep.subr.bf16.mxu0 %v23387_v0 }
 0xd61   : > { %16109 = vmatmul.mubr.bf16.vlgmr.msra.gmra.mrb[64].mxu1 %v15898_v1  ;;  %v23034_v1 = vld [vmem:[#allocation11 + $0x498] sm:$0xff]  }
 0xd62   : > { %20013 = vmatpush3.bf16.msra.mxu1 %v22981_v9  ;;  %16424 = vmatprep.mubr.bf16.mxu1 %v16215_v48  ;;  %v23033_v9 = vld [vmem:[#allocation11 + $0x4d8] sm:$0xff]   ;;  %v23037_v48 = vld [vmem:[#allocation11 + $0x540] sm:$0xff]  }
 0xd63   : > { %15176 = vmatpush1.bf16.msra.mxu0 %v22982_v2  ;;  %20014 = vmatprep.subr.bf16.mxu1 %v22983_v3  ;;  %v23035_v2 = vld [vmem:[#allocation11 + $0x180] sm:$0xff]  }
 0xd64   : > { %15177 = vmatprep.subr.bf16.mxu0 %v23387_v0  ;;  %v23036_v3 = vld [vmem:[#allocation11 + $0x580] sm:$0xff]  }
 0xd66   : > { %20015 = vmatpush3.bf16.msra.mxu1 %v22984_v53  ;;  %v16530_v53 = vrot.slane %v28320_v63, 2 }
 0xd67   : > { %15178 = vmatpush1.bf16.msra.mxu0 %v22985_v5  ;;  %20016 = vmatprep.subr.bf16.mxu1 %v22986_v24  ;;  %v23038_v5 = vld [vmem:[#allocation11 + $0x188] sm:$0xff]  }
 0xd68   : > { %15179 = vmatprep.subr.bf16.mxu0 %v23387_v0  ;;  %v23039_v24 = vld [vmem:[#allocation11 + $0x588] sm:$0xff]  }
 0xd6a   : > { %20017 = vmatpush3.bf16.msra.mxu1 %v22987_v62  ;;  %v16847_v62 = vrot.slane %v28298_v40, 3  ;;  %v23046_v40 = vld [vmem:[#allocation11 + $0x558] sm:$0xff]  }
 0xd6b   : > { %15180 = vmatpush1.bf16.msra.mxu0 %v22988_v33  ;;  %20018 = vmatprep.subr.bf16.mxu1 %v22989_v30  ;;  %v23040_v33 = vld [vmem:[#allocation11 + $0x548] sm:$0xff]   ;;  %v23041_v30 = vld [vmem:[#allocation11 + $0x190] sm:$0xff]  }
 0xd6c   : > { %19946 = vmatprep.subr.bf16.mxu0 %v22991_v6  ;;  %v23042_v6 = vld [vmem:[#allocation11 + $0x590] sm:$0xff]  }
 0xd6e   : > { %20019 = vmatpush3.bf16.msra.mxu1 %v22990_v42  ;;  %15190 = vmatmul.mubr.bf16.vlgmr.msra.gmra.mrb[124].mxu0 %v28330_v35  ;;  %v23043_v42 = vld [vmem:[#allocation11 + $0x550] sm:$0xff]  }
 0xd6f   : > { %19947 = vmatpush3.bf16.msra.mxu0 %v22992_v29  ;;  %15472 = vmatprep.mubr.bf16.mxu0 %v28305_v11  ;;  %v23022_v11 = vld [vmem:[#allocation11 + $0x478] sm:$0xff]  }
 0xd70   : > { %20020 = vmatprep.subr.bf16.mxu1 %v22993_v37  ;;  %19948 = vmatprep.subr.bf16.mxu0 %v22995_v16  ;;  %v23045_v29 = vld [vmem:[#allocation11 + $0x598] sm:$0xff]   ;;  %v23047_v37 = vld [vmem:[#allocation11 + $0x1a0] sm:$0xff]  }
 0xd71   : > { %v23048_v16 = vld [vmem:[#allocation11 + $0x5a0] sm:$0xff]  }
 0xd72   : > { %20021 = vmatpush3.bf16.msra.mxu1 %v22994_v8  ;;  %v23049_v8 = vld [vmem:[#allocation11 + $0x560] sm:$0xff]  }
 0xd73   : > { %19949 = vmatpush3.bf16.msra.mxu0 %v22996_v14  ;;  %20022 = vmatprep.subr.bf16.mxu1 %v22997_v51  ;;  %v23050_v14 = vld [vmem:[#allocation11 + $0x1a8] sm:$0xff]  }
 0xd74   : > { %19950 = vmatprep.subr.bf16.mxu0 %v22999_v39  ;;  %v23051_v51 = vld [vmem:[#allocation11 + $0x5a8] sm:$0xff]  }
 0xd75   : > { %v23052_v39 = vld [vmem:[#allocation11 + $0x568] sm:$0xff]  }
 0xd76   : > { %20023 = vmatpush3.bf16.msra.mxu1 %v22998_v58  ;;  %v23053_v58 = vld [vmem:[#allocation11 + $0x1b0] sm:$0xff]  }
 0xd77   : > { %19951 = vmatpush3.bf16.msra.mxu0 %v23000_v17  ;;  %20024 = vmatprep.subr.bf16.mxu1 %v23001_v50  ;;  %v23054_v17 = vld [vmem:[#allocation11 + $0x5b0] sm:$0xff]  }
 0xd78   : > { %19952 = vmatprep.subr.bf16.mxu0 %v23003_v21  ;;  %v23055_v50 = vld [vmem:[#allocation11 + $0x570] sm:$0xff]   ;;  %v23056_v21 = vld [vmem:[#allocation11 + $0x1b8] sm:$0xff]  }
 0xd7a   : > { %20025 = vmatpush3.bf16.msra.mxu1 %v23002_v15  ;;  %v23057_v15 = vld [vmem:[#allocation11 + $0x5b8] sm:$0xff]  }
 0xd7b   : > { %19953 = vmatpush3.bf16.msra.mxu0 %v23004_v31  ;;  %20026 = vmatprep.subr.bf16.mxu1 %v23005_v23  ;;  %v23058_v31 = vld [vmem:[#allocation11 + $0x578] sm:$0xff]   ;;  %v23059_v23 = vld [vmem:[#allocation11 + $0x240] sm:$0xff]  }
 0xd7c   : > { %19954 = vmatprep.subr.bf16.mxu0 %v23007_v18  ;;  %v28357_v18 = vshrl.u32 %v28330_v35, 16 }
 0xd7e   : > { %20027 = vmatpush3.bf16.msra.mxu1 %v23006_v27  ;;  %v15585_v27 = vrot.slane %v28300_v36, 1 }
 0xd7f   : > { %19955 = vmatpush3.bf16.msra.mxu0 %v23008_v20  ;;  %20034 = vmatprep.subr.bf16.mxu1 %v23009_v13  ;;  %v16846_v20 = vrot.slane %v28296_v32, 3  ;;  %v23060_v13 = vld [vmem:[#allocation11 + $0x248] sm:$0xff]  }
 0xd80   : > { %19956 = vmatprep.subr.bf16.mxu0 %v23011_v25  ;;  %v23061_v25 = vld [vmem:[#allocation11 + $0x250] sm:$0xff]   ;;  %v23064_v32 = vld [vmem:[#allocation11 + $0x268] sm:$0xff]  }
 0xd81   : > { %16425 = vmatmul.mubr.bf16.vlgmr.msra.gmra.mrb[68].mxu1 %v16214_v28  ;;  %v23063_v28 = vld [vmem:[#allocation11 + $0x260] sm:$0xff]  }
 0xd82   : > { %20035 = vmatpush3.bf16.msra.mxu1 %v23010_v12  ;;  %16740 = vmatprep.mubr.bf16.mxu1 %v16531_v57  ;;  %v23062_v12 = vld [vmem:[#allocation11 + $0x258] sm:$0xff]   ;;  %v23067_v57 = vld [vmem:[#allocation11 + $0x280] sm:$0xff]  }
 0xd83   : > { %19957 = vmatpush3.bf16.msra.mxu0 %v23012_v22  ;;  %20036 = vmatprep.subr.bf16.mxu1 %v23013_v44  ;;  %v23065_v22 = vld [vmem:[#allocation11 + $0x270] sm:$0xff]   ;;  %v23066_v44 = vld [vmem:[#allocation11 + $0x278] sm:$0xff]  }
 0xd84   : > { %19958 = vmatprep.subr.bf16.mxu0 %v23015_v4  ;;  %v23068_v4 = vld [vmem:[#allocation11 + $0x288] sm:$0xff]  }
 0xd86   : > { %20037 = vmatpush3.bf16.msra.mxu1 %v23014_v26  ;;  %v23069_v26 = vld [vmem:[#allocation11 + $0x290] sm:$0xff]  }
 0xd87   : > { %19959 = vmatpush3.bf16.msra.mxu0 %v23016_v52  ;;  %20038 = vmatprep.subr.bf16.mxu1 %v23017_v56  ;;  %v23070_v52 = vld [vmem:[#allocation11 + $0x298] sm:$0xff]   ;;  %v23071_v56 = vld [vmem:[#allocation11 + $0x320] sm:$0xff]  }
 0xd88   : > { %19960 = vmatprep.subr.bf16.mxu0 %v23019_v19  ;;  %v15584_v19 = vrot.slane %v28330_v35, 1 }
 0xd8a   : > { %20039 = vmatpush3.bf16.msra.mxu1 %v23018_v60  ;;  %v15901_v60 = vrot.slane %v28338_v34, 1 }
 0xd8b   : > { %19961 = vmatpush3.bf16.msra.mxu0 %v23020_v38  ;;  %20040 = vmatprep.subr.bf16.mxu1 %v23021_v41  ;;  %v23072_v38 = vld [vmem:[#allocation11 + $0x328] sm:$0xff]   ;;  %v23073_v41 = vld [vmem:[#allocation11 + $0x330] sm:$0xff]  }
 0xd8c   : > { %15480 = vmatprep.subr.bf16.mxu0 %v23387_v0 }
 0xd8e   : > { %20041 = vmatpush3.bf16.msra.mxu1 %v23022_v11  ;;  %15473 = vmatmul.mubr.bf16.vlgmr.msra.gmra.mrb[128].mxu0 %v28320_v63  ;;  %v23044_v63 = vld [vmem:[#allocation11 + $0x198] sm:$0xff]  }
 0xd8f   : > { %15481 = vmatpush1.bf16.msra.mxu0 %v23023_v43  ;;  %19612 = vmatprep.mubr.msk.bf16.mxu0 %vm15113_vm6, %v28338_v34  ;;  %v23074_v11 = vld [vmem:[#allocation11 + $0x338] sm:$0xff]   ;;  %v23075_v43 = vld [vmem:[#allocation11 + $0x340] sm:$0xff]  }
 0xd90   : > { %20042 = vmatprep.subr.bf16.mxu1 %v23024_v45  ;;  %15482 = vmatprep.subr.bf16.mxu0 %v23387_v0  ;;  %v23076_v45 = vld [vmem:[#allocation11 + $0x348] sm:$0xff]  }
 0xd92   : > { %20043 = vmatpush3.bf16.msra.mxu1 %v23025_v54  ;;  %v23077_v54 = vld [vmem:[#allocation11 + $0x350] sm:$0xff]  }
 0xd93   : > { %15483 = vmatpush1.bf16.msra.mxu0 %v23026_v47  ;;  %20044 = vmatprep.subr.bf16.mxu1 %v23027_v7  ;;  %v23078_v47 = vld [vmem:[#allocation11 + $0x358] sm:$0xff]   ;;  %v23079_v7 = vld [vmem:[#allocation11 + $0x360] sm:$0xff]  }
 0xd94   : > { %15484 = vmatprep.subr.bf16.mxu0 %v23387_v0 }
 0xd96   : > { %20045 = vmatpush3.bf16.msra.mxu1 %v23028_v49  ;;  %v23080_v49 = vld [vmem:[#allocation11 + $0x368] sm:$0xff]  }
 0xd97   : > { %15485 = vmatpush1.bf16.msra.mxu0 %v23029_v55  ;;  %20046 = vmatprep.subr.bf16.mxu1 %v23030_v59 }
 0xd98   : > { %15486 = vmatprep.subr.bf16.mxu0 %v23387_v0 }
 0xd9a   : > { %20047 = vmatpush3.bf16.msra.mxu1 %v23031_v61 }
 0xd9b   : > { %15487 = vmatpush1.bf16.msra.mxu0 %v23032_v46  ;;  %20048 = vmatprep.subr.bf16.mxu1 %v23033_v9  ;;  %v23081_v9 = vld [vmem:[#allocation11 + $0x370] sm:$0xff]  }
 0xd9c   : > { %15488 = vmatprep.subr.bf16.mxu0 %v23387_v0 }
 0xd9e   : > { %20049 = vmatpush3.bf16.msra.mxu1 %v23034_v1 }
 0xd9f   : > { %15489 = vmatpush1.bf16.msra.mxu0 %v23035_v2  ;;  %20056 = vmatprep.subr.bf16.mxu1 %v23036_v3 }
 0xda0   : > { %15490 = vmatprep.subr.bf16.mxu0 %v23387_v0 }
 0xda1   : > { %16741 = vmatmul.mubr.bf16.vlgmr.msra.gmra.mrb[72].mxu1 %v16530_v53 }
 0xda2   : > { %20057 = vmatpush3.bf16.msra.mxu1 %v23037_v48  ;;  %17056 = vmatprep.mubr.bf16.mxu1 %v16847_v62  ;;  %v23083_v62 = vld [vmem:[#allocation11 + $0x400] sm:$0xff]  }
 0xda3   : > { %15491 = vmatpush1.bf16.msra.mxu0 %v23038_v5  ;;  %20058 = vmatprep.subr.bf16.mxu1 %v23039_v24  ;;  %v23082_v24 = vld [vmem:[#allocation11 + $0x378] sm:$0xff]  }
 0xda4   : > { %15492 = vmatprep.subr.bf16.mxu0 %v23387_v0 }
 0xda6   : > { %20059 = vmatpush3.bf16.msra.mxu1 %v23040_v33  ;;  %v15900_v33 = vrot.slane %v28357_v18, 1 }
 0xda7   : > { %15493 = vmatpush1.bf16.msra.mxu0 %v23041_v30  ;;  %20060 = vmatprep.subr.bf16.mxu1 %v23042_v6  ;;  %v16217_v30 = vrot.slane %v28300_v36, 2  ;;  %v23084_v6 = vld [vmem:[#allocation11 + $0x408] sm:$0xff]  }
 0xda8   : > { %15494 = vmatprep.subr.bf16.mxu0 %v23387_v0 }
 0xdaa   : > { %20061 = vmatpush3.bf16.msra.mxu1 %v23043_v42  ;;  %v23085_v42 = vld [vmem:[#allocation11 + $0x410] sm:$0xff]  }
 0xdab   : > { %15495 = vmatpush1.bf16.msra.mxu0 %v23044_v63  ;;  %20062 = vmatprep.subr.bf16.mxu1 %v23045_v29  ;;  %v23086_v63 = vld [vmem:[#allocation11 + $0x418] sm:$0xff]   ;;  %v23087_v29 = vld [vmem:[#allocation11 + $0x420] sm:$0xff]  }
 0xdac   : > { %15496 = vmatprep.subr.bf16.mxu0 %v23387_v0 }
 0xdae   : > { %20063 = vmatpush3.bf16.msra.mxu1 %v23046_v40  ;;  %v23119_v40 = vld [vmem:[%s28606_s11] sm:$0xff]  }
 0xdaf   : > { %15497 = vmatpush1.bf16.msra.mxu0 %v23047_v37  ;;  %20064 = vmatprep.subr.bf16.mxu1 %v23048_v16  ;;  %v23088_v37 = vld [vmem:[#allocation11 + $0x428] sm:$0xff]  }
 0xdb0   : > { %15498 = vmatprep.subr.bf16.mxu0 %v23387_v0  ;;  %v23120_v16 = vld [vmem:[%s28606_s11 + $0x8] sm:$0xff]  }
 0xdb2   : > { %20065 = vmatpush3.bf16.msra.mxu1 %v23049_v8  ;;  %v23089_v8 = vld [vmem:[#allocation11 + $0x430] sm:$0xff]  }
 0xdb3   : > { %15499 = vmatpush1.bf16.msra.mxu0 %v23050_v14  ;;  %20066 = vmatprep.subr.bf16.mxu1 %v23051_v51  ;;  %v23121_v51 = vld [vmem:[%s28606_s11 + $0x10] sm:$0xff]  }
 0xdb4   : > { %15500 = vmatprep.subr.bf16.mxu0 %v23387_v0 }
 0xdb6   : > { %20067 = vmatpush3.bf16.msra.mxu1 %v23052_v39 }
 0xdb7   : > { %15501 = vmatpush1.bf16.msra.mxu0 %v23053_v58  ;;  %20068 = vmatprep.subr.bf16.mxu1 %v23054_v17 }
 0xdb8   : > { %15502 = vmatprep.subr.bf16.mxu0 %v23387_v0 }
 0xdba   : > { %20069 = vmatpush3.bf16.msra.mxu1 %v23055_v50 }
 0xdbb   : > { %15503 = vmatpush1.bf16.msra.mxu0 %v23056_v21  ;;  %20070 = vmatprep.subr.bf16.mxu1 %v23057_v15  ;;  %v23090_v21 = vld [vmem:[#allocation11 + $0x438] sm:$0xff]  }
 0xdbc   : > { %15800 = vmatprep.subr.bf16.mxu0 %v23387_v0  ;;  %v23122_v15 = vld [vmem:[%s28606_s11 + $0x18] sm:$0xff]  }
 0xdbe   : > { %20071 = vmatpush3.bf16.msra.mxu1 %v23058_v31  ;;  %15513 = vmatmul.mubr.bf16.vlgmr.msra.gmra.mrb[124].mxu0 %v28357_v18  ;;  %v23091_v31 = vld [vmem:[#allocation11 + $0x440] sm:$0xff]  }
 0xdbf   : > { %15801 = vmatpush1.bf16.msra.mxu0 %v23059_v23  ;;  %19641 = vmatprep.mubr.msk.bf16.mxu0 %vm15113_vm6, %v15585_v27  ;;  %v23123_v23 = vld [vmem:[%s28606_s11 + $0x20] sm:$0xff]   ;;  %v23092_v27 = vld [vmem:[#allocation11 + $0x448] sm:$0xff]  }
 0xdc0   : > { %15802 = vmatprep.subr.bf16.mxu0 %v23387_v0  ;;  %20139 = vmatprep.subr.bf16.mxu1 %v23388_v10 }
 0xdc1   : > { %17057 = vmatmul.mubr.bf16.vlgmr.msra.gmra.mrb[76].mxu1 %v16846_v20  ;;  %v23124_v20 = vld [vmem:[%s28606_s11 + $0x28] sm:$0xff]  }
 0xdc2   : > { %20155 = vmatprep.mubr.msk.bf16.mxu1 %vm23389_vm2, %v23388_v10  ;;  %20140 = vmatpush3.bf16.msra.mxu1 %v23119_v40  ;;  %v23110_v40 = vld [vmem:[#allocation11 + $0x5d8] sm:$0xff]  }
 0xdc3   : > { %15803 = vmatpush1.bf16.msra.mxu0 %v23060_v13  ;;  %20141 = vmatprep.subr.bf16.mxu1 %v23388_v10  ;;  %v23093_v13 = vld [vmem:[#allocation11 + $0x450] sm:$0xff]  }
 0xdc4   : > { %15804 = vmatprep.subr.bf16.mxu0 %v23387_v0 }
 0xdc6   : > { %20142 = vmatpush3.bf16.msra.mxu1 %v23120_v16 }
 0xdc7   : > { %15805 = vmatpush1.bf16.msra.mxu0 %v23061_v25  ;;  %20143 = vmatprep.subr.bf16.mxu1 %v23388_v10  ;;  %v23094_v25 = vld [vmem:[#allocation11 + $0x458] sm:$0xff]  }
 0xdc8   : > { %15806 = vmatprep.subr.bf16.mxu0 %v23387_v0 }
 0xdca   : > { %20144 = vmatpush3.bf16.msra.mxu1 %v23121_v51 }
 0xdcb   : > { %15807 = vmatpush1.bf16.msra.mxu0 %v23062_v12  ;;  %20145 = vmatprep.subr.bf16.mxu1 %v23388_v10  ;;  %v23095_v12 = vld [vmem:[#allocation11 + $0x4e0] sm:$0xff]  }
 0xdcc   : > { %15808 = vmatprep.subr.bf16.mxu0 %v23387_v0 }
 0xdce   : > { %20146 = vmatpush3.bf16.msra.mxu1 %v23122_v15  ;;  %v23117_v15 = vld [vmem:[#allocation11 + $0x610] sm:$0xff]  }
 0xdcf   : > { %15809 = vmatpush1.bf16.msra.mxu0 %v23063_v28  ;;  %20147 = vmatprep.subr.bf16.mxu1 %v23388_v10  ;;  %v16216_v28 = vrot.slane %v28330_v35, 2 }
 0xdd0   : > { %15810 = vmatprep.subr.bf16.mxu0 %v23387_v0 }
 0xdd2   : > { %20148 = vmatpush3.bf16.msra.mxu1 %v23123_v23  ;;  %v16848_v23 = vrot.slane %v28330_v35, 3 }
 0xdd3   : > { %15811 = vmatpush1.bf16.msra.mxu0 %v23064_v32  ;;  %20149 = vmatprep.subr.bf16.mxu1 %v23388_v10  ;;  %v16533_v32 = vrot.slane %v28338_v34, 2  ;;  %v23099_v34 = vld [vmem:[#allocation11 + $0x500] sm:$0xff]  }
 0xdd4   : > { %15812 = vmatprep.subr.bf16.mxu0 %v23387_v0 }
 0xdd6   : > { %20150 = vmatpush3.bf16.msra.mxu1 %v23124_v20  ;;  %v23126_v20 = vld [vmem:[%s28606_s11 + $0x38] sm:$0xff]  }
 0xdd7   : > { %15813 = vmatpush1.bf16.msra.mxu0 %v23065_v22  ;;  %20151 = vmatprep.subr.bf16.mxu1 %v23388_v10  ;;  %v23096_v22 = vld [vmem:[#allocation11 + $0x4e8] sm:$0xff]  }
 0xdd8   : > { %15814 = vmatprep.subr.bf16.mxu0 %v23387_v0 }
 0xddb   : > { %15815 = vmatpush1.bf16.msra.mxu0 %v23066_v44  ;;  %v23097_v44 = vld [vmem:[#allocation11 + $0x4f0] sm:$0xff]  }
 0xddc   : > { %15816 = vmatprep.subr.bf16.mxu0 %v23387_v0 }
 0xddf   : > { %15817 = vmatpush1.bf16.msra.mxu0 %v23067_v57 }
 0xde0   : > { %15818 = vmatprep.subr.bf16.mxu0 %v23387_v0 }
 0xde3   : > { %15819 = vmatpush1.bf16.msra.mxu0 %v23068_v4 }
 0xde4   : > { %15820 = vmatprep.subr.bf16.mxu0 %v23387_v0 }
 0xde7   : > { %15821 = vmatpush1.bf16.msra.mxu0 %v23069_v26 }
 0xde8   : > { %15822 = vmatprep.subr.bf16.mxu0 %v23387_v0 }
 0xdeb   : > { %15823 = vmatpush1.bf16.msra.mxu0 %v23070_v52 }
 0xdec   : > { %16116 = vmatprep.subr.bf16.mxu0 %v23387_v0 }
 0xdee   : > { %15833 = vmatmul.mubr.bf16.vlgmr.msra.gmra.mrb[124].mxu0 %v15584_v19  ;;  %v23098_v19 = vld [vmem:[#allocation11 + $0x4f8] sm:$0xff]  }
 0xdef   : > { %16117 = vmatpush1.bf16.msra.mxu0 %v23071_v56  ;;  %19670 = vmatprep.mubr.msk.bf16.mxu0 %vm15113_vm6, %v15901_v60  ;;  %v23100_v60 = vld [vmem:[#allocation11 + $0x508] sm:$0xff]  }
 0xdf0   : > { %16118 = vmatprep.subr.bf16.mxu0 %v23387_v0 }
 0xdf3   : > { %16119 = vmatpush1.bf16.msra.mxu0 %v23072_v38  ;;  %v14884_v38 = vld [vmem:[%s28607_s0] sm:$0x1]  ;;  %s23295_s0 = scalar_lea.vmem %s28492_s25, 16 }
 0xdf4   : > { %16120 = vmatprep.subr.bf16.mxu0 %v23387_v0  ;;  %p23296_p13 = scmp.ne.s32.totalorder %s28492_s25, %s23295_s0  ;;  %p23303_p10 = scmp.lt.s32.totalorder %s23301_s24, %s23295_s0 }
 0xdf6   : > { %p23297_p6 = pnand %p23296_p13, %p28612_p1  ;;  %p23304_p0 = por %p23303_p10, %p23302_p5 }
 0xdf7   : > { %16121 = vmatpush1.bf16.msra.mxu0 %v23073_v41 }
 0xdf8   : > { %16122 = vmatprep.subr.bf16.mxu0 %v23387_v0  ;;  %p23298_p9 = pneg %p23297_p6 }
 0xdfa   : > { %p23305_p2 = pnand %p23304_p0, %p23298_p9 }
 0xdfb   : > { %16123 = vmatpush1.bf16.msra.mxu0 %v23074_v11 }
 0xdfc   : > { %16124 = vmatprep.subr.bf16.mxu0 %v23387_v0 }
 0xdff   : > { %16125 = vmatpush1.bf16.msra.mxu0 %v23075_v43 }
 0xe00   : > { %16126 = vmatprep.subr.bf16.mxu0 %v23387_v0 }
 0xe03   : > { %16127 = vmatpush1.bf16.msra.mxu0 %v23076_v45 }
 0xe04   : > { %16128 = vmatprep.subr.bf16.mxu0 %v23387_v0 }
 0xe07   : > { %16129 = vmatpush1.bf16.msra.mxu0 %v23077_v54 }
 0xe08   : > { %16130 = vmatprep.subr.bf16.mxu0 %v23387_v0 }
 0xe0b   : > { %16131 = vmatpush1.bf16.msra.mxu0 %v23078_v47  ;;  %v23101_v47 = vld [vmem:[#allocation11 + $0x510] sm:$0xff]  }
 0xe0c   : > { %16132 = vmatprep.subr.bf16.mxu0 %v23387_v0 }
 0xe0f   : > { %16133 = vmatpush1.bf16.msra.mxu0 %v23079_v7 }
 0xe10   : > { %16134 = vmatprep.subr.bf16.mxu0 %v23387_v0 }
 0xe11   : > { %v19940_v55 = vpop.f32.mrb[120].mxu0 }
 0xe12   : > { %v19941_v59 = vpop.f32.mrb[121].mxu0 }
 0xe13   : > { %v28391_v61 = vadd.f32 %v19941_v59, %v19940_v55  ;;  %16135 = vmatpush1.bf16.msra.mxu0 %v23080_v49  ;;  %v19943_v46 = vpop.f32.mrb[122].mxu0  ;;  %v23102_v59 = vld [vmem:[#allocation11 + $0x518] sm:$0xff]  }
 0xe14   : > { %v19984_v1 = vpop.f32.mrb[60].mxu1  ;;  %v19944_v2 = vpop.f32.mrb[123].mxu0  ;;  %16136 = vmatprep.subr.bf16.mxu0 %v23387_v0 }
 0xe15   : > { %v19985_v3 = vpop.f32.mrb[61].mxu1  ;;  %v20203_v43 = vadd.f32 %v28391_v61, %v14884_v38  ;;  %v23104_v61 = vld [vmem:[#allocation11 + $0x528] sm:$0xff]   ;;  %v23105_v2 = vld [vmem:[#allocation11 + $0x530] sm:$0xff]  }
 0xe16   : > { %v28394_v48 = vadd.f32 %v19985_v3, %v19984_v1  ;;  %v19987_v53 = vpop.f32.mrb[62].mxu1 }
 0xe17   : > { %v19988_v5 = vpop.f32.mrb[63].mxu1  ;;  %16137 = vmatpush1.bf16.msra.mxu0 %v23081_v9  ;;  %v23103_v9 = vld [vmem:[#allocation11 + $0x520] sm:$0xff]  }
 0xe18   : > { %16138 = vmatprep.subr.bf16.mxu0 %v23387_v0 }
 0xe1b   : > { %16139 = vmatpush1.bf16.msra.mxu0 %v23082_v24 }
 0xe1c   : > { %16432 = vmatprep.subr.bf16.mxu0 %v23387_v0 }
 0xe1e   : > { %16149 = vmatmul.mubr.bf16.vlgmr.msra.gmra.mrb[124].mxu0 %v15900_v33 }
 0xe1f   : > { %16433 = vmatpush1.bf16.msra.mxu0 %v23083_v62  ;;  %19699 = vmatprep.mubr.msk.bf16.mxu0 %vm15113_vm6, %v16217_v30  ;;  %v23106_v62 = vld [vmem:[#allocation11 + $0x538] sm:$0xff]   ;;  %v23107_v30 = vld [vmem:[#allocation11 + $0x5c0] sm:$0xff]  }
 0xe20   : > { %16434 = vmatprep.subr.bf16.mxu0 %v23387_v0 }
 0xe23   : > { %16435 = vmatpush1.bf16.msra.mxu0 %v23084_v6  ;;  %v16532_v6 = vrot.slane %v28357_v18, 2  ;;  %v23111_v18 = vld [vmem:[#allocation11 + $0x5e0] sm:$0xff]  }
 0xe24   : > { %16436 = vmatprep.subr.bf16.mxu0 %v23387_v0 }
 0xe27   : > { %16437 = vmatpush1.bf16.msra.mxu0 %v23085_v42  ;;  %v16849_v42 = vrot.slane %v28300_v36, 3  ;;  %v23112_v36 = vld [vmem:[#allocation11 + $0x5e8] sm:$0xff]  }
 0xe28   : > { %16438 = vmatprep.subr.bf16.mxu0 %v23387_v0 }
 0xe2b   : > { %16439 = vmatpush1.bf16.msra.mxu0 %v23086_v63  ;;  %v23108_v63 = vld [vmem:[#allocation11 + $0x5c8] sm:$0xff]  }
 0xe2c   : > { %16440 = vmatprep.subr.bf16.mxu0 %v23387_v0 }
 0xe2f   : > { %16441 = vmatpush1.bf16.msra.mxu0 %v23087_v29  ;;  %v23109_v29 = vld [vmem:[#allocation11 + $0x5d0] sm:$0xff]  }
 0xe30   : > { %16442 = vmatprep.subr.bf16.mxu0 %v23387_v0 }
 0xe33   : > { %16443 = vmatpush1.bf16.msra.mxu0 %v23088_v37  ;;  %v23113_v37 = vld [vmem:[#allocation11 + $0x5f0] sm:$0xff]  }
 0xe34   : > { %v20006_v14 = vpop.f32.mrb[64].mxu1  ;;  %16444 = vmatprep.subr.bf16.mxu0 %v23387_v0 }
 0xe35   : > { %v20007_v39 = vpop.f32.mrb[65].mxu1 }
 0xe36   : > { %v28418_v58 = vadd.f32 %v20007_v39, %v20006_v14  ;;  %v20009_v17 = vpop.f32.mrb[66].mxu1 }
 0xe37   : > { %v20010_v50 = vpop.f32.mrb[67].mxu1  ;;  %16445 = vmatpush1.bf16.msra.mxu0 %v23089_v8 }
 0xe38   : > { %16446 = vmatprep.subr.bf16.mxu0 %v23387_v0  ;;  %v23115_v50 = vld [vmem:[#allocation11 + $0x600] sm:$0xff]  }
 0xe3b   : > { %16447 = vmatpush1.bf16.msra.mxu0 %v23090_v21  ;;  %v23116_v21 = vld [vmem:[#allocation11 + $0x608] sm:$0xff]  }
 0xe3c   : > { %16448 = vmatprep.subr.bf16.mxu0 %v23387_v0 }
 0xe3f   : > { %16449 = vmatpush1.bf16.msra.mxu0 %v23091_v31  ;;  %v23118_v31 = vld [vmem:[#allocation11 + $0x618] sm:$0xff]  }
 0xe40   : > { %16450 = vmatprep.subr.bf16.mxu0 %v23387_v0 }
 0xe43   : > { %16451 = vmatpush1.bf16.msra.mxu0 %v23092_v27  ;;  %v23125_v27 = vld [vmem:[%s28606_s11 + $0x30] sm:$0xff]  }
 0xe44   : > { %16452 = vmatprep.subr.bf16.mxu0 %v23387_v0  ;;  %20152 = vmatpush3.bf16.msra.mxu1 %v23125_v27 }
 0xe45   : > { %20153 = vmatprep.subr.bf16.mxu1 %v23388_v10 }
 0xe47   : > { %16453 = vmatpush1.bf16.msra.mxu0 %v23093_v13 }
 0xe48   : > { %16454 = vmatprep.subr.bf16.mxu0 %v23387_v0  ;;  %20154 = vmatpush3.bf16.msra.mxu1 %v23126_v20 }
 0xe4b   : > { %16455 = vmatpush1.bf16.msra.mxu0 %v23094_v25 }
 0xe4c   : > { %16748 = vmatprep.subr.bf16.mxu0 %v23387_v0 }
 0xe4e   : > { %16465 = vmatmul.mubr.bf16.vlgmr.msra.gmra.mrb[124].mxu0 %v16216_v28 }
 0xe4f   : > { %16749 = vmatpush1.bf16.msra.mxu0 %v23095_v12  ;;  %19728 = vmatprep.mubr.msk.bf16.mxu0 %vm15113_vm6, %v16533_v32 }
 0xe50   : > { %16750 = vmatprep.subr.bf16.mxu0 %v23387_v0 }
 0xe53   : > { %16751 = vmatpush1.bf16.msra.mxu0 %v23096_v22  ;;  %v17123_v22 = vld [vmem:[%s28609_s28] sm:$0x1] }
 0xe54   : > { %v20028_v57 = vpop.f32.mrb[68].mxu1  ;;  %16752 = vmatprep.subr.bf16.mxu0 %v23387_v0 }
 0xe55   : > { %v20029_v4 = vpop.f32.mrb[69].mxu1 }
 0xe56   : > { %v20030_v26 = vadd.f32 %v20029_v4, %v20028_v57  ;;  %v20031_v52 = vpop.f32.mrb[70].mxu1 }
 0xe57   : > { %v20032_v56 = vpop.f32.mrb[71].mxu1  ;;  %16753 = vmatpush1.bf16.msra.mxu0 %v23097_v44 }
 0xe58   : > { %16754 = vmatprep.subr.bf16.mxu0 %v23387_v0 }
 0xe5b   : > { %16755 = vmatpush1.bf16.msra.mxu0 %v23098_v19 }
 0xe5c   : > { %16756 = vmatprep.subr.bf16.mxu0 %v23387_v0 }
 0xe5f   : > { %16757 = vmatpush1.bf16.msra.mxu0 %v23099_v34 }
 0xe60   : > { %16758 = vmatprep.subr.bf16.mxu0 %v23387_v0 }
 0xe61   : > { %v19962_v41 = vpop.f32.mrb[128].mxu0 }
 0xe62   : > { %v19963_v11 = vpop.f32.mrb[129].mxu0 }
 0xe63   : > { %v19964_v45 = vadd.f32 %v19963_v11, %v19962_v41  ;;  %v19965_v54 = vpop.f32.mrb[130].mxu0  ;;  %16759 = vmatpush1.bf16.msra.mxu0 %v23100_v60 }
 0xe64   : > { %v19966_v7 = vpop.f32.mrb[131].mxu0  ;;  %16760 = vmatprep.subr.bf16.mxu0 %v23387_v0 }
 0xe65   : > { %v20204_v49 = vadd.f32 %v20203_v43, %v19964_v45 }
 0xe67   : > { %v20205_v55 = vadd.f32 %v20204_v49, %v28394_v48  ;;  %16761 = vmatpush1.bf16.msra.mxu0 %v23101_v47 }
 0xe68   : > { %16762 = vmatprep.subr.bf16.mxu0 %v23387_v0 }
 0xe69   : > { %v20206_v46 = vadd.f32 %v20205_v55, %v28418_v58  ;;  %v23114_v58 = vld [vmem:[#allocation11 + $0x5f8] sm:$0xff]  }
 0xe6b   : > { %16763 = vmatpush1.bf16.msra.mxu0 %v23102_v59  ;;  %v20207_v1 = vadd.f32 %v20206_v46, %v20030_v26 }
 0xe6c   : > { %16764 = vmatprep.subr.bf16.mxu0 %v23387_v0 }
 0xe6f   : > { %16765 = vmatpush1.bf16.msra.mxu0 %v23103_v9 }
 0xe70   : > { %16766 = vmatprep.subr.bf16.mxu0 %v23387_v0 }
 0xe73   : > { %16767 = vmatpush1.bf16.msra.mxu0 %v23104_v61 }
 0xe74   : > { %v20050_v3 = vpop.f32.mrb[72].mxu1  ;;  %16768 = vmatprep.subr.bf16.mxu0 %v23387_v0 }
 0xe75   : > { %v20051_v48 = vpop.f32.mrb[73].mxu1 }
 0xe76   : > { %v20052_v53 = vadd.f32 %v20051_v48, %v20050_v3  ;;  %v20053_v5 = vpop.f32.mrb[74].mxu1 }
 0xe77   : > { %v20054_v24 = vpop.f32.mrb[75].mxu1  ;;  %16769 = vmatpush1.bf16.msra.mxu0 %v23105_v2 }
 0xe78   : > { %v20208_v33 = vadd.f32 %v20207_v1, %v20052_v53  ;;  %16770 = vmatprep.subr.bf16.mxu0 %v23387_v0 }
 0xe7b   : > { %16771 = vmatpush1.bf16.msra.mxu0 %v23106_v62 }
 0xe7c   : > { %17064 = vmatprep.subr.bf16.mxu0 %v23387_v0 }
 0xe7e   : > { %16781 = vmatmul.mubr.bf16.vlgmr.msra.gmra.mrb[124].mxu0 %v16532_v6 }
 0xe7f   : > { %17065 = vmatpush1.bf16.msra.mxu0 %v23107_v30  ;;  %19757 = vmatprep.mubr.msk.bf16.mxu0 %vm15113_vm6, %v16849_v42 }
 0xe80   : > { %17066 = vmatprep.subr.bf16.mxu0 %v23387_v0 }
 0xe83   : > { %17067 = vmatpush1.bf16.msra.mxu0 %v23108_v63 }
 0xe84   : > { %17068 = vmatprep.subr.bf16.mxu0 %v23387_v0 }
 0xe87   : > { %17069 = vmatpush1.bf16.msra.mxu0 %v23109_v29 }
 0xe88   : > { %17070 = vmatprep.subr.bf16.mxu0 %v23387_v0 }
 0xe8b   : > { %17071 = vmatpush1.bf16.msra.mxu0 %v23110_v40 }
 0xe8c   : > { %17072 = vmatprep.subr.bf16.mxu0 %v23387_v0 }
 0xe8f   : > { %17073 = vmatpush1.bf16.msra.mxu0 %v23111_v18 }
 0xe90   : > { %17074 = vmatprep.subr.bf16.mxu0 %v23387_v0 }
 0xe93   : > { %17075 = vmatpush1.bf16.msra.mxu0 %v23112_v36 }
 0xe94   : > { %v20072_v16 = vpop.f32.mrb[76].mxu1  ;;  %17076 = vmatprep.subr.bf16.mxu0 %v23387_v0 }
 0xe95   : > { %v20073_v8 = vpop.f32.mrb[77].mxu1 }
 0xe96   : > { %v20074_v14 = vadd.f32 %v20073_v8, %v20072_v16  ;;  %v20075_v51 = vpop.f32.mrb[78].mxu1 }
 0xe97   : > { %v20076_v39 = vpop.f32.mrb[79].mxu1  ;;  %17077 = vmatpush1.bf16.msra.mxu0 %v23113_v37 }
 0xe98   : > { %17078 = vmatprep.subr.bf16.mxu0 %v23387_v0  ;;  %v20209_v17 = vadd.f32 %v20208_v33, %v20074_v14 }
 0xe9b   : > { %17079 = vmatpush1.bf16.msra.mxu0 %v23114_v58 }
 0xe9c   : > { %17080 = vmatprep.subr.bf16.mxu0 %v23387_v0 }
 0xe9f   : > { %17081 = vmatpush1.bf16.msra.mxu0 %v23115_v50 }
 0xea0   : > { %17082 = vmatprep.subr.bf16.mxu0 %v23387_v0 }
 0xea3   : > { %17083 = vmatpush1.bf16.msra.mxu0 %v23116_v21 }
 0xea4   : > { %17084 = vmatprep.subr.bf16.mxu0 %v23387_v0 }
 0xea7   : > { %17085 = vmatpush1.bf16.msra.mxu0 %v23117_v15 }
 0xea8   : > { %17086 = vmatprep.subr.bf16.mxu0 %v23387_v0 }
 0xeab   : > { %17087 = vmatpush1.bf16.msra.mxu0 %v23118_v31 }
 0xeae   : > { %17097 = vmatmul.mubr.bf16.vlgmr.msra.gmra.mrb[124].mxu0 %v16848_v23 }
 0xf81   : > { %v17098_v13 = vpop.f32.mrb[124].mxu0 }
 0xf82   : > { %v20210_v0 = vadd.f32 %v20209_v17, %v17098_v13  ;;  %v17100_v25 = vpop.f32.mrb[125].mxu0 }
 0xf83   : > { %v17101_v12 = vpop.f32.mrb[126].mxu0 }
 0xf84   : > { %v17105_v28 = vmax.f32 %v20210_v0, 0.0  ;;  %v17102_v35 = vpop.f32.mrb[127].mxu0 }
 0xf86   : > { %v17106_v32 = vpack.c.bf16 %v17105_v28, %v17105_v28 }
 0xf88   : > { %20156 = vmatmul.mubr.bf16.vlgmr.msra.gmra.mrb[80].mxu1 %v17106_v32 }
0x105b   : > { %v17206_v44 = vpop.f32.mrb[80].mxu1 }
0x105c   : > { %v17207_v10 = vadd.f32 %v17206_v44, %v17123_v22  ;;  %v20157_v57 = vpop.f32.mrb[81].mxu1 }
0x105d   : > { %v17209_v4 = vpop.f32.mrb[82].mxu1 }
0x105e   : > { %v20158_v26 = vpop.f32.mrb[83].mxu1  ;;  %17213 = vst.msk [vmem:[%s676_s23] sm:$0x1] %vm17212_vm7, %v17207_v10 }
0x105f   : > { %23308 = shalt.err (!%p23305_p2)
}
0x1060   : > { %s23309_s6 = scalar_lea.hbm %s28490_s21, 16  ;;  %s23313_s18 = scalar_lea.hbm %s28611_s22, 32 }
0x1061   : > { %p23310_p3 = scmp.ne.s32.totalorder %s28490_s21, %s23309_s6  ;;  %p23314_p7 = scmp.lt.u32.totalorder %s28490_s21, %s28611_s22 }
0x1062   : > { %p23315_p8 = scmp.lt.u32.totalorder %s23313_s18, %s23309_s6  ;;  %p23317_p13 = scmp.lt.u32.totalorder %s23309_s6, %s28490_s21 }
0x1063   : > { %p23311_p4 = pnand %p23310_p3, %p28612_p1 }
0x1064   : > { %p23316_p11 = por %p23315_p8, %p23314_p7 }
0x1065   : > { %p23312_p12 = pneg %p23311_p4 }
0x1066   : > { %p23318_p6 = por %p23317_p13, %p23316_p11 }
0x1068   : > { %p23319_p9 = pnand %p23318_p6, %p23312_p12 }
0x106a   : > { %23322 = shalt.err (!%p23319_p9)
}
0x106b   : > { %20470 = dma.vmem_to_hbm [thread:$0]  (%p28612_p1), %s28492_s25, 16, %s28490_s21, %s17215_s1  }
0x106c PF: > { %s28613_s26 = sld [smem:[#allocation22_spill]]  ;;  %s28614_s23 = sld [smem:[#allocation19_spill]] }
0x106d   : > { %s28615_s19 = sld [smem:[#allocation26_spill]] }
0x1072   : > { %p20507_p5 = scmp.ge.s32.totalorder %s28613_s26, 2  ;;  %s17239_s27 = sand.u32 1, %s28614_s23  }
0x1073   : > { %p28616_p10 = scmp.ne.s32.totalorder %s28615_s19, 0  ;;  %s17240_s0 = scalar_lea.sflag [#allocation4], %s17239_s27 }
0x1075   : > { %p20492_p0 = pnand %p20507_p5, %p28616_p10 }
0x1077   : > { %23356 = dma.done.wait (!%p20492_p0), %s17240_s0, 16  }
0x1078   : > { %23358 = vsyncadd (!%p20492_p0), %s17240_s0, 4294967280  ;;  %s28617_s21 = sld [smem:[#allocation23_spill]]  ;;  %s28618_s0 = sld [smem:[#allocation20_spill]] }
0x1079   : > { %s28619_s30 = sld [smem:[#allocation21_spill]]  ;;  %s28620_s20 = sld [smem:[#allocation24_spill]] }
0x107e   : > { %p33_p2 = scmp.ge.s32.totalorder %s28617_s21, 4  }
0x1080   :  { %35 = sbr.rel (!%p33_p2) target bundleno = 18 (0x12), region = 166 }
0x1087   :  { %17244 = vsyncpa [#allocation3], 1 }
0x1088   :  { %17246 = vsyncpa [#allocation3 + $0x1], 1 }
0x1089   :  { %17247 = vsyncpa [#allocation6], 1 }
0x108a   :  { %17248 = vsyncpa [#allocation9], 1 }
0x108b   :  { %17249 = vsyncpa [#allocation12], 1 }
0x108c   :  { %17250 = vsyncpa [#allocation4], 1 }
0x108d   :  { %17252 = vsyncpa [#allocation4 + $0x1], 1 }

</bundles_post_ra>
